<compile_context>
chip_gen: v7x
topology: tpu7x:2x2x1
jax: 0.10.0
libtpu: 0.0.40
codegen_flags: <defaults>
</compile_context>

<pallas_src>
import functools

import jax
import jax.numpy as jnp
from jax import lax
from jax.experimental import pallas as pl
from jax.experimental.pallas import tpu as pltpu

LANE = 128
SUBLANE = 8

# Same dot (f32 accumulate, full f32 precision) in kernel and reference.
_dot = functools.partial(jnp.dot, precision=lax.Precision.HIGHEST,
                         preferred_element_type=jnp.float32)


def _round_up(x, m):
    return ((x + m - 1) // m) * m


def _pad_blocks(w, row_segs, col_segs):
    """Zero-pad a 2-D weight whose rows/cols split into consecutive segments.

    Each (orig_size, padded_size) segment is placed at the start of its padded
    slot; everything else is zero, so padded lanes contribute nothing."""
    rows_p = sum(p for _, p in row_segs)
    cols_p = sum(p for _, p in col_segs)
    out = jnp.zeros((rows_p, cols_p), w.dtype)
    r_src = r_dst = 0
    for rs, rp in row_segs:
        c_src = c_dst = 0
        for cs, cp in col_segs:
            out = out.at[r_dst:r_dst + rs, c_dst:c_dst + cs].set(
                w[r_src:r_src + rs, c_src:c_src + cs])
            c_src += cs
            c_dst += cp
        r_src += rs
        r_dst += rp
    return out


def _make_kernel(Lp, Zp, n_data_dims):
    """Build the fused ODE-RNN encoder kernel (closes over padded dims)."""

    def kernel(dts_ref,                       # SMEM: per-step dt = t_i - prev_t
               x_ref,                         # (1, row_tile, IN_pad) observation
               wu1, bu1, wu2, bu2,            # update gate
               wr1, br1, wr2, br2,            # reset gate
               wn1, bn1, wn2, bn2,            # new-state net
               wo1, bo1, wo2, bo2,            # ode_func MLP
               wt1, bt1, wt2, bt2,            # transform_z0
               mean_ref, std_ref,             # outputs (row_tile, Z_pad)
               prev_y, prev_std):             # VMEM scratch (row_tile, L_pad)
        t = pl.program_id(1)
        n_t = pl.num_programs(1)

        @pl.when(t == 0)
        def _init():
            prev_y[...] = jnp.zeros_like(prev_y)
            prev_std[...] = jnp.zeros_like(prev_std)

        x = x_ref[0]                 # (row_tile, IN_pad): values ++ observation mask
        dt = dts_ref[t]              # scalar (negative: running backwards in time)

        y = prev_y[...]
        s = prev_std[...]

        # --- ODE evolution of the mean state: one explicit-Euler step. ---
        # TODO(synk): the reference delegates to an injected z0_diffeq_solver
        # (adaptive / multi-step odeint); only the single-Euler-step branch of
        # run_odernn is implemented here, with a built-in 2-layer tanh ode_func.
        h_ode = jnp.tanh(_dot(y, wo1[...]) + bo1[...])
        dy = _dot(h_ode, wo2[...]) + bo2[...]
        y_ode = y + dy * dt

        # --- GRU_unit ---
        cat = jnp.concatenate([y_ode, s, x], axis=-1)
        u = jax.nn.sigmoid(
            _dot(jnp.tanh(_dot(cat, wu1[...]) + bu1[...]), wu2[...]) + bu2[...])
        r = jax.nn.sigmoid(
            _dot(jnp.tanh(_dot(cat, wr1[...]) + br1[...]), wr2[...]) + br2[...])
        cat_r = jnp.concatenate([y_ode * r, s * r, x], axis=-1)
        ns = _dot(jnp.tanh(_dot(cat_r, wn1[...]) + bn1[...]), wn2[...]) + bn2[...]
        new_state = ns[:, :Lp]
        new_state_std = jnp.abs(ns[:, Lp:])
        new_y = (1.0 - u) * new_state + u * y_ode
        new_y_std = (1.0 - u) * new_state_std + u * s

        # Masked update: observation mask lives in columns [n_data, 2*n_data).
        col = lax.broadcasted_iota(jnp.int32, x.shape, 1)
        mask_cols = jnp.logical_and(col >= n_data_dims, col < 2 * n_data_dims)
        observed = jnp.sum(jnp.where(mask_cols, x, 0.0), axis=-1, keepdims=True) > 0.0
        m = observed.astype(jnp.float32)
        new_y = m * new_y + (1.0 - m) * y_ode
        new_y_std = jnp.abs(m * new_y_std + (1.0 - m) * s)

        prev_y[...] = new_y
        prev_std[...] = new_y_std

        # --- transform_z0 on the final hidden state only. ---
        @pl.when(t == n_t - 1)
        def _final():
            z = jnp.concatenate([new_y, new_y_std], axis=-1)
            ht = jnp.tanh(_dot(z, wt1[...]) + bt1[...])
            zt = _dot(ht, wt2[...]) + bt2[...]
            mean_ref[...] = zt[:, :Zp].astype(mean_ref.dtype)
            std_ref[...] = jnp.abs(zt[:, Zp:]).astype(std_ref.dtype)

    return kernel


def encoder_z0_ode_rnn_forward(data, time_steps, params, *, row_tile=8,
                               run_backwards=True):
    """data: [n_traj, n_tp, input_dim] (values ++ mask); time_steps: [n_tp].
    Returns (mean_z0, std_z0), each [1, n_traj, z0_dim] (as in the torch module)."""
    assert run_backwards, "only the default run_backwards=True path is implemented"
    assert row_tile % SUBLANE == 0

    n_traj, n_tp, in_dim = data.shape
    n_data = in_dim // 2

    # Unpadded parameter shapes (weights stored [in, out]).
    L = params["wo1"].shape[0]                 # latent_dim
    U = params["wu1"].shape[1]                 # n_gru_units
    Uo = params["wo1"].shape[1]                # ode_func hidden units
    Ht = params["wt1"].shape[1]                # transform_z0 hidden units
    Z = params["wt2"].shape[1] // 2            # z0_dim

    Lp, INp = _round_up(L, LANE), _round_up(in_dim, LANE)
    Up, Uop = _round_up(U, LANE), _round_up(Uo, LANE)
    Htp, Zp = _round_up(Ht, LANE), _round_up(Z, LANE)

    sL, sIN = (L, Lp), (in_dim, INp)
    sU, sUo, sHt, sZ = (U, Up), (Uo, Uop), (Ht, Htp), (Z, Zp)
    cat_segs = [sL, sL, sIN]
    one = (1, 1)
    p = params
    w_list = [
        _pad_blocks(p["wu1"], cat_segs, [sU]),  _pad_blocks(p["bu1"][None], [one], [sU]),
        _pad_blocks(p["wu2"], [sU], [sL]),      _pad_blocks(p["bu2"][None], [one], [sL]),
        _pad_blocks(p["wr1"], cat_segs, [sU]),  _pad_blocks(p["br1"][None], [one], [sU]),
        _pad_blocks(p["wr2"], [sU], [sL]),      _pad_blocks(p["br2"][None], [one], [sL]),
        _pad_blocks(p["wn1"], cat_segs, [sU]),  _pad_blocks(p["bn1"][None], [one], [sU]),
        _pad_blocks(p["wn2"], [sU], [sL, sL]),  _pad_blocks(p["bn2"][None], [one], [sL, sL]),
        _pad_blocks(p["wo1"], [sL], [sUo]),     _pad_blocks(p["bo1"][None], [one], [sUo]),
        _pad_blocks(p["wo2"], [sUo], [sL]),     _pad_blocks(p["bo2"][None], [one], [sL]),
        _pad_blocks(p["wt1"], [sL, sL], [sHt]), _pad_blocks(p["bt1"][None], [one], [sHt]),
        _pad_blocks(p["wt2"], [sHt], [sZ, sZ]), _pad_blocks(p["bt2"][None], [one], [sZ, sZ]),
    ]

    # Fixed, sublane-aligned row tile; pad trajectories to a multiple of it.
    n_traj_p = _round_up(n_traj, row_tile)
    n_row_tiles = n_traj_p // row_tile

    # Time-major, lane-padded observations: [n_tp, n_traj_p, IN_pad].
    data_tm = jnp.zeros((n_tp, n_traj_p, INp), jnp.float32)
    data_tm = data_tm.at[:, :n_traj, :in_dim].set(
        jnp.transpose(data.astype(jnp.float32), (1, 0, 2)))

    # dt per processed step (backwards): step 0 handles time index n_tp-1 with
    # prev_t = t[-1] + 0.01; step k>=1 handles i = n_tp-1-k with dt = t[i]-t[i+1].
    ts = time_steps.astype(jnp.float32)
    if n_tp == 1:
        dts = jnp.zeros((1,), jnp.float32)   # matches the no-ODE single-obs branch
    else:
        dts = jnp.concatenate(
            [jnp.full((1,), -0.01, jnp.float32), (ts[:-1] - ts[1:])[::-1]])

    kernel = _make_kernel(Lp, Zp, n_data)

    # Advisory cost estimate for XLA's scheduler.
    CATp = 2 * Lp + INp
    flops_step = 2 * (2 * Lp * Uop + 2 * (CATp * Up + Up * Lp) + CATp * Up + Up * 2 * Lp)
    flops_final = 2 * (2 * Lp * Htp + Htp * 2 * Zp)
    flops = int(n_traj_p * (n_tp * flops_step + flops_final))
    transcendentals = int(n_traj_p * (n_tp * (3 * Up + Uop + 2 * Lp) + Htp))
    bytes_accessed = int(4 * (data_tm.size + sum(int(w.size) for w in w_list)
                              + 2 * n_traj_p * Zp + n_tp))

    in_specs = [
        pl.BlockSpec(memory_space=pltpu.MemorySpace.SMEM),                     # dts
        pl.BlockSpec((1, row_tile, INp), lambda r, t: (n_tp - 1 - t, r, 0)),   # obs (reversed)
    ] + [pl.BlockSpec(w.shape, lambda r, t: (0, 0)) for w in w_list]           # resident weights

    out_specs = [
        pl.BlockSpec((row_tile, Zp), lambda r, t: (r, 0)),
        pl.BlockSpec((row_tile, Zp), lambda r, t: (r, 0)),
    ]
    out_shape = [jax.ShapeDtypeStruct((n_traj_p, Zp), jnp.float32)] * 2

    mean_p, std_p = pl.pallas_call(
        kernel,
        out_shape=out_shape,
        grid_spec=pltpu.PrefetchScalarGridSpec(
            num_scalar_prefetch=0,
            grid=(n_row_tiles, n_tp),
            in_specs=in_specs,
            out_specs=out_specs,
            scratch_shapes=[pltpu.VMEM((row_tile, Lp), jnp.float32),
                            pltpu.VMEM((row_tile, Lp), jnp.float32)],
        ),
        compiler_params=pltpu.CompilerParams(
            dimension_semantics=("parallel", "arbitrary")),
        cost_estimate=pl.CostEstimate(flops=flops,
                                      transcendentals=transcendentals,
                                      bytes_accessed=bytes_accessed),
    )(dts, data_tm, *w_list)

    mean_z0 = mean_p[:n_traj, :Z].reshape(1, n_traj, Z)
    std_z0 = std_p[:n_traj, :Z].reshape(1, n_traj, Z)
    return mean_z0, std_z0


def _reference_forward(data, time_steps, p, n_data_dims):
    """Pure-JAX replica of Encoder_z0_ODE_RNN.forward (backward ODE-RNN with a
    single explicit-Euler ODE step per interval, matching the kernel)."""
    n_traj, n_tp, _ = data.shape
    L = p["wo1"].shape[0]
    Z = p["wt2"].shape[1] // 2
    y = jnp.zeros((n_traj, L), jnp.float32)
    s = jnp.zeros((n_traj, L), jnp.float32)
    prev_t = time_steps[-1] + 0.01
    t_i = time_steps[-1]
    for i in range(n_tp - 1, -1, -1):
        dt = t_i - prev_t
        h = jnp.tanh(_dot(y, p["wo1"]) + p["bo1"])
        y_ode = y + (_dot(h, p["wo2"]) + p["bo2"]) * dt
        x = data[:, i, :]
        cat = jnp.concatenate([y_ode, s, x], -1)
        u = jax.nn.sigmoid(_dot(jnp.tanh(_dot(cat, p["wu1"]) + p["bu1"]), p["wu2"]) + p["bu2"])
        r = jax.nn.sigmoid(_dot(jnp.tanh(_dot(cat, p["wr1"]) + p["br1"]), p["wr2"]) + p["br2"])
        cat_r = jnp.concatenate([y_ode * r, s * r, x], -1)
        ns = _dot(jnp.tanh(_dot(cat_r, p["wn1"]) + p["bn1"]), p["wn2"]) + p["bn2"]
        new_state, new_state_std = ns[:, :L], jnp.abs(ns[:, L:])
        new_y = (1.0 - u) * new_state + u * y_ode
        new_y_std = (1.0 - u) * new_state_std + u * s
        m = (jnp.sum(x[:, n_data_dims:], -1, keepdims=True) > 0).astype(jnp.float32)
        y = m * new_y + (1.0 - m) * y_ode
        s = jnp.abs(m * new_y_std + (1.0 - m) * s)
        prev_t, t_i = time_steps[i], time_steps[i - 1]
    z = jnp.concatenate([y, s], -1)
    zt = _dot(jnp.tanh(_dot(z, p["wt1"]) + p["bt1"]), p["wt2"]) + p["bt2"]
    return zt[:, :Z], jnp.abs(zt[:, Z:])


if __name__ == "__main__":
    latent_dim = 32
    n_gru_units = 100
    n_ode_units = 100
    transform_units = 100
    z0_dim = latent_dim
    n_data_dims = 8
    input_dim = 2 * n_data_dims          # observed values ++ observation mask
    n_traj, n_tp = 16, 8                 # 2 row tiles of 8 -> grid length >= 2

    key = jax.random.PRNGKey(0)
    keys = jax.random.split(key, 12)

    def linear(k, n_in, n_out):
        # utils.init_network_weights: N(0, 0.1) weights, zero biases.
        return (0.1 * jax.random.normal(k, (n_in, n_out), jnp.float32),
                jnp.zeros((n_out,), jnp.float32))

    cat_dim = 2 * latent_dim + input_dim
    params = {}
    params["wu1"], params["bu1"] = linear(keys[0], cat_dim, n_gru_units)
    params["wu2"], params["bu2"] = linear(keys[1], n_gru_units, latent_dim)
    params["wr1"], params["br1"] = linear(keys[2], cat_dim, n_gru_units)
    params["wr2"], params["br2"] = linear(keys[3], n_gru_units, latent_dim)
    params["wn1"], params["bn1"] = linear(keys[4], cat_dim, n_gru_units)
    params["wn2"], params["bn2"] = linear(keys[5], n_gru_units, 2 * latent_dim)
    params["wo1"], params["bo1"] = linear(keys[6], latent_dim, n_ode_units)
    params["wo2"], params["bo2"] = linear(keys[7], n_ode_units, latent_dim)
    params["wt1"], params["bt1"] = linear(keys[8], 2 * latent_dim, transform_units)
    params["wt2"], params["bt2"] = linear(keys[9], transform_units, 2 * z0_dim)

    vals = jax.random.normal(keys[10], (n_traj, n_tp, n_data_dims), jnp.float32)
    obs_mask = (jax.random.uniform(keys[11], (n_traj, n_tp, n_data_dims)) < 0.7
                ).astype(jnp.float32)
    data = jnp.concatenate([vals * obs_mask, obs_mask], axis=-1)
    time_steps = jnp.linspace(0.0, 1.0, n_tp).astype(jnp.float32)

    mean_z0, std_z0 = encoder_z0_ode_rnn_forward(data, time_steps, params, row_tile=8)
    jax.block_until_ready((mean_z0, std_z0))

    ref_mean, ref_std = _reference_forward(data, time_steps, params, n_data_dims)
    assert mean_z0.shape == (1, n_traj, z0_dim) and std_z0.shape == (1, n_traj, z0_dim)
    assert jnp.allclose(mean_z0[0], ref_mean, atol=2e-4, rtol=2e-4), "mean_z0 mismatch"
    assert jnp.allclose(std_z0[0], ref_std, atol=2e-4, rtol=2e-4), "std_z0 mismatch"

    print("KERNEL_OK")
</pallas_src>

<mosaic_0001>
module attributes {stable_mosaic.version = 11 : i64} {
  func.func @kernel(%arg0: i32, %arg1: i32, %arg2: memref<8xf32, #tpu.memory_space<smem>>, %arg3: memref<1x8x128xf32, #tpu.memory_space<vmem>>, %arg4: memref<384x128xf32, #tpu.memory_space<vmem>>, %arg5: memref<1x128xf32, #tpu.memory_space<vmem>>, %arg6: memref<128x128xf32, #tpu.memory_space<vmem>>, %arg7: memref<1x128xf32, #tpu.memory_space<vmem>>, %arg8: memref<384x128xf32, #tpu.memory_space<vmem>>, %arg9: memref<1x128xf32, #tpu.memory_space<vmem>>, %arg10: memref<128x128xf32, #tpu.memory_space<vmem>>, %arg11: memref<1x128xf32, #tpu.memory_space<vmem>>, %arg12: memref<384x128xf32, #tpu.memory_space<vmem>>, %arg13: memref<1x128xf32, #tpu.memory_space<vmem>>, %arg14: memref<128x256xf32, #tpu.memory_space<vmem>>, %arg15: memref<1x256xf32, #tpu.memory_space<vmem>>, %arg16: memref<128x128xf32, #tpu.memory_space<vmem>>, %arg17: memref<1x128xf32, #tpu.memory_space<vmem>>, %arg18: memref<128x128xf32, #tpu.memory_space<vmem>>, %arg19: memref<1x128xf32, #tpu.memory_space<vmem>>, %arg20: memref<256x128xf32, #tpu.memory_space<vmem>>, %arg21: memref<1x128xf32, #tpu.memory_space<vmem>>, %arg22: memref<128x256xf32, #tpu.memory_space<vmem>>, %arg23: memref<1x256xf32, #tpu.memory_space<vmem>>, %arg24: memref<8x128xf32, #tpu.memory_space<vmem>>, %arg25: memref<8x128xf32, #tpu.memory_space<vmem>>, %arg26: memref<8x128xf32, #tpu.memory_space<vmem>>, %arg27: memref<8x128xf32, #tpu.memory_space<vmem>>) attributes {dimension_semantics = [#tpu.dimension_semantics<parallel>, #tpu.dimension_semantics<arbitrary>], iteration_bounds = array<i64: 2, 8>, scalar_prefetch = 0 : i64, scratch_operands = 2 : i64, tpu.core_type = #tpu.core_type<tc>, window_params = [{transform_indices = @transform_0, window_bounds = array<i64: 8>}, {transform_indices = @transform_1, window_bounds = array<i64: 1, 8, 128>}, {pipeline_mode = #tpu.pipeline_mode<synchronous>, transform_indices = @transform_2, window_bounds = array<i64: 384, 128>}, {pipeline_mode = #tpu.pipeline_mode<synchronous>, transform_indices = @transform_3, window_bounds = array<i64: 1, 128>}, {pipeline_mode = #tpu.pipeline_mode<synchronous>, transform_indices = @transform_4, window_bounds = array<i64: 128, 128>}, {pipeline_mode = #tpu.pipeline_mode<synchronous>, transform_indices = @transform_5, window_bounds = array<i64: 1, 128>}, {pipeline_mode = #tpu.pipeline_mode<synchronous>, transform_indices = @transform_6, window_bounds = array<i64: 384, 128>}, {pipeline_mode = #tpu.pipeline_mode<synchronous>, transform_indices = @transform_7, window_bounds = array<i64: 1, 128>}, {pipeline_mode = #tpu.pipeline_mode<synchronous>, transform_indices = @transform_8, window_bounds = array<i64: 128, 128>}, {pipeline_mode = #tpu.pipeline_mode<synchronous>, transform_indices = @transform_9, window_bounds = array<i64: 1, 128>}, {pipeline_mode = #tpu.pipeline_mode<synchronous>, transform_indices = @transform_10, window_bounds = array<i64: 384, 128>}, {pipeline_mode = #tpu.pipeline_mode<synchronous>, transform_indices = @transform_11, window_bounds = array<i64: 1, 128>}, {pipeline_mode = #tpu.pipeline_mode<synchronous>, transform_indices = @transform_12, window_bounds = array<i64: 128, 256>}, {pipeline_mode = #tpu.pipeline_mode<synchronous>, transform_indices = @transform_13, window_bounds = array<i64: 1, 256>}, {pipeline_mode = #tpu.pipeline_mode<synchronous>, transform_indices = @transform_14, window_bounds = array<i64: 128, 128>}, {pipeline_mode = #tpu.pipeline_mode<synchronous>, transform_indices = @transform_15, window_bounds = array<i64: 1, 128>}, {pipeline_mode = #tpu.pipeline_mode<synchronous>, transform_indices = @transform_16, window_bounds = array<i64: 128, 128>}, {pipeline_mode = #tpu.pipeline_mode<synchronous>, transform_indices = @transform_17, window_bounds = array<i64: 1, 128>}, {pipeline_mode = #tpu.pipeline_mode<synchronous>, transform_indices = @transform_18, window_bounds = array<i64: 256, 128>}, {pipeline_mode = #tpu.pipeline_mode<synchronous>, transform_indices = @transform_19, window_bounds = array<i64: 1, 128>}, {pipeline_mode = #tpu.pipeline_mode<synchronous>, transform_indices = @transform_20, window_bounds = array<i64: 128, 256>}, {pipeline_mode = #tpu.pipeline_mode<synchronous>, transform_indices = @transform_21, window_bounds = array<i64: 1, 256>}, {transform_indices = @transform_22, window_bounds = array<i64: 8, 128>}, {transform_indices = @transform_23, window_bounds = array<i64: 8, 128>}]} {
    %c0_i32 = arith.constant 0 : i32
    %0 = arith.cmpi eq, %arg1, %c0_i32 : i32
    %1 = arith.extui %0 : i1 to i32
    %c0_i32_0 = arith.constant 0 : i32
    %2 = arith.cmpi ne, %1, %c0_i32_0 : i32
    scf.if %2 {
      %cst_60 = arith.constant 0.000000e+00 : f32
      %117 = vector.broadcast %cst_60 : f32 to vector<8x128xf32>
      %c0_61 = arith.constant 0 : index
      %c0_62 = arith.constant 0 : index
      %118 = vector.load %arg26[%c0_61, %c0_62] : memref<8x128xf32, #tpu.memory_space<vmem>>, vector<8x128xf32>
      tpu.vector_store %arg26[%c0_61, %c0_62], %117 {strides = array<i32>} : memref<8x128xf32, #tpu.memory_space<vmem>>, vector<8x128xf32>,
      %cst_63 = arith.constant 0.000000e+00 : f32
      %119 = vector.broadcast %cst_63 : f32 to vector<8x128xf32>
      %c0_64 = arith.constant 0 : index
      %c0_65 = arith.constant 0 : index
      %120 = vector.load %arg27[%c0_64, %c0_65] : memref<8x128xf32, #tpu.memory_space<vmem>>, vector<8x128xf32>
      tpu.vector_store %arg27[%c0_64, %c0_65], %119 {strides = array<i32>} : memref<8x128xf32, #tpu.memory_space<vmem>>, vector<8x128xf32>,
    } else {
    }
    %c0 = arith.constant 0 : index
    %c0_1 = arith.constant 0 : index
    %c0_2 = arith.constant 0 : index
    %3 = vector.load %arg3[%c0, %c0_1, %c0_2] : memref<1x8x128xf32, #tpu.memory_space<vmem>>, vector<1x8x128xf32>
    %4 = vector.shape_cast %3 : vector<1x8x128xf32> to vector<8x128xf32>
    %5 = arith.index_cast %arg1 : i32 to index
    %6 = memref.load %arg2[%5] : memref<8xf32, #tpu.memory_space<smem>>
    %c0_3 = arith.constant 0 : index
    %c0_4 = arith.constant 0 : index
    %7 = vector.load %arg26[%c0_3, %c0_4] : memref<8x128xf32, #tpu.memory_space<vmem>>, vector<8x128xf32>
    %c0_5 = arith.constant 0 : index
    %c0_6 = arith.constant 0 : index
    %8 = vector.load %arg27[%c0_5, %c0_6] : memref<8x128xf32, #tpu.memory_space<vmem>>, vector<8x128xf32>
    %c0_7 = arith.constant 0 : index
    %c0_8 = arith.constant 0 : index
    %9 = vector.load %arg16[%c0_7, %c0_8] : memref<128x128xf32, #tpu.memory_space<vmem>>, vector<128x128xf32>
    %cst = arith.constant dense<0.000000e+00> : vector<8x128xf32>
    %10 = tpu.matmul %7, %9, %cst {dimension_numbers = #tpu.dot_dimension_numbers<[1], [0], [0], [1], [0, 0, 1, 1], [], []>, precision = #tpu.contract_precision<fp32>} : vector<8x128xf32>, vector<128x128xf32>, vector<8x128xf32> -> vector<8x128xf32>
    %c0_9 = arith.constant 0 : index
    %c0_10 = arith.constant 0 : index
    %11 = vector.load %arg17[%c0_9, %c0_10] : memref<1x128xf32, #tpu.memory_space<vmem>>, vector<1x128xf32>
    %12 = vector.broadcast %11 : vector<1x128xf32> to vector<8x128xf32>
    %13 = arith.addf %10, %12 : vector<8x128xf32>
    %14 = math.tanh %13 : vector<8x128xf32>
    %c0_11 = arith.constant 0 : index
    %c0_12 = arith.constant 0 : index
    %15 = vector.load %arg18[%c0_11, %c0_12] : memref<128x128xf32, #tpu.memory_space<vmem>>, vector<128x128xf32>
    %cst_13 = arith.constant dense<0.000000e+00> : vector<8x128xf32>
    %16 = tpu.matmul %14, %15, %cst_13 {dimension_numbers = #tpu.dot_dimension_numbers<[1], [0], [0], [1], [0, 0, 1, 1], [], []>, precision = #tpu.contract_precision<fp32>} : vector<8x128xf32>, vector<128x128xf32>, vector<8x128xf32> -> vector<8x128xf32>
    %c0_14 = arith.constant 0 : index
    %c0_15 = arith.constant 0 : index
    %17 = vector.load %arg19[%c0_14, %c0_15] : memref<1x128xf32, #tpu.memory_space<vmem>>, vector<1x128xf32>
    %18 = vector.broadcast %17 : vector<1x128xf32> to vector<8x128xf32>
    %19 = arith.addf %16, %18 : vector<8x128xf32>
    %20 = vector.broadcast %6 : f32 to vector<8x128xf32>
    %21 = arith.mulf %19, %20 : vector<8x128xf32>
    %22 = arith.addf %7, %21 : vector<8x128xf32>
    %23 = tpu.concatenate %22, %8, %4 in 1 : vector<8x128xf32>, vector<8x128xf32>, vector<8x128xf32> -> vector<8x384xf32>
    %c0_16 = arith.constant 0 : index
    %c0_17 = arith.constant 0 : index
    %24 = vector.load %arg4[%c0_16, %c0_17] : memref<384x128xf32, #tpu.memory_space<vmem>>, vector<384x128xf32>
    %cst_18 = arith.constant dense<0.000000e+00> : vector<8x128xf32>
    %25 = tpu.matmul %23, %24, %cst_18 {dimension_numbers = #tpu.dot_dimension_numbers<[1], [0], [0], [1], [0, 0, 1, 1], [], []>, precision = #tpu.contract_precision<fp32>} : vector<8x384xf32>, vector<384x128xf32>, vector<8x128xf32> -> vector<8x128xf32>
    %c0_19 = arith.constant 0 : index
    %c0_20 = arith.constant 0 : index
    %26 = vector.load %arg5[%c0_19, %c0_20] : memref<1x128xf32, #tpu.memory_space<vmem>>, vector<1x128xf32>
    %27 = vector.broadcast %26 : vector<1x128xf32> to vector<8x128xf32>
    %28 = arith.addf %25, %27 : vector<8x128xf32>
    %29 = math.tanh %28 : vector<8x128xf32>
    %c0_21 = arith.constant 0 : index
    %c0_22 = arith.constant 0 : index
    %30 = vector.load %arg6[%c0_21, %c0_22] : memref<128x128xf32, #tpu.memory_space<vmem>>, vector<128x128xf32>
    %cst_23 = arith.constant dense<0.000000e+00> : vector<8x128xf32>
    %31 = tpu.matmul %29, %30, %cst_23 {dimension_numbers = #tpu.dot_dimension_numbers<[1], [0], [0], [1], [0, 0, 1, 1], [], []>, precision = #tpu.contract_precision<fp32>} : vector<8x128xf32>, vector<128x128xf32>, vector<8x128xf32> -> vector<8x128xf32>
    %c0_24 = arith.constant 0 : index
    %c0_25 = arith.constant 0 : index
    %32 = vector.load %arg7[%c0_24, %c0_25] : memref<1x128xf32, #tpu.memory_space<vmem>>, vector<1x128xf32>
    %33 = vector.broadcast %32 : vector<1x128xf32> to vector<8x128xf32>
    %34 = arith.addf %31, %33 : vector<8x128xf32>
    %35 = arith.negf %34 : vector<8x128xf32>
    %36 = math.exp %35 : vector<8x128xf32>
    %cst_26 = arith.constant 1.000000e+00 : f32
    %37 = vector.broadcast %cst_26 : f32 to vector<8x128xf32>
    %38 = arith.addf %37, %36 : vector<8x128xf32>
    %39 = arith.divf %37, %38 : vector<8x128xf32>
    %c0_27 = arith.constant 0 : index
    %c0_28 = arith.constant 0 : index
    %40 = vector.load %arg8[%c0_27, %c0_28] : memref<384x128xf32, #tpu.memory_space<vmem>>, vector<384x128xf32>
    %cst_29 = arith.constant dense<0.000000e+00> : vector<8x128xf32>
    %41 = tpu.matmul %23, %40, %cst_29 {dimension_numbers = #tpu.dot_dimension_numbers<[1], [0], [0], [1], [0, 0, 1, 1], [], []>, precision = #tpu.contract_precision<fp32>} : vector<8x384xf32>, vector<384x128xf32>, vector<8x128xf32> -> vector<8x128xf32>
    %c0_30 = arith.constant 0 : index
    %c0_31 = arith.constant 0 : index
    %42 = vector.load %arg9[%c0_30, %c0_31] : memref<1x128xf32, #tpu.memory_space<vmem>>, vector<1x128xf32>
    %43 = vector.broadcast %42 : vector<1x128xf32> to vector<8x128xf32>
    %44 = arith.addf %41, %43 : vector<8x128xf32>
    %45 = math.tanh %44 : vector<8x128xf32>
    %c0_32 = arith.constant 0 : index
    %c0_33 = arith.constant 0 : index
    %46 = vector.load %arg10[%c0_32, %c0_33] : memref<128x128xf32, #tpu.memory_space<vmem>>, vector<128x128xf32>
    %cst_34 = arith.constant dense<0.000000e+00> : vector<8x128xf32>
    %47 = tpu.matmul %45, %46, %cst_34 {dimension_numbers = #tpu.dot_dimension_numbers<[1], [0], [0], [1], [0, 0, 1, 1], [], []>, precision = #tpu.contract_precision<fp32>} : vector<8x128xf32>, vector<128x128xf32>, vector<8x128xf32> -> vector<8x128xf32>
    %c0_35 = arith.constant 0 : index
    %c0_36 = arith.constant 0 : index
    %48 = vector.load %arg11[%c0_35, %c0_36] : memref<1x128xf32, #tpu.memory_space<vmem>>, vector<1x128xf32>
    %49 = vector.broadcast %48 : vector<1x128xf32> to vector<8x128xf32>
    %50 = arith.addf %47, %49 : vector<8x128xf32>
    %51 = arith.negf %50 : vector<8x128xf32>
    %52 = math.exp %51 : vector<8x128xf32>
    %cst_37 = arith.constant 1.000000e+00 : f32
    %53 = vector.broadcast %cst_37 : f32 to vector<8x128xf32>
    %54 = arith.addf %53, %52 : vector<8x128xf32>
    %55 = arith.divf %53, %54 : vector<8x128xf32>
    %56 = arith.mulf %22, %55 : vector<8x128xf32>
    %57 = arith.mulf %8, %55 : vector<8x128xf32>
    %58 = tpu.concatenate %56, %57, %4 in 1 : vector<8x128xf32>, vector<8x128xf32>, vector<8x128xf32> -> vector<8x384xf32>
    %c0_38 = arith.constant 0 : index
    %c0_39 = arith.constant 0 : index
    %59 = vector.load %arg12[%c0_38, %c0_39] : memref<384x128xf32, #tpu.memory_space<vmem>>, vector<384x128xf32>
    %cst_40 = arith.constant dense<0.000000e+00> : vector<8x128xf32>
    %60 = tpu.matmul %58, %59, %cst_40 {dimension_numbers = #tpu.dot_dimension_numbers<[1], [0], [0], [1], [0, 0, 1, 1], [], []>, precision = #tpu.contract_precision<fp32>} : vector<8x384xf32>, vector<384x128xf32>, vector<8x128xf32> -> vector<8x128xf32>
    %c0_41 = arith.constant 0 : index
    %c0_42 = arith.constant 0 : index
    %61 = vector.load %arg13[%c0_41, %c0_42] : memref<1x128xf32, #tpu.memory_space<vmem>>, vector<1x128xf32>
    %62 = vector.broadcast %61 : vector<1x128xf32> to vector<8x128xf32>
    %63 = arith.addf %60, %62 : vector<8x128xf32>
    %64 = math.tanh %63 : vector<8x128xf32>
    %c0_43 = arith.constant 0 : index
    %c0_44 = arith.constant 0 : index
    %65 = vector.load %arg14[%c0_43, %c0_44] : memref<128x256xf32, #tpu.memory_space<vmem>>, vector<128x256xf32>
    %cst_45 = arith.constant dense<0.000000e+00> : vector<8x256xf32>
    %66 = tpu.matmul %64, %65, %cst_45 {dimension_numbers = #tpu.dot_dimension_numbers<[1], [0], [0], [1], [0, 0, 1, 1], [], []>, precision = #tpu.contract_precision<fp32>} : vector<8x128xf32>, vector<128x256xf32>, vector<8x256xf32> -> vector<8x256xf32>
    %c0_46 = arith.constant 0 : index
    %c0_47 = arith.constant 0 : index
    %67 = vector.load %arg15[%c0_46, %c0_47] : memref<1x256xf32, #tpu.memory_space<vmem>>, vector<1x256xf32>
    %68 = vector.broadcast %67 : vector<1x256xf32> to vector<8x256xf32>
    %69 = arith.addf %66, %68 : vector<8x256xf32>
    %70 = vector.extract_strided_slice %69 {offsets = [0, 0], sizes = [8, 128], strides = [1, 1]} : vector<8x256xf32> to vector<8x128xf32>
    %71 = vector.extract_strided_slice %69 {offsets = [0, 128], sizes = [8, 128], strides = [1, 1]} : vector<8x256xf32> to vector<8x128xf32>
    %72 = math.absf %71 : vector<8x128xf32>
    %cst_48 = arith.constant 1.000000e+00 : f32
    %73 = vector.broadcast %cst_48 : f32 to vector<8x128xf32>
    %74 = arith.subf %73, %39 : vector<8x128xf32>
    %75 = arith.mulf %74, %70 : vector<8x128xf32>
    %76 = arith.mulf %39, %22 : vector<8x128xf32>
    %77 = arith.addf %75, %76 : vector<8x128xf32>
    %cst_49 = arith.constant 1.000000e+00 : f32
    %78 = vector.broadcast %cst_49 : f32 to vector<8x128xf32>
    %79 = arith.subf %78, %39 : vector<8x128xf32>
    %80 = arith.mulf %79, %72 : vector<8x128xf32>
    %81 = arith.mulf %39, %8 : vector<8x128xf32>
    %82 = arith.addf %80, %81 : vector<8x128xf32>
    %83 = tpu.iota {dimensions = array<i32: 1>} : vector<8x128xi32>
    %c8_i32 = arith.constant 8 : i32
    %84 = vector.broadcast %c8_i32 : i32 to vector<8x128xi32>
    %85 = arith.cmpi sge, %83, %84 : vector<8x128xi32>
    %c16_i32 = arith.constant 16 : i32
    %86 = vector.broadcast %c16_i32 : i32 to vector<8x128xi32>
    %87 = arith.cmpi slt, %83, %86 : vector<8x128xi32>
    %88 = arith.andi %85, %87 : vector<8x128xi1>
    %cst_50 = arith.constant 0.000000e+00 : f32
    %89 = vector.broadcast %cst_50 : f32 to vector<8x128xf32>
    %90 = arith.select %88, %4, %89 : vector<8x128xi1>, vector<8x128xf32>
    %cst_51 = arith.constant dense<0.000000e+00> : vector<8xf32>
    %91 = vector.multi_reduction <add>, %90, %cst_51 [1] : vector<8x128xf32> to vector<8xf32>
    %92 = vector.shape_cast %91 : vector<8xf32> to vector<8x1xf32>
    %cst_52 = arith.constant 0.000000e+00 : f32
    %93 = vector.broadcast %cst_52 : f32 to vector<8x1xf32>
    %94 = arith.cmpf ogt, %92, %93 : vector<8x1xf32>
    %95 = arith.extui %94 : vector<8x1xi1> to vector<8x1xi32>
    %96 = arith.sitofp %95 : vector<8x1xi32> to vector<8x1xf32>
    %97 = vector.broadcast %96 : vector<8x1xf32> to vector<8x128xf32>
    %98 = arith.mulf %97, %77 : vector<8x128xf32>
    %cst_53 = arith.constant 1.000000e+00 : f32
    %99 = vector.broadcast %cst_53 : f32 to vector<8x1xf32>
    %100 = arith.subf %99, %96 : vector<8x1xf32>
    %101 = vector.broadcast %100 : vector<8x1xf32> to vector<8x128xf32>
    %102 = arith.mulf %101, %22 : vector<8x128xf32>
    %103 = arith.addf %98, %102 : vector<8x128xf32>
    %104 = vector.broadcast %96 : vector<8x1xf32> to vector<8x128xf32>
    %105 = arith.mulf %104, %82 : vector<8x128xf32>
    %cst_54 = arith.constant 1.000000e+00 : f32
    %106 = vector.broadcast %cst_54 : f32 to vector<8x1xf32>
    %107 = arith.subf %106, %96 : vector<8x1xf32>
    %108 = vector.broadcast %107 : vector<8x1xf32> to vector<8x128xf32>
    %109 = arith.mulf %108, %8 : vector<8x128xf32>
    %110 = arith.addf %105, %109 : vector<8x128xf32>
    %111 = math.absf %110 : vector<8x128xf32>
    %c0_55 = arith.constant 0 : index
    %c0_56 = arith.constant 0 : index
    %112 = vector.load %arg26[%c0_55, %c0_56] : memref<8x128xf32, #tpu.memory_space<vmem>>, vector<8x128xf32>
    tpu.vector_store %arg26[%c0_55, %c0_56], %103 {strides = array<i32>} : memref<8x128xf32, #tpu.memory_space<vmem>>, vector<8x128xf32>,
    %c0_57 = arith.constant 0 : index
    %c0_58 = arith.constant 0 : index
    %113 = vector.load %arg27[%c0_57, %c0_58] : memref<8x128xf32, #tpu.memory_space<vmem>>, vector<8x128xf32>
    tpu.vector_store %arg27[%c0_57, %c0_58], %111 {strides = array<i32>} : memref<8x128xf32, #tpu.memory_space<vmem>>, vector<8x128xf32>,
    %c7_i32 = arith.constant 7 : i32
    %114 = arith.cmpi eq, %arg1, %c7_i32 : i32
    %115 = arith.extui %114 : i1 to i32
    %c0_i32_59 = arith.constant 0 : i32
    %116 = arith.cmpi ne, %115, %c0_i32_59 : i32
    scf.if %116 {
      %117 = tpu.concatenate %103, %111 in 1 : vector<8x128xf32>, vector<8x128xf32> -> vector<8x256xf32>
      %c0_60 = arith.constant 0 : index
      %c0_61 = arith.constant 0 : index
      %118 = vector.load %arg20[%c0_60, %c0_61] : memref<256x128xf32, #tpu.memory_space<vmem>>, vector<256x128xf32>
      %cst_62 = arith.constant dense<0.000000e+00> : vector<8x128xf32>
      %119 = tpu.matmul %117, %118, %cst_62 {dimension_numbers = #tpu.dot_dimension_numbers<[1], [0], [0], [1], [0, 0, 1, 1], [], []>, precision = #tpu.contract_precision<fp32>} : vector<8x256xf32>, vector<256x128xf32>, vector<8x128xf32> -> vector<8x128xf32>
      %c0_63 = arith.constant 0 : index
      %c0_64 = arith.constant 0 : index
      %120 = vector.load %arg21[%c0_63, %c0_64] : memref<1x128xf32, #tpu.memory_space<vmem>>, vector<1x128xf32>
      %121 = vector.broadcast %120 : vector<1x128xf32> to vector<8x128xf32>
      %122 = arith.addf %119, %121 : vector<8x128xf32>
      %123 = math.tanh %122 : vector<8x128xf32>
      %c0_65 = arith.constant 0 : index
      %c0_66 = arith.constant 0 : index
      %124 = vector.load %arg22[%c0_65, %c0_66] : memref<128x256xf32, #tpu.memory_space<vmem>>, vector<128x256xf32>
      %cst_67 = arith.constant dense<0.000000e+00> : vector<8x256xf32>
      %125 = tpu.matmul %123, %124, %cst_67 {dimension_numbers = #tpu.dot_dimension_numbers<[1], [0], [0], [1], [0, 0, 1, 1], [], []>, precision = #tpu.contract_precision<fp32>} : vector<8x128xf32>, vector<128x256xf32>, vector<8x256xf32> -> vector<8x256xf32>
      %c0_68 = arith.constant 0 : index
      %c0_69 = arith.constant 0 : index
      %126 = vector.load %arg23[%c0_68, %c0_69] : memref<1x256xf32, #tpu.memory_space<vmem>>, vector<1x256xf32>
      %127 = vector.broadcast %126 : vector<1x256xf32> to vector<8x256xf32>
      %128 = arith.addf %125, %127 : vector<8x256xf32>
      %129 = vector.extract_strided_slice %128 {offsets = [0, 0], sizes = [8, 128], strides = [1, 1]} : vector<8x256xf32> to vector<8x128xf32>
      %c0_70 = arith.constant 0 : index
      %c0_71 = arith.constant 0 : index
      %130 = vector.load %arg24[%c0_70, %c0_71] : memref<8x128xf32, #tpu.memory_space<vmem>>, vector<8x128xf32>
      tpu.vector_store %arg24[%c0_70, %c0_71], %129 {strides = array<i32>} : memref<8x128xf32, #tpu.memory_space<vmem>>, vector<8x128xf32>,
      %131 = vector.extract_strided_slice %128 {offsets = [0, 128], sizes = [8, 128], strides = [1, 1]} : vector<8x256xf32> to vector<8x128xf32>
      %132 = math.absf %131 : vector<8x128xf32>
      %c0_72 = arith.constant 0 : index
      %c0_73 = arith.constant 0 : index
      %133 = vector.load %arg25[%c0_72, %c0_73] : memref<8x128xf32, #tpu.memory_space<vmem>>, vector<8x128xf32>
      tpu.vector_store %arg25[%c0_72, %c0_73], %132 {strides = array<i32>} : memref<8x128xf32, #tpu.memory_space<vmem>>, vector<8x128xf32>,
    } else {
    }
    return
  }
  func.func @transform_0(%arg0: i32, %arg1: i32) -> i32 {
    %c0_i32 = arith.constant 0 : i32
    %c0_i32_0 = arith.constant 0 : i32
    return %c0_i32 : i32
  }
  func.func @transform_1(%arg0: i32, %arg1: i32) -> (i32, i32, i32) {
    %c7_i32 = arith.constant 7 : i32
    %0 = arith.subi %c7_i32, %arg1 : i32
    %c0_i32 = arith.constant 0 : i32
    %c0_i32_0 = arith.constant 0 : i32
    return %0, %arg0, %c0_i32 : i32, i32, i32
  }
  func.func @transform_2(%arg0: i32, %arg1: i32) -> (i32, i32) {
    %c0_i32 = arith.constant 0 : i32
    %c0_i32_0 = arith.constant 0 : i32
    %c0_i32_1 = arith.constant 0 : i32
    return %c0_i32, %c0_i32_0 : i32, i32
  }
  func.func @transform_3(%arg0: i32, %arg1: i32) -> (i32, i32) {
    %c0_i32 = arith.constant 0 : i32
    %c0_i32_0 = arith.constant 0 : i32
    %c0_i32_1 = arith.constant 0 : i32
    return %c0_i32, %c0_i32_0 : i32, i32
  }
  func.func @transform_4(%arg0: i32, %arg1: i32) -> (i32, i32) {
    %c0_i32 = arith.constant 0 : i32
    %c0_i32_0 = arith.constant 0 : i32
    %c0_i32_1 = arith.constant 0 : i32
    return %c0_i32, %c0_i32_0 : i32, i32
  }
  func.func @transform_5(%arg0: i32, %arg1: i32) -> (i32, i32) {
    %c0_i32 = arith.constant 0 : i32
    %c0_i32_0 = arith.constant 0 : i32
    %c0_i32_1 = arith.constant 0 : i32
    return %c0_i32, %c0_i32_0 : i32, i32
  }
  func.func @transform_6(%arg0: i32, %arg1: i32) -> (i32, i32) {
    %c0_i32 = arith.constant 0 : i32
    %c0_i32_0 = arith.constant 0 : i32
    %c0_i32_1 = arith.constant 0 : i32
    return %c0_i32, %c0_i32_0 : i32, i32
  }
  func.func @transform_7(%arg0: i32, %arg1: i32) -> (i32, i32) {
    %c0_i32 = arith.constant 0 : i32
    %c0_i32_0 = arith.constant 0 : i32
    %c0_i32_1 = arith.constant 0 : i32
    return %c0_i32, %c0_i32_0 : i32, i32
  }
  func.func @transform_8(%arg0: i32, %arg1: i32) -> (i32, i32) {
    %c0_i32 = arith.constant 0 : i32
    %c0_i32_0 = arith.constant 0 : i32
    %c0_i32_1 = arith.constant 0 : i32
    return %c0_i32, %c0_i32_0 : i32, i32
  }
  func.func @transform_9(%arg0: i32, %arg1: i32) -> (i32, i32) {
    %c0_i32 = arith.constant 0 : i32
    %c0_i32_0 = arith.constant 0 : i32
    %c0_i32_1 = arith.constant 0 : i32
    return %c0_i32, %c0_i32_0 : i32, i32
  }
  func.func @transform_10(%arg0: i32, %arg1: i32) -> (i32, i32) {
    %c0_i32 = arith.constant 0 : i32
    %c0_i32_0 = arith.constant 0 : i32
    %c0_i32_1 = arith.constant 0 : i32
    return %c0_i32, %c0_i32_0 : i32, i32
  }
  func.func @transform_11(%arg0: i32, %arg1: i32) -> (i32, i32) {
    %c0_i32 = arith.constant 0 : i32
    %c0_i32_0 = arith.constant 0 : i32
    %c0_i32_1 = arith.constant 0 : i32
    return %c0_i32, %c0_i32_0 : i32, i32
  }
  func.func @transform_12(%arg0: i32, %arg1: i32) -> (i32, i32) {
    %c0_i32 = arith.constant 0 : i32
    %c0_i32_0 = arith.constant 0 : i32
    %c0_i32_1 = arith.constant 0 : i32
    return %c0_i32, %c0_i32_0 : i32, i32
  }
  func.func @transform_13(%arg0: i32, %arg1: i32) -> (i32, i32) {
    %c0_i32 = arith.constant 0 : i32
    %c0_i32_0 = arith.constant 0 : i32
    %c0_i32_1 = arith.constant 0 : i32
    return %c0_i32, %c0_i32_0 : i32, i32
  }
  func.func @transform_14(%arg0: i32, %arg1: i32) -> (i32, i32) {
    %c0_i32 = arith.constant 0 : i32
    %c0_i32_0 = arith.constant 0 : i32
    %c0_i32_1 = arith.constant 0 : i32
    return %c0_i32, %c0_i32_0 : i32, i32
  }
  func.func @transform_15(%arg0: i32, %arg1: i32) -> (i32, i32) {
    %c0_i32 = arith.constant 0 : i32
    %c0_i32_0 = arith.constant 0 : i32
    %c0_i32_1 = arith.constant 0 : i32
    return %c0_i32, %c0_i32_0 : i32, i32
  }
  func.func @transform_16(%arg0: i32, %arg1: i32) -> (i32, i32) {
    %c0_i32 = arith.constant 0 : i32
    %c0_i32_0 = arith.constant 0 : i32
    %c0_i32_1 = arith.constant 0 : i32
    return %c0_i32, %c0_i32_0 : i32, i32
  }
  func.func @transform_17(%arg0: i32, %arg1: i32) -> (i32, i32) {
    %c0_i32 = arith.constant 0 : i32
    %c0_i32_0 = arith.constant 0 : i32
    %c0_i32_1 = arith.constant 0 : i32
    return %c0_i32, %c0_i32_0 : i32, i32
  }
  func.func @transform_18(%arg0: i32, %arg1: i32) -> (i32, i32) {
    %c0_i32 = arith.constant 0 : i32
    %c0_i32_0 = arith.constant 0 : i32
    %c0_i32_1 = arith.constant 0 : i32
    return %c0_i32, %c0_i32_0 : i32, i32
  }
  func.func @transform_19(%arg0: i32, %arg1: i32) -> (i32, i32) {
    %c0_i32 = arith.constant 0 : i32
    %c0_i32_0 = arith.constant 0 : i32
    %c0_i32_1 = arith.constant 0 : i32
    return %c0_i32, %c0_i32_0 : i32, i32
  }
  func.func @transform_20(%arg0: i32, %arg1: i32) -> (i32, i32) {
    %c0_i32 = arith.constant 0 : i32
    %c0_i32_0 = arith.constant 0 : i32
    %c0_i32_1 = arith.constant 0 : i32
    return %c0_i32, %c0_i32_0 : i32, i32
  }
  func.func @transform_21(%arg0: i32, %arg1: i32) -> (i32, i32) {
    %c0_i32 = arith.constant 0 : i32
    %c0_i32_0 = arith.constant 0 : i32
    %c0_i32_1 = arith.constant 0 : i32
    return %c0_i32, %c0_i32_0 : i32, i32
  }
  func.func @transform_22(%arg0: i32, %arg1: i32) -> (i32, i32) {
    %c0_i32 = arith.constant 0 : i32
    %c0_i32_0 = arith.constant 0 : i32
    return %arg0, %c0_i32 : i32, i32
  }
  func.func @transform_23(%arg0: i32, %arg1: i32) -> (i32, i32) {
    %c0_i32 = arith.constant 0 : i32
    %c0_i32_0 = arith.constant 0 : i32
    return %arg0, %c0_i32 : i32, i32
  }
}

</mosaic_0001>

<bundles_post_ra>
// kernel: tpu_custom_call.1
= control target key start
LH: loop header
LB: loop body
LE: loop exit
PB: predicated region body
PF: predicated region fallthrough
CT: control target
= control target key end

     0   :  { %s23150_s0 = inlined_call_operand.hbm [shape: f32[8], index: 0, kind: input, shape index: {}]   ;;  %s23151_s1 = inlined_call_operand.hbm [shape: f32[8,16,128], index: 1, kind: input, shape index: {}]   ;;  %s23152_s2 = inlined_call_operand.hbm [shape: f32[384,128], index: 2, kind: input, shape index: {}]   ;;  %s23153_s3 = inlined_call_operand.vmem [shape: f32[1,128], index: 3, kind: input, shape index: {}]   ;;  %s23154_s4 = inlined_call_operand.hbm [shape: f32[128,128], index: 4, kind: input, shape index: {}]   ;;  %s23155_s5 = inlined_call_operand.vmem [shape: f32[1,128], index: 5, kind: input, shape index: {}]   ;;  %s23156_s6 = inlined_call_operand.hbm [shape: f32[384,128], index: 6, kind: input, shape index: {}]   ;;  %s23157_s7 = inlined_call_operand.vmem [shape: f32[1,128], index: 7, kind: input, shape index: {}]   ;;  %s23158_s8 = inlined_call_operand.hbm [shape: f32[128,128], index: 8, kind: input, shape index: {}]   ;;  %s23159_s9 = inlined_call_operand.vmem [shape: f32[1,128], index: 9, kind: input, shape index: {}]   ;;  %s23160_s10 = inlined_call_operand.hbm [shape: f32[384,128], index: 10, kind: input, shape index: {}]   ;;  %s23161_s11 = inlined_call_operand.vmem [shape: f32[1,128], index: 11, kind: input, shape index: {}]   ;;  %s23162_s12 = inlined_call_operand.hbm [shape: f32[128,256], index: 12, kind: input, shape index: {}]   ;;  %s23163_s13 = inlined_call_operand.vmem [shape: f32[1,256], index: 13, kind: input, shape index: {}]   ;;  %s23164_s14 = inlined_call_operand.hbm [shape: f32[128,128], index: 14, kind: input, shape index: {}]   ;;  %s23165_s15 = inlined_call_operand.vmem [shape: f32[1,128], index: 15, kind: input, shape index: {}]   ;;  %s23166_s16 = inlined_call_operand.hbm [shape: f32[128,128], index: 16, kind: input, shape index: {}]   ;;  %s23167_s17 = inlined_call_operand.vmem [shape: f32[1,128], index: 17, kind: input, shape index: {}]   ;;  %s23168_s18 = inlined_call_operand.hbm [shape: f32[256,128], index: 18, kind: input, shape index: {}]   ;;  %s23169_s19 = inlined_call_operand.vmem [shape: f32[1,128], index: 19, kind: input, shape index: {}]   ;;  %s23170_s20 = inlined_call_operand.hbm [shape: f32[128,256], index: 20, kind: input, shape index: {}]   ;;  %s23171_s21 = inlined_call_operand.vmem [shape: f32[1,256], index: 21, kind: input, shape index: {}]   ;;  %s23172_s22 = inlined_call_operand.hbm [shape: f32[16,128], index: 22, kind: output, shape index: {0}]   ;;  %s23173_s23 = inlined_call_operand.hbm [shape: f32[16,128], index: 23, kind: output, shape index: {1}]  }
   0x1   :  { %23781 = sst [smem:[#allocation148_spill]] %s23150_s0 }
   0x2   :  { %23782 = sst [smem:[#allocation149_spill]] %s23151_s1 }
   0x3   :  { %23783 = sst [smem:[#allocation150_spill]] %s23152_s2 }
   0x4   :  { %23784 = sst [smem:[#allocation151_spill]] %s23153_s3 }
   0x5   :  { %23785 = sst [smem:[#allocation152_spill]] %s23154_s4 }
   0x6   :  { %23786 = sst [smem:[#allocation153_spill]] %s23155_s5 }
   0x7   :  { %23787 = sst [smem:[#allocation154_spill]] %s23156_s6 }
   0x8   :  { %23788 = sst [smem:[#allocation155_spill]] %s23157_s7 }
   0x9   :  { %23789 = sst [smem:[#allocation156_spill]] %s23158_s8 }
   0xa   :  { %23790 = sst [smem:[#allocation157_spill]] %s23159_s9 }
   0xb   :  { %23791 = sst [smem:[#allocation158_spill]] %s23160_s10 }
   0xc   :  { %23792 = sst [smem:[#allocation159_spill]] %s23161_s11 }
   0xd   :  { %23793 = sst [smem:[#allocation160_spill]] %s23162_s12 }
   0xe   :  { %23794 = sst [smem:[#allocation161_spill]] %s23163_s13 }
   0xf   :  { %23795 = sst [smem:[#allocation162_spill]] %s23164_s14 }
  0x10   :  { %23796 = sst [smem:[#allocation163_spill]] %s23165_s15 }
  0x11   :  { %23797 = sst [smem:[#allocation164_spill]] %s23166_s16 }
  0x12   :  { %23798 = sst [smem:[#allocation165_spill]] %s23167_s17 }
  0x13   :  { %23799 = sst [smem:[#allocation166_spill]] %s23168_s18 }
  0x14   :  { %23800 = sst [smem:[#allocation167_spill]] %s23169_s19 }
  0x15   :  { %23801 = sst [smem:[#allocation168_spill]] %s23171_s21 }
  0x16   :  { %23802 = sst [smem:[#allocation169_spill]] %s23172_s22 }
  0x17   :  { %23803 = sst [smem:[#allocation170_spill]] %s23173_s23 }
  0x18   :  { %29 = vsyncpa [#allocation7], 0 }
  0x19   :  { %30 = vsyncpa [#allocation5], 0 }
  0x1a   :  { %32 = vsyncpa [#allocation5 + $0x1], 0 }
  0x1b   :  { %33 = vsyncpa [#allocation10], 0 }
  0x1c   :  { %34 = vsyncpa [#allocation13], 0 }
  0x1d   :  { %35 = vsyncpa [#allocation16], 0 }
  0x1e   :  { %36 = vsyncpa [#allocation19], 0 }
  0x1f   :  { %37 = vsyncpa [#allocation22], 0 }
  0x20   :  { %38 = vsyncpa [#allocation6], 0 }
  0x21   :  { %40 = vsyncpa [#allocation6 + $0x1], 0 }
  0x22   :  { %41 = vsyncpa [#allocation26], 0 }
  0x23   :  { %43 = vsyncpa [#allocation26 + $0x1], 0  ;;  %s17496_s4 = smov 0   ;;  %s17498_s30 = smov 0  }
  0x24   :  { %s17500_s24 = smov 0   ;;  %s17502_s25 = smov 0  }
  0x25   :  { %s17504_s5 = smov 0   ;;  %s17506_s1 = smov 0  }
  0x26   :  { %s17508_s26 = smov 0   ;;  %s17510_s2 = smov 0  }
  0x27   :  { %s17512_s6 = smov 0   ;;  %s17514_s27 = smov 0  }
  0x28   :  { %s17516_s7 = smov 0  }
  0x29 LB: > { %23804 = sst [smem:[#allocation36_spill]] %s17311_s4  ;;  %s17353_s28 = smov [#allocation9]   ;;  %s17351_s7 = sphi %s17516_s7, %s49_s7   ;;  %s17347_s27 = sphi %s17514_s27, %s24624_s27   ;;  %s17343_s6 = sphi %s17512_s6, %s24623_s6   ;;  %s17339_s2 = sphi %s17510_s2, %s24622_s2   ;;  %s17335_s26 = sphi %s17508_s26, %s24621_s26   ;;  %s17331_s1 = sphi %s17506_s1, %s24620_s1   ;;  %s17327_s5 = sphi %s17504_s5, %s24619_s5   ;;  %s17323_s25 = sphi %s17502_s25, %s24618_s25   ;;  %s17319_s24 = sphi %s17500_s24, %s24617_s24   ;;  %s17315_s30 = sphi %s17498_s30, %s24615_s30   ;;  %s17311_s4 = sphi %s17496_s4, %s24614_s4  }
  0x2a   : > { %23805 = sst [smem:[#allocation37_spill]] %s17315_s30  ;;  %s610_s29 = sshll.u32 %s17353_s28, 4  ;;  %s17560_s29 = int_to_ptr.vmem [resolvable:$true] %s610_s29 }
  0x2b   : > { %23806 = sst [smem:[#allocation38_spill]] %s17319_s24  ;;  %s23182_s3 = sadd.s32 4294967295, %s17351_s7  }
  0x2c   : > { %23807 = sst [smem:[#allocation39_spill]] %s17335_s26  ;;  %p11267_p0 = scmp.ge.s32.totalorder %s17351_s7, 1 }
  0x2d   : > { %23808 = sst [smem:[#allocation40_spill]] %s17339_s2  ;;  %p17555_p1 = scmp.eq.s32.totalorder %s23182_s3, 0 }
  0x2e   : > { %p589_p2 = scmp.lt.s32.totalorder %s17351_s7, 17  ;;  %s17354_s22 = smov [#allocation12]  }
  0x2f   : > { %s23809_s0 = scalar_select %p17555_p1, 1, 0 }
  0x30   : > { %p17562_p3 = pnand %p11267_p0, %p589_p2  ;;  %s642_s28 = sshll.u32 %s17354_s22, 4  ;;  %s17574_s28 = int_to_ptr.vmem [resolvable:$true] %s642_s28 }
  0x31   : > { %23810 = sst [smem:[#allocation41_spill]] %s23809_s0  ;;  %s17355_s3 = smov [#allocation15]  }
  0x32   : > { %s23811_s23 = scalar_select %p17562_p3, 1, 0 }
  0x33   : > { %p16652_p4 = pneg %p17562_p3  ;;  %s674_s21 = sshll.u32 %s17355_s3, 4  ;;  %s17576_s21 = int_to_ptr.vmem [resolvable:$true] %s674_s21 }
  0x34   : > { %23812 = sst [smem:[#allocation42_spill]] %s23811_s23  ;;  %s23814_s11 = sld [smem:[#allocation150_spill]] }
  0x35   : > { %p17570_p5 = pnand %p16652_p4, %p17555_p1 }
  0x37   : > { %p17586_p7 = pneg %p17570_p5 }
  0x3a   : > { %s16850_s9 = scalar_lea.hbm %s23814_s11, 6144 }
  0x3b   : > { %p16851_p6 = scmp.ne.s32.totalorder %s23814_s11, %s16850_s9  ;;  %p16857_p10 = scmp.lt.u32.totalorder %s16850_s9, %s23814_s11 }
  0x3d   : > { %p16853_p8 = pnand %p17586_p7, %p16851_p6 }
  0x3f   : > { %p16854_p9 = pneg %p16853_p8 }
  0x41   : > { %p16859_p11 = pnand %p16857_p10, %p16854_p9 }
  0x43   : > { %16862 = shalt.err (!%p16859_p11)
}
  0x44   : > { %s16863_s13 = scalar_lea.vmem %s17560_s29, 6144  ;;  %p16871_p2 = scmp.lt.s32.totalorder %s17560_s29, %s17560_s29 }
  0x45   : > { %p16864_p12 = scmp.ne.s32.totalorder %s17560_s29, %s16863_s13  ;;  %p16872_p4 = scmp.lt.s32.totalorder %s16863_s13, %s16863_s13 }
  0x47   : > { %p16866_p13 = pnand %p16864_p12, %p17586_p7  ;;  %p16873_p6 = por %p16872_p4, %p16871_p2 }
  0x49   : > { %p16867_p0 = pneg %p16866_p13 }
  0x4b   : > { %p16874_p8 = pnand %p16873_p6, %p16867_p0 }
  0x4d   : > { %16877 = shalt.err (!%p16874_p8)
}
  0x4e   : > { %s23193_s15 = smov 128   ;;  %s23196_s9 = smov 8  }
  0x4f   : > { %16658 = dma.hbm_to_vmem [thread:$0]  (!%p17570_p5), %s23814_s11, 6144, %s17560_s29, [#allocation10], %s23193_s15, %s23193_s15, %s23196_s9  }
  0x50   : > { %s23816_s23 = sld [smem:[#allocation154_spill]] }
  0x56   : > { %s16878_s13 = scalar_lea.hbm %s23816_s23, 6144 }
  0x57   : > { %p16879_p9 = scmp.ne.s32.totalorder %s23816_s23, %s16878_s13  ;;  %p16885_p12 = scmp.lt.u32.totalorder %s16878_s13, %s23816_s23 }
  0x59   : > { %p16881_p10 = pnand %p16879_p9, %p17586_p7 }
  0x5b   : > { %p16882_p11 = pneg %p16881_p10 }
  0x5d   : > { %p16887_p13 = pnand %p16885_p12, %p16882_p11 }
  0x5f   : > { %16890 = shalt.err (!%p16887_p13)
}
  0x60   : > { %s16891_s29 = scalar_lea.vmem %s17574_s28, 6144  ;;  %p16899_p6 = scmp.lt.s32.totalorder %s17574_s28, %s17574_s28 }
  0x61   : > { %p16892_p0 = scmp.ne.s32.totalorder %s17574_s28, %s16891_s29  ;;  %p16900_p8 = scmp.lt.s32.totalorder %s16891_s29, %s16891_s29 }
  0x63   : > { %p16894_p2 = pnand %p16892_p0, %p17586_p7  ;;  %p16901_p9 = por %p16900_p8, %p16899_p6 }
  0x65   : > { %p16895_p4 = pneg %p16894_p2 }
  0x67   : > { %p16902_p10 = pnand %p16901_p9, %p16895_p4 }
  0x69   : > { %16905 = shalt.err (!%p16902_p10)
}
  0x6a   : > { %16664 = dma.hbm_to_vmem [thread:$0]  (!%p17570_p5), %s23816_s23, 6144, %s17574_s28, [#allocation13], %s23193_s15, %s23193_s15, %s23196_s9  }
  0x6b   : > { %s23817_s10 = sld [smem:[#allocation158_spill]] }
  0x71   : > { %s16906_s17 = scalar_lea.hbm %s23817_s10, 6144 }
  0x72   : > { %p16907_p11 = scmp.ne.s32.totalorder %s23817_s10, %s16906_s17  ;;  %p16913_p0 = scmp.lt.u32.totalorder %s16906_s17, %s23817_s10 }
  0x74   : > { %p16909_p12 = pnand %p16907_p11, %p17586_p7 }
  0x76   : > { %p16910_p13 = pneg %p16909_p12 }
  0x78   : > { %p16915_p2 = pnand %p16913_p0, %p16910_p13 }
  0x7a   : > { %16918 = shalt.err (!%p16915_p2)
}
  0x7b   : > { %s16919_s28 = scalar_lea.vmem %s17576_s21, 6144  ;;  %p16927_p9 = scmp.lt.s32.totalorder %s17576_s21, %s17576_s21 }
  0x7c   : > { %p16920_p4 = scmp.ne.s32.totalorder %s17576_s21, %s16919_s28  ;;  %p16928_p10 = scmp.lt.s32.totalorder %s16919_s28, %s16919_s28 }
  0x7e   : > { %p16922_p6 = pnand %p16920_p4, %p17586_p7  ;;  %p16929_p11 = por %p16928_p10, %p16927_p9 }
  0x80   : > { %p16923_p8 = pneg %p16922_p6 }
  0x82   : > { %p16930_p12 = pnand %p16929_p11, %p16923_p8 }
  0x84   : > { %16933 = shalt.err (!%p16930_p12)
}
  0x85   : > { %16670 = dma.hbm_to_vmem [thread:$0]  (!%p17570_p5), %s23817_s10, 6144, %s17576_s21, [#allocation16], %s23193_s15, %s23193_s15, %s23196_s9  }
  0x86   : > { %s17358_s30 = smov [#allocation18]   ;;  %s17359_s0 = smov [#allocation21]  }
  0x87   : > { %s706_s24 = sshll.u32 %s17358_s30, 4  ;;  %s738_s17 = sshll.u32 %s17359_s0, 4  ;;  %s707_s24 = int_to_ptr.vmem [resolvable:$true] %s706_s24  ;;  %s739_s17 = int_to_ptr.vmem [resolvable:$true] %s738_s17 }
  0x88   : > { %s23818_s14 = sld [smem:[#allocation162_spill]] }
  0x8e   : > { %s16934_s3 = scalar_lea.hbm %s23818_s14, 2048 }
  0x8f   : > { %p16935_p13 = scmp.ne.s32.totalorder %s23818_s14, %s16934_s3  ;;  %p16941_p4 = scmp.lt.u32.totalorder %s16934_s3, %s23818_s14 }
  0x91   : > { %p16937_p0 = pnand %p16935_p13, %p17586_p7 }
  0x93   : > { %p16938_p2 = pneg %p16937_p0 }
  0x95   : > { %p16943_p6 = pnand %p16941_p4, %p16938_p2 }
  0x97   : > { %16946 = shalt.err (!%p16943_p6)
}
  0x98   : > { %s16947_s21 = scalar_lea.vmem %s707_s24, 2048  ;;  %p16955_p11 = scmp.lt.s32.totalorder %s707_s24, %s707_s24 }
  0x99   : > { %p16948_p8 = scmp.ne.s32.totalorder %s707_s24, %s16947_s21  ;;  %p16956_p12 = scmp.lt.s32.totalorder %s16947_s21, %s16947_s21 }
  0x9b   : > { %p16950_p9 = pnand %p16948_p8, %p17586_p7  ;;  %p16957_p3 = por %p16956_p12, %p16955_p11 }
  0x9d   : > { %p16951_p10 = pneg %p16950_p9 }
  0x9f   : > { %p16958_p1 = pnand %p16957_p3, %p16951_p10 }
  0xa1   : > { %16961 = shalt.err (!%p16958_p1)
}
  0xa2   : > { %16676 = dma.hbm_to_vmem [thread:$0]  (!%p17570_p5), %s23818_s14, 2048, %s707_s24, [#allocation19], %s23193_s15, %s23193_s15, %s23196_s9  }
  0xa3   : > { %s23819_s18 = sld [smem:[#allocation166_spill]] }
  0xa9   : > { %s16962_s19 = scalar_lea.hbm %s23819_s18, 4096 }
  0xaa   : > { %p16963_p3 = scmp.ne.s32.totalorder %s23819_s18, %s16962_s19  ;;  %p16969_p0 = scmp.lt.u32.totalorder %s16962_s19, %s23819_s18 }
  0xac   : > { %p16965_p1 = pnand %p16963_p3, %p17586_p7 }
  0xae   : > { %p16966_p13 = pneg %p16965_p1 }
  0xb0   : > { %p16971_p2 = pnand %p16969_p0, %p16966_p13 }
  0xb2   : > { %16974 = shalt.err (!%p16971_p2)
}
  0xb3   : > { %s16975_s29 = scalar_lea.vmem %s739_s17, 4096  ;;  %p16983_p9 = scmp.lt.s32.totalorder %s739_s17, %s739_s17 }
  0xb4   : > { %p16976_p4 = scmp.ne.s32.totalorder %s739_s17, %s16975_s29  ;;  %p16984_p10 = scmp.lt.s32.totalorder %s16975_s29, %s16975_s29 }
  0xb6   : > { %p16978_p6 = pnand %p16976_p4, %p17586_p7  ;;  %p16985_p11 = por %p16984_p10, %p16983_p9 }
  0xb8   : > { %p16979_p8 = pneg %p16978_p6 }
  0xba   : > { %p16986_p12 = pnand %p16985_p11, %p16979_p8 }
  0xbc   : > { %16989 = shalt.err (!%p16986_p12)
}
  0xbd   : > { %16682 = dma.hbm_to_vmem [thread:$0]  (!%p17570_p5), %s23819_s18, 4096, %s739_s17, [#allocation22], %s23193_s15, %s23193_s15, %s23196_s9  }
  0xbe   : > { %s23820_s30 = sld [smem:[#allocation148_spill]] }
  0xc4   : > { %s23821_s0 = smov %s23820_s30  ;;  %s16990_s19 = scalar_lea.hbm %s23820_s30, 16 }
  0xc5   : > { %p16991_p3 = scmp.ne.s32.totalorder %s23821_s0, %s16990_s19  ;;  %p16997_p0 = scmp.lt.u32.totalorder %s16990_s19, %s23821_s0 }
  0xc7   : > { %p16993_p1 = pnand %p16991_p3, %p17586_p7 }
  0xc9   : > { %p16994_p13 = pneg %p16993_p1 }
  0xcb   : > { %p16999_p2 = pnand %p16997_p0, %p16994_p13 }
  0xcd   : > { %17002 = shalt.err (!%p16999_p2)
}
  0xce   : > { %s17360_s29 = smov [#allocation4]   ;;  %s17361_s21 = smov [#allocation11]  }
  0xcf   : > { %16655 = dma.hbm_to_smem (!%p17570_p5), %s23821_s0, 16, %s17360_s29, [#allocation7]  }
  0xd0   : > { %s626_s11 = sshll.u32 %s17361_s21, 4  ;;  %s17362_s4 = smov [#allocation14]   ;;  %s627_s11 = int_to_ptr.vmem [resolvable:$true] %s626_s11 }
  0xd1   : > { %s658_s30 = sshll.u32 %s17362_s4, 4  ;;  %s23822_s19 = sld [smem:[#allocation152_spill]]  ;;  %s17720_s30 = int_to_ptr.vmem [resolvable:$true] %s658_s30 }
  0xd7   : > { %s17003_s13 = scalar_lea.hbm %s23822_s19, 2048 }
  0xd8   : > { %p17004_p4 = scmp.ne.s32.totalorder %s23822_s19, %s17003_s13  ;;  %p17010_p9 = scmp.lt.u32.totalorder %s17003_s13, %s23822_s19 }
  0xda   : > { %p17006_p6 = pnand %p17004_p4, %p17586_p7 }
  0xdc   : > { %p17007_p8 = pneg %p17006_p6 }
  0xde   : > { %p17012_p10 = pnand %p17010_p9, %p17007_p8 }
  0xe0   : > { %17015 = shalt.err (!%p17012_p10)
}
  0xe1   : > { %s17016_s24 = scalar_lea.vmem %s627_s11, 2048  ;;  %p17024_p1 = scmp.lt.s32.totalorder %s627_s11, %s627_s11 }
  0xe2   : > { %p17017_p11 = scmp.ne.s32.totalorder %s627_s11, %s17016_s24  ;;  %p17025_p13 = scmp.lt.s32.totalorder %s17016_s24, %s17016_s24 }
  0xe4   : > { %p17019_p12 = pnand %p17017_p11, %p17586_p7  ;;  %p17026_p0 = por %p17025_p13, %p17024_p1 }
  0xe6   : > { %p17020_p3 = pneg %p17019_p12 }
  0xe8   : > { %p17027_p2 = pnand %p17026_p0, %p17020_p3 }
  0xea   : > { %17030 = shalt.err (!%p17027_p2)
}
  0xeb   : > { %s23823_s15 = smov 128   ;;  %s23824_s8 = sld [smem:[#allocation156_spill]] }
  0xec   : > { %16661 = dma.hbm_to_vmem [thread:$0]  (!%p17570_p5), %s23822_s19, 2048, %s627_s11, [#allocation10], %s23823_s15, %s23823_s15, %s23196_s9  }
  0xf1   : > { %s17031_s13 = scalar_lea.hbm %s23824_s8, 2048 }
  0xf2   : > { %p17032_p4 = scmp.ne.s32.totalorder %s23824_s8, %s17031_s13  ;;  %p17038_p9 = scmp.lt.u32.totalorder %s17031_s13, %s23824_s8 }
  0xf4   : > { %p17034_p6 = pnand %p17032_p4, %p17586_p7 }
  0xf6   : > { %p17035_p8 = pneg %p17034_p6 }
  0xf8   : > { %p17040_p10 = pnand %p17038_p9, %p17035_p8 }
  0xfa   : > { %17043 = shalt.err (!%p17040_p10)
}
  0xfb   : > { %s17044_s11 = scalar_lea.vmem %s17720_s30, 2048  ;;  %p17052_p1 = scmp.lt.s32.totalorder %s17720_s30, %s17720_s30 }
  0xfc   : > { %p17045_p11 = scmp.ne.s32.totalorder %s17720_s30, %s17044_s11  ;;  %p17053_p13 = scmp.lt.s32.totalorder %s17044_s11, %s17044_s11 }
  0xfe   : > { %p17047_p12 = pnand %p17045_p11, %p17586_p7  ;;  %p17054_p0 = por %p17053_p13, %p17052_p1 }
 0x100   : > { %p17048_p3 = pneg %p17047_p12 }
 0x102   : > { %p17055_p2 = pnand %p17054_p0, %p17048_p3 }
 0x104   : > { %17058 = shalt.err (!%p17055_p2)
}
 0x105   : > { %16667 = dma.hbm_to_vmem [thread:$0]  (!%p17570_p5), %s23824_s8, 2048, %s17720_s30, [#allocation13], %s23823_s15, %s23823_s15, %s23196_s9  }
 0x106   : > { %s17363_s26 = smov [#allocation17]   ;;  %s23825_s12 = sld [smem:[#allocation160_spill]] }
 0x107   : > { %s690_s3 = sshll.u32 %s17363_s26, 4  ;;  %s691_s3 = int_to_ptr.vmem [resolvable:$true] %s690_s3 }
 0x10c   : > { %s17059_s17 = scalar_lea.hbm %s23825_s12, 4096 }
 0x10d   : > { %p17060_p4 = scmp.ne.s32.totalorder %s23825_s12, %s17059_s17  ;;  %p17066_p9 = scmp.lt.u32.totalorder %s17059_s17, %s23825_s12 }
 0x10f   : > { %p17062_p6 = pnand %p17060_p4, %p17586_p7 }
 0x111   : > { %p17063_p8 = pneg %p17062_p6 }
 0x113   : > { %p17068_p10 = pnand %p17066_p9, %p17063_p8 }
 0x115   : > { %17071 = shalt.err (!%p17068_p10)
}
 0x116   : > { %s17072_s30 = scalar_lea.vmem %s691_s3, 4096  ;;  %p17080_p1 = scmp.lt.s32.totalorder %s691_s3, %s691_s3 }
 0x117   : > { %p17073_p11 = scmp.ne.s32.totalorder %s691_s3, %s17072_s30  ;;  %p17081_p13 = scmp.lt.s32.totalorder %s17072_s30, %s17072_s30 }
 0x119   : > { %p17075_p12 = pnand %p17073_p11, %p17586_p7  ;;  %p17082_p0 = por %p17081_p13, %p17080_p1 }
 0x11b   : > { %p17076_p3 = pneg %p17075_p12 }
 0x11d   : > { %p17083_p2 = pnand %p17082_p0, %p17076_p3 }
 0x11f   : > { %17086 = shalt.err (!%p17083_p2)
}
 0x120   : > { %s17364_s21 = smov 256   ;;  %s17365_s4 = smov 16  }
 0x121   : > { %16673 = dma.hbm_to_vmem [thread:$0]  (!%p17570_p5), %s23825_s12, 4096, %s691_s3, [#allocation16], %s17364_s21, %s17364_s21, %s17365_s4  }
 0x122   : > { %s17366_s13 = smov [#allocation20]   ;;  %s17367_s17 = smov [#allocation23]  }
 0x123   : > { %s722_s28 = sshll.u32 %s17366_s13, 4  ;;  %s754_s29 = sshll.u32 %s17367_s17, 4  ;;  %s723_s28 = int_to_ptr.vmem [resolvable:$true] %s722_s28  ;;  %s755_s29 = int_to_ptr.vmem [resolvable:$true] %s754_s29 }
 0x124   : > { %s23826_s16 = sld [smem:[#allocation164_spill]] }
 0x12a   : > { %s17087_s30 = scalar_lea.hbm %s23826_s16, 2048 }
 0x12b   : > { %p17088_p4 = scmp.ne.s32.totalorder %s23826_s16, %s17087_s30  ;;  %p17094_p9 = scmp.lt.u32.totalorder %s17087_s30, %s23826_s16 }
 0x12d   : > { %p17090_p6 = pnand %p17088_p4, %p17586_p7 }
 0x12f   : > { %p17091_p8 = pneg %p17090_p6 }
 0x131   : > { %p17096_p10 = pnand %p17094_p9, %p17091_p8 }
 0x133   : > { %17099 = shalt.err (!%p17096_p10)
}
 0x134   : > { %s17100_s3 = scalar_lea.vmem %s723_s28, 2048  ;;  %p17108_p1 = scmp.lt.s32.totalorder %s723_s28, %s723_s28 }
 0x135   : > { %p17101_p11 = scmp.ne.s32.totalorder %s723_s28, %s17100_s3  ;;  %p17109_p13 = scmp.lt.s32.totalorder %s17100_s3, %s17100_s3 }
 0x137   : > { %p17103_p12 = pnand %p17101_p11, %p17586_p7  ;;  %p17110_p0 = por %p17109_p13, %p17108_p1 }
 0x139   : > { %p17104_p3 = pneg %p17103_p12 }
 0x13b   : > { %p17111_p2 = pnand %p17110_p0, %p17104_p3 }
 0x13d   : > { %17114 = shalt.err (!%p17111_p2)
}
 0x13e   : > { %s23827_s8 = smov 8   ;;  %s17115_s26 = scalar_lea.hbm %s23170_s20, 4096 }
 0x13f   : > { %16679 = dma.hbm_to_vmem [thread:$0]  (!%p17570_p5), %s23826_s16, 2048, %s723_s28, [#allocation19], %s23823_s15, %s23823_s15, %s23827_s8  }
 0x140   : > { %p17116_p4 = scmp.ne.s32.totalorder %s23170_s20, %s17115_s26  ;;  %p17122_p9 = scmp.lt.u32.totalorder %s17115_s26, %s23170_s20 }
 0x142   : > { %p17118_p6 = pnand %p17116_p4, %p17586_p7 }
 0x144   : > { %p17119_p8 = pneg %p17118_p6 }
 0x146   : > { %p17124_p10 = pnand %p17122_p9, %p17119_p8 }
 0x148   : > { %17127 = shalt.err (!%p17124_p10)
}
 0x149   : > { %s17128_s30 = scalar_lea.vmem %s755_s29, 4096  ;;  %p17136_p1 = scmp.lt.s32.totalorder %s755_s29, %s755_s29 }
 0x14a   : > { %p17129_p11 = scmp.ne.s32.totalorder %s755_s29, %s17128_s30  ;;  %p17137_p13 = scmp.lt.s32.totalorder %s17128_s30, %s17128_s30 }
 0x14c   : > { %p17131_p12 = pnand %p17129_p11, %p17586_p7  ;;  %p17138_p0 = por %p17137_p13, %p17136_p1 }
 0x14e   : > { %p17132_p3 = pneg %p17131_p12 }
 0x150   : > { %p17139_p2 = pnand %p17138_p0, %p17132_p3 }
 0x152   : > { %17142 = shalt.err (!%p17139_p2)
}
 0x153   : > { %16685 = dma.hbm_to_vmem [thread:$0]  (!%p17570_p5), %s23170_s20, 4096, %s755_s29, [#allocation22], %s17364_s21, %s17364_s21, %s17365_s4  }
 0x154   : > { %s11266_s22 = sadd.s32 4294967294, %s17351_s7   ;;  %s23828_s2 = sld [smem:[#allocation41_spill]] }
 0x155   : > { %s58_s3 = sadd.s32 1, %s17343_s6  ;;  %s23829_s8 = sld [smem:[#allocation38_spill]] }
 0x156   : > { %s61_s10 = sadd.s32 1, %s17347_s27  ;;  %p59_p7 = scmp.ge.s32.totalorder %s58_s3, 8 }
 0x157   : > { %s23830_s14 = sld [smem:[#allocation37_spill]]  ;;  %s86_s9 = ssub.s32 7, %s17343_s6 }
 0x158   : > { %s93_s0 = sadd.s32 1, %s17331_s1  ;;  %p100_p4 = scmp.ne.s32.totalorder %s17331_s1, %s17327_s5 }
 0x159   : > { %s24626_s3 = smov (%p59_p7, %s58_s3), 0  ;;  %s24628_s10 = smov (!%p59_p7, %s61_s10), %s17347_s27 }
 0x15a   : > { %s87_s26 = ssub.s32 7, %s24626_s3  ;;  %p101_p5 = scmp.eq.s32.totalorder %s17351_s7, 0 }
 0x15b   : > { %p63_p6 = scmp.ge.s32.totalorder %s24628_s10, 2  ;;  %s23831_s21 = sld [smem:[#allocation36_spill]] }
 0x15c   : > { %s88_s4 = ssub.s32 %s86_s9, %s87_s26  ;;  %p17844_p8 = por %p101_p5, %p100_p4 }
 0x15d   : > { %p106_p9 = scmp.ne.s32.totalorder %s17327_s5, %s17323_s25  ;;  %s24630_s10 = smov (%p63_p6, %s24628_s10), 0 }
 0x15e   : > { %p23833_p10 = scmp.ne.s32.totalorder %s23828_s2, 0  ;;  %s539_s17 = sadd.s32 1, %s23829_s8 }
 0x15f   : > { %s89_s24 = ssub.s32 %s17347_s27, %s24630_s10  ;;  %p549_p12 = scmp.ne.s32.totalorder %s23829_s8, %s23830_s14 }
 0x160   : > { %p17854_p11 = por %p23833_p10, %p106_p9  ;;  %s90_s11 = sor.u32 %s89_s24, %s88_s4 }
 0x161   : > { %p537_p3 = scmp.eq.s32.totalorder %s89_s24, 0  ;;  %p91_p1 = scmp.eq.s32.totalorder %s90_s11, 0 }
 0x162   : > { %s23835_s30 = sadd.s32 4294967295, %s17351_s7   ;;  %p555_p2 = scmp.ne.s32.totalorder %s23830_s14, %s23831_s21 }
 0x163   : > { %p550_p13 = scmp.eq.s32.totalorder %s23835_s30, 15  ;;  %s24632_s8 = smov (!%p537_p3, %s23829_s8), %s539_s17 }
 0x164   : > { %s17869_s25 = scalar_select %p91_p1, %s17331_s1, %s93_s0  }
 0x165   : > { %p17871_p0 = por %p550_p13, %p549_p12  ;;  %p556_p7 = scmp.eq.s32.totalorder %s11266_s22, 15 }
 0x166   : > { %p16708_p4 = scmp.lt.s32.totalorder %s17351_s7, 16  ;;  %s771_s28 = sand.u32 1, %s17331_s1  }
 0x167   : > { %s23836_s15 = scalar_select %p17871_p0, 1, 0 }
 0x168   : > { %s11281_s2 = sshll.u32 %s86_s9, 1  ;;  %p17879_p5 = por %p556_p7, %p555_p2 }
 0x169   : > { %s11280_s4 = sshll.u32 %s771_s28, 3  ;;  %s781_s24 = sadd.s32 %s17347_s27, %s11281_s2 }
 0x16a   : > { %s23837_s26 = scalar_select %p17879_p5, 1, 0 }
 0x16b   : > { %s11282_s17 = sshll.u32 %s781_s24, 7  ;;  %s23838_s0 = sld [smem:[#allocation149_spill]] }
 0x16c   : > { %s775_s22 = scalar_lea.vmem [#allocation8], %s11280_s4  ;;  %p17893_p6 = pnand %p16708_p4, %p17844_p8 }
 0x16d   : > { %s785_s14 = sshll.u32 %s775_s22, 4  ;;  %s772_s21 = scalar_lea.sflag [#allocation5], %s771_s28  ;;  %s17889_s14 = int_to_ptr.vmem [resolvable:$true] %s785_s14 }
 0x16e   : > { %p17145_p10 = pneg %p17893_p6 }
 0x171   : > { %s17887_s12 = scalar_lea.hbm %s23838_s0, %s11282_s17  ;;  %s17148_s17 = scalar_lea.hbm %s23838_s0, 2048 }
 0x172   : > { %s17143_s2 = scalar_lea.hbm %s17887_s12, 128  ;;  %p17149_p8 = scmp.lt.u32.totalorder %s17887_s12, %s23838_s0 }
 0x173   : > { %p17144_p9 = scmp.ne.s32.totalorder %s17887_s12, %s17143_s2  ;;  %p17150_p1 = scmp.lt.u32.totalorder %s17148_s17, %s17143_s2 }
 0x174   : > { %p17152_p2 = scmp.lt.u32.totalorder %s17143_s2, %s17887_s12 }
 0x175   : > { %p17146_p12 = pnand %p17145_p10, %p17144_p9  ;;  %p17151_p13 = por %p17150_p1, %p17149_p8 }
 0x177   : > { %p17147_p3 = pneg %p17146_p12  ;;  %p17153_p7 = por %p17152_p2, %p17151_p13 }
 0x179   : > { %p17154_p4 = pnand %p17153_p7, %p17147_p3 }
 0x17b   : > { %17157 = shalt.err (!%p17154_p4)
}
 0x17c   : > { %s17158_s28 = scalar_lea.vmem %s17889_s14, 128  ;;  %s17368_s30 = smov [#allocation8]  }
 0x17d   : > { %p17159_p9 = scmp.ne.s32.totalorder %s17889_s14, %s17158_s28  ;;  %s17163_s22 = sshll.u32 %s17368_s30, 4  ;;  %s17164_s22 = int_to_ptr.vmem [resolvable:$false] %s17163_s22 }
 0x17e   : > { %s17165_s4 = scalar_lea.vmem %s17164_s22, 256  ;;  %p17166_p0 = scmp.lt.s32.totalorder %s17889_s14, %s17164_s22 }
 0x17f   : > { %p17161_p12 = pnand %p17159_p9, %p17145_p10  ;;  %p17167_p8 = scmp.lt.s32.totalorder %s17165_s4, %s17158_s28 }
 0x181   : > { %p17162_p5 = pneg %p17161_p12  ;;  %p17168_p1 = por %p17167_p8, %p17166_p0 }
 0x183   : > { %p17169_p13 = pnand %p17168_p1, %p17162_p5 }
 0x185   : > { %17172 = shalt.err (!%p17169_p13)
}
 0x186   : > { %16689 = dma.hbm_to_vmem [thread:$0]  (!%p17893_p6), %s17887_s12, 128, %s17889_s14, %s772_s21  }
 0x187   : > { %s23840_s2 = sld [smem:[#allocation42_spill]] }
 0x18d   : > { %p23841_p3 = scmp.ne.s32.totalorder %s23840_s2, 0 }
 0x18f   : > { %794 = sbr.rel (%p23841_p3) target bundleno = 4409 (0x1139), region = 108 }
 0x196   : > { %s23842_s24 = sld [smem:[#allocation41_spill]] }
 0x19c   : > { %p23843_p10 = scmp.ne.s32.totalorder %s23842_s24, 0 }
 0x19e   : > { %17274 = dma.done.wait (%p23843_p10), [#allocation7], 16  }
 0x19f   : > { %17276 = vsyncadd (%p23843_p10), [#allocation7], 4294967280  ;;  %s800_s17 = sand.u32 1, %s17327_s5  }
 0x1a0   : > { %s17929_s29 = sshll.u32 %s800_s17, 3  ;;  %s801_s11 = scalar_lea.sflag [#allocation5], %s800_s17 }
 0x1a1   : > { %s804_s9 = scalar_lea.vmem [#allocation8], %s17929_s29 }
 0x1a2   : > { %17278 = dma.done.wait (%p17854_p11), %s801_s11, 128  }
 0x1a3   : > { %17280 = vsyncadd (%p17854_p11), %s801_s11, 4294967168 }
 0x1a4   : > { %17282 = dma.done.wait (%p23843_p10), [#allocation10], 8192  }
 0x1a5   : > { %17284 = vsyncadd (%p23843_p10), [#allocation10], 4294959104 }
 0x1a6   : > { %17286 = dma.done.wait (%p23843_p10), [#allocation13], 8192  }
 0x1a7   : > { %17288 = vsyncadd (%p23843_p10), [#allocation13], 4294959104 }
 0x1a8   : > { %17290 = dma.done.wait (%p23843_p10), [#allocation16], 10240  }
 0x1a9   : > { %17292 = vsyncadd (%p23843_p10), [#allocation16], 4294957056 }
 0x1aa   : > { %17294 = dma.done.wait (%p23843_p10), [#allocation19], 4096  }
 0x1ab   : > { %17296 = vsyncadd (%p23843_p10), [#allocation19], 4294963200 }
 0x1ac   : > { %17298 = dma.done.wait (%p23843_p10), [#allocation22], 8192  }
 0x1ad   : > { %17300 = vsyncadd (%p23843_p10), [#allocation22], 4294959104 }
 0x1ae   : > { %849 = sfence }
 0x1af   : > { %s23844_s12 = sld [smem:[#allocation37_spill]]  ;;  %s23845_s30 = sld [smem:[#allocation39_spill]] }
 0x1b5   : > { %s17957_s13 = sand.u32 1, %s23844_s12   ;;  %p11298_p11 = scmp.ne.s32.totalorder %s23845_s30, 0 }
 0x1b6   : > { %s11296_s14 = sshll.u32 %s17957_s13, 3  ;;  %v17369_v0 = vmov (!%p11298_p11), 0.0  }
 0x1b7   : > { %s17960_s21 = scalar_lea.vmem [#allocation24], %s11296_s14  ;;  %s17962_s28 = scalar_lea.vmem [#allocation25], %s11296_s14  ;;  %918 = vst [vmem:[#allocation2] sm:$0xff] (!%p11298_p11), %v17369_v0  ;;  %919 = vst [vmem:[#allocation3] sm:$0xff] (!%p11298_p11), %v17369_v0 }
 0x1b8   : > { %917 = sbr.rel (%p11298_p11) target bundleno = 447 (0x1bf), region = 160 }
 0x1bf PF: > { %v924_v1 = vld [vmem:[#allocation18] sm:$0xff]  ;;  %v925_v2 = vld [vmem:[#allocation18 + $0x8] sm:$0xff]  ;;  %v926_v3 = vld [vmem:[#allocation18 + $0x10] sm:$0xff]  ;;  %v23222_v4 = vmov 0.0|0.0   ;;  %vm17371_vm0 = vmmov 0   ;;  %v23216_v9 = vmov 0.0  }
 0x1c0   : > { %14341 = vmatprep.subr.bf16.mxu0 %v23222_v4  ;;  %v948_v5 = vand.u32 4294901760, %v924_v1  ;;  %v951_v6 = vand.u32 4294901760, %v925_v2  ;;  %v927_v7 = vld [vmem:[#allocation18 + $0x18] sm:$0xff]  ;;  %v954_v8 = vand.u32 4294901760, %v926_v3  ;;  %12903 = vmatprep.mubr.msk.f32.mxu0 %vm17371_vm0, %v23216_v9  ;;  %v928_v11 = vld [vmem:[#allocation18 + $0x20] sm:$0xff]  ;;  %v929_v12 = vld [vmem:[#allocation18 + $0x28] sm:$0xff] }
 0x1c1   : > { %v957_v10 = vand.u32 4294901760, %v927_v7  ;;  %14485 = vmatprep.subr.bf16.mxu1 %v23222_v4  ;;  %13113 = vmatprep.mubr.msk.f32.mxu1 %vm17371_vm0, %v23216_v9  ;;  %v960_v15 = vand.u32 4294901760, %v928_v11  ;;  %v963_v16 = vand.u32 4294901760, %v929_v12  ;;  %v930_v17 = vld [vmem:[#allocation18 + $0x30] sm:$0xff]  ;;  %v931_v18 = vld [vmem:[#allocation18 + $0x38] sm:$0xff]  ;;  %v932_v22 = vld [vmem:[#allocation18 + $0x40] sm:$0xff] }
 0x1c2   : > { %v17971_v13 = vpack.c.bf16 %v951_v6, %v948_v5  ;;  %v966_v20 = vand.u32 4294901760, %v930_v17  ;;  %v969_v21 = vand.u32 4294901760, %v931_v18  ;;  %v933_v23 = vld [vmem:[#allocation18 + $0x48] sm:$0xff]  ;;  %v922_v24 = vld [vmem:[#allocation2] sm:$0xff]  ;;  %v17981_v25 = vsub.f32 %v924_v1, %v948_v5  ;;  %v934_v30 = vld [vmem:[#allocation18 + $0x50] sm:$0xff]  ;;  %s23846_s2 = sld [smem:[#allocation163_spill]] }
 0x1c3   : > { %v17974_v14 = vpack.c.bf16 %v957_v10, %v954_v8  ;;  %v17978_v19 = vpack.c.bf16 %v963_v16, %v960_v15  ;;  %v17983_v26 = vsub.f32 %v925_v2, %v951_v6  ;;  %v972_v28 = vand.u32 4294901760, %v932_v22  ;;  %v935_v31 = vld [vmem:[#allocation18 + $0x58] sm:$0xff]  ;;  %v936_v33 = vld [vmem:[#allocation18 + $0x60] sm:$0xff]  ;;  %v937_v36 = vld [vmem:[#allocation18 + $0x68] sm:$0xff]  ;;  %s23891_s24 = sld [smem:[#allocation39_spill]]  ;;  %s23950_s30 = sld [smem:[#allocation151_spill]] }
 0x1c4   : > { %14343 = vmatpush3.bf16.msra.mxu0 %v17971_v13  ;;  %v17986_v27 = vpack.c.bf16 %v969_v21, %v966_v20  ;;  %v975_v29 = vand.u32 4294901760, %v933_v23  ;;  %v17989_v32 = vand.u32 4294901760, %v922_v24  ;;  %v17991_v34 = vsub.f32 %v926_v3, %v954_v8  ;;  %v938_v37 = vld [vmem:[#allocation18 + $0x70] sm:$0xff]  ;;  %v939_v38 = vld [vmem:[#allocation18 + $0x78] sm:$0xff]  ;;  %s24270_s11 = sld [smem:[#allocation157_spill]]  ;;  %s24332_s14 = sld [smem:[#allocation159_spill]] }
 0x1c5   : > { %14344 = vmatprep.subr.bf16.mxu0 %v23222_v4  ;;  %v978_v35 = vand.u32 4294901760, %v934_v30  ;;  %v981_v40 = vand.u32 4294901760, %v935_v31  ;;  %v1041_v41 = vand.u32 4294901760, %v17981_v25  ;;  %v1048_v42 = vand.u32 4294901760, %v17983_v26  ;;  %s24416_s4 = sld [smem:[#allocation153_spill]] }
 0x1c6   : > { %v17994_v39 = vpack.c.bf16 %v975_v29, %v972_v28  ;;  %v17998_v43 = vsub.f32 %v927_v7, %v957_v10  ;;  %v18000_v44 = vsub.f32 %v928_v11, %v960_v15  ;;  %v18002_v45 = vsub.f32 %v929_v12, %v963_v16  ;;  %s24420_s29 = sld [smem:[#allocation161_spill]] }
 0x1c7   : > { %v18006_v46 = vsub.f32 %v922_v24, %v17989_v32  ;;  %v984_v47 = vand.u32 4294901760, %v936_v33  ;;  %v987_v48 = vand.u32 4294901760, %v937_v36  ;;  %v990_v49 = vand.u32 4294901760, %v938_v37 }
 0x1c8   : > { %14346 = vmatpush3.bf16.msra.mxu0 %v17974_v14  ;;  %v993_v50 = vand.u32 4294901760, %v939_v38  ;;  %v18008_v51 = vsub.f32 %v930_v17, %v966_v20  ;;  %v18010_v52 = vsub.f32 %v931_v18, %v969_v21  ;;  %v18012_v53 = vsub.f32 %v932_v22, %v972_v28 }
 0x1c9   : > { %14347 = vmatprep.subr.bf16.mxu0 %v23222_v4  ;;  %v1055_v54 = vand.u32 4294901760, %v17991_v34  ;;  %v18016_v55 = vsub.f32 %v933_v23, %v975_v29  ;;  %v18018_v56 = vpack.c.bf16 %v981_v40, %v978_v35  ;;  %v1042_v57 = vsub.f32 %v17981_v25, %v1041_v41  ;;  %s921_s17 = sld [smem:[#allocation4 + %s23891_s24]]  ;;  %p11309_p0 = scmp.ne.s32.totalorder %s23891_s24, 7 }
 0x1ca   : > { %v1049_v58 = vsub.f32 %v17983_v26, %v1048_v42  ;;  %v18023_v59 = vsub.f32 %v934_v30, %v978_v35  ;;  %v18025_v60 = vsub.f32 %v935_v31, %v981_v40  ;;  %v18027_v61 = vsub.f32 %v936_v33, %v984_v47 }
 0x1cb   : > { %v1030_v62 = vand.u32 4294901760, %v18006_v46  ;;  %v18030_v63 = vpack.c.bf16 %v987_v48, %v984_v47  ;;  %v18032_v0 = vsub.f32 %v937_v36, %v987_v48  ;;  %v18034_v1 = vpack.c.bf16 %v993_v50, %v990_v49 }
 0x1cc   : > { %14349 = vmatpush3.bf16.msra.mxu0 %v17978_v19  ;;  %v18036_v2 = vsub.f32 %v938_v37, %v990_v49  ;;  %v18038_v3 = vsub.f32 %v939_v38, %v993_v50  ;;  %v1056_v5 = vsub.f32 %v17991_v34, %v1055_v54  ;;  %v1062_v6 = vand.u32 4294901760, %v17998_v43 }
 0x1cd   : > { %14350 = vmatprep.subr.bf16.mxu0 %v23222_v4  ;;  %v1069_v7 = vand.u32 4294901760, %v18000_v44  ;;  %v1043_v8 = vand.u32 4294901760, %v1042_v57  ;;  %v1050_v10 = vand.u32 4294901760, %v1049_v58  ;;  %v1076_v11 = vand.u32 4294901760, %v18002_v45 }
 0x1ce   : > { %v1083_v12 = vand.u32 4294901760, %v18008_v51  ;;  %v1031_v15 = vsub.f32 %v18006_v46, %v1030_v62  ;;  %v1090_v16 = vand.u32 4294901760, %v18010_v52  ;;  %v1097_v17 = vand.u32 4294901760, %v18012_v53 }
 0x1cf   : > { %v1104_v18 = vand.u32 4294901760, %v18016_v55  ;;  %v1111_v20 = vand.u32 4294901760, %v18023_v59  ;;  %v1118_v21 = vand.u32 4294901760, %v18025_v60  ;;  %v1125_v22 = vand.u32 4294901760, %v18027_v61 }
 0x1d0   : > { %14352 = vmatpush3.bf16.msra.mxu0 %v17986_v27  ;;  %v1132_v23 = vand.u32 4294901760, %v18032_v0  ;;  %v1139_v24 = vand.u32 4294901760, %v18036_v2  ;;  %v1146_v28 = vand.u32 4294901760, %v18038_v3  ;;  %v18059_v29 = vpack.c.bf16 %v1048_v42, %v1041_v41 }
 0x1d1   : > { %14353 = vmatprep.subr.bf16.mxu0 %v23222_v4  ;;  %v18061_v30 = vpack.c.bf16 %v1062_v6, %v1055_v54  ;;  %v1063_v31 = vsub.f32 %v17998_v43, %v1062_v6  ;;  %v18065_v33 = vpack.c.bf16 %v1076_v11, %v1069_v7  ;;  %v18067_v35 = vpack.c.bf16 %v1090_v16, %v1083_v12 }
 0x1d2   : > { %v18069_v36 = vpack.c.bf16 %v1104_v18, %v1097_v17  ;;  %v18072_v37 = vpack.c.bf16 %v1118_v21, %v1111_v20  ;;  %v18074_v38 = vpack.c.bf16 %v1132_v23, %v1125_v22  ;;  %v18076_v40 = vpack.c.bf16 %v1146_v28, %v1139_v24 }
 0x1d3   : > { %v1032_v41 = vand.u32 4294901760, %v1031_v15  ;;  %v1057_v42 = vand.u32 4294901760, %v1056_v5  ;;  %v14366_v47 = vpack.c.bf16 %v1050_v10, %v1043_v8  ;;  %v1064_v48 = vand.u32 4294901760, %v1063_v31 }
 0x1d4   : > { %14355 = vmatpush3.bf16.msra.mxu0 %v17994_v39  ;;  %v1070_v49 = vsub.f32 %v18000_v44, %v1069_v7  ;;  %v1077_v50 = vsub.f32 %v18002_v45, %v1076_v11  ;;  %v1084_v54 = vsub.f32 %v18008_v51, %v1083_v12  ;;  %v1091_v15 = vsub.f32 %v18010_v52, %v1090_v16 }
 0x1d5   : > { %14356 = vmatprep.subr.bf16.mxu0 %v23222_v4  ;;  %v14369_v57 = vpack.c.bf16 %v1064_v48, %v1057_v42  ;;  %v1098_v5 = vsub.f32 %v18012_v53, %v1097_v17  ;;  %v1105_v11 = vsub.f32 %v18016_v55, %v1104_v18  ;;  %v1112_v16 = vsub.f32 %v18023_v59, %v1111_v20 }
 0x1d6   : > { %v1071_v58 = vand.u32 4294901760, %v1070_v49  ;;  %v1078_v6 = vand.u32 4294901760, %v1077_v50  ;;  %v1085_v8 = vand.u32 4294901760, %v1084_v54  ;;  %v1092_v10 = vand.u32 4294901760, %v1091_v15 }
 0x1d7   : > { %v1099_v12 = vand.u32 4294901760, %v1098_v5  ;;  %v1119_v42 = vsub.f32 %v18025_v60, %v1118_v21  ;;  %v1126_v17 = vsub.f32 %v18027_v61, %v1125_v22  ;;  %v1113_v48 = vand.u32 4294901760, %v1112_v16  ;;  %v1591_v5 = vld [vmem:[#allocation20 + $0x10] sm:$0xff] }
 0x1d8   : > { %14358 = vmatpush3.bf16.msra.mxu0 %v18018_v56  ;;  %v14372_v7 = vpack.c.bf16 %v1078_v6, %v1071_v58  ;;  %v14375_v31 = vpack.c.bf16 %v1092_v10, %v1085_v8  ;;  %v1133_v18 = vsub.f32 %v18032_v0, %v1132_v23  ;;  %v1140_v20 = vsub.f32 %v18036_v2, %v1139_v24  ;;  %v1589_v24 = vld [vmem:[#allocation20] sm:$0xff] }
 0x1d9   : > { %14359 = vmatprep.subr.bf16.mxu0 %v23222_v4  ;;  %v1120_v49 = vand.u32 4294901760, %v1119_v42  ;;  %v1127_v50 = vand.u32 4294901760, %v1126_v17  ;;  %v1147_v21 = vsub.f32 %v18038_v3, %v1146_v28  ;;  %v14390_v15 = vpack.c.bf16 %v17983_v26, %v17981_v25  ;;  %v1590_v28 = vld [vmem:[#allocation20 + $0x8] sm:$0xff] }
 0x1da   : > { %v1141_v58 = vand.u32 4294901760, %v1140_v20  ;;  %v1613_v8 = vand.u32 4294901760, %v1589_v24  ;;  %v1616_v10 = vand.u32 4294901760, %v1590_v28  ;;  %v14399_v17 = vpack.c.bf16 %v18010_v52, %v18008_v51 }
 0x1db   : > { %v14381_v54 = vpack.c.bf16 %v1120_v49, %v1113_v48  ;;  %v1148_v6 = vand.u32 4294901760, %v1147_v21  ;;  %v14408_v51 = vpack.c.bf16 %v18032_v0, %v18027_v61  ;;  %v14411_v52 = vpack.c.bf16 %v18038_v3, %v18036_v2  ;;  %v1598_v61 = vld [vmem:[#allocation20 + $0x48] sm:$0xff]  ;;  %v1599_v0 = vld [vmem:[#allocation20 + $0x50] sm:$0xff]  ;;  %v1604_v49 = vld [vmem:[#allocation20 + $0x78] sm:$0xff] }
 0x1dc   : > { %14361 = vmatpush3.bf16.msra.mxu0 %v18030_v63  ;;  %v18110_v26 = vpack.c.bf16 %v1616_v10, %v1613_v8  ;;  %v1643_v2 = vand.u32 4294901760, %v1599_v0  ;;  %v1603_v48 = vld [vmem:[#allocation20 + $0x70] sm:$0xff] }
 0x1dd   : > { %14362 = vmatprep.subr.bf16.mxu0 %v23222_v4  ;;  %v14387_v23 = vpack.c.bf16 %v1148_v6, %v1141_v58  ;;  %v1655_v58 = vand.u32 4294901760, %v1603_v48  ;;  %v1658_v6 = vand.u32 4294901760, %v1604_v49 }
 0x1de   : > { %14487 = vmatpush3.bf16.msra.mxu1 %v18110_v26 }
 0x1df   : > { %14488 = vmatprep.subr.bf16.mxu1 %v23222_v4 }
 0x1e0   : > { %14364 = vmatpush3.bf16.msra.mxu0 %v18034_v1 }
 0x1e1   : > { %14365 = vmatprep.subr.bf16.mxu0 %v23222_v4 }
 0x1e3   : > { %12904 = vmatmul.mubr.f32.vlgmr.msra.gmra.mrb[0].mxu0 %v1032_v41  ;;  %v1106_v41 = vand.u32 4294901760, %v1105_v11  ;;  %v1592_v11 = vld [vmem:[#allocation20 + $0x18] sm:$0xff] }
 0x1e4   : > { %14367 = vmatpush3.bf16.msra.mxu0 %v14366_v47  ;;  %12938 = vmatprep.mubr.msk.f32.mxu0 %vm17371_vm0, %v23216_v9  ;;  %v1622_v25 = vand.u32 4294901760, %v1592_v11 }
 0x1e5   : > { %14368 = vmatprep.subr.bf16.mxu0 %v23222_v4  ;;  %v14378_v47 = vpack.c.bf16 %v1106_v41, %v1099_v12  ;;  %v1619_v12 = vand.u32 4294901760, %v1591_v5  ;;  %v18114_v41 = vsub.f32 %v1590_v28, %v1616_v10  ;;  %v18247_v28 = vpack.c.bf16 %v1658_v6, %v1655_v58 }
 0x1e6   : > { %v18118_v42 = vsub.f32 %v1592_v11, %v1622_v25 }
 0x1e7   : > { %v18116_v16 = vsub.f32 %v1591_v5, %v1619_v12  ;;  %v18249_v5 = vsub.f32 %v1604_v49, %v1658_v6 }
 0x1e8   : > { %14370 = vmatpush3.bf16.msra.mxu0 %v14369_v57  ;;  %v1134_v57 = vand.u32 4294901760, %v1133_v18 }
 0x1e9   : > { %14371 = vmatprep.subr.bf16.mxu0 %v23222_v4 }
 0x1ea   : > { %v14384_v22 = vpack.c.bf16 %v1134_v57, %v1127_v50 }
 0x1ec   : > { %14373 = vmatpush3.bf16.msra.mxu0 %v14372_v7  ;;  %v14393_v7 = vpack.c.bf16 %v17998_v43, %v17991_v34  ;;  %v14396_v34 = vpack.c.bf16 %v18002_v45, %v18000_v44  ;;  %v18123_v43 = vpack.c.bf16 %v1622_v25, %v1619_v12  ;;  %v14402_v44 = vpack.c.bf16 %v18016_v55, %v18012_v53  ;;  %v1596_v53 = vld [vmem:[#allocation20 + $0x38] sm:$0xff] }
 0x1ed   : > { %14374 = vmatprep.subr.bf16.mxu0 %v23222_v4  ;;  %v14405_v45 = vpack.c.bf16 %v18025_v60, %v18023_v59  ;;  %v1597_v60 = vld [vmem:[#allocation20 + $0x40] sm:$0xff]  ;;  %v23212_v12 = vand.u32 4294901760, %v18116_v16  ;;  %v23211_v25 = vand.u32 4294901760, %v18118_v42 }
 0x1ee   : > { %14490 = vmatpush3.bf16.msra.mxu1 %v18123_v43 }
 0x1ef   : > { %14491 = vmatprep.subr.bf16.mxu1 %v23222_v4 }
 0x1f0   : > { %14376 = vmatpush3.bf16.msra.mxu0 %v14375_v31  ;;  %v18112_v31 = vsub.f32 %v1589_v24, %v1613_v8  ;;  %v18244_v24 = vsub.f32 %v1603_v48, %v1655_v58 }
 0x1f1   : > { %14377 = vmatprep.subr.bf16.mxu0 %v23222_v4 }
 0x1f4   : > { %14379 = vmatpush3.bf16.msra.mxu0 %v14378_v47 }
 0x1f5   : > { %14380 = vmatprep.subr.bf16.mxu0 %v23222_v4 }
 0x1f8   : > { %14382 = vmatpush3.bf16.msra.mxu0 %v14381_v54  ;;  %v18231_v54 = vsub.f32 %v1599_v0, %v1643_v2 }
 0x1f9   : > { %14383 = vmatprep.subr.bf16.mxu0 %v23222_v4 }
 0x1fa   : > { %v23203_v48 = vand.u32 4294901760, %v18231_v54 }
 0x1fc   : > { %14385 = vmatpush3.bf16.msra.mxu0 %v14384_v22  ;;  %v1777_v6 = vsub.f32 %v18231_v54, %v23203_v48  ;;  %v2258_v48 = vld [vmem:[#allocation9 + $0x10] sm:$0xff] }
 0x1fd   : > { %14386 = vmatprep.subr.bf16.mxu0 %v23222_v4 }
 0x200   : > { %14388 = vmatpush3.bf16.msra.mxu0 %v14387_v23  ;;  %v23215_v23 = vand.u32 4294901760, %v18112_v31 }
 0x201   : > { %14389 = vmatprep.subr.bf16.mxu0 %v23222_v4 }
 0x203   : > { %12939 = vmatmul.mubr.f32.vlgmr.msra.gmra.mrb[0].mxu0 %v17989_v32 }
 0x204   : > { %14391 = vmatpush3.bf16.msra.mxu0 %v14390_v15  ;;  %12973 = vmatprep.mubr.msk.f32.mxu0 %vm17371_vm0, %v23216_v9  ;;  %v23214_v15 = vand.u32 4294901760, %v18114_v41 }
 0x205   : > { %14392 = vmatprep.subr.bf16.mxu0 %v23222_v4 }
 0x206   : > { %v1714_v8 = vsub.f32 %v18114_v41, %v23214_v15 }
 0x208   : > { %14394 = vmatpush3.bf16.msra.mxu0 %v14393_v7  ;;  %v1707_v7 = vsub.f32 %v18112_v31, %v23215_v23  ;;  %v1715_v11 = vand.u32 4294901760, %v1714_v8  ;;  %v1778_v8 = vand.u32 4294901760, %v1777_v6 }
 0x209   : > { %14395 = vmatprep.subr.bf16.mxu0 %v23222_v4 }
 0x20a   : > { %v1708_v10 = vand.u32 4294901760, %v1707_v7 }
 0x20c   : > { %14397 = vmatpush3.bf16.msra.mxu0 %v14396_v34  ;;  %v18261_v34 = vpack.c.bf16 %v1715_v11, %v1708_v10 }
 0x20d   : > { %14398 = vmatprep.subr.bf16.mxu0 %v23222_v4 }
 0x210   : > { %14400 = vmatpush3.bf16.msra.mxu0 %v14399_v17  ;;  %v1721_v17 = vsub.f32 %v18116_v16, %v23212_v12  ;;  %v2278_v12 = vld [vmem:[#allocation9 + $0xb0] sm:$0xff] }
 0x211   : > { %14401 = vmatprep.subr.bf16.mxu0 %v23222_v4 }
 0x214   : > { %14403 = vmatpush3.bf16.msra.mxu0 %v14402_v44  ;;  %v1728_v44 = vsub.f32 %v18118_v42, %v23211_v25 }
 0x215   : > { %14404 = vmatprep.subr.bf16.mxu0 %v23222_v4 }
 0x218   : > { %14406 = vmatpush3.bf16.msra.mxu0 %v14405_v45  ;;  %v1722_v45 = vand.u32 4294901760, %v1721_v17 }
 0x219   : > { %14407 = vmatprep.subr.bf16.mxu0 %v23222_v4 }
 0x21c   : > { %14409 = vmatpush3.bf16.msra.mxu0 %v14408_v51  ;;  %v1729_v51 = vand.u32 4294901760, %v1728_v44 }
 0x21d   : > { %14410 = vmatprep.subr.bf16.mxu0 %v23222_v4 }
 0x220   : > { %14412 = vmatpush3.bf16.msra.mxu0 %v14411_v52 }
 0x221   : > { %14413 = vmatprep.subr.bf16.mxu0 %v23222_v4 }
 0x223   : > { %12974 = vmatmul.mubr.f32.vlgmr.msra.gmra.mrb[0].mxu0 %v18006_v46 }
 0x224   : > { %14415 = vmatpush3.bf16.msra.mxu0 %v17971_v13  ;;  %13008 = vmatprep.mubr.msk.f32.mxu0 %vm17371_vm0, %v23216_v9 }
 0x225   : > { %14416 = vmatprep.subr.bf16.mxu0 %v23222_v4 }
 0x228   : > { %14418 = vmatpush3.bf16.msra.mxu0 %v17974_v14 }
 0x229   : > { %14419 = vmatprep.subr.bf16.mxu0 %v23222_v4 }
 0x22c   : > { %14421 = vmatpush3.bf16.msra.mxu0 %v17978_v19 }
 0x22d   : > { %14422 = vmatprep.subr.bf16.mxu0 %v23222_v4 }
 0x230   : > { %14424 = vmatpush3.bf16.msra.mxu0 %v17986_v27 }
 0x231   : > { %14425 = vmatprep.subr.bf16.mxu0 %v23222_v4 }
 0x234   : > { %14427 = vmatpush3.bf16.msra.mxu0 %v17994_v39 }
 0x235   : > { %14428 = vmatprep.subr.bf16.mxu0 %v23222_v4 }
 0x238   : > { %14430 = vmatpush3.bf16.msra.mxu0 %v18018_v56 }
 0x239   : > { %14431 = vmatprep.subr.bf16.mxu0 %v23222_v4 }
 0x23c   : > { %14433 = vmatpush3.bf16.msra.mxu0 %v18030_v63 }
 0x23d   : > { %14434 = vmatprep.subr.bf16.mxu0 %v23222_v4 }
 0x240   : > { %14436 = vmatpush3.bf16.msra.mxu0 %v18034_v1 }
 0x241   : > { %14437 = vmatprep.subr.bf16.mxu0 %v23222_v4 }
 0x243   : > { %13009 = vmatmul.mubr.f32.vlgmr.msra.gmra.mrb[0].mxu0 %v1030_v62  ;;  %v1640_v62 = vand.u32 4294901760, %v1598_v61 }
 0x244   : > { %14439 = vmatpush3.bf16.msra.mxu0 %v18059_v29  ;;  %13043 = vmatprep.mubr.msk.f32.mxu0 %vm17371_vm0, %v23216_v9 }
 0x245   : > { %14440 = vmatprep.subr.bf16.mxu0 %v23222_v4  ;;  %v18229_v50 = vsub.f32 %v1598_v61, %v1640_v62 }
 0x248   : > { %14442 = vmatpush3.bf16.msra.mxu0 %v18061_v30  ;;  %v1601_v30 = vld [vmem:[#allocation20 + $0x60] sm:$0xff] }
 0x249   : > { %14443 = vmatprep.subr.bf16.mxu0 %v23222_v4 }
 0x24c   : > { %14445 = vmatpush3.bf16.msra.mxu0 %v18065_v33  ;;  %v1602_v33 = vld [vmem:[#allocation20 + $0x68] sm:$0xff] }
 0x24d   : > { %14446 = vmatprep.subr.bf16.mxu0 %v23222_v4 }
 0x250   : > { %14448 = vmatpush3.bf16.msra.mxu0 %v18067_v35  ;;  %v1649_v35 = vand.u32 4294901760, %v1601_v30 }
 0x251   : > { %14449 = vmatprep.subr.bf16.mxu0 %v23222_v4 }
 0x252   : > { %v18237_v21 = vsub.f32 %v1601_v30, %v1649_v35 }
 0x254   : > { %14451 = vmatpush3.bf16.msra.mxu0 %v18069_v36  ;;  %v1652_v36 = vand.u32 4294901760, %v1602_v33  ;;  %v23201_v11 = vand.u32 4294901760, %v18237_v21 }
 0x255   : > { %14452 = vmatprep.subr.bf16.mxu0 %v23222_v4 }
 0x256   : > { %v18235_v20 = vpack.c.bf16 %v1652_v36, %v1649_v35  ;;  %v18239_v22 = vsub.f32 %v1602_v33, %v1652_v36 }
 0x258   : > { %14454 = vmatpush3.bf16.msra.mxu0 %v18072_v37  ;;  %v23200_v17 = vand.u32 4294901760, %v18239_v22 }
 0x259   : > { %14455 = vmatprep.subr.bf16.mxu0 %v23222_v4 }
 0x25c   : > { %14457 = vmatpush3.bf16.msra.mxu0 %v18074_v38 }
 0x25d   : > { %14458 = vmatprep.subr.bf16.mxu0 %v23222_v4 }
 0x260   : > { %14460 = vmatpush3.bf16.msra.mxu0 %v18076_v40 }
 0x261   : > { %14461 = vmatprep.subr.bf16.mxu0 %v23222_v4 }
 0x263   : > { %13044 = vmatmul.mubr.f32.vlgmr.msra.gmra.mrb[0].mxu0 %v17989_v32 }
 0x264   : > { %14463 = vmatpush3.bf16.msra.mxu0 %v17971_v13  ;;  %13078 = vmatprep.mubr.msk.f32.mxu0 %vm17371_vm0, %v23216_v9  ;;  %v1593_v13 = vld [vmem:[#allocation20 + $0x20] sm:$0xff] }
 0x265   : > { %14464 = vmatprep.subr.bf16.mxu0 %v23222_v4 }
 0x268   : > { %14466 = vmatpush3.bf16.msra.mxu0 %v17974_v14  ;;  %v1594_v14 = vld [vmem:[#allocation20 + $0x28] sm:$0xff] }
 0x269   : > { %14467 = vmatprep.subr.bf16.mxu0 %v23222_v4 }
 0x26c   : > { %14469 = vmatpush3.bf16.msra.mxu0 %v17978_v19  ;;  %v1625_v19 = vand.u32 4294901760, %v1593_v13 }
 0x26d   : > { %14470 = vmatprep.subr.bf16.mxu0 %v23222_v4 }
 0x26e   : > { %v18219_v37 = vsub.f32 %v1593_v13, %v1625_v19 }
 0x270   : > { %14472 = vmatpush3.bf16.msra.mxu0 %v17986_v27  ;;  %v1628_v27 = vand.u32 4294901760, %v1594_v14  ;;  %v23210_v52 = vand.u32 4294901760, %v18219_v37 }
 0x271   : > { %14473 = vmatprep.subr.bf16.mxu0 %v23222_v4 }
 0x272   : > { %v18203_v46 = vpack.c.bf16 %v1628_v27, %v1625_v19  ;;  %v18221_v38 = vsub.f32 %v1594_v14, %v1628_v27  ;;  %v18271_v14 = vpack.c.bf16 %v1729_v51, %v1722_v45  ;;  %v1735_v19 = vsub.f32 %v18219_v37, %v23210_v52 }
 0x273   : > { %v1791_v45 = vsub.f32 %v18237_v21, %v23201_v11  ;;  %v1798_v51 = vsub.f32 %v18239_v22, %v23200_v17 }
 0x274   : > { %14475 = vmatpush3.bf16.msra.mxu0 %v17994_v39  ;;  %v1595_v39 = vld [vmem:[#allocation20 + $0x30] sm:$0xff]  ;;  %14493 = vmatpush3.bf16.msra.mxu1 %v18203_v46  ;;  %v23209_v13 = vand.u32 4294901760, %v18221_v38  ;;  %v14540_v6 = vpack.c.bf16 %v18221_v38, %v18219_v37 }
 0x275   : > { %14476 = vmatprep.subr.bf16.mxu0 %v23222_v4  ;;  %v1631_v55 = vand.u32 4294901760, %v1595_v39  ;;  %14494 = vmatprep.subr.bf16.mxu1 %v23222_v4 }
 0x276   : > { %v1742_v27 = vsub.f32 %v18221_v38, %v23209_v13 }
 0x277   : > { %v18223_v40 = vsub.f32 %v1595_v39, %v1631_v55  ;;  %v1736_v39 = vand.u32 4294901760, %v1735_v19  ;;  %v1792_v19 = vand.u32 4294901760, %v1791_v45  ;;  %v14552_v45 = vpack.c.bf16 %v18239_v22, %v18237_v21 }
 0x278   : > { %14478 = vmatpush3.bf16.msra.mxu0 %v18018_v56  ;;  %v1634_v56 = vand.u32 4294901760, %v1596_v53 }
 0x279   : > { %14479 = vmatprep.subr.bf16.mxu0 %v23222_v4 }
 0x27a   : > { %v18207_v59 = vpack.c.bf16 %v1634_v56, %v1631_v55  ;;  %v18225_v47 = vsub.f32 %v1596_v53, %v1634_v56  ;;  %v1743_v53 = vand.u32 4294901760, %v1742_v27  ;;  %v23208_v55 = vand.u32 4294901760, %v18223_v40 }
 0x27b   : > { %v1799_v27 = vand.u32 4294901760, %v1798_v51  ;;  %v2263_v51 = vld [vmem:[#allocation9 + $0x38] sm:$0xff] }
 0x27c   : > { %14481 = vmatpush3.bf16.msra.mxu0 %v18030_v63  ;;  %14496 = vmatpush3.bf16.msra.mxu1 %v18207_v59  ;;  %v23207_v56 = vand.u32 4294901760, %v18225_v47  ;;  %v1749_v61 = vsub.f32 %v18223_v40, %v23208_v55  ;;  %v2259_v55 = vld [vmem:[#allocation9 + $0x18] sm:$0xff] }
 0x27d   : > { %14482 = vmatprep.subr.bf16.mxu0 %v23222_v4  ;;  %14497 = vmatprep.subr.bf16.mxu1 %v23222_v4  ;;  %v2321_v13 = vand.u32 4294901760, %v2259_v55 }
 0x280   : > { %14484 = vmatpush3.bf16.msra.mxu0 %v18034_v1  ;;  %v1600_v1 = vld [vmem:[#allocation20 + $0x58] sm:$0xff] }
 0x281   : > { %v1646_v3 = vand.u32 4294901760, %v1600_v1 }
 0x283   : > { %13079 = vmatmul.mubr.f32.vlgmr.msra.gmra.mrb[0].mxu0 %v17989_v32  ;;  %v1637_v32 = vand.u32 4294901760, %v1597_v60  ;;  %v18215_v29 = vpack.c.bf16 %v1646_v3, %v1643_v2  ;;  %v18233_v57 = vsub.f32 %v1600_v1, %v1646_v3  ;;  %v23204_v2 = vand.u32 4294901760, %v18229_v50 }
 0x285   : > { %v18211_v63 = vpack.c.bf16 %v1640_v62, %v1637_v32  ;;  %v18227_v18 = vsub.f32 %v1597_v60, %v1637_v32  ;;  %v14516_v60 = vpack.c.bf16 %v1743_v53, %v1736_v39  ;;  %v1756_v32 = vsub.f32 %v18225_v47, %v23207_v56 }
 0x286   : > { %v1750_v62 = vand.u32 4294901760, %v1749_v61  ;;  %v1770_v33 = vsub.f32 %v18229_v50, %v23204_v2  ;;  %v23202_v49 = vand.u32 4294901760, %v18233_v57  ;;  %v23199_v39 = vand.u32 4294901760, %v18244_v24 }
 0x287   : > { %14499 = vmatpush3.bf16.msra.mxu1 %v18211_v63  ;;  %v1757_v0 = vand.u32 4294901760, %v1756_v32  ;;  %v23205_v1 = vand.u32 4294901760, %v18227_v18  ;;  %v23198_v53 = vand.u32 4294901760, %v18249_v5  ;;  %v14528_v61 = vpack.c.bf16 %v1799_v27, %v1792_v19  ;;  %v11299_v19 = vld [vmem:[%s23846_s2] ss:$0 sm:$0xff]  ;;  %s24239_s2 = sld [smem:[#allocation155_spill]] }
 0x288   : > { %14500 = vmatprep.subr.bf16.mxu1 %v23222_v4  ;;  %v1771_v36 = vand.u32 4294901760, %v1770_v33  ;;  %v1784_v7 = vsub.f32 %v18233_v57, %v23202_v49  ;;  %v1805_v32 = vsub.f32 %v18244_v24, %v23199_v39 }
 0x289   : > { %v14519_v3 = vpack.c.bf16 %v1757_v0, %v1750_v62  ;;  %v1763_v30 = vsub.f32 %v18227_v18, %v23205_v1  ;;  %v1812_v62 = vsub.f32 %v18249_v5, %v23198_v53 }
 0x28a   : > { %v1785_v10 = vand.u32 4294901760, %v1784_v7  ;;  %v1806_v0 = vand.u32 4294901760, %v1805_v32  ;;  %v14543_v7 = vpack.c.bf16 %v18225_v47, %v18223_v40 }
 0x28b   : > { %14502 = vmatpush3.bf16.msra.mxu1 %v18215_v29  ;;  %v1764_v35 = vand.u32 4294901760, %v1763_v30  ;;  %v1813_v30 = vand.u32 4294901760, %v1812_v62 }
 0x28c   : > { %14503 = vmatprep.subr.bf16.mxu1 %v23222_v4  ;;  %v14525_v44 = vpack.c.bf16 %v1785_v10, %v1778_v8  ;;  %v14546_v8 = vpack.c.bf16 %v18229_v50, %v18227_v18  ;;  %v14549_v10 = vpack.c.bf16 %v18233_v57, %v18231_v54 }
 0x28d   : > { %v14522_v58 = vpack.c.bf16 %v1771_v36, %v1764_v35  ;;  %v14531_v33 = vpack.c.bf16 %v1813_v30, %v1806_v0  ;;  %v14534_v35 = vpack.c.bf16 %v18114_v41, %v18112_v31  ;;  %v14537_v36 = vpack.c.bf16 %v18118_v42, %v18116_v16 }
 0x28f   : > { %14505 = vmatpush3.bf16.msra.mxu1 %v18235_v20 }
 0x290   : > { %14506 = vmatprep.subr.bf16.mxu1 %v23222_v4 }
 0x293   : > { %14508 = vmatpush3.bf16.msra.mxu1 %v18247_v28 }
 0x294   : > { %14509 = vmatprep.subr.bf16.mxu1 %v23222_v4 }
 0x356   : > { %v1584_v27 = vpop.f32.mrb[0].mxu0 }
 0x357   : > { %v16501_v32 = vadd.f32 %v11299_v19, %v1584_v27  ;;  %v13080_v62 = vpop.f32.mrb[1].mxu0  ;;  %v2275_v27 = vld [vmem:[#allocation9 + $0x98] sm:$0xff] }
 0x358   : > { %v18366_v62 = vld [vmem:[%s804_s9] sm:$0xff]  ;;  %v2369_v49 = vand.u32 4294901760, %v2275_v27  ;;  %s23893_s9 = sld [smem:[#allocation165_spill]] }
 0x359   : > { %16829 = vtanh.f32 %v16501_v32  ;;  %23847 = vst [vmem:[#allocation43_spill] sm:$0xff] %v18366_v62 }
 0x35a   : > { %v18378_v56 = vsub.f32 %v2275_v27, %v2369_v49  ;;  %v2261_v27 = vld [vmem:[#allocation9 + $0x28] sm:$0xff] }
 0x363   : > { %v16830_v0 = vpop.eup %16829 }
 0x364   : > { %v18338_v30 = vand.u32 4294901760, %v16830_v0 }
 0x366   : > { %v18341_v53 = vsub.f32 %v16830_v0, %v18338_v30 }
 0x368   : > { %v23213_v39 = vand.u32 4294901760, %v18341_v53 }
 0x36a   : > { %v1696_v17 = vsub.f32 %v18341_v53, %v23213_v39  ;;  %v2279_v39 = vld [vmem:[#allocation9 + $0xb8] sm:$0xff] }
 0x36c   : > { %v1697_v11 = vand.u32 4294901760, %v1696_v17  ;;  %v2257_v17 = vld [vmem:[#allocation9 + $0x8] sm:$0xff] }
 0x36d   : > { %v2315_v19 = vand.u32 4294901760, %v2257_v17 }
 0x36e   : > { %13114 = vmatmul.mubr.f32.vlgmr.msra.gmra.mrb[0].mxu1 %v1697_v11  ;;  %v2256_v11 = vld [vmem:[#allocation9] sm:$0xff] }
 0x36f   : > { %14511 = vmatpush3.bf16.msra.mxu1 %v18261_v34  ;;  %13148 = vmatprep.mubr.msk.f32.mxu1 %vm17371_vm0, %v23216_v9  ;;  %v23206_v34 = vlaneseq  ;;  %v18374_v1 = vsub.f32 %v2257_v17, %v2315_v19  ;;  %v2277_v17 = vld [vmem:[#allocation9 + $0xa8] sm:$0xff] }
 0x370   : > { %14512 = vmatprep.subr.bf16.mxu1 %v23222_v4 }
 0x373   : > { %14514 = vmatpush3.bf16.msra.mxu1 %v18271_v14  ;;  %v2272_v14 = vld [vmem:[#allocation9 + $0x80] sm:$0xff] }
 0x374   : > { %14515 = vmatprep.subr.bf16.mxu1 %v23222_v4 }
 0x377   : > { %14517 = vmatpush3.bf16.msra.mxu1 %v14516_v60  ;;  %v2273_v60 = vld [vmem:[#allocation9 + $0x88] sm:$0xff] }
 0x378   : > { %14518 = vmatprep.subr.bf16.mxu1 %v23222_v4 }
 0x37b   : > { %14520 = vmatpush3.bf16.msra.mxu1 %v14519_v3  ;;  %v2360_v3 = vand.u32 4294901760, %v2272_v14 }
 0x37c   : > { %14521 = vmatprep.subr.bf16.mxu1 %v23222_v4 }
 0x37f   : > { %14523 = vmatpush3.bf16.msra.mxu1 %v14522_v58  ;;  %v2363_v58 = vand.u32 4294901760, %v2273_v60 }
 0x380   : > { %14524 = vmatprep.subr.bf16.mxu1 %v23222_v4 }
 0x381   : > { %v18370_v0 = vsub.f32 %v2273_v60, %v2363_v58  ;;  %v2318_v60 = vand.u32 4294901760, %v2258_v48 }
 0x383   : > { %14526 = vmatpush3.bf16.msra.mxu1 %v14525_v44  ;;  %v2274_v44 = vld [vmem:[#allocation9 + $0x90] sm:$0xff]  ;;  %v18382_v52 = vsub.f32 %v2258_v48, %v2318_v60  ;;  %v2375_v48 = vand.u32 4294901760, %v2277_v17 }
 0x384   : > { %14527 = vmatprep.subr.bf16.mxu1 %v23222_v4  ;;  %v2366_v32 = vand.u32 4294901760, %v2274_v44 }
 0x386   : > { %v18406_v23 = vpack.c.bf16 %v2369_v49, %v2366_v32 }
 0x387   : > { %14529 = vmatpush3.bf16.msra.mxu1 %v14528_v61  ;;  %v9183_v61 = vand.u32 127, %v23206_v34  ;;  %v18376_v34 = vsub.f32 %v2274_v44, %v2366_v32  ;;  %v2260_v44 = vld [vmem:[#allocation9 + $0x20] sm:$0xff] }
 0x388   : > { %14530 = vmatprep.subr.bf16.mxu1 %v23222_v4 }
 0x389   : > { %vm9184_vm1 = vcmp.ge.s32.totalorder %v9183_v61, 8  ;;  %vm9185_vm2 = vcmp.lt.s32.totalorder %v9183_v61, 16  ;;  %v18390_v61 = vpack.c.bf16 %v2363_v58, %v2360_v3  ;;  %v18401_v58 = vsub.f32 %v2277_v17, %v2375_v48 }
 0x38a   : > { %vm9186_vm3 = vmand %vm9184_vm1, %vm9185_vm2  ;;  %v18416_v17 = vpack.c.bf16 %v2321_v13, %v2318_v60  ;;  %v23850_v60 = vand.u32 4294901760, %v18112_v31  ;;  %v23855_v31 = vand.u32 4294901760, %v18219_v37  ;;  %v23861_v37 = vand.u32 4294901760, %v18231_v54 }
 0x38b   : > { %14532 = vmatpush3.bf16.msra.mxu1 %v14531_v33  ;;  %v2312_v33 = vand.u32 4294901760, %v2256_v11  ;;  %14630 = vmatprep.subr.bf16.mxu0 %v18390_v61 }
 0x38c   : > { %14533 = vmatprep.subr.bf16.mxu1 %v23222_v4 }
 0x38d   : > { %v18372_v2 = vsub.f32 %v2256_v11, %v2312_v33  ;;  %v18388_v11 = vsub.f32 %v2259_v55, %v2321_v13 }
 0x38e   : > { %13149 = vmatmul.mubr.f32.vlgmr.msra.gmra.mrb[0].mxu1 %v18338_v30 }
 0x38f   : > { %14535 = vmatpush3.bf16.msra.mxu1 %v14534_v35  ;;  %13183 = vmatprep.mubr.msk.f32.mxu1 %vm17371_vm0, %v23216_v9  ;;  %v18368_v35 = vsub.f32 %v2272_v14, %v2360_v3  ;;  %v9187_v14 = vsel %vm9186_vm3, %v18366_v62, 0.0  ;;  %v2327_v3 = vand.u32 4294901760, %v2261_v27 }
 0x390   : > { %14536 = vmatprep.subr.bf16.mxu1 %v23222_v4  ;;  %9188 = vadd.xlane.f32.xlu0 %v9187_v14  ;;  %v2324_v14 = vand.u32 4294901760, %v2260_v44 }
 0x391   : > { %v18408_v9 = vsub.f32 %v2261_v27, %v2327_v3  ;;  %v23851_v27 = vand.u32 4294901760, %v18114_v41  ;;  %v23856_v41 = vand.u32 4294901760, %v18221_v38  ;;  %v23862_v38 = vand.u32 4294901760, %v18233_v57 }
 0x392   : > { %v18404_v15 = vsub.f32 %v2260_v44, %v2324_v14  ;;  %v2333_v44 = vand.u32 4294901760, %v2263_v51  ;;  %v23233_v54 = vand.u32 4294901760, %v18368_v35  ;;  %v23232_v57 = vand.u32 4294901760, %v18370_v0 }
 0x393   : > { %14538 = vmatpush3.bf16.msra.mxu1 %v14537_v36  ;;  %v2276_v36 = vld [vmem:[#allocation9 + $0xa0] sm:$0xff] }
 0x394   : > { %14539 = vmatprep.subr.bf16.mxu1 %v23222_v4  ;;  %v2372_v25 = vand.u32 4294901760, %v2276_v36 }
 0x396   : > { %v18399_v55 = vsub.f32 %v2276_v36, %v2372_v25  ;;  %v18430_v13 = vpack.c.bf16 %v2375_v48, %v2372_v25  ;;  %v14582_v48 = vpack.c.bf16 %v23851_v27, %v23850_v60  ;;  %v14597_v60 = vpack.c.bf16 %v23862_v38, %v23861_v37 }
 0x397   : > { %14541 = vmatpush3.bf16.msra.mxu1 %v14540_v6  ;;  %v18396_v6 = vpack.c.bf16 %v2315_v19, %v2312_v33  ;;  %v2381_v33 = vand.u32 4294901760, %v2279_v39  ;;  %v2262_v19 = vld [vmem:[#allocation9 + $0x30] sm:$0xff] }
 0x398   : > { %14542 = vmatprep.subr.bf16.mxu1 %v23222_v4  ;;  %v2330_v32 = vand.u32 4294901760, %v2262_v19 }
 0x399   : > { %14632 = vmatpush3.bf16.msra.mxu0 %v18396_v6  ;;  %v18419_v49 = vsub.f32 %v2279_v39, %v2381_v33  ;;  %v18436_v39 = vpack.c.bf16 %v2327_v3, %v2324_v14  ;;  %v23852_v14 = vand.u32 4294901760, %v18341_v53  ;;  %v23853_v3 = vand.u32 4294901760, %v18116_v16 }
 0x39a   : > { %14634 = vmatprep.subr.bf16.mxu0 %v18406_v23  ;;  %v18446_v25 = vpack.c.bf16 %v2333_v44, %v2330_v32  ;;  %v23858_v16 = vand.u32 4294901760, %v18225_v47  ;;  %v23864_v47 = vand.u32 4294901760, %v18239_v22  ;;  %v23225_v22 = vand.u32 4294901760, %v18376_v34 }
 0x39b   : > { %14544 = vmatpush3.bf16.msra.mxu1 %v14543_v7  ;;  %v2378_v7 = vand.u32 4294901760, %v2278_v12 }
 0x39c   : > { %14545 = vmatprep.subr.bf16.mxu1 %v23222_v4 }
 0x39d   : > { %v18414_v36 = vsub.f32 %v2278_v12, %v2378_v7  ;;  %14636 = vmatpush3.bf16.msra.mxu0 %v18416_v17  ;;  %v18428_v12 = vsub.f32 %v2263_v51, %v2333_v44  ;;  %v23848_v51 = vpack.c.bf16 %v18249_v5, %v18244_v24  ;;  %v23860_v44 = vand.u32 4294901760, %v18229_v50 }
 0x39e   : > { %14638 = vmatprep.subr.bf16.mxu0 %v18430_v13  ;;  %v23866_v50 = vand.u32 4294901760, %v18249_v5 }
 0x39f   : > { %14547 = vmatpush3.bf16.msra.mxu1 %v14546_v8  ;;  %v18425_v8 = vsub.f32 %v2262_v19, %v2330_v32  ;;  %v14588_v19 = vpack.c.bf16 %v23856_v41, %v23855_v31  ;;  %v23859_v32 = vand.u32 4294901760, %v18227_v18  ;;  %v23865_v18 = vand.u32 4294901760, %v18244_v24 }
 0x3a0   : > { %14548 = vmatprep.subr.bf16.mxu1 %v23222_v4  ;;  %v23224_v24 = vand.u32 4294901760, %v18378_v56 }
 0x3a1   : > { %14640 = vmatpush3.bf16.msra.mxu0 %v18436_v39 }
 0x3a3   : > { %14550 = vmatpush3.bf16.msra.mxu1 %v14549_v10  ;;  %v18440_v10 = vpack.c.bf16 %v2381_v33, %v2378_v7  ;;  %v23854_v7 = vand.u32 4294901760, %v18118_v42 }
 0x3a4   : > { %14551 = vmatprep.subr.bf16.mxu1 %v23222_v4 }
 0x3a5   : > { %14642 = vmatprep.subr.bf16.mxu0 %v18440_v10  ;;  %v14585_v33 = vpack.c.bf16 %v23854_v7, %v23853_v3  ;;  %v2560_v3 = vsub.f32 %v18378_v56, %v23224_v24  ;;  %v23221_v7 = vand.u32 4294901760, %v18382_v52 }
 0x3a6   : > { %14644 = vmatpush3.bf16.msra.mxu0 %v18446_v25 }
 0x3a7   : > { %14553 = vmatpush3.bf16.msra.mxu1 %v14552_v45  ;;  %v23849_v45 = vmov 0.0   ;;  %v2441_v37 = vsub.f32 %v18382_v52, %v23221_v7 }
 0x3a8   : > { %14554 = vmatprep.subr.bf16.mxu1 %v23222_v4 }
 0x3ab   : > { %14556 = vmatpush3.bf16.msra.mxu1 %v23848_v51  ;;  %v14594_v51 = vpack.c.bf16 %v23860_v44, %v23859_v32 }
 0x3ac   : > { %14557 = vmatprep.subr.bf16.mxu1 %v23222_v4 }
 0x3ae   : > { %13184 = vmatmul.mubr.f32.vlgmr.msra.gmra.mrb[0].mxu1 %v18341_v53  ;;  %v23857_v53 = vand.u32 4294901760, %v18223_v40  ;;  %v23863_v40 = vand.u32 4294901760, %v18237_v21  ;;  %v23227_v21 = vand.u32 4294901760, %v18372_v2 }
 0x3af   : > { %14559 = vmatpush3.bf16.msra.mxu1 %v18110_v26  ;;  %13218 = vmatprep.mubr.msk.f32.mxu1 %vm17371_vm0, %v23849_v45 }
 0x3b0   : > { %14560 = vmatprep.subr.bf16.mxu1 %v23222_v4  ;;  %v14591_v42 = vpack.c.bf16 %v23858_v16, %v23857_v53  ;;  %v14600_v27 = vpack.c.bf16 %v23864_v47, %v23863_v40  ;;  %v2427_v5 = vsub.f32 %v18372_v2, %v23227_v21  ;;  %v23219_v53 = vand.u32 4294901760, %v18401_v58  ;;  %v18554_v16 = vld [vmem:[#allocation9 + $0xc0] sm:$0xff] }
 0x3b1   : > { %v23237_v40 = vand.u32 4294901760, %v18554_v16  ;;  %v23241_v21 = vand.u32 4294901760, %v18425_v8 }
 0x3b2   : > { %v2428_v32 = vand.u32 4294901760, %v2427_v5  ;;  %v18582_v5 = vld [vmem:[#allocation9 + $0xd8] sm:$0xff] }
 0x3b3   : > { %14562 = vmatpush3.bf16.msra.mxu1 %v18123_v43  ;;  %v18593_v7 = vsub.f32 %v18554_v16, %v23237_v40 }
 0x3b4   : > { %14563 = vmatprep.subr.bf16.mxu1 %v23222_v4 }
 0x3b5   : > { %23867 = vst [vmem:[#allocation44_spill] sm:$0xff] %v18593_v7 }
 0x3b7   : > { %14565 = vmatpush3.bf16.msra.mxu1 %v18203_v46 }
 0x3b8   : > { %14566 = vmatprep.subr.bf16.mxu1 %v23222_v4 }
 0x3bb   : > { %14568 = vmatpush3.bf16.msra.mxu1 %v18207_v59 }
 0x3bc   : > { %14569 = vmatprep.subr.bf16.mxu1 %v23222_v4 }
 0x3bf   : > { %14571 = vmatpush3.bf16.msra.mxu1 %v18211_v63 }
 0x3c0   : > { %14572 = vmatprep.subr.bf16.mxu1 %v23222_v4 }
 0x3c3   : > { %14574 = vmatpush3.bf16.msra.mxu1 %v18215_v29 }
 0x3c4   : > { %14575 = vmatprep.subr.bf16.mxu1 %v23222_v4 }
 0x3c7   : > { %14577 = vmatpush3.bf16.msra.mxu1 %v18235_v20 }
 0x3c8   : > { %14578 = vmatprep.subr.bf16.mxu1 %v23222_v4 }
 0x3cb   : > { %14580 = vmatpush3.bf16.msra.mxu1 %v18247_v28 }
 0x3cc   : > { %14581 = vmatprep.subr.bf16.mxu1 %v23222_v4 }
 0x3ce   : > { %13219 = vmatmul.mubr.f32.vlgmr.msra.gmra.mrb[0].mxu1 %v23852_v14 }
 0x3cf   : > { %14583 = vmatpush3.bf16.msra.mxu1 %v14582_v48  ;;  %13253 = vmatprep.mubr.msk.f32.mxu1 %vm17371_vm0, %v23849_v45  ;;  %v14603_v48 = vpack.c.bf16 %v23866_v50, %v23865_v18  ;;  %v18570_v18 = vld [vmem:[#allocation9 + $0x48] sm:$0xff]  ;;  %v2574_v50 = vsub.f32 %v18401_v58, %v23219_v53 }
 0x3d0   : > { %14584 = vmatprep.subr.bf16.mxu1 %v23222_v4 }
 0x3d3   : > { %14586 = vmatpush3.bf16.msra.mxu1 %v14585_v33  ;;  %v23220_v33 = vand.u32 4294901760, %v18388_v11 }
 0x3d4   : > { %14587 = vmatprep.subr.bf16.mxu1 %v23222_v4 }
 0x3d5   : > { %v2448_v38 = vsub.f32 %v18388_v11, %v23220_v33  ;;  %v23234_v33 = vand.u32 4294901760, %v18570_v18 }
 0x3d7   : > { %14589 = vmatpush3.bf16.msra.mxu1 %v14588_v19  ;;  %v23218_v19 = vand.u32 4294901760, %v18399_v55 }
 0x3d8   : > { %14590 = vmatprep.subr.bf16.mxu1 %v23222_v4 }
 0x3db   : > { %14592 = vmatpush3.bf16.msra.mxu1 %v14591_v42  ;;  %v18556_v42 = vld [vmem:[#allocation9 + $0xc8] sm:$0xff] }
 0x3dc   : > { %14593 = vmatprep.subr.bf16.mxu1 %v23222_v4  ;;  %v23236_v47 = vand.u32 4294901760, %v18556_v42 }
 0x3df   : > { %14595 = vmatpush3.bf16.msra.mxu1 %v14594_v51 }
 0x3e0   : > { %14596 = vmatprep.subr.bf16.mxu1 %v23222_v4 }
 0x3e3   : > { %14598 = vmatpush3.bf16.msra.mxu1 %v14597_v60 }
 0x3e4   : > { %14599 = vmatprep.subr.bf16.mxu1 %v23222_v4 }
 0x3e7   : > { %14601 = vmatpush3.bf16.msra.mxu1 %v14600_v27  ;;  %v18568_v27 = vld [vmem:[#allocation9 + $0x40] sm:$0xff] }
 0x3e8   : > { %14602 = vmatprep.subr.bf16.mxu1 %v23222_v4  ;;  %v23235_v53 = vand.u32 4294901760, %v18568_v27 }
 0x3eb   : > { %14604 = vmatpush3.bf16.msra.mxu1 %v14603_v48  ;;  %v23231_v48 = vand.u32 4294901760, %v18404_v15 }
 0x3ec   : > { %14605 = vmatprep.subr.bf16.mxu1 %v23222_v4 }
 0x3ee   : > { %13254 = vmatmul.mubr.f32.vlgmr.msra.gmra.mrb[0].mxu1 %v18338_v30 }
 0x3ef   : > { %14607 = vmatpush3.bf16.msra.mxu1 %v18110_v26  ;;  %13288 = vmatprep.mubr.msk.f32.mxu1 %vm17371_vm0, %v23849_v45  ;;  %v23226_v26 = vand.u32 4294901760, %v18374_v1 }
 0x3f0   : > { %14608 = vmatprep.subr.bf16.mxu1 %v23222_v4 }
 0x3f1   : > { %v2434_v14 = vsub.f32 %v18374_v1, %v23226_v26 }
 0x3f3   : > { %14610 = vmatpush3.bf16.msra.mxu1 %v18123_v43  ;;  %v2539_v43 = vsub.f32 %v18368_v35, %v23233_v54  ;;  %v2435_v44 = vand.u32 4294901760, %v2434_v14 }
 0x3f4   : > { %14611 = vmatprep.subr.bf16.mxu1 %v23222_v4 }
 0x3f5   : > { %v2540_v31 = vand.u32 4294901760, %v2539_v43  ;;  %v23228_v43 = vand.u32 4294901760, %v18408_v9  ;;  %v14663_v14 = vpack.c.bf16 %v2435_v44, %v2428_v32  ;;  %v18598_v32 = vsub.f32 %v18556_v42, %v23236_v47 }
 0x3f6   : > { %v23239_v44 = vand.u32 4294901760, %v18582_v5 }
 0x3f7   : > { %14613 = vmatpush3.bf16.msra.mxu1 %v18203_v46  ;;  %v2546_v46 = vsub.f32 %v18370_v0, %v23232_v57  ;;  %23868 = vst [vmem:[#allocation45_spill] sm:$0xff] %v18598_v32  ;;  %v2462_v24 = vsub.f32 %v18408_v9, %v23228_v43  ;;  %v18629_v43 = vsub.f32 %v18570_v18, %v23234_v33 }
 0x3f8   : > { %14614 = vmatprep.subr.bf16.mxu1 %v23222_v4  ;;  %v18643_v54 = vsub.f32 %v18582_v5, %v23239_v44  ;;  %v2469_v57 = vsub.f32 %v18425_v8, %v23241_v21 }
 0x3f9   : > { %v2547_v41 = vand.u32 4294901760, %v2546_v46  ;;  %v18580_v46 = vld [vmem:[#allocation9 + $0xd0] sm:$0xff]  ;;  %23870 = vst [vmem:[#allocation47_spill] sm:$0xff] %v18629_v43  ;;  %v2463_v40 = vand.u32 4294901760, %v2462_v24  ;;  %v23876_v24 = vand.u32 4294901760, %v18598_v32 }
 0x3fa   : > { %23872 = vst [vmem:[#allocation49_spill] sm:$0xff] %v18643_v54  ;;  %v2470_v21 = vand.u32 4294901760, %v2469_v57 }
 0x3fb   : > { %14616 = vmatpush3.bf16.msra.mxu1 %v18207_v59  ;;  %v2553_v59 = vsub.f32 %v18376_v34, %v23225_v22  ;;  %v14661_v60 = vpack.c.bf16 %v2547_v41, %v2540_v31  ;;  %v23230_v31 = vand.u32 4294901760, %v18419_v49  ;;  %v2442_v41 = vand.u32 4294901760, %v2441_v37 }
 0x3fc   : > { %14617 = vmatprep.subr.bf16.mxu1 %v23222_v4 }
 0x3fd   : > { %v2554_v51 = vand.u32 4294901760, %v2553_v59  ;;  %v2588_v26 = vsub.f32 %v18419_v49, %v23230_v31 }
 0x3ff   : > { %14619 = vmatpush3.bf16.msra.mxu1 %v18211_v63  ;;  %v2561_v63 = vand.u32 4294901760, %v2560_v3  ;;  %v23229_v3 = vand.u32 4294901760, %v18414_v36 }
 0x400   : > { %14620 = vmatprep.subr.bf16.mxu1 %v23222_v4 }
 0x401   : > { %v14665_v59 = vpack.c.bf16 %v2561_v63, %v2554_v51  ;;  %v18602_v51 = vld [vmem:[#allocation9 + $0x50] sm:$0xff]  ;;  %v18604_v63 = vld [vmem:[#allocation9 + $0x58] sm:$0xff]  ;;  %v2581_v22 = vsub.f32 %v18414_v36, %v23229_v3 }
 0x402   : > { %v23242_v3 = vand.u32 4294901760, %v18602_v51  ;;  %v23243_v31 = vand.u32 4294901760, %v18604_v63 }
 0x403   : > { %14622 = vmatpush3.bf16.msra.mxu1 %v18215_v29  ;;  %v2567_v29 = vsub.f32 %v18399_v55, %v23218_v19  ;;  %v2449_v19 = vand.u32 4294901760, %v2448_v38  ;;  %v2575_v38 = vand.u32 4294901760, %v2574_v50  ;;  %v18624_v50 = vsub.f32 %v18568_v27, %v23235_v53 }
 0x404   : > { %14623 = vmatprep.subr.bf16.mxu1 %v23222_v4 }
 0x405   : > { %v2568_v37 = vand.u32 4294901760, %v2567_v29  ;;  %v23240_v29 = vand.u32 4294901760, %v18428_v12  ;;  %23869 = vst [vmem:[#allocation46_spill] sm:$0xff] %v18624_v50  ;;  %v14667_v33 = vpack.c.bf16 %v2449_v19, %v2442_v41  ;;  %v23245_v44 = vand.u32 4294901760, %v18624_v50 }
 0x406   : > { %v23244_v19 = vand.u32 4294901760, %v18629_v43 }
 0x407   : > { %14625 = vmatpush3.bf16.msra.mxu1 %v18235_v20  ;;  %v23238_v20 = vand.u32 4294901760, %v18580_v46  ;;  %v14669_v53 = vpack.c.bf16 %v2575_v38, %v2568_v37 }
 0x408   : > { %14626 = vmatprep.subr.bf16.mxu1 %v23222_v4  ;;  %v2455_v4 = vsub.f32 %v18404_v15, %v23231_v48  ;;  %v2589_v48 = vand.u32 4294901760, %v2588_v26  ;;  %v23875_v26 = vand.u32 4294901760, %v18593_v7 }
 0x40a   : > { %v2456_v47 = vand.u32 4294901760, %v2455_v4  ;;  %v18657_v4 = vsub.f32 %v18602_v51, %v23242_v3 }
 0x40b   : > { %14628 = vmatpush3.bf16.msra.mxu1 %v18247_v28  ;;  %v18638_v28 = vsub.f32 %v18580_v46, %v23238_v20  ;;  %v2476_v20 = vsub.f32 %v18428_v12, %v23240_v29 }
 0x40c   : > { %14662 = vmatprep.subr.bf16.mxu1 %v14661_v60  ;;  %v2582_v60 = vand.u32 4294901760, %v2581_v22  ;;  %23873 = vst [vmem:[#allocation50_spill] sm:$0xff] %v18657_v4  ;;  %v2595_v22 = vsub.f32 %v18593_v7, %v23875_v26  ;;  %v14671_v38 = vpack.c.bf16 %v2463_v40, %v2456_v47  ;;  %v2490_v26 = vsub.f32 %v18629_v43, %v23244_v19 }
 0x40d   : > { %23871 = vst [vmem:[#allocation48_spill] sm:$0xff] %v18638_v28  ;;  %v2477_v3 = vand.u32 4294901760, %v2476_v20  ;;  %v23877_v40 = vand.u32 4294901760, %v18638_v28  ;;  %v23879_v7 = vand.u32 4294901760, %v18554_v16 }
 0x40e   : > { %13289 = vmatmul.mubr.f32.vlgmr.msra.gmra.mrb[0].mxu1 %v18338_v30  ;;  %v18662_v30 = vsub.f32 %v18604_v63, %v23243_v31  ;;  %v14673_v29 = vpack.c.bf16 %v2589_v48, %v2582_v60  ;;  %v23249_v31 = vand.u32 4294901760, %v18657_v4  ;;  %v2596_v41 = vand.u32 4294901760, %v2595_v22 }
 0x40f   : > { %14664 = vmatpush3.bf16.msra.mxu1 %v14663_v14  ;;  %v2602_v14 = vsub.f32 %v18598_v32, %v23876_v24  ;;  %v2609_v57 = vsub.f32 %v18638_v28, %v23877_v40  ;;  %v14675_v48 = vpack.c.bf16 %v2477_v3, %v2470_v21  ;;  %v2491_v60 = vand.u32 4294901760, %v2490_v26 }
 0x410   : > { %23874 = vst [vmem:[#allocation51_spill] sm:$0xff] %v18662_v30  ;;  %14666 = vmatprep.subr.bf16.mxu1 %v14665_v59  ;;  %v2483_v59 = vsub.f32 %v18624_v50, %v23245_v44  ;;  %v23248_v24 = vand.u32 4294901760, %v18662_v30  ;;  %v2497_v19 = vsub.f32 %v18657_v4, %v23249_v31 }
 0x411   : > { %v2603_v37 = vand.u32 4294901760, %v2602_v14  ;;  %v2610_v14 = vand.u32 4294901760, %v2609_v57 }
 0x412   : > { %v2484_v20 = vand.u32 4294901760, %v2483_v59  ;;  %v2498_v62 = vand.u32 4294901760, %v2497_v19  ;;  %v18694_v59 = vld [vmem:[#allocation9 + $0xe8] sm:$0xff] }
 0x413   : > { %14668 = vmatpush3.bf16.msra.mxu1 %v14667_v33  ;;  %v23878_v33 = vand.u32 4294901760, %v18643_v54  ;;  %v14677_v22 = vpack.c.bf16 %v2603_v37, %v2596_v41  ;;  %v18698_v41 = vld [vmem:[#allocation9 + $0x60] sm:$0xff]  ;;  %v18700_v37 = vld [vmem:[#allocation9 + $0x68] sm:$0xff] }
 0x414   : > { %14670 = vmatprep.subr.bf16.mxu1 %v14669_v53  ;;  %v2504_v53 = vsub.f32 %v18662_v30, %v23248_v24  ;;  %v14679_v44 = vpack.c.bf16 %v2491_v60, %v2484_v20  ;;  %v2348_v19 = vand.u32 4294901760, %v18698_v41  ;;  %v2351_v57 = vand.u32 4294901760, %v18700_v37  ;;  %v2286_v20 = vld [vmem:[#allocation9 + $0xf0] sm:$0xff]  ;;  %v2287_v60 = vld [vmem:[#allocation9 + $0xf8] sm:$0xff] }
 0x415   : > { %v2616_v47 = vsub.f32 %v18643_v54, %v23878_v33 }
 0x416   : > { %v2505_v33 = vand.u32 4294901760, %v2504_v53 }
 0x417   : > { %14672 = vmatpush3.bf16.msra.mxu1 %v14671_v38  ;;  %v2617_v40 = vand.u32 4294901760, %v2616_v47  ;;  %v18692_v38 = vld [vmem:[#allocation9 + $0xe0] sm:$0xff]  ;;  %v18715_v47 = vsub.f32 %v18698_v41, %v2348_v19 }
 0x418   : > { %14674 = vmatprep.subr.bf16.mxu1 %v14673_v29  ;;  %v14683_v3 = vpack.c.bf16 %v2505_v33, %v2498_v62  ;;  %v23251_v26 = vand.u32 4294901760, %v18692_v38  ;;  %v23250_v29 = vand.u32 4294901760, %v18694_v59  ;;  %v2270_v33 = vld [vmem:[#allocation9 + $0x70] sm:$0xff] }
 0x419   : > { %v14681_v21 = vpack.c.bf16 %v2617_v40, %v2610_v14  ;;  %v2402_v14 = vand.u32 4294901760, %v2286_v20  ;;  %v2405_v40 = vand.u32 4294901760, %v2287_v60  ;;  %v2354_v31 = vand.u32 4294901760, %v2270_v33 }
 0x41a   : > { %v18707_v62 = vsub.f32 %v18692_v38, %v23251_v26 }
 0x41b   : > { %14676 = vmatpush3.bf16.msra.mxu1 %v14675_v48  ;;  %v18718_v48 = vsub.f32 %v18700_v37, %v2351_v57  ;;  %v18730_v26 = vsub.f32 %v2286_v20, %v2402_v14  ;;  %v18732_v45 = vsub.f32 %v2287_v60, %v2405_v40  ;;  %v18740_v54 = vsub.f32 %v2270_v33, %v2354_v31 }
 0x41c   : > { %14678 = vmatprep.subr.bf16.mxu1 %v14677_v22  ;;  %v23261_v53 = vand.u32 4294901760, %v18707_v62 }
 0x41d   : > { %v23272_v24 = vand.u32 4294901760, %v18718_v48  ;;  %v23274_v20 = vand.u32 4294901760, %v18732_v45  ;;  %v23273_v32 = vand.u32 4294901760, %v18740_v54 }
 0x41e   : > { %v2623_v37 = vsub.f32 %v18707_v62, %v23261_v53 }
 0x41f   : > { %14680 = vmatpush3.bf16.msra.mxu1 %v14679_v44  ;;  %v18712_v44 = vsub.f32 %v18694_v59, %v23250_v29  ;;  %v2518_v4 = vsub.f32 %v18718_v48, %v23272_v24  ;;  %v23880_v24 = vand.u32 4294901760, %v18556_v42 }
 0x420   : > { %14682 = vmatprep.subr.bf16.mxu1 %v14681_v21  ;;  %v2271_v21 = vld [vmem:[#allocation9 + $0x78] sm:$0xff]  ;;  %v2624_v53 = vand.u32 4294901760, %v2623_v37  ;;  %v23882_v37 = vand.u32 4294901760, %v18570_v18 }
 0x421   : > { %v23264_v22 = vand.u32 4294901760, %v18712_v44  ;;  %v2357_v41 = vand.u32 4294901760, %v2271_v21  ;;  %v2519_v50 = vand.u32 4294901760, %v2518_v4  ;;  %v18752_v33 = vpack.c.bf16 %v23880_v24, %v23879_v7 }
 0x422   : > { %v23881_v4 = vand.u32 4294901760, %v18568_v27  ;;  %v2525_v7 = vsub.f32 %v18740_v54, %v23273_v32  ;;  %v23886_v32 = vand.u32 4294901760, %v18602_v51 }
 0x423   : > { %14684 = vmatpush3.bf16.msra.mxu1 %v14683_v3  ;;  %v23269_v3 = vand.u32 4294901760, %v18715_v47  ;;  %v2630_v29 = vsub.f32 %v18712_v44, %v23264_v22  ;;  %v18742_v28 = vsub.f32 %v2271_v21, %v2357_v41  ;;  %v23275_v22 = vand.u32 4294901760, %v18730_v26  ;;  %14646 = vmatprep.subr.bf16.mxu0 %v18752_v33 }
 0x424   : > { %v2526_v27 = vand.u32 4294901760, %v2525_v7 }
 0x425   : > { %v2511_v30 = vsub.f32 %v18715_v47, %v23269_v3  ;;  %v2631_v43 = vand.u32 4294901760, %v2630_v29  ;;  %v2637_v29 = vsub.f32 %v18730_v26, %v23275_v22  ;;  %v18764_v3 = vpack.c.bf16 %v23882_v37, %v23881_v4 }
 0x426   : > { %v23883_v42 = vand.u32 4294901760, %v18742_v28 }
 0x427   : > { %v2512_v60 = vand.u32 4294901760, %v2511_v30  ;;  %v14685_v21 = vpack.c.bf16 %v2631_v43, %v2624_v53  ;;  %v2644_v30 = vsub.f32 %v18732_v45, %v23274_v20  ;;  %v2638_v24 = vand.u32 4294901760, %v2637_v29  ;;  %14648 = vmatpush3.bf16.msra.mxu0 %v18764_v3  ;;  %v923_v29 = vld [vmem:[#allocation3] sm:$0xff] }
 0x428   : > { %v2532_v43 = vsub.f32 %v18742_v28, %v23883_v42  ;;  %v23887_v42 = vand.u32 4294901760, %v18604_v63  ;;  %v18805_v63 = vpack.c.bf16 %v2405_v40, %v2402_v14  ;;  %v14719_v14 = vpack.c.bf16 %v18718_v48, %v18715_v47 }
 0x429   : > { %v14687_v16 = vpack.c.bf16 %v2519_v50, %v2512_v60  ;;  %14686 = vmatprep.subr.bf16.mxu1 %v14685_v21  ;;  %v2645_v53 = vand.u32 4294901760, %v2644_v30  ;;  %v23884_v50 = vand.u32 4294901760, %v18580_v46  ;;  %v23885_v60 = vand.u32 4294901760, %v18582_v5 }
 0x42a   : > { %v2533_v18 = vand.u32 4294901760, %v2532_v43  ;;  %v18784_v20 = vpack.c.bf16 %v23887_v42, %v23886_v32  ;;  %v18788_v46 = vand.u32 4294901760, %v923_v29  ;;  %v23889_v5 = vand.u32 4294901760, %v18692_v38  ;;  %v11300_v43 = vld [vmem:[%s23893_s9] ss:$0 sm:$0xff] }
 0x42b   : > { %14688 = vmatpush3.bf16.msra.mxu1 %v14687_v16  ;;  %v18778_v4 = vpack.c.bf16 %v23885_v60, %v23884_v50  ;;  %v14689_v37 = vpack.c.bf16 %v2645_v53, %v2638_v24  ;;  %v23890_v30 = vand.u32 4294901760, %v18694_v59  ;;  %v18797_v32 = vpack.c.bf16 %v2351_v57, %v2348_v19  ;;  %v16845_v60 = vld [vmem:[#allocation2] sm:$0xff] }
 0x42c   : > { %v14691_v21 = vpack.c.bf16 %v2533_v18, %v2526_v27  ;;  %23888 = vst [vmem:[#allocation52_spill] sm:$0xff] %v18788_v46  ;;  %2648 = vmatprep.mubr.f32.mxu1 %v18788_v46  ;;  %v18803_v51 = vsub.f32 %v923_v29, %v18788_v46  ;;  %v18807_v38 = vpack.c.bf16 %v2357_v41, %v2354_v31  ;;  %v2253_v53 = vstv %s921_s17  ;;  %v23904_v41 = vld [vmem:[#allocation51_spill] sm:$0xff] }
 0x42d   : > { %14650 = vmatprep.subr.bf16.mxu0 %v18778_v4  ;;  %14690 = vmatprep.subr.bf16.mxu1 %v14689_v37  ;;  %v18794_v16 = vpack.c.bf16 %v23890_v30, %v23889_v5  ;;  %v14693_v57 = vpack.c.bf16 %v18370_v0, %v18368_v35  ;;  %v14717_v31 = vpack.c.bf16 %v18712_v44, %v18707_v62 }
 0x42e   : > { %14652 = vmatpush3.bf16.msra.mxu0 %v18784_v20  ;;  %v18810_v59 = vand.u32 4294901760, %v18803_v51  ;;  %v14721_v40 = vpack.c.bf16 %v18732_v45, %v18730_v26  ;;  %v14695_v30 = vpack.c.bf16 %v18374_v1, %v18372_v2 }
 0x42f   : > { %14692 = vmatpush3.bf16.msra.mxu1 %v14691_v21  ;;  %14654 = vmatprep.subr.bf16.mxu0 %v18794_v16 }
 0x430   : > { %14726 = vmatprep.subr.bf16.mxu1 %v18390_v61  ;;  %23892 = vst [vmem:[#allocation53_spill] sm:$0xff] %v18810_v59  ;;  %v2410_v19 = vsub.f32 %v18803_v51, %v18810_v59 }
 0x432   : > { %14656 = vmatpush3.bf16.msra.mxu0 %v18797_v32  ;;  %v18818_v7 = vand.u32 4294901760, %v2410_v19 }
 0x433   : > { %14658 = vmatprep.subr.bf16.mxu0 %v18805_v63 }
 0x434   : > { %2412 = vmatprep.mubr.f32.mxu0 %v18818_v7 }
 0x436   : > { %14660 = vmatpush3.bf16.msra.mxu0 %v18807_v38 }
 0x437   : > { %14694 = vmatprep.subr.bf16.mxu0 %v14693_v57  ;;  %v14697_v57 = vpack.c.bf16 %v18378_v56, %v18376_v34 }
 0x4e1   : > { %v2249_v24 = vpop.f32.mrb[0].mxu1 }
 0x4e2   : > { %v16502_v27 = vadd.f32 %v11300_v43, %v2249_v24  ;;  %v13290_v18 = vpop.f32.mrb[1].mxu1  ;;  %v14699_v43 = vpack.c.bf16 %v18388_v11, %v18382_v52  ;;  %v14701_v24 = vpack.c.bf16 %v18401_v58, %v18399_v55 }
 0x4e3   : > { %v14707_v18 = vpack.c.bf16 %v18428_v12, %v18425_v8 }
 0x4e4   : > { %v2254_v50 = vmul.f32 %v16502_v27, %v2253_v53  ;;  %v14703_v53 = vpack.c.bf16 %v18408_v9, %v18404_v15  ;;  %v14705_v27 = vpack.c.bf16 %v18419_v49, %v18414_v36 }
 0x4e6   : > { %v18833_v37 = vadd.f32 %v16845_v60, %v2254_v50  ;;  %v23897_v50 = vld [vmem:[#allocation44_spill] sm:$0xff]  ;;  %v23898_v60 = vld [vmem:[#allocation45_spill] sm:$0xff] }
 0x4e8   : > { %23894 = vst [vmem:[#allocation54_spill] sm:$0xff] %v18833_v37  ;;  %v18836_v42 = vand.u32 4294901760, %v18833_v37 }
 0x4ea   : > { %23895 = vst [vmem:[#allocation55_spill] sm:$0xff] %v18836_v42  ;;  %2650 = vmatmul.mubr.f32.vlgmr.msra.gmra.mrb[2].mxu1 %v18836_v42  ;;  %v18841_v21 = vsub.f32 %v18833_v37, %v18836_v42 }
 0x4eb   : > { %14728 = vmatpush3.bf16.msra.mxu1 %v18396_v6  ;;  %2892 = vmatprep.mubr.f32.mxu1 %v18810_v59  ;;  %v19795_v59 = vld [vmem:[#allocation12 + $0x100] sm:$0xff] }
 0x4ec   : > { %14730 = vmatprep.subr.bf16.mxu1 %v18406_v23  ;;  %v18847_v29 = vand.u32 4294901760, %v18841_v21 }
 0x4ee   : > { %23896 = vst [vmem:[#allocation56_spill] sm:$0xff] %v18847_v29  ;;  %v2416_v5 = vsub.f32 %v18841_v21, %v18847_v29 }
 0x4ef   : > { %14732 = vmatpush3.bf16.msra.mxu1 %v18416_v17 }
 0x4f0   : > { %14734 = vmatprep.subr.bf16.mxu1 %v18430_v13  ;;  %v18855_v19 = vand.u32 4294901760, %v2416_v5  ;;  %v14709_v5 = vpack.c.bf16 %v23898_v60, %v23897_v50 }
 0x4f2   : > { %2418 = vmatmul.mubr.f32.vlgmr.msra.gmra.mrb[2].mxu0 %v18855_v19 }
 0x4f3   : > { %14696 = vmatpush3.bf16.msra.mxu0 %v14695_v30  ;;  %14736 = vmatpush3.bf16.msra.mxu1 %v18436_v39  ;;  %v23899_v30 = vld [vmem:[#allocation46_spill] sm:$0xff] }
 0x4f4   : > { %14698 = vmatprep.subr.bf16.mxu0 %v14697_v57  ;;  %14738 = vmatprep.subr.bf16.mxu1 %v18440_v10  ;;  %v23900_v57 = vld [vmem:[#allocation47_spill] sm:$0xff] }
 0x4f5   : > { %2785 = vmatprep.mubr.f32.mxu0 %v18803_v51 }
 0x4f7   : > { %14700 = vmatpush3.bf16.msra.mxu0 %v14699_v43  ;;  %14740 = vmatpush3.bf16.msra.mxu1 %v18446_v25  ;;  %v14711_v43 = vpack.c.bf16 %v23900_v57, %v23899_v30 }
 0x4f8   : > { %14702 = vmatprep.subr.bf16.mxu0 %v14701_v24  ;;  %14742 = vmatprep.subr.bf16.mxu1 %v18752_v33  ;;  %v23901_v24 = vld [vmem:[#allocation48_spill] sm:$0xff] }
 0x4fb   : > { %14704 = vmatpush3.bf16.msra.mxu0 %v14703_v53  ;;  %14744 = vmatpush3.bf16.msra.mxu1 %v18764_v3  ;;  %v23902_v53 = vld [vmem:[#allocation49_spill] sm:$0xff] }
 0x4fc   : > { %14706 = vmatprep.subr.bf16.mxu0 %v14705_v27  ;;  %14746 = vmatprep.subr.bf16.mxu1 %v18778_v4  ;;  %v14713_v22 = vpack.c.bf16 %v23902_v53, %v23901_v24  ;;  %v23903_v27 = vld [vmem:[#allocation50_spill] sm:$0xff] }
 0x4fd   : > { %v14715_v37 = vpack.c.bf16 %v23904_v41, %v23903_v27 }
 0x4ff   : > { %14708 = vmatpush3.bf16.msra.mxu0 %v14707_v18  ;;  %14748 = vmatpush3.bf16.msra.mxu1 %v18784_v20  ;;  %v23905_v18 = vand.u32 4294901760, %v18368_v35  ;;  %v23911_v35 = vand.u32 4294901760, %v18378_v56  ;;  %v23916_v56 = vand.u32 4294901760, %v18404_v15  ;;  %v23923_v15 = vand.u32 4294901760, %v23898_v60 }
 0x500   : > { %14710 = vmatprep.subr.bf16.mxu0 %v14709_v5  ;;  %14750 = vmatprep.subr.bf16.mxu1 %v18794_v16 }
 0x503   : > { %14712 = vmatpush3.bf16.msra.mxu0 %v14711_v43  ;;  %14752 = vmatpush3.bf16.msra.mxu1 %v18797_v32  ;;  %v23932_v43 = vand.u32 4294901760, %v18715_v47  ;;  %v23938_v47 = vand.u32 4294901760, %v18742_v28 }
 0x504   : > { %14714 = vmatprep.subr.bf16.mxu0 %v14713_v22  ;;  %14754 = vmatprep.subr.bf16.mxu1 %v18805_v63  ;;  %v23906_v22 = vand.u32 4294901760, %v18370_v0 }
 0x506   : > { %v14757_v5 = vpack.c.bf16 %v23906_v22, %v23905_v18  ;;  %v2289_v18 = vld [vmem:[#allocation9 + $0x108] sm:$0xff] }
 0x507   : > { %14716 = vmatpush3.bf16.msra.mxu0 %v14715_v37  ;;  %14756 = vmatpush3.bf16.msra.mxu1 %v18807_v38  ;;  %v3177_v22 = vand.u32 4294901760, %v2289_v18 }
 0x508   : > { %14718 = vmatprep.subr.bf16.mxu0 %v14717_v31  ;;  %14790 = vmatprep.subr.bf16.mxu1 %v18390_v61  ;;  %v23907_v31 = vpack.c.bf16 %v18742_v28, %v18740_v54  ;;  %v23908_v61 = vand.u32 4294901760, %v18372_v2  ;;  %v23913_v2 = vand.u32 4294901760, %v18388_v11  ;;  %v23918_v11 = vand.u32 4294901760, %v18414_v36 }
 0x509   : > { %v23924_v36 = vand.u32 4294901760, %v23899_v30  ;;  %v23930_v30 = vand.u32 4294901760, %v18707_v62  ;;  %v23936_v62 = vmov 0.0|0.0  }
 0x50a   : > { %2896 = vmatmul.mubr.f32.vlgmr.msra.gmra.mrb[4].mxu1 %v18847_v29 }
 0x50b   : > { %14720 = vmatpush3.bf16.msra.mxu0 %v14719_v14  ;;  %14792 = vmatpush3.bf16.msra.mxu1 %v18396_v6  ;;  %v23909_v6 = vand.u32 4294901760, %v18374_v1  ;;  %v23914_v1 = vand.u32 4294901760, %v18399_v55  ;;  %v23919_v55 = vand.u32 4294901760, %v18419_v49  ;;  %v23925_v49 = vand.u32 4294901760, %v23900_v57 }
 0x50c   : > { %14722 = vmatprep.subr.bf16.mxu0 %v14721_v40  ;;  %14794 = vmatprep.subr.bf16.mxu1 %v18406_v23  ;;  %v23910_v23 = vand.u32 4294901760, %v18376_v34  ;;  %v23915_v34 = vand.u32 4294901760, %v18401_v58  ;;  %v23920_v58 = vand.u32 4294901760, %v18425_v8  ;;  %v23926_v8 = vand.u32 4294901760, %v23901_v24 }
 0x50d   : > { %3166 = vmatprep.mubr.f32.mxu1 %v18788_v46  ;;  %v14759_v14 = vpack.c.bf16 %v23909_v6, %v23908_v61 }
 0x50e   : > { %v14761_v0 = vpack.c.bf16 %v23911_v35, %v23910_v23 }
 0x50f   : > { %14724 = vmatpush3.bf16.msra.mxu0 %v23907_v31  ;;  %14796 = vmatpush3.bf16.msra.mxu1 %v18416_v17  ;;  %v23912_v17 = vand.u32 4294901760, %v18382_v52  ;;  %v23917_v52 = vand.u32 4294901760, %v18408_v9  ;;  %v23922_v9 = vand.u32 4294901760, %v23897_v50  ;;  %v23928_v50 = vand.u32 4294901760, %v23903_v27 }
 0x510   : > { %14758 = vmatprep.subr.bf16.mxu0 %v14757_v5  ;;  %14798 = vmatprep.subr.bf16.mxu1 %v18430_v13  ;;  %v14765_v13 = vpack.c.bf16 %v23915_v34, %v23914_v1  ;;  %v23939_v5 = vmov 0.0   ;;  %v2296_v34 = vld [vmem:[#allocation9 + $0x140] sm:$0xff] }
 0x511   : > { %v14763_v40 = vpack.c.bf16 %v23913_v2, %v23912_v17  ;;  %v2295_v17 = vld [vmem:[#allocation9 + $0x138] sm:$0xff] }
 0x512   : > { %2788 = vmatmul.mubr.f32.vlgmr.msra.gmra.mrb[4].mxu0 %v18841_v21  ;;  %v3195_v1 = vand.u32 4294901760, %v2295_v17 }
 0x513   : > { %14760 = vmatpush3.bf16.msra.mxu0 %v14759_v14  ;;  %14800 = vmatpush3.bf16.msra.mxu1 %v18436_v39  ;;  %v14767_v39 = vpack.c.bf16 %v23917_v52, %v23916_v56  ;;  %v2292_v14 = vld [vmem:[#allocation9 + $0x120] sm:$0xff]  ;;  %v3198_v52 = vand.u32 4294901760, %v2296_v34 }
 0x514   : > { %14762 = vmatprep.subr.bf16.mxu0 %v14761_v0  ;;  %14802 = vmatprep.subr.bf16.mxu1 %v18440_v10  ;;  %v14769_v10 = vpack.c.bf16 %v23919_v55, %v23918_v11  ;;  %v3186_v23 = vand.u32 4294901760, %v2292_v14  ;;  %v2294_v0 = vld [vmem:[#allocation9 + $0x130] sm:$0xff]  ;;  %v2299_v55 = vld [vmem:[#allocation9 + $0x158] sm:$0xff] }
 0x515   : > { %3062 = vmatprep.mubr.f32.mxu0 %v18788_v46  ;;  %v2298_v11 = vld [vmem:[#allocation9 + $0x150] sm:$0xff] }
 0x517   : > { %14764 = vmatpush3.bf16.msra.mxu0 %v14763_v40  ;;  %14804 = vmatpush3.bf16.msra.mxu1 %v18446_v25  ;;  %v23921_v25 = vand.u32 4294901760, %v18428_v12  ;;  %v23927_v12 = vand.u32 4294901760, %v23902_v53  ;;  %v23935_v53 = vand.u32 4294901760, %v18732_v45  ;;  %v2290_v45 = vld [vmem:[#allocation9 + $0x110] sm:$0xff]  ;;  %v3192_v40 = vand.u32 4294901760, %v2294_v0 }
 0x518   : > { %14766 = vmatprep.subr.bf16.mxu0 %v14765_v13  ;;  %14806 = vmatprep.subr.bf16.mxu1 %v18752_v33  ;;  %v14773_v33 = vpack.c.bf16 %v23923_v15, %v23922_v9  ;;  %v3180_v61 = vand.u32 4294901760, %v2290_v45  ;;  %v2297_v13 = vld [vmem:[#allocation9 + $0x148] sm:$0xff]  ;;  %v3204_v15 = vand.u32 4294901760, %v2298_v11 }
 0x519   : > { %v14771_v37 = vpack.c.bf16 %v23921_v25, %v23920_v58  ;;  %v18996_v56 = vpack.c.bf16 %v3195_v1, %v3192_v40 }
 0x51b   : > { %14768 = vmatpush3.bf16.msra.mxu0 %v14767_v39  ;;  %14808 = vmatpush3.bf16.msra.mxu1 %v18764_v3  ;;  %v14775_v3 = vpack.c.bf16 %v23925_v49, %v23924_v36  ;;  %v3201_v39 = vand.u32 4294901760, %v2297_v13  ;;  %v19010_v36 = vld [vmem:[#allocation9 + $0x160] sm:$0xff]  ;;  %v19012_v49 = vld [vmem:[#allocation9 + $0x168] sm:$0xff] }
 0x51c   : > { %14770 = vmatprep.subr.bf16.mxu0 %v14769_v10  ;;  %14810 = vmatprep.subr.bf16.mxu1 %v18778_v4  ;;  %v14777_v4 = vpack.c.bf16 %v23927_v12, %v23926_v8  ;;  %v23940_v10 = vld [vmem:[#allocation43_spill] sm:$0xff]  ;;  %v19018_v8 = vsub.f32 %v2290_v45, %v3180_v61 }
 0x51d   : > { %v19000_v58 = vand.u32 4294901760, %v23940_v10  ;;  %v19007_v9 = vpack.c.bf16 %v3201_v39, %v3198_v52 }
 0x51f   : > { %14772 = vmatpush3.bf16.msra.mxu0 %v14771_v37  ;;  %14812 = vmatpush3.bf16.msra.mxu1 %v18784_v20  ;;  %v23929_v20 = vand.u32 4294901760, %v23904_v41  ;;  %v23934_v41 = vand.u32 4294901760, %v18730_v26  ;;  %v2291_v26 = vld [vmem:[#allocation9 + $0x118] sm:$0xff]  ;;  %23941 = vst [vmem:[#allocation44_spill] sm:$0xff] %v19000_v58  ;;  %v19004_v37 = vsub.f32 %v2289_v18, %v3177_v22 }
 0x520   : > { %14774 = vmatprep.subr.bf16.mxu0 %v14773_v33  ;;  %14814 = vmatprep.subr.bf16.mxu1 %v18794_v16  ;;  %v23931_v16 = vand.u32 4294901760, %v18712_v44  ;;  %v23937_v44 = vand.u32 4294901760, %v18740_v54  ;;  %v3183_v6 = vand.u32 4294901760, %v2291_v26  ;;  %v2293_v54 = vld [vmem:[#allocation9 + $0x128] sm:$0xff]  ;;  %v3207_v33 = vand.u32 4294901760, %v2299_v55 }
 0x521   : > { %v14779_v60 = vpack.c.bf16 %v23929_v20, %v23928_v50  ;;  %v14785_v27 = vpack.c.bf16 %v23935_v53, %v23934_v41  ;;  %v3189_v35 = vand.u32 4294901760, %v2293_v54  ;;  %v3274_v50 = vand.u32 4294901760, %v19004_v37 }
 0x522   : > { %v14781_v57 = vpack.c.bf16 %v23931_v16, %v23930_v30  ;;  %v18986_v28 = vpack.c.bf16 %v3183_v6, %v3180_v61  ;;  %v19020_v12 = vsub.f32 %v2291_v26, %v3183_v6  ;;  %v19025_v20 = vpack.c.bf16 %v3207_v33, %v3204_v15  ;;  %v2302_v16 = vld [vmem:[#allocation9 + $0x170] sm:$0xff] }
 0x523   : > { %14776 = vmatpush3.bf16.msra.mxu0 %v14775_v3  ;;  %14816 = vmatpush3.bf16.msra.mxu1 %v18797_v32  ;;  %v23933_v32 = vand.u32 4294901760, %v18718_v48  ;;  %v18992_v2 = vpack.c.bf16 %v3189_v35, %v3186_v23  ;;  %v19016_v3 = vsub.f32 %v23940_v10, %v19000_v58  ;;  %v3213_v30 = vand.u32 4294901760, %v19012_v49 }
 0x524   : > { %14778 = vmatprep.subr.bf16.mxu0 %v14777_v4  ;;  %14818 = vmatprep.subr.bf16.mxu1 %v18805_v63  ;;  %v2288_v63 = vld [vmem:[#allocation9 + $0x100] sm:$0xff]  ;;  %v3275_v41 = vsub.f32 %v19004_v37, %v3274_v50  ;;  %v3281_v53 = vand.u32 4294901760, %v19018_v8  ;;  %v19062_v6 = vsub.f32 %v2295_v17, %v3195_v1 }
 0x525   : > { %v14783_v24 = vpack.c.bf16 %v23933_v32, %v23932_v43  ;;  %v3174_v48 = vand.u32 4294901760, %v2288_v63  ;;  %23942 = vst [vmem:[#allocation45_spill] sm:$0xff] %v19016_v3  ;;  %v19032_v43 = vsub.f32 %v2292_v14, %v3186_v23  ;;  %v19035_v32 = vand.u32 4294901760, %v19016_v3 }
 0x526   : > { %v3276_v45 = vand.u32 4294901760, %v3275_v41  ;;  %v3282_v26 = vsub.f32 %v19018_v8, %v3281_v53 }
 0x527   : > { %14780 = vmatpush3.bf16.msra.mxu0 %v14779_v60  ;;  %14820 = vmatpush3.bf16.msra.mxu1 %v18807_v38  ;;  %v14787_v38 = vpack.c.bf16 %v23938_v47, %v23937_v44  ;;  %v18981_v31 = vpack.c.bf16 %v3177_v22, %v3174_v48  ;;  %v19002_v25 = vsub.f32 %v2288_v63, %v3174_v48  ;;  %v3210_v60 = vand.u32 4294901760, %v19010_v36 }
 0x528   : > { %14782 = vmatprep.subr.bf16.mxu0 %v14781_v57  ;;  %14965 = vmatprep.subr.bf16.mxu1 %v23936_v62  ;;  %v19030_v57 = vld [vmem:[#allocation9 + $0x178] sm:$0xff]  ;;  %23943 = vst [vmem:[#allocation46_spill] sm:$0xff] %v19035_v32  ;;  %v19045_v63 = vsub.f32 %v2293_v54, %v3189_v35  ;;  %v3216_v44 = vand.u32 4294901760, %v2302_v16  ;;  %v3257_v48 = vsub.f32 %v19016_v3, %v19035_v32  ;;  %v3295_v54 = vand.u32 4294901760, %v19032_v43 }
 0x529   : > { %v3267_v4 = vand.u32 4294901760, %v19002_v25  ;;  %v19048_v18 = vpack.c.bf16 %v3213_v30, %v3210_v60  ;;  %v3219_v47 = vand.u32 4294901760, %v19030_v57  ;;  %v19070_v35 = vsub.f32 %v2296_v34, %v3198_v52 }
 0x52a   : > { %3168 = vmatmul.mubr.f32.vlgmr.msra.gmra.mrb[6].mxu1 %v18836_v42  ;;  %v23278_v23 = vand.u32 4294901760, %v19045_v63  ;;  %v3296_v1 = vsub.f32 %v19032_v43, %v3295_v54  ;;  %v19086_v52 = vsub.f32 %v2298_v11, %v3204_v15 }
 0x52b   : > { %14784 = vmatpush3.bf16.msra.mxu0 %v14783_v24  ;;  %13533 = vmatprep.mubr.msk.f32.mxu1 %vm17371_vm0, %v23939_v5  ;;  %v3268_v24 = vsub.f32 %v19002_v25, %v3267_v4  ;;  %v19065_v14 = vpack.c.bf16 %v3219_v47, %v3216_v44 }
 0x52c   : > { %14786 = vmatprep.subr.bf16.mxu0 %v14785_v27  ;;  %v3288_v27 = vand.u32 4294901760, %v19020_v12  ;;  %v3303_v41 = vsub.f32 %v19045_v63, %v23278_v23 }
 0x52d   : > { %v3269_v22 = vand.u32 4294901760, %v3268_v24  ;;  %v3283_v24 = vand.u32 4294901760, %v3282_v26  ;;  %v3297_v26 = vand.u32 4294901760, %v3296_v1 }
 0x52e   : > { %v3289_v61 = vsub.f32 %v19020_v12, %v3288_v27 }
 0x52f   : > { %14788 = vmatpush3.bf16.msra.mxu0 %v14787_v38  ;;  %v19052_v38 = vsub.f32 %v2294_v0, %v3192_v40  ;;  %v19072_v0 = vsub.f32 %v2297_v13, %v3201_v39  ;;  %v19074_v40 = vand.u32 4294901760, %v3257_v48  ;;  %v14846_v10 = vpack.c.bf16 %v3276_v45, %v3269_v22 }
 0x530   : > { %14821 = vmatprep.subr.bf16.mxu0 %v23936_v62  ;;  %v3290_v17 = vand.u32 4294901760, %v3289_v61  ;;  %v23280_v13 = vand.u32 4294901760, %v19062_v6  ;;  %v19088_v39 = vsub.f32 %v2299_v55, %v3207_v33  ;;  %v23279_v22 = vand.u32 4294901760, %v19070_v35 }
 0x531   : > { %23944 = vst [vmem:[#allocation47_spill] sm:$0xff] %v19074_v40  ;;  %v23282_v34 = vand.u32 4294901760, %v19052_v38  ;;  %v23281_v45 = vand.u32 4294901760, %v19072_v0  ;;  %v3304_v61 = vand.u32 4294901760, %v3303_v41  ;;  %v19103_v55 = vsub.f32 %v19010_v36, %v3210_v60 }
 0x532   : > { %3064 = vmatmul.mubr.f32.vlgmr.msra.gmra.mrb[6].mxu0 %v18836_v42  ;;  %v14849_v48 = vpack.c.bf16 %v3290_v17, %v3283_v24  ;;  %v3317_v11 = vsub.f32 %v19062_v6, %v23280_v13  ;;  %v3324_v15 = vsub.f32 %v19070_v35, %v23279_v22  ;;  %v3344_v24 = vand.u32 4294901760, %v19088_v39 }
 0x533   : > { %14823 = vmatpush3.bf16.msra.mxu0 %v18981_v31  ;;  %13323 = vmatprep.mubr.msk.f32.mxu0 %vm17371_vm0, %v23939_v5  ;;  %v3310_v23 = vsub.f32 %v19052_v38, %v23282_v34  ;;  %v3331_v33 = vsub.f32 %v19072_v0, %v23281_v45  ;;  %v19114_v17 = vsub.f32 %v19012_v49, %v3213_v30 }
 0x534   : > { %14824 = vmatprep.subr.bf16.mxu0 %v23936_v62  ;;  %v14852_v1 = vpack.c.bf16 %v3304_v61, %v3297_v26  ;;  %v3318_v36 = vand.u32 4294901760, %v3317_v11  ;;  %v19117_v60 = vsub.f32 %v2302_v16, %v3216_v44  ;;  %v3325_v22 = vand.u32 4294901760, %v3324_v15 }
 0x535   : > { %v3311_v41 = vand.u32 4294901760, %v3310_v23  ;;  %v3332_v13 = vand.u32 4294901760, %v3331_v33  ;;  %v3345_v34 = vsub.f32 %v19088_v39, %v3344_v24  ;;  %v19126_v49 = vsub.f32 %v19030_v57, %v3219_v47 }
 0x536   : > { %v3351_v23 = vand.u32 4294901760, %v19103_v55  ;;  %v3358_v16 = vand.u32 4294901760, %v19114_v17  ;;  %v3365_v47 = vand.u32 4294901760, %v19117_v60 }
 0x537   : > { %14826 = vmatpush3.bf16.msra.mxu0 %v18986_v28  ;;  %v14855_v30 = vpack.c.bf16 %v3318_v36, %v3311_v41  ;;  %v14858_v44 = vpack.c.bf16 %v3332_v13, %v3325_v22  ;;  %v3346_v26 = vand.u32 4294901760, %v3345_v34  ;;  %v3372_v11 = vand.u32 4294901760, %v19126_v49 }
 0x538   : > { %14827 = vmatprep.subr.bf16.mxu0 %v23936_v62  ;;  %v3352_v61 = vsub.f32 %v19103_v55, %v3351_v23  ;;  %v3359_v57 = vsub.f32 %v19114_v17, %v3358_v16  ;;  %v3366_v34 = vsub.f32 %v19117_v60, %v3365_v47 }
 0x53a   : > { %v3353_v13 = vand.u32 4294901760, %v3352_v61  ;;  %v3360_v22 = vand.u32 4294901760, %v3359_v57  ;;  %v14882_v61 = vpack.c.bf16 %v19072_v0, %v19070_v35  ;;  %v14885_v57 = vpack.c.bf16 %v19088_v39, %v19086_v52 }
 0x53b   : > { %14829 = vmatpush3.bf16.msra.mxu0 %v18992_v2  ;;  %v14939_v39 = vpack.c.bf16 %v3372_v11, %v3365_v47 }
 0x53c   : > { %14830 = vmatprep.subr.bf16.mxu0 %v23936_v62  ;;  %v14864_v33 = vpack.c.bf16 %v3360_v22, %v3353_v13  ;;  %v14891_v13 = vpack.c.bf16 %v19126_v49, %v19117_v60  ;;  %v14918_v22 = vpack.c.bf16 %v3274_v50, %v3267_v4  ;;  %v23946_v4 = vand.u32 4294901760, %v19052_v38  ;;  %v19255_v60 = vld [vmem:[#allocation12 + $0x80] sm:$0xff] }
 0x53f   : > { %14832 = vmatpush3.bf16.msra.mxu0 %v18996_v56 }
 0x540   : > { %14833 = vmatprep.subr.bf16.mxu0 %v23936_v62 }
 0x543   : > { %14835 = vmatpush3.bf16.msra.mxu0 %v19007_v9 }
 0x544   : > { %14836 = vmatprep.subr.bf16.mxu0 %v23936_v62 }
 0x547   : > { %14838 = vmatpush3.bf16.msra.mxu0 %v19025_v20 }
 0x548   : > { %14839 = vmatprep.subr.bf16.mxu0 %v23936_v62 }
 0x54b   : > { %14841 = vmatpush3.bf16.msra.mxu0 %v19048_v18 }
 0x54c   : > { %14842 = vmatprep.subr.bf16.mxu0 %v23936_v62 }
 0x54f   : > { %14844 = vmatpush3.bf16.msra.mxu0 %v19065_v14 }
 0x550   : > { %14845 = vmatprep.subr.bf16.mxu0 %v23936_v62 }
 0x552   : > { %13324 = vmatmul.mubr.f32.vlgmr.msra.gmra.mrb[8].mxu0 %v19074_v40 }
 0x553   : > { %14847 = vmatpush3.bf16.msra.mxu0 %v14846_v10  ;;  %13358 = vmatprep.mubr.msk.f32.mxu0 %vm17371_vm0, %v23939_v5  ;;  %v3337_v10 = vand.u32 4294901760, %v19086_v52 }
 0x554   : > { %14848 = vmatprep.subr.bf16.mxu0 %v23936_v62 }
 0x555   : > { %v3338_v45 = vsub.f32 %v19086_v52, %v3337_v10 }
 0x557   : > { %14850 = vmatpush3.bf16.msra.mxu0 %v14849_v48  ;;  %v3339_v48 = vand.u32 4294901760, %v3338_v45  ;;  %v3373_v45 = vsub.f32 %v19126_v49, %v3372_v11  ;;  %v19267_v11 = vld [vmem:[#allocation12 + $0x90] sm:$0xff] }
 0x558   : > { %14851 = vmatprep.subr.bf16.mxu0 %v23936_v62 }
 0x559   : > { %v14861_v15 = vpack.c.bf16 %v3346_v26, %v3339_v48  ;;  %v3374_v41 = vand.u32 4294901760, %v3373_v45  ;;  %v14876_v48 = vpack.c.bf16 %v19045_v63, %v19032_v43  ;;  %v14879_v26 = vpack.c.bf16 %v19062_v6, %v19052_v38 }
 0x55a   : > { %v23948_v45 = vand.u32 4294901760, %v19070_v35  ;;  %v23949_v43 = vand.u32 4294901760, %v19072_v0  ;;  %v14933_v38 = vpack.c.bf16 %v3344_v24, %v3337_v10  ;;  %v14936_v0 = vpack.c.bf16 %v3358_v16, %v3351_v23  ;;  %v19263_v16 = vld [vmem:[#allocation12] sm:$0xff] }
 0x55b   : > { %14853 = vmatpush3.bf16.msra.mxu0 %v14852_v1  ;;  %v3367_v1 = vand.u32 4294901760, %v3366_v34  ;;  %v14921_v34 = vpack.c.bf16 %v3288_v27, %v3281_v53  ;;  %v23304_v23 = vand.u32 4294901760, %v19255_v60 }
 0x55c   : > { %14854 = vmatprep.subr.bf16.mxu0 %v23936_v62 }
 0x55d   : > { %v14867_v36 = vpack.c.bf16 %v3374_v41, %v3367_v1  ;;  %v19269_v1 = vld [vmem:[#allocation12 + $0x98] sm:$0xff]  ;;  %v23300_v41 = vand.u32 4294901760, %v19263_v16 }
 0x55f   : > { %14856 = vmatpush3.bf16.msra.mxu0 %v14855_v30  ;;  %v14870_v30 = vpack.c.bf16 %v19004_v37, %v19002_v25  ;;  %v23945_v25 = vand.u32 4294901760, %v19045_v63  ;;  %v14930_v63 = vpack.c.bf16 %v23949_v43, %v23948_v45 }
 0x560   : > { %14857 = vmatprep.subr.bf16.mxu0 %v23936_v62 }
 0x561   : > { %v14924_v37 = vpack.c.bf16 %v23945_v25, %v3295_v54  ;;  %v11301_v54 = vld [vmem:[%s23950_s30] ss:$0 sm:$0xff] }
 0x563   : > { %14859 = vmatpush3.bf16.msra.mxu0 %v14858_v44  ;;  %v14873_v44 = vpack.c.bf16 %v19020_v12, %v19018_v8  ;;  %v23947_v8 = vand.u32 4294901760, %v19062_v6 }
 0x564   : > { %14860 = vmatprep.subr.bf16.mxu0 %v23936_v62 }
 0x565   : > { %v14927_v12 = vpack.c.bf16 %v23947_v8, %v23946_v4  ;;  %v19313_v4 = vld [vmem:[#allocation12 + $0x28] sm:$0xff]  ;;  %v19315_v8 = vld [vmem:[#allocation12 + $0xb0] sm:$0xff] }
 0x566   : > { %v23284_v43 = vand.u32 4294901760, %v19315_v8 }
 0x567   : > { %14862 = vmatpush3.bf16.msra.mxu0 %v14861_v15  ;;  %v14888_v15 = vpack.c.bf16 %v19114_v17, %v19103_v55 }
 0x568   : > { %14863 = vmatprep.subr.bf16.mxu0 %v23936_v62 }
 0x56b   : > { %14865 = vmatpush3.bf16.msra.mxu0 %v14864_v33 }
 0x56c   : > { %14866 = vmatprep.subr.bf16.mxu0 %v23936_v62 }
 0x56f   : > { %14868 = vmatpush3.bf16.msra.mxu0 %v14867_v36 }
 0x570   : > { %14869 = vmatprep.subr.bf16.mxu0 %v23936_v62 }
 0x572   : > { %13359 = vmatmul.mubr.f32.vlgmr.msra.gmra.mrb[8].mxu0 %v19000_v58 }
 0x573   : > { %14871 = vmatpush3.bf16.msra.mxu0 %v14870_v30  ;;  %13393 = vmatprep.mubr.msk.f32.mxu0 %vm17371_vm0, %v23939_v5 }
 0x574   : > { %14872 = vmatprep.subr.bf16.mxu0 %v23936_v62 }
 0x577   : > { %14874 = vmatpush3.bf16.msra.mxu0 %v14873_v44  ;;  %v23296_v44 = vand.u32 4294901760, %v19267_v11 }
 0x578   : > { %14875 = vmatprep.subr.bf16.mxu0 %v23936_v62 }
 0x57b   : > { %14877 = vmatpush3.bf16.msra.mxu0 %v14876_v48  ;;  %v23295_v48 = vand.u32 4294901760, %v19269_v1 }
 0x57c   : > { %14878 = vmatprep.subr.bf16.mxu0 %v23936_v62 }
 0x57f   : > { %14880 = vmatpush3.bf16.msra.mxu0 %v14879_v26  ;;  %v19285_v26 = vld [vmem:[#allocation12 + $0x10] sm:$0xff] }
 0x580   : > { %14881 = vmatprep.subr.bf16.mxu0 %v23936_v62 }
 0x583   : > { %14883 = vmatpush3.bf16.msra.mxu0 %v14882_v61  ;;  %v19289_v61 = vld [vmem:[#allocation12 + $0xa0] sm:$0xff] }
 0x584   : > { %14884 = vmatprep.subr.bf16.mxu0 %v23936_v62 }
 0x587   : > { %14886 = vmatpush3.bf16.msra.mxu0 %v14885_v57  ;;  %v19291_v57 = vld [vmem:[#allocation12 + $0xa8] sm:$0xff] }
 0x588   : > { %14887 = vmatprep.subr.bf16.mxu0 %v23936_v62  ;;  %v23289_v25 = vand.u32 4294901760, %v19291_v57 }
 0x58b   : > { %14889 = vmatpush3.bf16.msra.mxu0 %v14888_v15 }
 0x58c   : > { %14890 = vmatprep.subr.bf16.mxu0 %v23936_v62 }
 0x58f   : > { %14892 = vmatpush3.bf16.msra.mxu0 %v14891_v13  ;;  %v23292_v13 = vand.u32 4294901760, %v19285_v26 }
 0x590   : > { %14893 = vmatprep.subr.bf16.mxu0 %v23936_v62 }
 0x592   : > { %13394 = vmatmul.mubr.f32.vlgmr.msra.gmra.mrb[8].mxu0 %v19016_v3 }
 0x593   : > { %14895 = vmatpush3.bf16.msra.mxu0 %v18981_v31  ;;  %13428 = vmatprep.mubr.msk.f32.mxu0 %vm17371_vm0, %v23939_v5 }
 0x594   : > { %14896 = vmatprep.subr.bf16.mxu0 %v23936_v62 }
 0x597   : > { %14898 = vmatpush3.bf16.msra.mxu0 %v18986_v28 }
 0x598   : > { %14899 = vmatprep.subr.bf16.mxu0 %v23936_v62 }
 0x59b   : > { %14901 = vmatpush3.bf16.msra.mxu0 %v18992_v2 }
 0x59c   : > { %14902 = vmatprep.subr.bf16.mxu0 %v23936_v62 }
 0x59f   : > { %14904 = vmatpush3.bf16.msra.mxu0 %v18996_v56 }
 0x5a0   : > { %14905 = vmatprep.subr.bf16.mxu0 %v23936_v62 }
 0x5a3   : > { %14907 = vmatpush3.bf16.msra.mxu0 %v19007_v9 }
 0x5a4   : > { %14908 = vmatprep.subr.bf16.mxu0 %v23936_v62 }
 0x5a7   : > { %14910 = vmatpush3.bf16.msra.mxu0 %v19025_v20 }
 0x5a8   : > { %14911 = vmatprep.subr.bf16.mxu0 %v23936_v62 }
 0x5ab   : > { %14913 = vmatpush3.bf16.msra.mxu0 %v19048_v18 }
 0x5ac   : > { %14914 = vmatprep.subr.bf16.mxu0 %v23936_v62 }
 0x5af   : > { %14916 = vmatpush3.bf16.msra.mxu0 %v19065_v14 }
 0x5b0   : > { %14917 = vmatprep.subr.bf16.mxu0 %v23936_v62 }
 0x5b2   : > { %13429 = vmatmul.mubr.f32.vlgmr.msra.gmra.mrb[8].mxu0 %v19035_v32 }
 0x5b3   : > { %14919 = vmatpush3.bf16.msra.mxu0 %v14918_v22  ;;  %13463 = vmatprep.mubr.msk.f32.mxu0 %vm17371_vm0, %v23939_v5 }
 0x5b4   : > { %14920 = vmatprep.subr.bf16.mxu0 %v23936_v62 }
 0x5b7   : > { %14922 = vmatpush3.bf16.msra.mxu0 %v14921_v34  ;;  %v19307_v34 = vpack.c.bf16 %v23295_v48, %v23296_v44 }
 0x5b8   : > { %14923 = vmatprep.subr.bf16.mxu0 %v23936_v62 }
 0x5b9   : > { %23953 = vst [vmem:[#allocation50_spill] sm:$0xff] %v19307_v34 }
 0x5bb   : > { %14925 = vmatpush3.bf16.msra.mxu0 %v14924_v37  ;;  %v19311_v37 = vld [vmem:[#allocation12 + $0x20] sm:$0xff] }
 0x5bc   : > { %14926 = vmatprep.subr.bf16.mxu0 %v23936_v62 }
 0x5bd   : > { %v11588_v50 = vpop.f32.mrb[2].mxu1 }
 0x5be   : > { %v11589_v53 = vpop.f32.mrb[3].mxu1 }
 0x5bf   : > { %v11590_v27 = vadd.f32 %v11589_v53, %v11588_v50  ;;  %14928 = vmatpush3.bf16.msra.mxu0 %v14927_v12  ;;  %v19317_v12 = vld [vmem:[#allocation12 + $0xb8] sm:$0xff]  ;;  %v23286_v53 = vand.u32 4294901760, %v19311_v37 }
 0x5c0   : > { %14929 = vmatprep.subr.bf16.mxu0 %v23936_v62 }
 0x5c3   : > { %14931 = vmatpush3.bf16.msra.mxu0 %v14930_v63  ;;  %v23283_v63 = vand.u32 4294901760, %v19317_v12 }
 0x5c4   : > { %14932 = vmatprep.subr.bf16.mxu0 %v23936_v62 }
 0x5c5   : > { %v11553_v6 = vpop.f32.mrb[2].mxu0 }
 0x5c6   : > { %v11554_v33 = vpop.f32.mrb[3].mxu0 }
 0x5c7   : > { %v11555_v35 = vadd.f32 %v11554_v33, %v11553_v6  ;;  %14934 = vmatpush3.bf16.msra.mxu0 %v14933_v38  ;;  %v19339_v38 = vld [vmem:[#allocation12 + $0x30] sm:$0xff]  ;;  %v19341_v6 = vld [vmem:[#allocation12 + $0x38] sm:$0xff]  ;;  %v19345_v33 = vld [vmem:[#allocation12 + $0xc8] sm:$0xff] }
 0x5c8   : > { %14935 = vmatprep.subr.bf16.mxu0 %v23936_v62 }
 0x5c9   : > { %v2420_v52 = vadd.f32 %v11555_v35, %v11301_v54  ;;  %v19343_v54 = vld [vmem:[#allocation12 + $0xc0] sm:$0xff]  ;;  %v23288_v35 = vand.u32 4294901760, %v19339_v38 }
 0x5cb   : > { %14937 = vmatpush3.bf16.msra.mxu0 %v14936_v0  ;;  %v2652_v10 = vadd.f32 %v11590_v27, %v2420_v52  ;;  %v23285_v27 = vand.u32 4294901760, %v19313_v4  ;;  %v23287_v0 = vand.u32 4294901760, %v19341_v6  ;;  %v19361_v52 = vpack.c.bf16 %v23283_v63, %v23284_v43 }
 0x5cc   : > { %14938 = vmatprep.subr.bf16.mxu0 %v23936_v62 }
 0x5cd   : > { %23957 = vst [vmem:[#allocation58_spill] sm:$0xff] %v19361_v52 }
 0x5cf   : > { %14940 = vmatpush3.bf16.msra.mxu0 %v14939_v39  ;;  %v23294_v39 = vand.u32 4294901760, %v19343_v54 }
 0x5d0   : > { %14941 = vmatprep.subr.bf16.mxu0 %v23936_v62 }
 0x5d2   : > { %13464 = vmatmul.mubr.f32.vlgmr.msra.gmra.mrb[8].mxu0 %v19000_v58 }
 0x5d3   : > { %14943 = vmatpush3.bf16.msra.mxu0 %v18981_v31  ;;  %13498 = vmatprep.mubr.msk.f32.mxu0 %vm17371_vm0, %v23939_v5 }
 0x5d4   : > { %14944 = vmatprep.subr.bf16.mxu0 %v23936_v62 }
 0x5d7   : > { %14946 = vmatpush3.bf16.msra.mxu0 %v18986_v28  ;;  %v19257_v28 = vld [vmem:[#allocation12 + $0x88] sm:$0xff] }
 0x5d8   : > { %14947 = vmatprep.subr.bf16.mxu0 %v23936_v62 }
 0x5db   : > { %14949 = vmatpush3.bf16.msra.mxu0 %v18992_v2 }
 0x5dc   : > { %14950 = vmatprep.subr.bf16.mxu0 %v23936_v62 }
 0x5dd   : > { %v11658_v55 = vpop.f32.mrb[4].mxu1 }
 0x5de   : > { %v11659_v24 = vpop.f32.mrb[5].mxu1 }
 0x5df   : > { %v11660_v17 = vadd.f32 %v11659_v24, %v11658_v55  ;;  %14952 = vmatpush3.bf16.msra.mxu0 %v18996_v56  ;;  %v23303_v56 = vand.u32 4294901760, %v19257_v28  ;;  %v19365_v55 = vld [vmem:[#allocation12 + $0x40] sm:$0xff]  ;;  %v19367_v24 = vld [vmem:[#allocation12 + $0x48] sm:$0xff] }
 0x5e0   : > { %14953 = vmatprep.subr.bf16.mxu0 %v23936_v62 }
 0x5e1   : > { %v19281_v30 = vpack.c.bf16 %v23303_v56, %v23304_v23 }
 0x5e3   : > { %14955 = vmatpush3.bf16.msra.mxu0 %v19007_v9  ;;  %v19265_v9 = vld [vmem:[#allocation12 + $0x8] sm:$0xff]  ;;  %23951 = vst [vmem:[#allocation48_spill] sm:$0xff] %v19281_v30 }
 0x5e4   : > { %14956 = vmatprep.subr.bf16.mxu0 %v23936_v62 }
 0x5e5   : > { %v11623_v31 = vpop.f32.mrb[4].mxu0 }
 0x5e6   : > { %v11624_v49 = vpop.f32.mrb[5].mxu0 }
 0x5e7   : > { %v11625_v2 = vadd.f32 %v11624_v49, %v11623_v31  ;;  %14958 = vmatpush3.bf16.msra.mxu0 %v19025_v20  ;;  %v23297_v20 = vand.u32 4294901760, %v19265_v9  ;;  %v19371_v31 = vld [vmem:[#allocation12 + $0xd8] sm:$0xff]  ;;  %v19378_v49 = vpack.c.bf16 %v23287_v0, %v23288_v35 }
 0x5e8   : > { %14959 = vmatprep.subr.bf16.mxu0 %v23936_v62  ;;  %v19393_v0 = vld [vmem:[#allocation12 + $0x58] sm:$0xff] }
 0x5e9   : > { %v2790_v47 = vadd.f32 %v11625_v2, %v2652_v10  ;;  %v19298_v15 = vpack.c.bf16 %v23297_v20, %v23300_v41  ;;  %v23293_v10 = vand.u32 4294901760, %v19345_v33  ;;  %23958 = vst [vmem:[#allocation59_spill] sm:$0xff] %v19378_v49  ;;  %v23299_v2 = vand.u32 4294901760, %v19365_v55  ;;  %v19417_v20 = vld [vmem:[#allocation12 + $0x60] sm:$0xff]  ;;  %v19423_v41 = vld [vmem:[#allocation12 + $0xf8] sm:$0xff] }
 0x5ea   : > { %v23310_v48 = vand.u32 4294901760, %v19393_v0  ;;  %v23964_v56 = vand.u32 4294901760, %v19417_v20 }
 0x5eb   : > { %14961 = vmatpush3.bf16.msra.mxu0 %v19048_v18  ;;  %v19274_v36 = vadd.f32 %v11660_v17, %v2790_v47  ;;  %v19287_v18 = vld [vmem:[#allocation12 + $0x18] sm:$0xff]  ;;  %23952 = vst [vmem:[#allocation49_spill] sm:$0xff] %v19298_v15  ;;  %v19369_v17 = vld [vmem:[#allocation12 + $0xd0] sm:$0xff]  ;;  %v23298_v47 = vand.u32 4294901760, %v19367_v24  ;;  %v19387_v63 = vpack.c.bf16 %v23293_v10, %v23294_v39 }
 0x5ec   : > { %14962 = vmatprep.subr.bf16.mxu0 %v23936_v62  ;;  %v23291_v22 = vand.u32 4294901760, %v19287_v18  ;;  %v23302_v43 = vand.u32 4294901760, %v19369_v17 }
 0x5ed   : > { %23959 = vst [vmem:[#allocation60_spill] sm:$0xff] %v19387_v63  ;;  %v19404_v10 = vpack.c.bf16 %v23298_v47, %v23299_v2  ;;  %v19419_v47 = vld [vmem:[#allocation12 + $0x68] sm:$0xff]  ;;  %v19421_v2 = vld [vmem:[#allocation12 + $0xf0] sm:$0xff] }
 0x5ee   : > { %v19325_v50 = vpack.c.bf16 %v23291_v22, %v23292_v13 }
 0x5ef   : > { %14964 = vmatpush3.bf16.msra.mxu0 %v19065_v14  ;;  %v23290_v14 = vand.u32 4294901760, %v19289_v61  ;;  %23960 = vst [vmem:[#allocation61_spill] sm:$0xff] %v19404_v10 }
 0x5f0   : > { %15110 = vmatprep.subr.bf16.mxu0 %v19281_v30  ;;  %23954 = vst [vmem:[#allocation51_spill] sm:$0xff] %v19325_v50 }
 0x5f1   : > { %v19335_v45 = vpack.c.bf16 %v23289_v25, %v23290_v14  ;;  %v19395_v25 = vld [vmem:[#allocation12 + $0xe0] sm:$0xff]  ;;  %v19397_v14 = vld [vmem:[#allocation12 + $0xe8] sm:$0xff] }
 0x5f2   : > { %13499 = vmatmul.mubr.f32.vlgmr.msra.gmra.mrb[8].mxu0 %v19000_v58 }
 0x5f3   : > { %15112 = vmatpush3.bf16.msra.mxu0 %v19298_v15  ;;  %4641 = vmatprep.mubr.f32.mxu0 %v18818_v7  ;;  %23955 = vst [vmem:[#allocation43_spill] sm:$0xff] %v19335_v45  ;;  %v19352_v7 = vpack.c.bf16 %v23285_v27, %v23286_v53  ;;  %v23301_v27 = vand.u32 4294901760, %v19371_v31  ;;  %v19391_v53 = vld [vmem:[#allocation12 + $0x50] sm:$0xff] }
 0x5f4   : > { %15114 = vmatprep.subr.bf16.mxu0 %v19307_v34  ;;  %v23311_v39 = vand.u32 4294901760, %v19391_v53 }
 0x5f5   : > { %23956 = vst [vmem:[#allocation57_spill] sm:$0xff] %v19352_v7  ;;  %v19413_v44 = vpack.c.bf16 %v23301_v27, %v23302_v43 }
 0x5f6   : > { %v19430_v27 = vpack.c.bf16 %v23310_v48, %v23311_v39  ;;  %v19445_v48 = vld [vmem:[#allocation12 + $0x78] sm:$0xff] }
 0x5f7   : > { %15116 = vmatpush3.bf16.msra.mxu0 %v19325_v50  ;;  %23961 = vst [vmem:[#allocation62_spill] sm:$0xff] %v19413_v44 }
 0x5f8   : > { %15118 = vmatprep.subr.bf16.mxu0 %v19335_v45  ;;  %23962 = vst [vmem:[#allocation63_spill] sm:$0xff] %v19430_v27 }
 0x5fb   : > { %15120 = vmatpush3.bf16.msra.mxu0 %v19352_v7  ;;  %v23969_v7 = vand.u32 4294901760, %v19257_v28 }
 0x5fc   : > { %15122 = vmatprep.subr.bf16.mxu0 %v19361_v52 }
 0x5fd   : > { %v11728_v35 = vpop.f32.mrb[6].mxu1 }
 0x5fe   : > { %v11729_v22 = vpop.f32.mrb[7].mxu1 }
 0x5ff   : > { %v11730_v13 = vadd.f32 %v11729_v22, %v11728_v35  ;;  %15124 = vmatpush3.bf16.msra.mxu0 %v19378_v49  ;;  %v23319_v22 = vand.u32 4294901760, %v19395_v25  ;;  %v23318_v35 = vand.u32 4294901760, %v19397_v14 }
 0x600   : > { %15126 = vmatprep.subr.bf16.mxu0 %v19387_v63  ;;  %v19443_v63 = vld [vmem:[#allocation12 + $0x70] sm:$0xff] }
 0x601   : > { %v19439_v23 = vpack.c.bf16 %v23318_v35, %v23319_v22  ;;  %v23974_v35 = vand.u32 4294901760, %v19263_v16 }
 0x603   : > { %15128 = vmatpush3.bf16.msra.mxu0 %v19404_v10  ;;  %23963 = vst [vmem:[#allocation64_spill] sm:$0xff] %v19439_v23  ;;  %v23967_v10 = vand.u32 4294901760, %v19255_v60 }
 0x604   : > { %15130 = vmatprep.subr.bf16.mxu0 %v19413_v44  ;;  %v23965_v44 = vand.u32 4294901760, %v19419_v47 }
 0x605   : > { %v11693_v39 = vpop.f32.mrb[6].mxu0  ;;  %v19459_v29 = vsub.f32 %v19255_v60, %v23967_v10  ;;  %v19477_v60 = vsub.f32 %v19263_v16, %v23974_v35  ;;  %v23976_v10 = vand.u32 4294901760, %v19265_v9  ;;  %v3815_v16 = vld [vmem:[#allocation11] sm:$0xff]  ;;  %v3816_v35 = vld [vmem:[#allocation11 + $0x8] sm:$0xff] }
 0x606   : > { %v11694_v43 = vpop.f32.mrb[7].mxu0  ;;  %v19452_v52 = vpack.c.bf16 %v23965_v44, %v23964_v56  ;;  %v23972_v56 = vand.u32 4294901760, %v19423_v41 }
 0x607   : > { %v11695_v49 = vadd.f32 %v11694_v43, %v11693_v39  ;;  %15132 = vmatpush3.bf16.msra.mxu0 %v19430_v27  ;;  %23968 = vst [vmem:[#allocation66_spill] sm:$0xff] %v19459_v29  ;;  %v19464_v43 = vsub.f32 %v19257_v28, %v23969_v7  ;;  %v23971_v39 = vand.u32 4294901760, %v19421_v2  ;;  %23975 = vst [vmem:[#allocation69_spill] sm:$0xff] %v19477_v60  ;;  %v23978_v7 = vand.u32 4294901760, %v19267_v11 }
 0x608   : > { %23966 = vst [vmem:[#allocation65_spill] sm:$0xff] %v19452_v52  ;;  %15134 = vmatprep.subr.bf16.mxu0 %v19439_v23  ;;  %v19482_v28 = vsub.f32 %v19265_v9, %v23976_v10  ;;  %v23983_v9 = vand.u32 4294901760, %v19269_v1 }
 0x609   : > { %23970 = vst [vmem:[#allocation67_spill] sm:$0xff] %v19464_v43  ;;  %v19471_v44 = vpack.c.bf16 %v23972_v56, %v23971_v39  ;;  %v3066_v22 = vadd.f32 %v11695_v49, %v19274_v36  ;;  %v19487_v23 = vsub.f32 %v19267_v11, %v23978_v7  ;;  %v23980_v39 = vand.u32 4294901760, %v19443_v63 }
 0x60a   : > { %23977 = vst [vmem:[#allocation70_spill] sm:$0xff] %v19482_v28  ;;  %v23981_v36 = vand.u32 4294901760, %v19445_v48  ;;  %v19501_v10 = vsub.f32 %v19269_v1, %v23983_v9  ;;  %v15173_v11 = vpack.c.bf16 %v19464_v43, %v19459_v29  ;;  %v3839_v7 = vand.u32 4294901760, %v3815_v16 }
 0x60b   : > { %23973 = vst [vmem:[#allocation68_spill] sm:$0xff] %v19471_v44  ;;  %23979 = vst [vmem:[#allocation71_spill] sm:$0xff] %v19487_v23  ;;  %15136 = vmatpush3.bf16.msra.mxu0 %v19452_v52  ;;  %v19496_v56 = vadd.f32 %v11730_v13, %v3066_v22  ;;  %v3842_v52 = vand.u32 4294901760, %v3816_v35  ;;  %v23986_v13 = vand.u32 4294901760, %v19285_v26  ;;  %v23988_v1 = vand.u32 4294901760, %v19287_v18 }
 0x60c   : > { %v19494_v49 = vpack.c.bf16 %v23981_v36, %v23980_v39  ;;  %23984 = vst [vmem:[#allocation73_spill] sm:$0xff] %v19501_v10  ;;  %15138 = vmatprep.subr.bf16.mxu0 %v19471_v44  ;;  %v19508_v39 = vsub.f32 %v3815_v16, %v3839_v7  ;;  %v23990_v44 = vand.u32 4294901760, %v19289_v61  ;;  %v3817_v16 = vld [vmem:[#allocation11 + $0x10] sm:$0xff] }
 0x60d   : > { %v19506_v27 = vpack.c.bf16 %v3842_v52, %v3839_v7  ;;  %v19510_v36 = vsub.f32 %v3816_v35, %v3842_v52  ;;  %v19515_v22 = vsub.f32 %v19285_v26, %v23986_v13  ;;  %v19520_v9 = vsub.f32 %v19287_v18, %v23988_v1  ;;  %v3818_v35 = vld [vmem:[#allocation11 + $0x18] sm:$0xff] }
 0x60e   : > { %23982 = vst [vmem:[#allocation72_spill] sm:$0xff] %v19494_v49  ;;  %v19525_v45 = vsub.f32 %v19289_v61, %v23990_v44  ;;  %v15175_v52 = vpack.c.bf16 %v19482_v28, %v19477_v60  ;;  %v23992_v26 = vand.u32 4294901760, %v19291_v57  ;;  %v15177_v18 = vpack.c.bf16 %v19501_v10, %v19487_v23 }
 0x60f   : > { %23985 = vst [vmem:[#allocation74_spill] sm:$0xff] %v19506_v27  ;;  %23987 = vst [vmem:[#allocation75_spill] sm:$0xff] %v19515_v22  ;;  %15140 = vmatpush3.bf16.msra.mxu0 %v19494_v49  ;;  %14967 = vmatpush3.bf16.msra.mxu1 %v19506_v27  ;;  %v3845_v61 = vand.u32 4294901760, %v3817_v16  ;;  %v3848_v44 = vand.u32 4294901760, %v3818_v35 }
 0x610   : > { %23989 = vst [vmem:[#allocation76_spill] sm:$0xff] %v19520_v9  ;;  %23991 = vst [vmem:[#allocation77_spill] sm:$0xff] %v19525_v45  ;;  %v19533_v7 = vsub.f32 %v19291_v57, %v23992_v26  ;;  %15174 = vmatprep.subr.bf16.mxu0 %v15173_v11  ;;  %14968 = vmatprep.subr.bf16.mxu1 %v23936_v62  ;;  %v23995_v57 = vand.u32 4294901760, %v19311_v37  ;;  %v23997_v26 = vand.u32 4294901760, %v19313_v4 }
 0x611   : > { %v19540_v13 = vpack.c.bf16 %v3848_v44, %v3845_v61  ;;  %v19542_v1 = vsub.f32 %v3817_v16, %v3845_v61  ;;  %v19544_v49 = vsub.f32 %v3818_v35, %v3848_v44  ;;  %v23999_v16 = vand.u32 4294901760, %v19315_v8 }
 0x612   : > { %23993 = vst [vmem:[#allocation78_spill] sm:$0xff] %v19533_v7  ;;  %4647 = vmatmul.mubr.f32.vlgmr.msra.gmra.mrb[10].mxu0 %v18855_v19  ;;  %v19549_v11 = vsub.f32 %v19311_v37, %v23995_v57  ;;  %v19554_v50 = vsub.f32 %v19313_v4, %v23997_v26  ;;  %v15179_v19 = vpack.c.bf16 %v19520_v9, %v19515_v22  ;;  %v24001_v61 = vand.u32 4294901760, %v19317_v12 }
 0x613   : > { %23994 = vst [vmem:[#allocation79_spill] sm:$0xff] %v19540_v13  ;;  %15176 = vmatpush3.bf16.msra.mxu0 %v15175_v52  ;;  %5014 = vmatprep.mubr.f32.mxu0 %v18803_v51  ;;  %v19562_v35 = vsub.f32 %v19315_v8, %v23999_v16  ;;  %v15181_v4 = vpack.c.bf16 %v19533_v7, %v19525_v45  ;;  %v24003_v51 = vand.u32 4294901760, %v19339_v38  ;;  %v24005_v8 = vand.u32 4294901760, %v19341_v6 }
 0x614   : > { %23996 = vst [vmem:[#allocation80_spill] sm:$0xff] %v19549_v11  ;;  %23998 = vst [vmem:[#allocation81_spill] sm:$0xff] %v19554_v50  ;;  %v19567_v37 = vsub.f32 %v19317_v12, %v24001_v61  ;;  %15178 = vmatprep.subr.bf16.mxu0 %v15177_v18  ;;  %14970 = vmatpush3.bf16.msra.mxu1 %v19540_v13  ;;  %v15183_v12 = vpack.c.bf16 %v19554_v50, %v19549_v11  ;;  %v24007_v18 = vand.u32 4294901760, %v19343_v54 }
 0x615   : > { %24000 = vst [vmem:[#allocation82_spill] sm:$0xff] %v19562_v35  ;;  %14971 = vmatprep.subr.bf16.mxu1 %v23936_v62  ;;  %v19576_v52 = vsub.f32 %v19339_v38, %v24003_v51  ;;  %v19581_v44 = vsub.f32 %v19341_v6, %v24005_v8  ;;  %v24009_v26 = vand.u32 4294901760, %v19345_v33  ;;  %v24011_v6 = vand.u32 4294901760, %v19365_v55 }
 0x616   : > { %24002 = vst [vmem:[#allocation83_spill] sm:$0xff] %v19567_v37  ;;  %v19588_v57 = vsub.f32 %v19343_v54, %v24007_v18  ;;  %v15185_v38 = vpack.c.bf16 %v19567_v37, %v19562_v35  ;;  %v24013_v61 = vand.u32 4294901760, %v19367_v24  ;;  %v24017_v8 = vand.u32 4294901760, %v19371_v31 }
 0x617   : > { %24004 = vst [vmem:[#allocation84_spill] sm:$0xff] %v19576_v52  ;;  %24006 = vst [vmem:[#allocation85_spill] sm:$0xff] %v19581_v44  ;;  %15180 = vmatpush3.bf16.msra.mxu0 %v15179_v19  ;;  %v19593_v16 = vsub.f32 %v19345_v33, %v24009_v26  ;;  %v19600_v19 = vsub.f32 %v19365_v55, %v24011_v6  ;;  %v15187_v54 = vpack.c.bf16 %v19581_v44, %v19576_v52 }
 0x618   : > { %24008 = vst [vmem:[#allocation86_spill] sm:$0xff] %v19588_v57  ;;  %15182 = vmatprep.subr.bf16.mxu0 %v15181_v4  ;;  %v19605_v51 = vsub.f32 %v19367_v24, %v24013_v61  ;;  %v24015_v33 = vand.u32 4294901760, %v19369_v17  ;;  %v19617_v18 = vsub.f32 %v19371_v31, %v24017_v8  ;;  %v24019_v24 = vand.u32 4294901760, %v19391_v53 }
 0x619   : > { %24010 = vst [vmem:[#allocation87_spill] sm:$0xff] %v19593_v16  ;;  %24012 = vst [vmem:[#allocation88_spill] sm:$0xff] %v19600_v19  ;;  %v15189_v55 = vpack.c.bf16 %v19593_v16, %v19588_v57  ;;  %v24021_v26 = vand.u32 4294901760, %v19393_v0  ;;  %v24023_v31 = vand.u32 4294901760, %v19395_v25  ;;  %v24025_v61 = vand.u32 4294901760, %v19397_v14 }
 0x61a   : > { %24014 = vst [vmem:[#allocation89_spill] sm:$0xff] %v19605_v51  ;;  %v19612_v4 = vsub.f32 %v19369_v17, %v24015_v33  ;;  %24018 = vst [vmem:[#allocation91_spill] sm:$0xff] %v19617_v18  ;;  %v15191_v17 = vpack.c.bf16 %v19605_v51, %v19600_v19  ;;  %v24029_v8 = vand.u32 4294901760, %v19419_v47 }
 0x61b   : > { %15184 = vmatpush3.bf16.msra.mxu0 %v15183_v12  ;;  %v19624_v12 = vsub.f32 %v19391_v53, %v24019_v24  ;;  %v19629_v6 = vsub.f32 %v19393_v0, %v24021_v26  ;;  %v19641_v33 = vsub.f32 %v19397_v14, %v24025_v61  ;;  %v24027_v0 = vand.u32 4294901760, %v19417_v20 }
 0x61c   : > { %24016 = vst [vmem:[#allocation90_spill] sm:$0xff] %v19612_v4  ;;  %15186 = vmatprep.subr.bf16.mxu0 %v15185_v38  ;;  %v19636_v38 = vsub.f32 %v19395_v25, %v24023_v31  ;;  %v15193_v53 = vpack.c.bf16 %v19617_v18, %v19612_v4  ;;  %v19653_v24 = vsub.f32 %v19419_v47, %v24029_v8  ;;  %v24031_v14 = vand.u32 4294901760, %v19421_v2 }
 0x61d   : > { %24020 = vst [vmem:[#allocation92_spill] sm:$0xff] %v19624_v12  ;;  %24022 = vst [vmem:[#allocation93_spill] sm:$0xff] %v19629_v6  ;;  %v15195_v25 = vpack.c.bf16 %v19629_v6, %v19624_v12  ;;  %v24033_v26 = vand.u32 4294901760, %v19423_v41  ;;  %v24035_v47 = vand.u32 4294901760, %v19443_v63  ;;  %v24037_v61 = vand.u32 4294901760, %v19445_v48 }
 0x61e   : > { %24024 = vst [vmem:[#allocation94_spill] sm:$0xff] %v19636_v38  ;;  %24026 = vst [vmem:[#allocation95_spill] sm:$0xff] %v19641_v33  ;;  %v23336_v8 = vand.u32 4294901760, %v19464_v43  ;;  %v20014_v43 = vld [vmem:[#allocation12 + $0x178] sm:$0xff] }
 0x61f   : > { %15188 = vmatpush3.bf16.msra.mxu0 %v15187_v54  ;;  %v19648_v54 = vsub.f32 %v19417_v20, %v24027_v0  ;;  %24030 = vst [vmem:[#allocation97_spill] sm:$0xff] %v19653_v24  ;;  %v19665_v31 = vsub.f32 %v19423_v41, %v24033_v26  ;;  %v15197_v20 = vpack.c.bf16 %v19641_v33, %v19636_v38  ;;  %v23342_v26 = vand.u32 4294901760, %v19487_v23 }
 0x620   : > { %15190 = vmatprep.subr.bf16.mxu0 %v15189_v55  ;;  %v19660_v55 = vsub.f32 %v19421_v2, %v24031_v14  ;;  %v19677_v0 = vsub.f32 %v19445_v48, %v24037_v61  ;;  %v23353_v14 = vand.u32 4294901760, %v19477_v60  ;;  %v23338_v48 = vand.u32 4294901760, %v19482_v28 }
 0x621   : > { %24028 = vst [vmem:[#allocation96_spill] sm:$0xff] %v19648_v54  ;;  %24034 = vst [vmem:[#allocation99_spill] sm:$0xff] %v19665_v31  ;;  %v15199_v2 = vpack.c.bf16 %v19653_v24, %v19648_v54  ;;  %v23341_v61 = vand.u32 4294901760, %v19515_v22  ;;  %v24045_v30 = vand.u32 4294901760, %v19665_v31 }
 0x622   : > { %24032 = vst [vmem:[#allocation98_spill] sm:$0xff] %v19660_v55  ;;  %24038 = vst [vmem:[#allocation101_spill] sm:$0xff] %v19677_v0  ;;  %v15201_v41 = vpack.c.bf16 %v19665_v31, %v19660_v55 }
 0x623   : > { %15192 = vmatpush3.bf16.msra.mxu0 %v15191_v17  ;;  %v19672_v17 = vsub.f32 %v19443_v63, %v24035_v47  ;;  %v15239_v47 = vpack.c.bf16 %v23338_v48, %v23353_v14  ;;  %v23346_v48 = vand.u32 4294901760, %v19549_v11  ;;  %v19759_v14 = vld [vmem:[#allocation11 + $0x28] sm:$0xff] }
 0x624   : > { %15194 = vmatprep.subr.bf16.mxu0 %v15193_v53  ;;  %v23337_v53 = vand.u32 4294901760, %v19459_v29  ;;  %v24054_v11 = vand.u32 4294901760, %v19759_v14 }
 0x625   : > { %24036 = vst [vmem:[#allocation100_spill] sm:$0xff] %v19672_v17  ;;  %v15203_v63 = vpack.c.bf16 %v19677_v0, %v19672_v17 }
 0x627   : > { %15196 = vmatpush3.bf16.msra.mxu0 %v15195_v25  ;;  %v15237_v25 = vpack.c.bf16 %v23336_v8, %v23337_v53  ;;  %v23344_v8 = vand.u32 4294901760, %v19525_v45  ;;  %v23343_v53 = vand.u32 4294901760, %v19533_v7  ;;  %v19877_v7 = vsub.f32 %v19759_v14, %v24054_v11 }
 0x628   : > { %15198 = vmatprep.subr.bf16.mxu0 %v15197_v20  ;;  %v23339_v20 = vand.u32 4294901760, %v19501_v10 }
 0x62b   : > { %15200 = vmatpush3.bf16.msra.mxu0 %v15199_v2  ;;  %v23340_v2 = vand.u32 4294901760, %v19520_v9 }
 0x62c   : > { %15202 = vmatprep.subr.bf16.mxu0 %v15201_v41  ;;  %v15241_v41 = vpack.c.bf16 %v23339_v20, %v23342_v26  ;;  %v15245_v20 = vpack.c.bf16 %v23343_v53, %v23344_v8  ;;  %v23349_v26 = vand.u32 4294901760, %v19581_v44  ;;  %v23352_v53 = vand.u32 4294901760, %v19588_v57  ;;  %v19844_v57 = vld [vmem:[#allocation12 + $0x138] sm:$0xff] }
 0x62d   : > { %v23351_v8 = vand.u32 4294901760, %v19593_v16  ;;  %v19842_v16 = vld [vmem:[#allocation12 + $0x130] sm:$0xff] }
 0x62f   : > { %15204 = vmatpush3.bf16.msra.mxu0 %v15203_v63  ;;  %v15243_v63 = vpack.c.bf16 %v23340_v2, %v23341_v61  ;;  %v23350_v61 = vand.u32 4294901760, %v19576_v52 }
 0x630   : > { %15238 = vmatprep.subr.bf16.mxu0 %v15237_v25  ;;  %v23345_v25 = vand.u32 4294901760, %v19554_v50 }
 0x632   : > { %5017 = vmatmul.mubr.f32.vlgmr.msra.gmra.mrb[12].mxu0 %v18841_v21  ;;  %v23348_v21 = vand.u32 4294901760, %v19562_v35  ;;  %v15247_v2 = vpack.c.bf16 %v23345_v25, %v23346_v48  ;;  %v23355_v25 = vand.u32 4294901760, %v19600_v19  ;;  %v23354_v48 = vand.u32 4294901760, %v19605_v51  ;;  %v3827_v19 = vld [vmem:[#allocation11 + $0x60] sm:$0xff]  ;;  %v3829_v35 = vld [vmem:[#allocation11 + $0x70] sm:$0xff] }
 0x633   : > { %15240 = vmatpush3.bf16.msra.mxu0 %v15239_v47  ;;  %5291 = vmatprep.mubr.f32.mxu0 %v18788_v46  ;;  %v23347_v47 = vand.u32 4294901760, %v19567_v37 }
 0x634   : > { %15242 = vmatprep.subr.bf16.mxu0 %v15241_v41 }
 0x635   : > { %v15249_v41 = vpack.c.bf16 %v23347_v47, %v23348_v21  ;;  %v23357_v47 = vand.u32 4294901760, %v19612_v4  ;;  %v23356_v21 = vand.u32 4294901760, %v19617_v18 }
 0x637   : > { %15244 = vmatpush3.bf16.msra.mxu0 %v15243_v63  ;;  %v15251_v63 = vpack.c.bf16 %v23349_v26, %v23350_v61  ;;  %v23362_v26 = vand.u32 4294901760, %v19624_v12  ;;  %v23361_v61 = vand.u32 4294901760, %v19629_v6  ;;  %v3826_v6 = vld [vmem:[#allocation11 + $0x58] sm:$0xff]  ;;  %v19823_v12 = vld [vmem:[#allocation12 + $0x120] sm:$0xff] }
 0x638   : > { %15246 = vmatprep.subr.bf16.mxu0 %v15245_v20  ;;  %v15253_v20 = vpack.c.bf16 %v23351_v8, %v23352_v53  ;;  %v23364_v8 = vand.u32 4294901760, %v19636_v38  ;;  %v3825_v38 = vld [vmem:[#allocation11 + $0x50] sm:$0xff]  ;;  %v24051_v46 = vand.u32 4294901760, %v19823_v12 }
 0x63b   : > { %15248 = vmatpush3.bf16.msra.mxu0 %v15247_v2  ;;  %v15255_v2 = vpack.c.bf16 %v23354_v48, %v23355_v25  ;;  %v23363_v25 = vand.u32 4294901760, %v19759_v14 }
 0x63c   : > { %15250 = vmatprep.subr.bf16.mxu0 %v15249_v41  ;;  %v15257_v41 = vpack.c.bf16 %v23356_v21, %v23357_v47  ;;  %v19783_v21 = vld [vmem:[#allocation11 + $0x38] sm:$0xff] }
 0x63f   : > { %15252 = vmatpush3.bf16.msra.mxu0 %v15251_v63  ;;  %v19757_v63 = vld [vmem:[#allocation11 + $0x20] sm:$0xff] }
 0x640   : > { %15254 = vmatprep.subr.bf16.mxu0 %v15253_v20  ;;  %v23365_v48 = vand.u32 4294901760, %v19757_v63  ;;  %v15259_v20 = vpack.c.bf16 %v23361_v61, %v23362_v26  ;;  %v19781_v26 = vld [vmem:[#allocation11 + $0x30] sm:$0xff] }
 0x641   : > { %v23375_v47 = vand.u32 4294901760, %v19781_v26  ;;  %v24055_v45 = vand.u32 4294901760, %v19781_v26 }
 0x642   : > { %v19773_v53 = vpack.c.bf16 %v23363_v25, %v23365_v48  ;;  %v23374_v25 = vand.u32 4294901760, %v19783_v21 }
 0x643   : > { %15256 = vmatpush3.bf16.msra.mxu0 %v15255_v2  ;;  %v24040_v2 = vand.u32 4294901760, %v19641_v33  ;;  %v19821_v33 = vld [vmem:[#allocation12 + $0x118] sm:$0xff] }
 0x644   : > { %24039 = vst [vmem:[#allocation102_spill] sm:$0xff] %v19773_v53  ;;  %15258 = vmatprep.subr.bf16.mxu0 %v15257_v41  ;;  %14973 = vmatpush3.bf16.msra.mxu1 %v19773_v53  ;;  %v24041_v41 = vand.u32 4294901760, %v19648_v54  ;;  %v19801_v15 = vpack.c.bf16 %v23374_v25, %v23375_v47  ;;  %v24046_v25 = vand.u32 4294901760, %v19672_v17  ;;  %v23418_v17 = vand.u32 4294901760, %v19821_v33 }
 0x645   : > { %v15261_v34 = vpack.c.bf16 %v24040_v2, %v23364_v8  ;;  %14974 = vmatprep.subr.bf16.mxu1 %v23936_v62  ;;  %v24042_v2 = vand.u32 4294901760, %v19653_v24  ;;  %v19807_v24 = vld [vmem:[#allocation12 + $0x108] sm:$0xff]  ;;  %v24068_v60 = vand.u32 4294901760, %v19821_v33 }
 0x646   : > { %24043 = vst [vmem:[#allocation103_spill] sm:$0xff] %v19801_v15 }
 0x647   : > { %15260 = vmatpush3.bf16.msra.mxu0 %v15259_v20  ;;  %v15263_v8 = vpack.c.bf16 %v24042_v2, %v24041_v41  ;;  %v24044_v20 = vand.u32 4294901760, %v19660_v55  ;;  %v3823_v41 = vld [vmem:[#allocation11 + $0x40] sm:$0xff]  ;;  %v3824_v2 = vld [vmem:[#allocation11 + $0x48] sm:$0xff]  ;;  %v23405_v55 = vand.u32 4294901760, %v19795_v59 }
 0x648   : > { %15262 = vmatprep.subr.bf16.mxu0 %v15261_v34  ;;  %14976 = vmatpush3.bf16.msra.mxu1 %v19801_v15  ;;  %v3863_v61 = vand.u32 4294901760, %v3823_v41  ;;  %v3866_v48 = vand.u32 4294901760, %v3824_v2  ;;  %v24047_v34 = vand.u32 4294901760, %v19677_v0 }
 0x649   : > { %v15265_v54 = vpack.c.bf16 %v24045_v30, %v24044_v20  ;;  %14977 = vmatprep.subr.bf16.mxu1 %v23936_v62  ;;  %v23404_v30 = vand.u32 4294901760, %v19807_v24  ;;  %v19817_v20 = vld [vmem:[#allocation12 + $0x110] sm:$0xff] }
 0x64a   : > { %v15267_v47 = vpack.c.bf16 %v24047_v34, %v24046_v25  ;;  %v19819_v31 = vpack.c.bf16 %v3866_v48, %v3863_v61  ;;  %v3869_v25 = vand.u32 4294901760, %v3825_v38  ;;  %v3872_v34 = vand.u32 4294901760, %v3826_v6 }
 0x64b   : > { %15264 = vmatpush3.bf16.msra.mxu0 %v15263_v8  ;;  %v19825_v8 = vld [vmem:[#allocation12 + $0x128] sm:$0xff]  ;;  %v23419_v0 = vand.u32 4294901760, %v19817_v20  ;;  %v19890_v52 = vsub.f32 %v3823_v41, %v3863_v61  ;;  %v19905_v61 = vld [vmem:[#allocation12 + $0x140] sm:$0xff] }
 0x64c   : > { %24048 = vst [vmem:[#allocation104_spill] sm:$0xff] %v19819_v31  ;;  %15266 = vmatprep.subr.bf16.mxu0 %v15265_v54  ;;  %14979 = vmatpush3.bf16.msra.mxu1 %v19819_v31  ;;  %v19833_v54 = vpack.c.bf16 %v23404_v30, %v23405_v55  ;;  %v19837_v18 = vpack.c.bf16 %v3872_v34, %v3869_v25  ;;  %v3875_v30 = vand.u32 4294901760, %v3827_v19  ;;  %v24078_v13 = vand.u32 4294901760, %v19825_v8 }
 0x64d   : > { %14980 = vmatprep.subr.bf16.mxu1 %v23936_v62  ;;  %v19854_v51 = vpack.c.bf16 %v23418_v17, %v23419_v0  ;;  %v3830_v17 = vld [vmem:[#allocation11 + $0x78] sm:$0xff]  ;;  %v24053_v0 = vand.u32 4294901760, %v19757_v63  ;;  %v19896_v11 = vsub.f32 %v3826_v6, %v3872_v34  ;;  %v23428_v6 = vand.u32 4294901760, %v19510_v36 }
 0x64e   : > { %24049 = vst [vmem:[#allocation105_spill] sm:$0xff] %v19837_v18  ;;  %v23464_v53 = vand.u32 4294901760, %v19890_v52 }
 0x64f   : > { %15268 = vmatpush3.bf16.msra.mxu0 %v15267_v47  ;;  %v3828_v47 = vld [vmem:[#allocation11 + $0x68] sm:$0xff]  ;;  %v19872_v50 = vsub.f32 %v19757_v63, %v24053_v0  ;;  %v19892_v0 = vsub.f32 %v3824_v2, %v3866_v48  ;;  %v19894_v63 = vsub.f32 %v3825_v38, %v3869_v25  ;;  %v23429_v38 = vand.u32 4294901760, %v19508_v39 }
 0x650   : > { %15301 = vmatprep.subr.bf16.mxu0 %v23936_v62  ;;  %14982 = vmatpush3.bf16.msra.mxu1 %v19837_v18  ;;  %v3878_v55 = vand.u32 4294901760, %v3828_v47  ;;  %v19907_v48 = vld [vmem:[#allocation12 + $0x148] sm:$0xff]  ;;  %v23438_v25 = vand.u32 4294901760, %v19542_v1 }
 0x651   : > { %14983 = vmatprep.subr.bf16.mxu1 %v23936_v62 }
 0x652   : > { %5293 = vmatmul.mubr.f32.vlgmr.msra.gmra.mrb[14].mxu0 %v18836_v42  ;;  %v19858_v4 = vpack.c.bf16 %v3878_v55, %v3875_v30  ;;  %v24052_v42 = vand.u32 4294901760, %v19825_v8  ;;  %v19902_v14 = vsub.f32 %v3828_v47, %v3878_v55  ;;  %v3933_v55 = vsub.f32 %v19508_v39, %v23429_v38  ;;  %v19941_v38 = vld [vmem:[#allocation12 + $0x150] sm:$0xff] }
 0x653   : > { %15303 = vmatpush3.bf16.msra.mxu0 %v19833_v54  ;;  %13743 = vmatprep.mubr.msk.f32.mxu0 %vm17371_vm0, %v23939_v5  ;;  %v24058_v47 = vand.u32 4294901760, %v19795_v59 }
 0x654   : > { %24050 = vst [vmem:[#allocation106_spill] sm:$0xff] %v19858_v4  ;;  %15304 = vmatprep.subr.bf16.mxu0 %v23936_v62  ;;  %v19865_v44 = vpack.c.bf16 %v24052_v42, %v24051_v46  ;;  %v19882_v46 = vsub.f32 %v19781_v26, %v24055_v45  ;;  %v24056_v42 = vand.u32 4294901760, %v19783_v21  ;;  %14985 = vmatpush3.bf16.msra.mxu1 %v19858_v4  ;;  %v3881_v26 = vand.u32 4294901760, %v3829_v35 }
 0x655   : > { %14986 = vmatprep.subr.bf16.mxu1 %v23936_v62  ;;  %v19900_v45 = vsub.f32 %v3827_v19, %v3875_v30  ;;  %v3940_v30 = vsub.f32 %v19510_v36, %v23428_v6 }
 0x656   : > { %v19887_v37 = vsub.f32 %v19783_v21, %v24056_v42  ;;  %v3884_v21 = vand.u32 4294901760, %v3830_v17  ;;  %v19913_v2 = vsub.f32 %v3829_v35, %v3881_v26  ;;  %v19928_v42 = vsub.f32 %v19795_v59, %v24058_v47  ;;  %v19943_v59 = vld [vmem:[#allocation12 + $0x158] sm:$0xff] }
 0x657   : > { %15306 = vmatpush3.bf16.msra.mxu0 %v19854_v51  ;;  %v24059_v35 = vand.u32 4294901760, %v19842_v16  ;;  %v3934_v47 = vand.u32 4294901760, %v3933_v55  ;;  %v3941_v34 = vand.u32 4294901760, %v3940_v30  ;;  %v23445_v55 = vand.u32 4294901760, %v19872_v50 }
 0x658   : > { %15307 = vmatprep.subr.bf16.mxu0 %v23936_v62  ;;  %v19911_v41 = vpack.c.bf16 %v3884_v21, %v3881_v26  ;;  %v19915_v19 = vsub.f32 %v3830_v17, %v3884_v21  ;;  %v24060_v17 = vand.u32 4294901760, %v19844_v57  ;;  %v24062_v21 = vand.u32 4294901760, %v19807_v24 }
 0x659   : > { %v19957_v22 = vpack.c.bf16 %v3941_v34, %v3934_v47  ;;  %v24064_v30 = vand.u32 4294901760, %v19905_v61  ;;  %v19971_v34 = vld [vmem:[#allocation12 + $0x160] sm:$0xff] }
 0x65a   : > { %24057 = vst [vmem:[#allocation107_spill] sm:$0xff] %v19911_v41  ;;  %v19935_v26 = vpack.c.bf16 %v24060_v17, %v24059_v35  ;;  %14988 = vmatpush3.bf16.msra.mxu1 %v19911_v41  ;;  %v3947_v35 = vsub.f32 %v19542_v1, %v23438_v25  ;;  %v24061_v17 = vand.u32 4294901760, %v19544_v49  ;;  %v19955_v9 = vsub.f32 %v19807_v24, %v24062_v21 }
 0x65b   : > { %15309 = vmatpush3.bf16.msra.mxu0 %v19865_v44  ;;  %14989 = vmatprep.subr.bf16.mxu1 %v23936_v62  ;;  %24063 = vst [vmem:[#allocation108_spill] sm:$0xff] %v19957_v22  ;;  %v24065_v25 = vand.u32 4294901760, %v19907_v48  ;;  %v24069_v21 = vand.u32 4294901760, %v19877_v7  ;;  %v24073_v41 = vand.u32 4294901760, %v19928_v42 }
 0x65c   : > { %15310 = vmatprep.subr.bf16.mxu0 %v23936_v62  ;;  %v3954_v6 = vsub.f32 %v19544_v49, %v24061_v17  ;;  %v3948_v10 = vand.u32 4294901760, %v3947_v35  ;;  %v24067_v35 = vand.u32 4294901760, %v19817_v20  ;;  %v19989_v17 = vsub.f32 %v19821_v33, %v24068_v60 }
 0x65d   : > { %v19965_v28 = vpack.c.bf16 %v24065_v25, %v24064_v30  ;;  %v3961_v25 = vsub.f32 %v19872_v50, %v23445_v55  ;;  %v20012_v55 = vld [vmem:[#allocation12 + $0x170] sm:$0xff] }
 0x65e   : > { %v3955_v23 = vand.u32 4294901760, %v3954_v6  ;;  %v19973_v6 = vld [vmem:[#allocation12 + $0x168] sm:$0xff]  ;;  %v19984_v30 = vsub.f32 %v19817_v20, %v24067_v35  ;;  %v24070_v20 = vand.u32 4294901760, %v19941_v38  ;;  %v24071_v35 = vand.u32 4294901760, %v19943_v59 }
 0x65f   : > { %15312 = vmatpush3.bf16.msra.mxu0 %v19935_v26  ;;  %v24080_v4 = vand.u32 4294901760, %v19973_v6 }
 0x660   : > { %15313 = vmatprep.subr.bf16.mxu0 %v23936_v62  ;;  %v19976_v47 = vpack.c.bf16 %v3955_v23, %v3948_v10  ;;  %v3968_v23 = vsub.f32 %v19877_v7, %v24069_v21  ;;  %v3962_v10 = vand.u32 4294901760, %v3961_v25  ;;  %v20002_v29 = vpack.c.bf16 %v24071_v35, %v24070_v20 }
 0x661   : > { %v24072_v21 = vand.u32 4294901760, %v19823_v12  ;;  %v5497_v20 = vsub.f32 %v19928_v42, %v24073_v41  ;;  %v24074_v35 = vand.u32 4294901760, %v19882_v46 }
 0x662   : > { %24066 = vst [vmem:[#allocation109_spill] sm:$0xff] %v19976_v47  ;;  %v3969_v24 = vand.u32 4294901760, %v3968_v23  ;;  %v24075_v23 = vand.u32 4294901760, %v19887_v37 }
 0x663   : > { %15315 = vmatpush3.bf16.msra.mxu0 %v19965_v28  ;;  %v20009_v25 = vsub.f32 %v19823_v12, %v24072_v21  ;;  %v3975_v33 = vsub.f32 %v19882_v46, %v24074_v35  ;;  %v24076_v12 = vand.u32 4294901760, %v19955_v9  ;;  %v23465_v35 = vand.u32 4294901760, %v19892_v0 }
 0x664   : > { %15316 = vmatprep.subr.bf16.mxu0 %v23936_v62  ;;  %v3982_v60 = vsub.f32 %v19887_v37, %v24075_v23  ;;  %v20030_v31 = vpack.c.bf16 %v3969_v24, %v3962_v10  ;;  %v20037_v23 = vsub.f32 %v19825_v8, %v24078_v13  ;;  %v3989_v8 = vsub.f32 %v19890_v52, %v23464_v53 }
 0x665   : > { %v5504_v21 = vsub.f32 %v19955_v9, %v24076_v12  ;;  %v3976_v15 = vand.u32 4294901760, %v3975_v33  ;;  %v24079_v12 = vand.u32 4294901760, %v19971_v34  ;;  %v24084_v10 = vand.u32 4294901760, %v19984_v30 }
 0x666   : > { %24077 = vst [vmem:[#allocation110_spill] sm:$0xff] %v20030_v31  ;;  %v3983_v41 = vand.u32 4294901760, %v3982_v60  ;;  %v24082_v60 = vand.u32 4294901760, %v19842_v16  ;;  %v24086_v31 = vand.u32 4294901760, %v19844_v57 }
 0x667   : > { %15318 = vmatpush3.bf16.msra.mxu0 %v20002_v29  ;;  %v20044_v18 = vpack.c.bf16 %v24080_v4, %v24079_v12  ;;  %v3996_v4 = vsub.f32 %v19892_v0, %v23465_v35  ;;  %v5498_v12 = vand.u32 4294901760, %v5497_v20  ;;  %v5505_v24 = vand.u32 4294901760, %v5504_v21 }
 0x668   : > { %v20051_v33 = vsub.f32 %v19842_v16, %v24082_v60  ;;  %15319 = vmatprep.subr.bf16.mxu0 %v23936_v62  ;;  %v20054_v13 = vpack.c.bf16 %v3983_v41, %v3976_v15  ;;  %v5511_v27 = vsub.f32 %v19984_v30, %v24084_v10  ;;  %v24085_v16 = vand.u32 4294901760, %v19989_v17 }
 0x669   : > { %24081 = vst [vmem:[#allocation111_spill] sm:$0xff] %v20044_v18  ;;  %v3990_v15 = vand.u32 4294901760, %v3989_v8  ;;  %v3997_v41 = vand.u32 4294901760, %v3996_v4  ;;  %v20073_v35 = vsub.f32 %v19844_v57, %v24086_v31  ;;  %v24087_v20 = vand.u32 4294901760, %v20012_v55 }
 0x66a   : > { %24083 = vst [vmem:[#allocation112_spill] sm:$0xff] %v20054_v13  ;;  %v5518_v60 = vsub.f32 %v19989_v17, %v24085_v16  ;;  %v23468_v13 = vand.u32 4294901760, %v19894_v63  ;;  %v24088_v21 = vand.u32 4294901760, %v20014_v43  ;;  %v24090_v16 = vand.u32 4294901760, %v19905_v61 }
 0x66b   : > { %15321 = vmatpush3.bf16.msra.mxu0 %v20044_v18  ;;  %v20090_v57 = vpack.c.bf16 %v3997_v41, %v3990_v15  ;;  %v24093_v8 = vand.u32 4294901760, %v19907_v48  ;;  %v15326_v47 = vpack.c.bf16 %v5505_v24, %v5498_v12  ;;  %v23469_v15 = vand.u32 4294901760, %v19900_v45 }
 0x66c   : > { %v20080_v10 = vpack.c.bf16 %v24088_v21, %v24087_v20  ;;  %v20087_v53 = vsub.f32 %v19905_v61, %v24090_v16  ;;  %15322 = vmatprep.subr.bf16.mxu0 %v23936_v62  ;;  %v4003_v31 = vsub.f32 %v19894_v63, %v23468_v13  ;;  %v24092_v20 = vand.u32 4294901760, %v19896_v11 }
 0x66d   : > { %24091 = vst [vmem:[#allocation114_spill] sm:$0xff] %v20090_v57  ;;  %v20101_v4 = vsub.f32 %v19907_v48, %v24093_v8  ;;  %v5512_v61 = vand.u32 4294901760, %v5511_v27  ;;  %v5519_v16 = vand.u32 4294901760, %v5518_v60  ;;  %v23470_v41 = vand.u32 4294901760, %v19902_v14 }
 0x66e   : > { %24089 = vst [vmem:[#allocation113_spill] sm:$0xff] %v20080_v10  ;;  %v4010_v21 = vsub.f32 %v19896_v11, %v24092_v20  ;;  %v4004_v22 = vand.u32 4294901760, %v4003_v31  ;;  %v24094_v13 = vand.u32 4294901760, %v20009_v25  ;;  %v24095_v57 = vand.u32 4294901760, %v20037_v23 }
 0x66f   : > { %15324 = vmatpush3.bf16.msra.mxu0 %v20080_v10  ;;  %v24096_v12 = vand.u32 4294901760, %v19941_v38  ;;  %v24098_v31 = vand.u32 4294901760, %v19943_v59  ;;  %v15329_v27 = vpack.c.bf16 %v5519_v16, %v5512_v61  ;;  %v23474_v24 = vand.u32 4294901760, %v19915_v19 }
 0x670   : > { %v4011_v32 = vand.u32 4294901760, %v4010_v21  ;;  %v5525_v20 = vsub.f32 %v20009_v25, %v24094_v13  ;;  %v5532_v48 = vsub.f32 %v20037_v23, %v24095_v57  ;;  %15325 = vmatprep.subr.bf16.mxu0 %v23936_v62  ;;  %v4017_v13 = vsub.f32 %v19900_v45, %v23469_v15 }
 0x671   : > { %v20117_v60 = vsub.f32 %v19941_v38, %v24096_v12  ;;  %v4024_v57 = vsub.f32 %v19902_v14, %v23470_v41  ;;  %v20131_v21 = vsub.f32 %v19943_v59, %v24098_v31  ;;  %v23476_v38 = vand.u32 4294901760, %v20087_v53 }
 0x672   : > { %v20120_v8 = vpack.c.bf16 %v4011_v32, %v4004_v22  ;;  %v23477_v12 = vand.u32 4294901760, %v20101_v4  ;;  %13744 = vmatmul.mubr.f32.vlgmr.msra.gmra.mrb[16].mxu0 %v19074_v40  ;;  %v4018_v32 = vand.u32 4294901760, %v4017_v13  ;;  %v23473_v15 = vand.u32 4294901760, %v19913_v2 }
 0x673   : > { %v4025_v22 = vand.u32 4294901760, %v4024_v57  ;;  %15327 = vmatpush3.bf16.msra.mxu0 %v15326_v47  ;;  %v5526_v41 = vand.u32 4294901760, %v5525_v20  ;;  %v24099_v10 = vand.u32 4294901760, %v20051_v33  ;;  %v24100_v61 = vand.u32 4294901760, %v20073_v35  ;;  %13778 = vmatprep.mubr.msk.f32.mxu0 %vm17371_vm0, %v23939_v5 }
 0x674   : > { %24097 = vst [vmem:[#allocation115_spill] sm:$0xff] %v20120_v8  ;;  %v5533_v8 = vand.u32 4294901760, %v5532_v48  ;;  %15328 = vmatprep.subr.bf16.mxu0 %v23936_v62  ;;  %v4031_v47 = vsub.f32 %v19913_v2, %v23473_v15  ;;  %v4038_v20 = vsub.f32 %v19915_v19, %v23474_v24  ;;  %v5553_v57 = vsub.f32 %v20087_v53, %v23476_v38 }
 0x675   : > { %v5539_v59 = vsub.f32 %v20051_v33, %v24099_v10  ;;  %v5546_v16 = vsub.f32 %v20073_v35, %v24100_v61  ;;  %v20147_v13 = vpack.c.bf16 %v4025_v22, %v4018_v32  ;;  %v24102_v10 = vand.u32 4294901760, %v19971_v34 }
 0x676   : > { %v5560_v31 = vsub.f32 %v20101_v4, %v23477_v12  ;;  %v5566_v32 = vand.u32 4294901760, %v20117_v60  ;;  %v5573_v22 = vand.u32 4294901760, %v20131_v21  ;;  %v4032_v61 = vand.u32 4294901760, %v4031_v47 }
 0x677   : > { %24101 = vst [vmem:[#allocation116_spill] sm:$0xff] %v20147_v13  ;;  %v20158_v48 = vsub.f32 %v19971_v34, %v24102_v10  ;;  %v4039_v15 = vand.u32 4294901760, %v4038_v20  ;;  %v24103_v24 = vand.u32 4294901760, %v19973_v6  ;;  %15330 = vmatpush3.bf16.msra.mxu0 %v15329_v27  ;;  %v15332_v34 = vpack.c.bf16 %v5533_v8, %v5526_v41 }
 0x678   : > { %v5540_v10 = vand.u32 4294901760, %v5539_v59  ;;  %v5547_v13 = vand.u32 4294901760, %v5546_v16  ;;  %15331 = vmatprep.subr.bf16.mxu0 %v23936_v62  ;;  %v5554_v12 = vand.u32 4294901760, %v5553_v57  ;;  %v5561_v18 = vand.u32 4294901760, %v5560_v31 }
 0x679   : > { %v20171_v40 = vsub.f32 %v19973_v6, %v24103_v24  ;;  %v20174_v38 = vpack.c.bf16 %v4039_v15, %v4032_v61  ;;  %v5567_v47 = vsub.f32 %v20117_v60, %v5566_v32  ;;  %v5574_v20 = vsub.f32 %v20131_v21, %v5573_v22 }
 0x67a   : > { %v5580_v6 = vand.u32 4294901760, %v20158_v48  ;;  %v24104_v41 = vand.u32 4294901760, %v20012_v55  ;;  %v24105_v15 = vand.u32 4294901760, %v20014_v43  ;;  %v15335_v8 = vpack.c.bf16 %v5547_v13, %v5540_v10 }
 0x67b   : > { %15333 = vmatpush3.bf16.msra.mxu0 %v15332_v34  ;;  %v5587_v59 = vand.u32 4294901760, %v20171_v40  ;;  %v15014_v16 = vpack.c.bf16 %v19510_v36, %v19508_v39  ;;  %v15338_v57 = vpack.c.bf16 %v5561_v18, %v5554_v12  ;;  %v5568_v31 = vand.u32 4294901760, %v5567_v47 }
 0x67c   : > { %v20186_v24 = vsub.f32 %v20012_v55, %v24104_v41  ;;  %v20191_v27 = vsub.f32 %v20014_v43, %v24105_v15  ;;  %15334 = vmatprep.subr.bf16.mxu0 %v23936_v62  ;;  %v5575_v61 = vand.u32 4294901760, %v5574_v20  ;;  %v5581_v55 = vsub.f32 %v20158_v48, %v5580_v6 }
 0x67d   : > { %v5588_v43 = vsub.f32 %v20171_v40, %v5587_v59  ;;  %v15020_v15 = vpack.c.bf16 %v19877_v7, %v19872_v50 }
 0x67e   : > { %v5594_v13 = vand.u32 4294901760, %v20186_v24  ;;  %v5601_v34 = vand.u32 4294901760, %v20191_v27  ;;  %v15341_v18 = vpack.c.bf16 %v5575_v61, %v5568_v31  ;;  %v5582_v12 = vand.u32 4294901760, %v5581_v55 }
 0x67f   : > { %15336 = vmatpush3.bf16.msra.mxu0 %v15335_v8  ;;  %v5589_v47 = vand.u32 4294901760, %v5588_v43  ;;  %v15026_v55 = vpack.c.bf16 %v19892_v0, %v19890_v52  ;;  %v15350_v43 = vpack.c.bf16 %v19955_v9, %v19928_v42 }
 0x680   : > { %15337 = vmatprep.subr.bf16.mxu0 %v23936_v62  ;;  %v5595_v20 = vsub.f32 %v20186_v24, %v5594_v13  ;;  %v5602_v41 = vsub.f32 %v20191_v27, %v5601_v34 }
 0x681   : > { %v15344_v8 = vpack.c.bf16 %v5589_v47, %v5582_v12  ;;  %v15356_v47 = vpack.c.bf16 %v20037_v23, %v20009_v25  ;;  %v24112_v12 = vand.u32 4294901760, %v19989_v17 }
 0x682   : > { %v5596_v10 = vand.u32 4294901760, %v5595_v20  ;;  %v5603_v31 = vand.u32 4294901760, %v5602_v41  ;;  %v15359_v41 = vpack.c.bf16 %v20073_v35, %v20051_v33 }
 0x683   : > { %15339 = vmatpush3.bf16.msra.mxu0 %v15338_v57  ;;  %v15023_v57 = vpack.c.bf16 %v19887_v37, %v19882_v46 }
 0x684   : > { %15340 = vmatprep.subr.bf16.mxu0 %v23936_v62  ;;  %v15347_v61 = vpack.c.bf16 %v5603_v31, %v5596_v10  ;;  %v15353_v10 = vpack.c.bf16 %v19989_v17, %v19984_v30  ;;  %v15365_v31 = vpack.c.bf16 %v20131_v21, %v20117_v60  ;;  %v24122_v60 = vld [vmem:[#allocation112_spill] sm:$0xff]  ;;  %v15419_v21 = vpack.c.bf16 %v5601_v34, %v5594_v13  ;;  %v24133_v13 = vld [vmem:[#allocation103_spill] sm:$0xff] }
 0x685   : > { %v24134_v34 = vld [vmem:[#allocation104_spill] sm:$0xff] }
 0x687   : > { %15342 = vmatpush3.bf16.msra.mxu0 %v15341_v18 }
 0x688   : > { %15343 = vmatprep.subr.bf16.mxu0 %v23936_v62 }
 0x68b   : > { %15345 = vmatpush3.bf16.msra.mxu0 %v15344_v8  ;;  %v15362_v8 = vpack.c.bf16 %v20101_v4, %v20087_v53 }
 0x68c   : > { %15346 = vmatprep.subr.bf16.mxu0 %v23936_v62 }
 0x68f   : > { %15348 = vmatpush3.bf16.msra.mxu0 %v15347_v61  ;;  %v15368_v61 = vpack.c.bf16 %v20171_v40, %v20158_v48  ;;  %v24124_v40 = vld [vmem:[#allocation115_spill] sm:$0xff]  ;;  %v24125_v48 = vld [vmem:[#allocation116_spill] sm:$0xff] }
 0x690   : > { %15349 = vmatprep.subr.bf16.mxu0 %v23936_v62 }
 0x692   : > { %13779 = vmatmul.mubr.f32.vlgmr.msra.gmra.mrb[16].mxu0 %v19000_v58 }
 0x693   : > { %15351 = vmatpush3.bf16.msra.mxu0 %v15350_v43  ;;  %13813 = vmatprep.mubr.msk.f32.mxu0 %vm17371_vm0, %v23939_v5  ;;  %v15371_v43 = vpack.c.bf16 %v20191_v27, %v20186_v24  ;;  %v24132_v27 = vld [vmem:[#allocation102_spill] sm:$0xff] }
 0x694   : > { %15352 = vmatprep.subr.bf16.mxu0 %v23936_v62 }
 0x697   : > { %15354 = vmatpush3.bf16.msra.mxu0 %v15353_v10 }
 0x698   : > { %15355 = vmatprep.subr.bf16.mxu0 %v23936_v62 }
 0x69b   : > { %15357 = vmatpush3.bf16.msra.mxu0 %v15356_v47 }
 0x69c   : > { %15358 = vmatprep.subr.bf16.mxu0 %v23936_v62 }
 0x69f   : > { %15360 = vmatpush3.bf16.msra.mxu0 %v15359_v41 }
 0x6a0   : > { %15361 = vmatprep.subr.bf16.mxu0 %v23936_v62 }
 0x6a3   : > { %15363 = vmatpush3.bf16.msra.mxu0 %v15362_v8  ;;  %v24106_v8 = vld [vmem:[#allocation111_spill] sm:$0xff] }
 0x6a4   : > { %15364 = vmatprep.subr.bf16.mxu0 %v23936_v62 }
 0x6a7   : > { %15366 = vmatpush3.bf16.msra.mxu0 %v15365_v31  ;;  %v24107_v31 = vld [vmem:[#allocation113_spill] sm:$0xff] }
 0x6a8   : > { %15367 = vmatprep.subr.bf16.mxu0 %v23936_v62 }
 0x6ab   : > { %15369 = vmatpush3.bf16.msra.mxu0 %v15368_v61  ;;  %v24108_v61 = vand.u32 4294901760, %v19928_v42 }
 0x6ac   : > { %15370 = vmatprep.subr.bf16.mxu0 %v23936_v62 }
 0x6af   : > { %15372 = vmatpush3.bf16.msra.mxu0 %v15371_v43  ;;  %v24109_v43 = vand.u32 4294901760, %v19955_v9 }
 0x6b0   : > { %15373 = vmatprep.subr.bf16.mxu0 %v23936_v62 }
 0x6b1   : > { %v15398_v20 = vpack.c.bf16 %v24109_v43, %v24108_v61  ;;  %v24113_v61 = vand.u32 4294901760, %v20009_v25  ;;  %v24117_v25 = vld [vmem:[#allocation108_spill] sm:$0xff] }
 0x6b2   : > { %13814 = vmatmul.mubr.f32.vlgmr.msra.gmra.mrb[16].mxu0 %v19016_v3 }
 0x6b3   : > { %15375 = vmatpush3.bf16.msra.mxu0 %v19833_v54  ;;  %13848 = vmatprep.mubr.msk.f32.mxu0 %vm17371_vm0, %v23939_v5 }
 0x6b4   : > { %15376 = vmatprep.subr.bf16.mxu0 %v23936_v62 }
 0x6b7   : > { %15378 = vmatpush3.bf16.msra.mxu0 %v19854_v51 }
 0x6b8   : > { %15379 = vmatprep.subr.bf16.mxu0 %v23936_v62 }
 0x6bb   : > { %15381 = vmatpush3.bf16.msra.mxu0 %v19865_v44 }
 0x6bc   : > { %15382 = vmatprep.subr.bf16.mxu0 %v23936_v62 }
 0x6bf   : > { %15384 = vmatpush3.bf16.msra.mxu0 %v19935_v26 }
 0x6c0   : > { %15385 = vmatprep.subr.bf16.mxu0 %v23936_v62 }
 0x6c3   : > { %15387 = vmatpush3.bf16.msra.mxu0 %v19965_v28 }
 0x6c4   : > { %15388 = vmatprep.subr.bf16.mxu0 %v23936_v62 }
 0x6c5   : > { %v3810_v10 = vpop.f32.mrb[8].mxu0 }
 0x6c6   : > { %v16503_v47 = vadd.f32 %v3810_v10, %v19496_v56  ;;  %v13500_v41 = vpop.f32.mrb[9].mxu0  ;;  %v24110_v10 = vld [vmem:[#allocation46_spill] sm:$0xff] }
 0x6c7   : > { %15390 = vmatpush3.bf16.msra.mxu0 %v20002_v29 }
 0x6c8   : > { %16831 = vtanh.f32 %v16503_v47  ;;  %15391 = vmatprep.subr.bf16.mxu0 %v23936_v62  ;;  %v24111_v47 = vand.u32 4294901760, %v19984_v30 }
 0x6ca   : > { %v15401_v18 = vpack.c.bf16 %v24112_v12, %v24111_v47  ;;  %v24115_v12 = vand.u32 4294901760, %v20051_v33  ;;  %v15413_v33 = vpack.c.bf16 %v5573_v22, %v5566_v32  ;;  %v24123_v32 = vld [vmem:[#allocation114_spill] sm:$0xff] }
 0x6cb   : > { %15393 = vmatpush3.bf16.msra.mxu0 %v24106_v8  ;;  %v24130_v22 = vld [vmem:[#allocation74_spill] sm:$0xff] }
 0x6cc   : > { %15394 = vmatprep.subr.bf16.mxu0 %v23936_v62 }
 0x6cf   : > { %15396 = vmatpush3.bf16.msra.mxu0 %v24107_v31 }
 0x6d0   : > { %15397 = vmatprep.subr.bf16.mxu0 %v23936_v62 }
 0x6d2   : > { %v16832_v56 = vpop.eup %16831  ;;  %13849 = vmatmul.mubr.f32.vlgmr.msra.gmra.mrb[16].mxu0 %v24110_v10 }
 0x6d3   : > { %v20282_v41 = vand.u32 4294901760, %v16832_v56  ;;  %15399 = vmatpush3.bf16.msra.mxu0 %v15398_v20  ;;  %13883 = vmatprep.mubr.msk.f32.mxu0 %vm17371_vm0, %v23939_v5  ;;  %v24114_v20 = vand.u32 4294901760, %v20037_v23  ;;  %v24118_v23 = vand.u32 4294901760, %v20087_v53 }
 0x6d4   : > { %15400 = vmatprep.subr.bf16.mxu0 %v23936_v62 }
 0x6d5   : > { %v20292_v9 = vsub.f32 %v16832_v56, %v20282_v41  ;;  %v15404_v43 = vpack.c.bf16 %v24114_v20, %v24113_v61  ;;  %v24116_v56 = vand.u32 4294901760, %v20073_v35  ;;  %v24120_v35 = vld [vmem:[#allocation109_spill] sm:$0xff] }
 0x6d7   : > { %v3921_v42 = vand.u32 4294901760, %v20292_v9  ;;  %15402 = vmatpush3.bf16.msra.mxu0 %v15401_v18  ;;  %v15407_v47 = vpack.c.bf16 %v24116_v56, %v24115_v12  ;;  %v24119_v18 = vand.u32 4294901760, %v20101_v4  ;;  %v24140_v12 = vand.u32 4294901760, %v19542_v1 }
 0x6d8   : > { %15403 = vmatprep.subr.bf16.mxu0 %v23936_v62  ;;  %v24141_v56 = vand.u32 4294901760, %v19544_v49 }
 0x6d9   : > { %v3922_v17 = vsub.f32 %v20292_v9, %v3921_v42  ;;  %v15410_v61 = vpack.c.bf16 %v24119_v18, %v24118_v23  ;;  %v24147_v23 = vand.u32 4294901760, %v19892_v0  ;;  %v24153_v0 = vand.u32 4294901760, %v19915_v19 }
 0x6db   : > { %v3923_v30 = vand.u32 4294901760, %v3922_v17  ;;  %15405 = vmatpush3.bf16.msra.mxu0 %v15404_v43  ;;  %v24121_v43 = vld [vmem:[#allocation110_spill] sm:$0xff]  ;;  %v15416_v17 = vpack.c.bf16 %v5587_v59, %v5580_v6  ;;  %v24131_v6 = vld [vmem:[#allocation79_spill] sm:$0xff] }
 0x6dc   : > { %15406 = vmatprep.subr.bf16.mxu0 %v23936_v62 }
 0x6dd   : > { %13534 = vmatmul.mubr.f32.vlgmr.msra.gmra.mrb[8].mxu1 %v3923_v30 }
 0x6de   : > { %14991 = vmatpush3.bf16.msra.mxu1 %v24117_v25  ;;  %13568 = vmatprep.mubr.msk.f32.mxu1 %vm17371_vm0, %v23939_v5 }
 0x6df   : > { %14992 = vmatprep.subr.bf16.mxu1 %v23936_v62  ;;  %15408 = vmatpush3.bf16.msra.mxu0 %v15407_v47  ;;  %v15065_v47 = vpack.c.bf16 %v24141_v56, %v24140_v12 }
 0x6e0   : > { %15409 = vmatprep.subr.bf16.mxu0 %v23936_v62 }
 0x6e2   : > { %14994 = vmatpush3.bf16.msra.mxu1 %v24120_v35 }
 0x6e3   : > { %14995 = vmatprep.subr.bf16.mxu1 %v23936_v62  ;;  %15411 = vmatpush3.bf16.msra.mxu0 %v15410_v61 }
 0x6e4   : > { %15412 = vmatprep.subr.bf16.mxu0 %v23936_v62 }
 0x6e5   : > { %v11967_v20 = vpop.f32.mrb[10].mxu0 }
 0x6e6   : > { %14997 = vmatpush3.bf16.msra.mxu1 %v24121_v43  ;;  %v11968_v53 = vpop.f32.mrb[11].mxu0 }
 0x6e7   : > { %v20325_v4 = vadd.f32 %v11968_v53, %v11967_v20  ;;  %14998 = vmatprep.subr.bf16.mxu1 %v23936_v62  ;;  %15414 = vmatpush3.bf16.msra.mxu0 %v15413_v33  ;;  %v24158_v20 = vld [vmem:[#allocation69_spill] sm:$0xff] }
 0x6e8   : > { %15415 = vmatprep.subr.bf16.mxu0 %v23936_v62  ;;  %v24159_v43 = vand.u32 4294901760, %v24158_v20 }
 0x6ea   : > { %15000 = vmatpush3.bf16.msra.mxu1 %v24122_v60  ;;  %v4656_v53 = vsub.f32 %v24158_v20, %v24159_v43 }
 0x6eb   : > { %15001 = vmatprep.subr.bf16.mxu1 %v23936_v62  ;;  %15417 = vmatpush3.bf16.msra.mxu0 %v15416_v17  ;;  %v24160_v17 = vld [vmem:[#allocation70_spill] sm:$0xff] }
 0x6ec   : > { %15418 = vmatprep.subr.bf16.mxu0 %v23936_v62  ;;  %v24161_v60 = vand.u32 4294901760, %v24160_v17 }
 0x6ee   : > { %15003 = vmatpush3.bf16.msra.mxu1 %v24123_v32 }
 0x6ef   : > { %15004 = vmatprep.subr.bf16.mxu1 %v23936_v62  ;;  %15420 = vmatpush3.bf16.msra.mxu0 %v15419_v21  ;;  %v4663_v21 = vsub.f32 %v24160_v17, %v24161_v60  ;;  %v24186_v60 = vld [vmem:[#allocation52_spill] sm:$0xff] }
 0x6f0   : > { %15421 = vmatprep.subr.bf16.mxu0 %v23936_v62 }
 0x6f2   : > { %15006 = vmatpush3.bf16.msra.mxu1 %v24124_v40  ;;  %13884 = vmatmul.mubr.f32.vlgmr.msra.gmra.mrb[16].mxu0 %v19000_v58 }
 0x6f3   : > { %15007 = vmatprep.subr.bf16.mxu1 %v23936_v62  ;;  %15423 = vmatpush3.bf16.msra.mxu0 %v19833_v54 }
 0x6f4   : > { %15424 = vmatprep.subr.bf16.mxu0 %v23936_v62  ;;  %13918 = vmatprep.mubr.msk.f32.mxu0 %vm17371_vm0, %v23939_v5 }
 0x6f6   : > { %15009 = vmatpush3.bf16.msra.mxu1 %v24125_v48  ;;  %v24162_v48 = vld [vmem:[#allocation71_spill] sm:$0xff] }
 0x6f7   : > { %15010 = vmatprep.subr.bf16.mxu1 %v23936_v62  ;;  %15426 = vmatpush3.bf16.msra.mxu0 %v19854_v51 }
 0x6f8   : > { %15427 = vmatprep.subr.bf16.mxu0 %v23936_v62 }
 0x6fa   : > { %15012 = vmatpush3.bf16.msra.mxu1 %v20174_v38 }
 0x6fb   : > { %15013 = vmatprep.subr.bf16.mxu1 %v23936_v62  ;;  %15429 = vmatpush3.bf16.msra.mxu0 %v19865_v44  ;;  %v24126_v44 = vpack.c.bf16 %v19544_v49, %v19542_v1  ;;  %v24145_v1 = vand.u32 4294901760, %v19887_v37  ;;  %v24150_v37 = vand.u32 4294901760, %v19900_v45 }
 0x6fc   : > { %15430 = vmatprep.subr.bf16.mxu0 %v23936_v62 }
 0x6fd   : > { %13569 = vmatmul.mubr.f32.vlgmr.msra.gmra.mrb[8].mxu1 %v20282_v41 }
 0x6fe   : > { %15015 = vmatpush3.bf16.msra.mxu1 %v15014_v16  ;;  %13603 = vmatprep.mubr.msk.f32.mxu1 %vm17371_vm0, %v23939_v5 }
 0x6ff   : > { %15016 = vmatprep.subr.bf16.mxu1 %v23936_v62  ;;  %15432 = vmatpush3.bf16.msra.mxu0 %v19935_v26  ;;  %v24129_v26 = vpack.c.bf16 %v19915_v19, %v19913_v2 }
 0x700   : > { %15433 = vmatprep.subr.bf16.mxu0 %v23936_v62 }
 0x702   : > { %15018 = vmatpush3.bf16.msra.mxu1 %v24126_v44  ;;  %v24163_v44 = vand.u32 4294901760, %v24162_v48 }
 0x703   : > { %15019 = vmatprep.subr.bf16.mxu1 %v23936_v62  ;;  %15435 = vmatpush3.bf16.msra.mxu0 %v19965_v28  ;;  %v24128_v28 = vpack.c.bf16 %v19902_v14, %v19900_v45 }
 0x704   : > { %15436 = vmatprep.subr.bf16.mxu0 %v23936_v62 }
 0x705   : > { %v12037_v51 = vpop.f32.mrb[12].mxu0 }
 0x706   : > { %15021 = vmatpush3.bf16.msra.mxu1 %v15020_v15  ;;  %v12038_v54 = vpop.f32.mrb[13].mxu0  ;;  %v24135_v15 = vld [vmem:[#allocation105_spill] sm:$0xff] }
 0x707   : > { %v20376_v38 = vadd.f32 %v12038_v54, %v12037_v51  ;;  %15022 = vmatprep.subr.bf16.mxu1 %v23936_v62  ;;  %15438 = vmatpush3.bf16.msra.mxu0 %v20002_v29  ;;  %v24127_v29 = vpack.c.bf16 %v19896_v11, %v19894_v63  ;;  %v4782_v51 = vsub.f32 %v24162_v48, %v24163_v44  ;;  %v24164_v54 = vld [vmem:[#allocation73_spill] sm:$0xff]  ;;  %v24189_v44 = vld [vmem:[#allocation87_spill] sm:$0xff] }
 0x708   : > { %15439 = vmatprep.subr.bf16.mxu0 %v23936_v62 }
 0x70a   : > { %15024 = vmatpush3.bf16.msra.mxu1 %v15023_v57  ;;  %v24136_v57 = vld [vmem:[#allocation106_spill] sm:$0xff] }
 0x70b   : > { %15025 = vmatprep.subr.bf16.mxu1 %v23936_v62  ;;  %15441 = vmatpush3.bf16.msra.mxu0 %v24106_v8  ;;  %v24138_v8 = vand.u32 4294901760, %v19508_v39  ;;  %v24142_v39 = vand.u32 4294901760, %v19872_v50  ;;  %v24148_v50 = vand.u32 4294901760, %v19894_v63  ;;  %v24154_v63 = vld [vmem:[#allocation66_spill] sm:$0xff] }
 0x70c   : > { %15442 = vmatprep.subr.bf16.mxu0 %v23936_v62 }
 0x70e   : > { %15027 = vmatpush3.bf16.msra.mxu1 %v15026_v55  ;;  %v24137_v55 = vld [vmem:[#allocation107_spill] sm:$0xff] }
 0x70f   : > { %15028 = vmatprep.subr.bf16.mxu1 %v23936_v62  ;;  %15444 = vmatpush3.bf16.msra.mxu0 %v24107_v31  ;;  %v24139_v31 = vand.u32 4294901760, %v19510_v36  ;;  %v24143_v36 = vand.u32 4294901760, %v19877_v7  ;;  %v24149_v7 = vand.u32 4294901760, %v19896_v11  ;;  %v24155_v11 = vand.u32 4294901760, %v24154_v63 }
 0x711   : > { %v15062_v30 = vpack.c.bf16 %v24139_v31, %v24138_v8  ;;  %v15068_v25 = vpack.c.bf16 %v24143_v36, %v24142_v39  ;;  %v15077_v61 = vpack.c.bf16 %v24149_v7, %v24148_v50  ;;  %v4768_v45 = vsub.f32 %v24154_v63, %v24155_v11 }
 0x712   : > { %15030 = vmatpush3.bf16.msra.mxu1 %v24127_v29  ;;  %13919 = vmatmul.mubr.f32.vlgmr.msra.gmra.mrb[16].mxu0 %v19000_v58  ;;  %v24165_v29 = vand.u32 4294901760, %v24164_v54 }
 0x713   : > { %15031 = vmatprep.subr.bf16.mxu1 %v23936_v62  ;;  %v4769_v32 = vand.u32 4294901760, %v4768_v45 }
 0x716   : > { %15033 = vmatpush3.bf16.msra.mxu1 %v24128_v28  ;;  %v4789_v28 = vsub.f32 %v24164_v54, %v24165_v29 }
 0x717   : > { %15034 = vmatprep.subr.bf16.mxu1 %v23936_v62 }
 0x718   : > { %v4790_v39 = vand.u32 4294901760, %v4789_v28 }
 0x71a   : > { %15036 = vmatpush3.bf16.msra.mxu1 %v24129_v26  ;;  %v4657_v26 = vand.u32 4294901760, %v4656_v53 }
 0x71b   : > { %15037 = vmatprep.subr.bf16.mxu1 %v23936_v62 }
 0x71d   : > { %13604 = vmatmul.mubr.f32.vlgmr.msra.gmra.mrb[8].mxu1 %v20292_v9  ;;  %v24144_v9 = vand.u32 4294901760, %v19882_v46  ;;  %v24151_v46 = vand.u32 4294901760, %v19902_v14  ;;  %v24156_v14 = vld [vmem:[#allocation67_spill] sm:$0xff] }
 0x71e   : > { %15039 = vmatpush3.bf16.msra.mxu1 %v24130_v22  ;;  %13638 = vmatprep.mubr.msk.f32.mxu1 %vm17371_vm0, %v23939_v5 }
 0x71f   : > { %15040 = vmatprep.subr.bf16.mxu1 %v23936_v62  ;;  %v15071_v49 = vpack.c.bf16 %v24145_v1, %v24144_v9  ;;  %v15080_v35 = vpack.c.bf16 %v24151_v46, %v24150_v37  ;;  %v24178_v46 = vld [vmem:[#allocation82_spill] sm:$0xff] }
 0x722   : > { %15042 = vmatpush3.bf16.msra.mxu1 %v24131_v6 }
 0x723   : > { %15043 = vmatprep.subr.bf16.mxu1 %v23936_v62 }
 0x725   : > { %v12107_v24 = vpop.f32.mrb[14].mxu0 }
 0x726   : > { %15045 = vmatpush3.bf16.msra.mxu1 %v24132_v27  ;;  %v12108_v59 = vpop.f32.mrb[15].mxu0 }
 0x727   : > { %v20413_v16 = vadd.f32 %v12108_v59, %v12107_v24  ;;  %15046 = vmatprep.subr.bf16.mxu1 %v23936_v62  ;;  %v24168_v59 = vld [vmem:[#allocation76_spill] sm:$0xff] }
 0x72a   : > { %15048 = vmatpush3.bf16.msra.mxu1 %v24133_v13 }
 0x72b   : > { %15049 = vmatprep.subr.bf16.mxu1 %v23936_v62 }
 0x72e   : > { %15051 = vmatpush3.bf16.msra.mxu1 %v24134_v34 }
 0x72f   : > { %15052 = vmatprep.subr.bf16.mxu1 %v23936_v62 }
 0x732   : > { %15054 = vmatpush3.bf16.msra.mxu1 %v24135_v15 }
 0x733   : > { %15055 = vmatprep.subr.bf16.mxu1 %v23936_v62 }
 0x736   : > { %15057 = vmatpush3.bf16.msra.mxu1 %v24136_v57 }
 0x737   : > { %15058 = vmatprep.subr.bf16.mxu1 %v23936_v62 }
 0x73a   : > { %15060 = vmatpush3.bf16.msra.mxu1 %v24137_v55 }
 0x73b   : > { %15061 = vmatprep.subr.bf16.mxu1 %v23936_v62 }
 0x73d   : > { %13639 = vmatmul.mubr.f32.vlgmr.msra.gmra.mrb[8].mxu1 %v3921_v42  ;;  %v24146_v42 = vand.u32 4294901760, %v19890_v52  ;;  %v24152_v52 = vand.u32 4294901760, %v19913_v2  ;;  %v24157_v2 = vand.u32 4294901760, %v24156_v14 }
 0x73e   : > { %15063 = vmatpush3.bf16.msra.mxu1 %v15062_v30  ;;  %13673 = vmatprep.mubr.msk.f32.mxu1 %vm17371_vm0, %v23939_v5  ;;  %v24172_v30 = vld [vmem:[#allocation78_spill] sm:$0xff] }
 0x73f   : > { %15064 = vmatprep.subr.bf16.mxu1 %v23936_v62  ;;  %v15074_v18 = vpack.c.bf16 %v24147_v23, %v24146_v42  ;;  %v15083_v33 = vpack.c.bf16 %v24153_v0, %v24152_v52  ;;  %v4775_v19 = vsub.f32 %v24156_v14, %v24157_v2  ;;  %v24173_v12 = vand.u32 4294901760, %v24172_v30  ;;  %v24180_v0 = vld [vmem:[#allocation83_spill] sm:$0xff]  ;;  %v24182_v14 = vld [vmem:[#allocation84_spill] sm:$0xff] }
 0x741   : > { %v4776_v40 = vand.u32 4294901760, %v4775_v19  ;;  %v4803_v56 = vsub.f32 %v24172_v30, %v24173_v12  ;;  %v24184_v19 = vld [vmem:[#allocation85_spill] sm:$0xff] }
 0x742   : > { %15066 = vmatpush3.bf16.msra.mxu1 %v15065_v47  ;;  %v24185_v20 = vand.u32 4294901760, %v24184_v19 }
 0x743   : > { %15067 = vmatprep.subr.bf16.mxu1 %v23936_v62  ;;  %v15141_v47 = vpack.c.bf16 %v4776_v40, %v4769_v32  ;;  %v24187_v40 = vld [vmem:[#allocation86_spill] sm:$0xff] }
 0x744   : > { %v4705_v43 = vsub.f32 %v24184_v19, %v24185_v20  ;;  %v24209_v20 = vld [vmem:[#allocation97_spill] sm:$0xff] }
 0x746   : > { %15069 = vmatpush3.bf16.msra.mxu1 %v15068_v25  ;;  %v24174_v25 = vld [vmem:[#allocation80_spill] sm:$0xff] }
 0x747   : > { %15070 = vmatprep.subr.bf16.mxu1 %v23936_v62  ;;  %v24175_v9 = vand.u32 4294901760, %v24174_v25 }
 0x749   : > { %v4684_v1 = vsub.f32 %v24174_v25, %v24175_v9 }
 0x74a   : > { %15072 = vmatpush3.bf16.msra.mxu1 %v15071_v49  ;;  %v24176_v49 = vld [vmem:[#allocation81_spill] sm:$0xff] }
 0x74b   : > { %15073 = vmatprep.subr.bf16.mxu1 %v23936_v62  ;;  %v24177_v42 = vand.u32 4294901760, %v24176_v49  ;;  %v4685_v11 = vand.u32 4294901760, %v4684_v1  ;;  %v24201_v1 = vld [vmem:[#allocation93_spill] sm:$0xff] }
 0x74d   : > { %v4691_v23 = vsub.f32 %v24176_v49, %v24177_v42  ;;  %v24202_v49 = vand.u32 4294901760, %v24201_v1 }
 0x74e   : > { %15075 = vmatpush3.bf16.msra.mxu1 %v15074_v18 }
 0x74f   : > { %15076 = vmatprep.subr.bf16.mxu1 %v23936_v62  ;;  %v4692_v45 = vand.u32 4294901760, %v4691_v23  ;;  %v4733_v42 = vsub.f32 %v24201_v1, %v24202_v49  ;;  %v24225_v1 = vld [vmem:[#allocation43_spill] sm:$0xff]  ;;  %v24226_v49 = vld [vmem:[#allocation57_spill] sm:$0xff] }
 0x751   : > { %v15151_v29 = vpack.c.bf16 %v4692_v45, %v4685_v11  ;;  %v4734_v11 = vand.u32 4294901760, %v4733_v42  ;;  %v24227_v42 = vld [vmem:[#allocation58_spill] sm:$0xff] }
 0x752   : > { %15078 = vmatpush3.bf16.msra.mxu1 %v15077_v61  ;;  %v4804_v61 = vand.u32 4294901760, %v4803_v56 }
 0x753   : > { %15079 = vmatprep.subr.bf16.mxu1 %v23936_v62 }
 0x756   : > { %15081 = vmatpush3.bf16.msra.mxu1 %v15080_v35  ;;  %v24179_v35 = vand.u32 4294901760, %v24178_v46 }
 0x757   : > { %15082 = vmatprep.subr.bf16.mxu1 %v23936_v62 }
 0x758   : > { %v4810_v52 = vsub.f32 %v24178_v46, %v24179_v35 }
 0x75a   : > { %15084 = vmatpush3.bf16.msra.mxu1 %v15083_v33  ;;  %v24181_v33 = vand.u32 4294901760, %v24180_v0 }
 0x75b   : > { %15085 = vmatprep.subr.bf16.mxu1 %v23936_v62 }
 0x75c   : > { %v4817_v63 = vsub.f32 %v24180_v0, %v24181_v33 }
 0x75d   : > { %13674 = vmatmul.mubr.f32.vlgmr.msra.gmra.mrb[8].mxu1 %v20282_v41 }
 0x75e   : > { %15087 = vmatpush3.bf16.msra.mxu1 %v24130_v22  ;;  %13708 = vmatprep.mubr.msk.f32.mxu1 %vm17371_vm0, %v23939_v5  ;;  %v4664_v22 = vand.u32 4294901760, %v4663_v21  ;;  %v4811_v21 = vand.u32 4294901760, %v4810_v52  ;;  %v4818_v32 = vand.u32 4294901760, %v4817_v63  ;;  %v24205_v52 = vld [vmem:[#allocation95_spill] sm:$0xff] }
 0x75f   : > { %15088 = vmatprep.subr.bf16.mxu1 %v23936_v62  ;;  %v24206_v0 = vand.u32 4294901760, %v24205_v52 }
 0x760   : > { %v15143_v36 = vpack.c.bf16 %v4664_v22, %v4657_v26  ;;  %v4706_v26 = vand.u32 4294901760, %v4705_v43  ;;  %v24191_v22 = vld [vmem:[#allocation88_spill] sm:$0xff]  ;;  %v15153_v56 = vpack.c.bf16 %v4818_v32, %v4811_v21  ;;  %v24210_v43 = vand.u32 4294901760, %v24209_v20  ;;  %v24211_v32 = vld [vmem:[#allocation98_spill] sm:$0xff] }
 0x761   : > { %v4859_v33 = vsub.f32 %v24205_v52, %v24206_v0  ;;  %v24236_v52 = vld [vmem:[#allocation72_spill] sm:$0xff] }
 0x762   : > { %15090 = vmatpush3.bf16.msra.mxu1 %v24131_v6  ;;  %v24166_v6 = vld [vmem:[#allocation75_spill] sm:$0xff]  ;;  %v24237_v0 = vld [vmem:[#allocation56_spill] sm:$0xff] }
 0x763   : > { %15091 = vmatprep.subr.bf16.mxu1 %v23936_v62  ;;  %v24167_v24 = vand.u32 4294901760, %v24166_v6  ;;  %v4860_v21 = vand.u32 4294901760, %v4859_v33 }
 0x766   : > { %15093 = vmatpush3.bf16.msra.mxu1 %v24132_v27  ;;  %v4670_v27 = vsub.f32 %v24166_v6, %v24167_v24  ;;  %v24192_v6 = vand.u32 4294901760, %v24191_v22 }
 0x767   : > { %15094 = vmatprep.subr.bf16.mxu1 %v23936_v62 }
 0x768   : > { %v4671_v18 = vand.u32 4294901760, %v4670_v27  ;;  %v4712_v24 = vsub.f32 %v24191_v22, %v24192_v6  ;;  %v24193_v27 = vld [vmem:[#allocation89_spill] sm:$0xff] }
 0x76a   : > { %15096 = vmatpush3.bf16.msra.mxu1 %v24133_v13  ;;  %v24169_v13 = vand.u32 4294901760, %v24168_v59  ;;  %v4713_v23 = vand.u32 4294901760, %v4712_v24  ;;  %v24217_v24 = vld [vmem:[#allocation101_spill] sm:$0xff] }
 0x76b   : > { %15097 = vmatprep.subr.bf16.mxu1 %v23936_v62 }
 0x76e   : > { %15099 = vmatpush3.bf16.msra.mxu1 %v24134_v34  ;;  %v4677_v34 = vsub.f32 %v24168_v59, %v24169_v13  ;;  %v24194_v59 = vand.u32 4294901760, %v24193_v27 }
 0x76f   : > { %15100 = vmatprep.subr.bf16.mxu1 %v23936_v62 }
 0x770   : > { %v4678_v50 = vand.u32 4294901760, %v4677_v34  ;;  %v4719_v13 = vsub.f32 %v24193_v27, %v24194_v59  ;;  %v24195_v34 = vld [vmem:[#allocation90_spill] sm:$0xff]  ;;  %v24218_v27 = vand.u32 4294901760, %v24217_v24 }
 0x772   : > { %15102 = vmatpush3.bf16.msra.mxu1 %v24135_v15  ;;  %v24170_v15 = vld [vmem:[#allocation77_spill] sm:$0xff]  ;;  %v15147_v53 = vpack.c.bf16 %v4678_v50, %v4671_v18  ;;  %v4720_v18 = vand.u32 4294901760, %v4719_v13  ;;  %v4761_v59 = vsub.f32 %v24217_v24, %v24218_v27 }
 0x773   : > { %15103 = vmatprep.subr.bf16.mxu1 %v23936_v62  ;;  %v24171_v8 = vand.u32 4294901760, %v24170_v15 }
 0x774   : > { %v15159_v45 = vpack.c.bf16 %v4720_v18, %v4713_v23  ;;  %v24228_v23 = vld [vmem:[#allocation59_spill] sm:$0xff]  ;;  %v24229_v18 = vld [vmem:[#allocation60_spill] sm:$0xff] }
 0x775   : > { %v4796_v31 = vsub.f32 %v24170_v15, %v24171_v8  ;;  %v24196_v15 = vand.u32 4294901760, %v24195_v34 }
 0x776   : > { %15105 = vmatpush3.bf16.msra.mxu1 %v24136_v57  ;;  %v4783_v57 = vand.u32 4294901760, %v4782_v51  ;;  %v24190_v51 = vand.u32 4294901760, %v24189_v44 }
 0x777   : > { %15106 = vmatprep.subr.bf16.mxu1 %v23936_v62  ;;  %v4797_v7 = vand.u32 4294901760, %v4796_v31  ;;  %v4838_v8 = vsub.f32 %v24195_v34, %v24196_v15  ;;  %v24197_v31 = vld [vmem:[#allocation91_spill] sm:$0xff] }
 0x778   : > { %v15145_v37 = vpack.c.bf16 %v4790_v39, %v4783_v57  ;;  %v4831_v54 = vsub.f32 %v24189_v44, %v24190_v51  ;;  %v24198_v30 = vand.u32 4294901760, %v24197_v31 }
 0x779   : > { %v15149_v17 = vpack.c.bf16 %v4804_v61, %v4797_v7  ;;  %v4839_v50 = vand.u32 4294901760, %v4838_v8 }
 0x77a   : > { %15108 = vmatpush3.bf16.msra.mxu1 %v24137_v55  ;;  %v24183_v55 = vand.u32 4294901760, %v24182_v14  ;;  %v4845_v12 = vsub.f32 %v24197_v31, %v24198_v30  ;;  %v4832_v57 = vand.u32 4294901760, %v4831_v54  ;;  %v4762_v30 = vand.u32 4294901760, %v4761_v59 }
 0x77b   : > { %15142 = vmatprep.subr.bf16.mxu1 %v15141_v47 }
 0x77c   : > { %v4698_v2 = vsub.f32 %v24182_v14, %v24183_v55  ;;  %v4846_v7 = vand.u32 4294901760, %v4845_v12  ;;  %v24207_v55 = vld [vmem:[#allocation96_spill] sm:$0xff] }
 0x77d   : > { %13709 = vmatmul.mubr.f32.vlgmr.msra.gmra.mrb[8].mxu1 %v20282_v41  ;;  %v24188_v41 = vand.u32 4294901760, %v24187_v40 }
 0x77e   : > { %15144 = vmatpush3.bf16.msra.mxu1 %v15143_v36  ;;  %4877 = vmatprep.mubr.f32.mxu1 %v24186_v60  ;;  %v4699_v28 = vand.u32 4294901760, %v4698_v2  ;;  %v24199_v36 = vld [vmem:[#allocation92_spill] sm:$0xff]  ;;  %v15161_v14 = vpack.c.bf16 %v4846_v7, %v4839_v50  ;;  %v24208_v2 = vand.u32 4294901760, %v24207_v55  ;;  %v24230_v50 = vld [vmem:[#allocation61_spill] sm:$0xff]  ;;  %v24231_v7 = vld [vmem:[#allocation62_spill] sm:$0xff] }
 0x77f   : > { %15146 = vmatprep.subr.bf16.mxu1 %v15145_v37  ;;  %v4824_v48 = vsub.f32 %v24187_v40, %v24188_v41  ;;  %v24200_v25 = vand.u32 4294901760, %v24199_v36  ;;  %v24203_v37 = vld [vmem:[#allocation94_spill] sm:$0xff]  ;;  %v24212_v40 = vand.u32 4294901760, %v24211_v32 }
 0x780   : > { %v15155_v39 = vpack.c.bf16 %v4706_v26, %v4699_v28  ;;  %v24204_v46 = vand.u32 4294901760, %v24203_v37  ;;  %v4740_v19 = vsub.f32 %v24207_v55, %v24208_v2  ;;  %v24215_v26 = vld [vmem:[#allocation100_spill] sm:$0xff] }
 0x781   : > { %v4825_v47 = vand.u32 4294901760, %v4824_v48  ;;  %v4726_v9 = vsub.f32 %v24199_v36, %v24200_v25  ;;  %v4866_v41 = vsub.f32 %v24211_v32, %v24212_v40  ;;  %v24213_v48 = vld [vmem:[#allocation99_spill] sm:$0xff]  ;;  %v24216_v22 = vand.u32 4294901760, %v24215_v26  ;;  %v24222_v36 = vld [vmem:[#allocation53_spill] sm:$0xff]  ;;  %v24223_v25 = vld [vmem:[#allocation50_spill] sm:$0xff] }
 0x782   : > { %15148 = vmatpush3.bf16.msra.mxu1 %v15147_v53  ;;  %v4852_v35 = vsub.f32 %v24203_v37, %v24204_v46  ;;  %v4747_v53 = vsub.f32 %v24209_v20, %v24210_v43  ;;  %v24214_v44 = vand.u32 4294901760, %v24213_v48  ;;  %v24233_v37 = vld [vmem:[#allocation64_spill] sm:$0xff]  ;;  %v24234_v46 = vld [vmem:[#allocation65_spill] sm:$0xff]  ;;  %v6047_v43 = vld [vmem:[#allocation14 + $0x18] sm:$0xff] }
 0x783   : > { %15150 = vmatprep.subr.bf16.mxu1 %v15149_v17  ;;  %v15157_v61 = vpack.c.bf16 %v4832_v57, %v4825_v47  ;;  %v4727_v63 = vand.u32 4294901760, %v4726_v9  ;;  %v4754_v6 = vsub.f32 %v24215_v26, %v24216_v22  ;;  %v4867_v34 = vand.u32 4294901760, %v4866_v41  ;;  %v24219_v47 = vld [vmem:[#allocation48_spill] sm:$0xff]  ;;  %v24220_v57 = vld [vmem:[#allocation55_spill] sm:$0xff]  ;;  %v6046_v20 = vld [vmem:[#allocation14 + $0x10] sm:$0xff] }
 0x784   : > { %v4853_v17 = vand.u32 4294901760, %v4852_v35  ;;  %v4873_v51 = vsub.f32 %v24213_v48, %v24214_v44  ;;  %v4748_v28 = vand.u32 4294901760, %v4747_v53  ;;  %v24224_v9 = vld [vmem:[#allocation51_spill] sm:$0xff]  ;;  %v24235_v35 = vld [vmem:[#allocation68_spill] sm:$0xff]  ;;  %v6074_v53 = vand.u32 4294901760, %v6046_v20 }
 0x785   : > { %v15163_v54 = vpack.c.bf16 %v4734_v11, %v4727_v63  ;;  %v4755_v31 = vand.u32 4294901760, %v4754_v6  ;;  %v6044_v63 = vld [vmem:[#allocation14] sm:$0xff]  ;;  %v6045_v11 = vld [vmem:[#allocation14 + $0x8] sm:$0xff] }
 0x786   : > { %15152 = vmatpush3.bf16.msra.mxu1 %v15151_v29  ;;  %v4741_v29 = vand.u32 4294901760, %v4740_v19  ;;  %v15165_v13 = vpack.c.bf16 %v4860_v21, %v4853_v17  ;;  %v4874_v15 = vand.u32 4294901760, %v4873_v51  ;;  %v6077_v17 = vand.u32 4294901760, %v6047_v43  ;;  %v6048_v32 = vld [vmem:[#allocation14 + $0x20] sm:$0xff]  ;;  %v6049_v40 = vld [vmem:[#allocation14 + $0x28] sm:$0xff]  ;;  %v6050_v51 = vld [vmem:[#allocation14 + $0x30] sm:$0xff] }
 0x787   : > { %15154 = vmatprep.subr.bf16.mxu1 %v15153_v56  ;;  %v15171_v56 = vpack.c.bf16 %v4762_v30, %v4755_v31  ;;  %v6080_v41 = vand.u32 4294901760, %v6048_v32  ;;  %v6083_v48 = vand.u32 4294901760, %v6049_v40  ;;  %v6052_v22 = vld [vmem:[#allocation14 + $0x40] sm:$0xff]  ;;  %v6053_v6 = vld [vmem:[#allocation14 + $0x48] sm:$0xff] }
 0x788   : > { %v15167_v8 = vpack.c.bf16 %v4748_v28, %v4741_v29  ;;  %v15169_v12 = vpack.c.bf16 %v4874_v15, %v4867_v34  ;;  %v20636_v21 = vpack.c.bf16 %v6077_v17, %v6074_v53  ;;  %v6086_v29 = vand.u32 4294901760, %v6050_v51  ;;  %v6055_v34 = vld [vmem:[#allocation14 + $0x58] sm:$0xff]  ;;  %v6056_v30 = vld [vmem:[#allocation14 + $0x60] sm:$0xff] }
 0x789   : > { %v20640_v44 = vpack.c.bf16 %v6083_v48, %v6080_v41  ;;  %v6092_v24 = vand.u32 4294901760, %v6052_v22  ;;  %v6095_v27 = vand.u32 4294901760, %v6053_v6 }
 0x78a   : > { %15156 = vmatpush3.bf16.msra.mxu1 %v15155_v39  ;;  %v24221_v39 = vld [vmem:[#allocation49_spill] sm:$0xff] }
 0x78b   : > { %15158 = vmatprep.subr.bf16.mxu1 %v15157_v61  ;;  %v24232_v61 = vld [vmem:[#allocation63_spill] sm:$0xff]  ;;  %v20648_v59 = vpack.c.bf16 %v6095_v27, %v6092_v24 }
 0x78e   : > { %15160 = vmatpush3.bf16.msra.mxu1 %v15159_v45  ;;  %v6068_v45 = vand.u32 4294901760, %v6044_v63 }
 0x78f   : > { %15162 = vmatprep.subr.bf16.mxu1 %v15161_v14  ;;  %v6071_v14 = vand.u32 4294901760, %v6045_v11 }
 0x790   : > { %v20630_v2 = vsub.f32 %v6044_v63, %v6068_v45 }
 0x791   : > { %v20628_v55 = vpack.c.bf16 %v6071_v14, %v6068_v45  ;;  %v20632_v19 = vsub.f32 %v6045_v11, %v6071_v14 }
 0x792   : > { %15164 = vmatpush3.bf16.msra.mxu1 %v15163_v54  ;;  %v6051_v54 = vld [vmem:[#allocation14 + $0x38] sm:$0xff] }
 0x793   : > { %15166 = vmatprep.subr.bf16.mxu1 %v15165_v13  ;;  %v6089_v28 = vand.u32 4294901760, %v6051_v54  ;;  %v6054_v13 = vld [vmem:[#allocation14 + $0x50] sm:$0xff] }
 0x794   : > { %v6098_v15 = vand.u32 4294901760, %v6054_v13 }
 0x795   : > { %v20644_v26 = vpack.c.bf16 %v6089_v28, %v6086_v29 }
 0x796   : > { %15168 = vmatpush3.bf16.msra.mxu1 %v15167_v8  ;;  %v6101_v8 = vand.u32 4294901760, %v6055_v34 }
 0x797   : > { %15170 = vmatprep.subr.bf16.mxu1 %v15169_v12  ;;  %v6057_v12 = vld [vmem:[#allocation14 + $0x68] sm:$0xff] }
 0x798   : > { %v20652_v31 = vpack.c.bf16 %v6101_v8, %v6098_v15 }
 0x79a   : > { %15172 = vmatpush3.bf16.msra.mxu1 %v15171_v56  ;;  %v6104_v56 = vand.u32 4294901760, %v6056_v30 }
 0x79b   : > { %15206 = vmatprep.subr.bf16.mxu1 %v24219_v47 }
 0x79d   : > { %4879 = vmatmul.mubr.f32.vlgmr.msra.gmra.mrb[10].mxu1 %v24220_v57 }
 0x79e   : > { %15208 = vmatpush3.bf16.msra.mxu1 %v24221_v39  ;;  %5121 = vmatprep.mubr.f32.mxu1 %v24222_v36  ;;  %v20660_v36 = vsub.f32 %v6048_v32, %v6080_v41 }
 0x79f   : > { %15210 = vmatprep.subr.bf16.mxu1 %v24223_v25 }
 0x7a2   : > { %15212 = vmatpush3.bf16.msra.mxu1 %v24224_v9 }
 0x7a3   : > { %15214 = vmatprep.subr.bf16.mxu1 %v24225_v1 }
 0x7a6   : > { %15216 = vmatpush3.bf16.msra.mxu1 %v24226_v49 }
 0x7a7   : > { %15218 = vmatprep.subr.bf16.mxu1 %v24227_v42 }
 0x7aa   : > { %15220 = vmatpush3.bf16.msra.mxu1 %v24228_v23 }
 0x7ab   : > { %15222 = vmatprep.subr.bf16.mxu1 %v24229_v18 }
 0x7ae   : > { %15224 = vmatpush3.bf16.msra.mxu1 %v24230_v50 }
 0x7af   : > { %15226 = vmatprep.subr.bf16.mxu1 %v24231_v7 }
 0x7b2   : > { %15228 = vmatpush3.bf16.msra.mxu1 %v24232_v61 }
 0x7b3   : > { %15230 = vmatprep.subr.bf16.mxu1 %v24233_v37 }
 0x7b6   : > { %15232 = vmatpush3.bf16.msra.mxu1 %v24234_v46 }
 0x7b7   : > { %15234 = vmatprep.subr.bf16.mxu1 %v24235_v35 }
 0x7ba   : > { %15236 = vmatpush3.bf16.msra.mxu1 %v24236_v52 }
 0x7bb   : > { %15270 = vmatprep.subr.bf16.mxu1 %v24219_v47  ;;  %v6107_v47 = vand.u32 4294901760, %v6057_v12 }
 0x7bd   : > { %5125 = vmatmul.mubr.f32.vlgmr.msra.gmra.mrb[12].mxu1 %v24237_v0  ;;  %v23495_v0 = vand.u32 4294901760, %v20630_v2 }
 0x7be   : > { %15272 = vmatpush3.bf16.msra.mxu1 %v24221_v39  ;;  %5395 = vmatprep.mubr.f32.mxu1 %v24186_v60  ;;  %v20658_v39 = vsub.f32 %v6047_v43, %v6077_v17 }
 0x7bf   : > { %15274 = vmatprep.subr.bf16.mxu1 %v24223_v25  ;;  %v20662_v25 = vsub.f32 %v6049_v40, %v6083_v48  ;;  %v6162_v14 = vsub.f32 %v20630_v2, %v23495_v0 }
 0x7c0   : > { %v23492_v17 = vand.u32 4294901760, %v20658_v39 }
 0x7c1   : > { %v6163_v43 = vand.u32 4294901760, %v6162_v14 }
 0x7c2   : > { %15276 = vmatpush3.bf16.msra.mxu1 %v24224_v9  ;;  %v6058_v9 = vld [vmem:[#allocation14 + $0x70] sm:$0xff]  ;;  %v6183_v41 = vsub.f32 %v20658_v39, %v23492_v17 }
 0x7c3   : > { %15278 = vmatprep.subr.bf16.mxu1 %v24225_v1  ;;  %v6059_v1 = vld [vmem:[#allocation14 + $0x78] sm:$0xff] }
 0x7c6   : > { %15280 = vmatpush3.bf16.msra.mxu1 %v24226_v49  ;;  %v20664_v49 = vsub.f32 %v6050_v51, %v6086_v29  ;;  %v23491_v29 = vand.u32 4294901760, %v20660_v36 }
 0x7c7   : > { %15282 = vmatprep.subr.bf16.mxu1 %v24227_v42  ;;  %v20666_v42 = vsub.f32 %v6051_v54, %v6089_v28  ;;  %v6184_v54 = vand.u32 4294901760, %v6183_v41  ;;  %v23490_v28 = vand.u32 4294901760, %v20662_v25 }
 0x7ca   : > { %15284 = vmatpush3.bf16.msra.mxu1 %v24228_v23  ;;  %v20668_v23 = vsub.f32 %v6052_v22, %v6092_v24  ;;  %v6190_v24 = vsub.f32 %v20660_v36, %v23491_v29 }
 0x7cb   : > { %15286 = vmatprep.subr.bf16.mxu1 %v24229_v18  ;;  %v20670_v18 = vsub.f32 %v6053_v6, %v6095_v27  ;;  %v6197_v27 = vsub.f32 %v20662_v25, %v23490_v28 }
 0x7ce   : > { %15288 = vmatpush3.bf16.msra.mxu1 %v24230_v50  ;;  %v20672_v50 = vsub.f32 %v6054_v13, %v6098_v15  ;;  %v6198_v15 = vand.u32 4294901760, %v6197_v27 }
 0x7cf   : > { %15290 = vmatprep.subr.bf16.mxu1 %v24231_v7  ;;  %v20674_v7 = vsub.f32 %v6055_v34, %v6101_v8  ;;  %v6191_v34 = vand.u32 4294901760, %v6190_v24  ;;  %v23489_v8 = vand.u32 4294901760, %v20664_v49 }
 0x7d0   : > { %v23484_v41 = vand.u32 4294901760, %v20672_v50 }
 0x7d2   : > { %15292 = vmatpush3.bf16.msra.mxu1 %v24232_v61  ;;  %v20676_v61 = vpack.c.bf16 %v6107_v47, %v6104_v56  ;;  %v6232_v24 = vsub.f32 %v20672_v50, %v23484_v41 }
 0x7d3   : > { %15294 = vmatprep.subr.bf16.mxu1 %v24233_v37  ;;  %v20678_v37 = vsub.f32 %v6056_v30, %v6104_v56  ;;  %v23488_v30 = vand.u32 4294901760, %v20666_v42  ;;  %v6204_v56 = vsub.f32 %v20664_v49, %v23489_v8 }
 0x7d6   : > { %15296 = vmatpush3.bf16.msra.mxu1 %v24234_v46  ;;  %v20680_v46 = vsub.f32 %v6057_v12, %v6107_v47  ;;  %v20724_v12 = vpack.c.bf16 %v6198_v15, %v6191_v34  ;;  %v6211_v47 = vsub.f32 %v20666_v42, %v23488_v30  ;;  %v23480_v15 = vand.u32 4294901760, %v20678_v37 }
 0x7d7   : > { %15298 = vmatprep.subr.bf16.mxu1 %v24235_v35  ;;  %v6110_v35 = vand.u32 4294901760, %v6058_v9 }
 0x7d9   : > { %v20688_v11 = vsub.f32 %v6058_v9, %v6110_v35  ;;  %v6205_v9 = vand.u32 4294901760, %v6204_v56  ;;  %v23482_v56 = vand.u32 4294901760, %v20680_v46 }
 0x7da   : > { %15300 = vmatpush3.bf16.msra.mxu1 %v24236_v52  ;;  %v6113_v52 = vand.u32 4294901760, %v6059_v1 }
 0x7db   : > { %15445 = vmatprep.subr.bf16.mxu1 %v23936_v62 }
 0x7dc   : > { %v20686_v63 = vpack.c.bf16 %v6113_v52, %v6110_v35  ;;  %v20690_v45 = vsub.f32 %v6059_v1, %v6113_v52  ;;  %v6212_v1 = vand.u32 4294901760, %v6211_v47  ;;  %v23487_v35 = vand.u32 4294901760, %v20668_v23 }
 0x7dd   : > { %5397 = vmatmul.mubr.f32.vlgmr.msra.gmra.mrb[14].mxu1 %v24220_v57  ;;  %v20656_v57 = vsub.f32 %v6046_v20, %v6074_v53  ;;  %v23486_v52 = vand.u32 4294901760, %v20670_v18 }
 0x7de   : > { %13953 = vmatprep.mubr.msk.f32.mxu1 %vm17371_vm0, %v23939_v5  ;;  %15447 = vmatpush3.bf16.msra.mxu1 %v20628_v55  ;;  %v20734_v14 = vpack.c.bf16 %v6212_v1, %v6205_v9  ;;  %v6246_v9 = vsub.f32 %v20678_v37, %v23480_v15  ;;  %v6253_v1 = vsub.f32 %v20680_v46, %v23482_v56 }
 0x7df   : > { %15448 = vmatprep.subr.bf16.mxu1 %v23936_v62  ;;  %v23493_v53 = vand.u32 4294901760, %v20656_v57 }
 0x7e1   : > { %v6176_v40 = vsub.f32 %v20656_v57, %v23493_v53 }
 0x7e2   : > { %15450 = vmatpush3.bf16.msra.mxu1 %v20636_v21 }
 0x7e3   : > { %15451 = vmatprep.subr.bf16.mxu1 %v23936_v62  ;;  %v6177_v51 = vand.u32 4294901760, %v6176_v40 }
 0x7e5   : > { %v20626_v60 = vpop.f32.mrb[16].mxu0  ;;  %v20714_v6 = vpack.c.bf16 %v6184_v54, %v6177_v51  ;;  %v23481_v51 = vand.u32 4294901760, %v20674_v7 }
 0x7e6   : > { %v13920_v33 = vpop.f32.mrb[17].mxu0  ;;  %15453 = vmatpush3.bf16.msra.mxu1 %v20640_v44 }
 0x7e7   : > { %15454 = vmatprep.subr.bf16.mxu1 %v23936_v62  ;;  %v23494_v33 = vand.u32 4294901760, %v20632_v19  ;;  %v6239_v27 = vsub.f32 %v20674_v7, %v23481_v51 }
 0x7e9   : > { %v6169_v20 = vsub.f32 %v20632_v19, %v23494_v33  ;;  %v6240_v34 = vand.u32 4294901760, %v6239_v27 }
 0x7ea   : > { %15456 = vmatpush3.bf16.msra.mxu1 %v20644_v26 }
 0x7eb   : > { %15457 = vmatprep.subr.bf16.mxu1 %v23936_v62  ;;  %v6170_v32 = vand.u32 4294901760, %v6169_v20  ;;  %v6218_v20 = vsub.f32 %v20668_v23, %v23487_v35  ;;  %v15512_v35 = vpack.c.bf16 %v20680_v46, %v20678_v37 }
 0x7ed   : > { %v20708_v48 = vpack.c.bf16 %v6170_v32, %v6163_v43  ;;  %v6225_v43 = vsub.f32 %v20670_v18, %v23486_v52  ;;  %v6219_v32 = vand.u32 4294901760, %v6218_v20  ;;  %v6247_v20 = vand.u32 4294901760, %v6246_v9 }
 0x7ee   : > { %15459 = vmatpush3.bf16.msra.mxu1 %v20648_v59  ;;  %v15494_v9 = vpack.c.bf16 %v20632_v19, %v20630_v2  ;;  %v15509_v52 = vpack.c.bf16 %v20674_v7, %v20672_v50 }
 0x7ef   : > { %15460 = vmatprep.subr.bf16.mxu1 %v23936_v62  ;;  %v6226_v40 = vand.u32 4294901760, %v6225_v43  ;;  %v6254_v43 = vand.u32 4294901760, %v6253_v1  ;;  %v11304_v1 = vld [vmem:[%s24239_s2] ss:$0 sm:$0xff] }
 0x7f1   : > { %v15482_v54 = vpack.c.bf16 %v6226_v40, %v6219_v32  ;;  %v23483_v32 = vand.u32 4294901760, %v20688_v11  ;;  %v23485_v40 = vand.u32 4294901760, %v20690_v45 }
 0x7f2   : > { %15462 = vmatpush3.bf16.msra.mxu1 %v20652_v31 }
 0x7f3   : > { %15463 = vmatprep.subr.bf16.mxu1 %v23936_v62  ;;  %v6260_v27 = vsub.f32 %v20688_v11, %v23483_v32  ;;  %v4649_v32 = vadd.f32 %v20325_v4, %v11304_v1  ;;  %v15515_v4 = vpack.c.bf16 %v20690_v45, %v20688_v11 }
 0x7f6   : > { %15465 = vmatpush3.bf16.msra.mxu1 %v20676_v61 }
 0x7f7   : > { %15466 = vmatprep.subr.bf16.mxu1 %v23936_v62 }
 0x7fa   : > { %15468 = vmatpush3.bf16.msra.mxu1 %v20686_v63 }
 0x7fb   : > { %15469 = vmatprep.subr.bf16.mxu1 %v23936_v62 }
 0x850   : > { %v20712_v22 = vpop.f32.mrb[8].mxu1 }
 0x851   : > { %24238 = vst [vmem:[#allocation111_spill] sm:$0xff] %v20712_v22  ;;  %v13710_v13 = vpop.f32.mrb[9].mxu1 }
 0x852   : > { %v6233_v13 = vand.u32 4294901760, %v6232_v24  ;;  %v15488_v24 = vpack.c.bf16 %v6254_v43, %v6247_v20  ;;  %v15497_v20 = vpack.c.bf16 %v20658_v39, %v20656_v57 }
 0x854   : > { %v15485_v47 = vpack.c.bf16 %v6240_v34, %v6233_v13  ;;  %v6267_v13 = vsub.f32 %v20690_v45, %v23485_v40  ;;  %v6261_v34 = vand.u32 4294901760, %v6260_v27  ;;  %v15500_v27 = vpack.c.bf16 %v20662_v25, %v20660_v36 }
 0x855   : > { %v15506_v40 = vpack.c.bf16 %v20670_v18, %v20668_v23 }
 0x856   : > { %v6268_v15 = vand.u32 4294901760, %v6267_v13 }
 0x858   : > { %v15491_v51 = vpack.c.bf16 %v6268_v15, %v6261_v34  ;;  %v15503_v34 = vpack.c.bf16 %v20666_v42, %v20664_v49 }
 0x870   : > { %v12002_v43 = vpop.f32.mrb[10].mxu1 }
 0x871   : > { %v12003_v56 = vpop.f32.mrb[11].mxu1 }
 0x872   : > { %v12004_v41 = vadd.f32 %v12003_v56, %v12002_v43 }
 0x874   : > { %v4881_v13 = vadd.f32 %v12004_v41, %v4649_v32 }
 0x876   : > { %v5019_v15 = vadd.f32 %v20376_v38, %v4881_v13 }
 0x890   : > { %v12072_v56 = vpop.f32.mrb[12].mxu1 }
 0x891   : > { %v12073_v1 = vpop.f32.mrb[13].mxu1 }
 0x892   : > { %v12074_v41 = vadd.f32 %v12073_v1, %v12072_v56 }
 0x894   : > { %v5127_v32 = vadd.f32 %v12074_v41, %v5019_v15 }
 0x896   : > { %v5295_v38 = vadd.f32 %v20413_v16, %v5127_v32  ;;  %v24240_v16 = vand.u32 4294901760, %v20630_v2  ;;  %v24244_v2 = vand.u32 4294901760, %v20660_v36  ;;  %v24250_v36 = vand.u32 4294901760, %v20672_v50 }
 0x8b0   : > { %v12142_v43 = vpop.f32.mrb[14].mxu1 }
 0x8b1   : > { %v12143_v13 = vpop.f32.mrb[15].mxu1 }
 0x8b2   : > { %v12144_v30 = vadd.f32 %v12143_v13, %v12142_v43 }
 0x8b4   : > { %v5399_v8 = vadd.f32 %v12144_v30, %v5295_v38  ;;  %v20976_v38 = vld [vmem:[#allocation15 + $0xa0] sm:$0xff] }
 0x8b6   : > { %v16505_v28 = vadd.f32 %v20626_v60, %v5399_v8  ;;  %v24241_v60 = vand.u32 4294901760, %v20632_v19  ;;  %v24245_v19 = vand.u32 4294901760, %v20662_v25  ;;  %v24251_v25 = vand.u32 4294901760, %v20674_v7 }
 0x8b8   : > { %16833 = vtanh.f32 %v16505_v28  ;;  %v15548_v28 = vpack.c.bf16 %v24245_v19, %v24244_v2  ;;  %v15557_v30 = vpack.c.bf16 %v24251_v25, %v24250_v36  ;;  %v20984_v19 = vld [vmem:[#allocation15 + $0x20] sm:$0xff] }
 0x8c2   : > { %v16834_v29 = vpop.eup %16833 }
 0x8c3   : > { %v20789_v17 = vand.u32 4294901760, %v16834_v29 }
 0x8c5   : > { %v6149_v53 = vsub.f32 %v16834_v29, %v20789_v17 }
 0x8c7   : > { %v6150_v33 = vand.u32 4294901760, %v6149_v53 }
 0x8c9   : > { %v6151_v0 = vsub.f32 %v6149_v53, %v6150_v33 }
 0x8cb   : > { %v6152_v22 = vand.u32 4294901760, %v6151_v0  ;;  %v15542_v0 = vpack.c.bf16 %v24241_v60, %v24240_v16 }
 0x8cd   : > { %13954 = vmatmul.mubr.f32.vlgmr.msra.gmra.mrb[16].mxu1 %v6152_v22  ;;  %v24248_v22 = vand.u32 4294901760, %v20668_v23  ;;  %v24254_v23 = vand.u32 4294901760, %v20688_v11  ;;  %v20928_v11 = vld [vmem:[#allocation15 + $0x90] sm:$0xff] }
 0x8ce   : > { %15471 = vmatpush3.bf16.msra.mxu1 %v20708_v48  ;;  %13988 = vmatprep.mubr.msk.f32.mxu1 %vm17371_vm0, %v23939_v5  ;;  %v24243_v48 = vand.u32 4294901760, %v20658_v39 }
 0x8cf   : > { %15472 = vmatprep.subr.bf16.mxu1 %v23936_v62 }
 0x8d2   : > { %15474 = vmatpush3.bf16.msra.mxu1 %v20714_v6  ;;  %v24249_v6 = vand.u32 4294901760, %v20670_v18  ;;  %v24255_v18 = vand.u32 4294901760, %v20690_v45  ;;  %v20930_v45 = vld [vmem:[#allocation15 + $0x98] sm:$0xff] }
 0x8d3   : > { %15475 = vmatprep.subr.bf16.mxu1 %v23936_v62 }
 0x8d4   : > { %v15554_v8 = vpack.c.bf16 %v24249_v6, %v24248_v22  ;;  %v20993_v22 = vld [vmem:[#allocation15 + $0x28] sm:$0xff] }
 0x8d6   : > { %15477 = vmatpush3.bf16.msra.mxu1 %v20724_v12 }
 0x8d7   : > { %15478 = vmatprep.subr.bf16.mxu1 %v23936_v62 }
 0x8da   : > { %15480 = vmatpush3.bf16.msra.mxu1 %v20734_v14  ;;  %v6826_v14 = vand.u32 4294901760, %v20928_v11 }
 0x8db   : > { %15481 = vmatprep.subr.bf16.mxu1 %v23936_v62 }
 0x8de   : > { %15483 = vmatpush3.bf16.msra.mxu1 %v15482_v54  ;;  %v20936_v54 = vld [vmem:[#allocation15 + $0x10] sm:$0xff] }
 0x8df   : > { %15484 = vmatprep.subr.bf16.mxu1 %v23936_v62 }
 0x8e2   : > { %15486 = vmatpush3.bf16.msra.mxu1 %v15485_v47  ;;  %v20938_v47 = vld [vmem:[#allocation15 + $0x18] sm:$0xff] }
 0x8e3   : > { %15487 = vmatprep.subr.bf16.mxu1 %v23936_v62 }
 0x8e6   : > { %15489 = vmatpush3.bf16.msra.mxu1 %v15488_v24 }
 0x8e7   : > { %15490 = vmatprep.subr.bf16.mxu1 %v23936_v62 }
 0x8ea   : > { %15492 = vmatpush3.bf16.msra.mxu1 %v15491_v51  ;;  %v6829_v51 = vand.u32 4294901760, %v20930_v45 }
 0x8eb   : > { %15493 = vmatprep.subr.bf16.mxu1 %v23936_v62 }
 0x8ed   : > { %13989 = vmatmul.mubr.f32.vlgmr.msra.gmra.mrb[16].mxu1 %v20789_v17 }
 0x8ee   : > { %15495 = vmatpush3.bf16.msra.mxu1 %v15494_v9  ;;  %14023 = vmatprep.mubr.msk.f32.mxu1 %vm17371_vm0, %v23939_v5  ;;  %v6778_v9 = vand.u32 4294901760, %v20936_v54 }
 0x8ef   : > { %15496 = vmatprep.subr.bf16.mxu1 %v23936_v62 }
 0x8f0   : > { %v20969_v41 = vsub.f32 %v20936_v54, %v6778_v9 }
 0x8f2   : > { %15498 = vmatpush3.bf16.msra.mxu1 %v15497_v20  ;;  %v6781_v20 = vand.u32 4294901760, %v20938_v47 }
 0x8f3   : > { %15499 = vmatprep.subr.bf16.mxu1 %v23936_v62 }
 0x8f4   : > { %v20974_v32 = vsub.f32 %v20938_v47, %v6781_v20 }
 0x8f6   : > { %15501 = vmatpush3.bf16.msra.mxu1 %v15500_v27  ;;  %v23497_v2 = vand.u32 4294901760, %v20974_v32 }
 0x8f7   : > { %15502 = vmatprep.subr.bf16.mxu1 %v23936_v62 }
 0x8f8   : > { %v6908_v36 = vsub.f32 %v20974_v32, %v23497_v2 }
 0x8fa   : > { %15504 = vmatpush3.bf16.msra.mxu1 %v15503_v34  ;;  %v20953_v34 = vsub.f32 %v20928_v11, %v6826_v14  ;;  %v21117_v11 = vpack.c.bf16 %v6781_v20, %v6778_v9 }
 0x8fb   : > { %15505 = vmatprep.subr.bf16.mxu1 %v23936_v62 }
 0x8fc   : > { %v23501_v16 = vand.u32 4294901760, %v20953_v34 }
 0x8fe   : > { %15507 = vmatpush3.bf16.msra.mxu1 %v15506_v40 }
 0x8ff   : > { %15508 = vmatprep.subr.bf16.mxu1 %v23936_v62 }
 0x902   : > { %15510 = vmatpush3.bf16.msra.mxu1 %v15509_v52 }
 0x903   : > { %15511 = vmatprep.subr.bf16.mxu1 %v23936_v62 }
 0x906   : > { %15513 = vmatpush3.bf16.msra.mxu1 %v15512_v35  ;;  %v15563_v35 = vpack.c.bf16 %v24255_v18, %v24254_v23  ;;  %v6784_v23 = vand.u32 4294901760, %v20984_v19  ;;  %v21010_v18 = vld [vmem:[#allocation15 + $0xb8] sm:$0xff] }
 0x907   : > { %15514 = vmatprep.subr.bf16.mxu1 %v23936_v62 }
 0x90a   : > { %15516 = vmatpush3.bf16.msra.mxu1 %v15515_v4  ;;  %v20958_v4 = vsub.f32 %v20930_v45, %v6829_v51 }
 0x90b   : > { %15517 = vmatprep.subr.bf16.mxu1 %v23936_v62 }
 0x90c   : > { %v23500_v60 = vand.u32 4294901760, %v20958_v4 }
 0x90d   : > { %14024 = vmatmul.mubr.f32.vlgmr.msra.gmra.mrb[16].mxu1 %v6149_v53  ;;  %v24242_v53 = vand.u32 4294901760, %v20656_v57  ;;  %v24247_v57 = vand.u32 4294901760, %v20666_v42  ;;  %v24253_v42 = vand.u32 4294901760, %v20680_v46 }
 0x90e   : > { %15519 = vmatpush3.bf16.msra.mxu1 %v20628_v55  ;;  %14058 = vmatprep.mubr.msk.f32.mxu1 %vm17371_vm0, %v23939_v5 }
 0x90f   : > { %15520 = vmatprep.subr.bf16.mxu1 %v23936_v62  ;;  %v15545_v29 = vpack.c.bf16 %v24243_v48, %v24242_v53 }
 0x912   : > { %15522 = vmatpush3.bf16.msra.mxu1 %v20636_v21 }
 0x913   : > { %15523 = vmatprep.subr.bf16.mxu1 %v23936_v62 }
 0x916   : > { %15525 = vmatpush3.bf16.msra.mxu1 %v20640_v44 }
 0x917   : > { %15526 = vmatprep.subr.bf16.mxu1 %v23936_v62 }
 0x91a   : > { %15528 = vmatpush3.bf16.msra.mxu1 %v20644_v26 }
 0x91b   : > { %15529 = vmatprep.subr.bf16.mxu1 %v23936_v62 }
 0x91e   : > { %15531 = vmatpush3.bf16.msra.mxu1 %v20648_v59 }
 0x91f   : > { %15532 = vmatprep.subr.bf16.mxu1 %v23936_v62 }
 0x922   : > { %15534 = vmatpush3.bf16.msra.mxu1 %v20652_v31 }
 0x923   : > { %15535 = vmatprep.subr.bf16.mxu1 %v23936_v62 }
 0x926   : > { %15537 = vmatpush3.bf16.msra.mxu1 %v20676_v61 }
 0x927   : > { %15538 = vmatprep.subr.bf16.mxu1 %v23936_v62 }
 0x92a   : > { %15540 = vmatpush3.bf16.msra.mxu1 %v20686_v63 }
 0x92b   : > { %15541 = vmatprep.subr.bf16.mxu1 %v23936_v62 }
 0x92d   : > { %14059 = vmatmul.mubr.f32.vlgmr.msra.gmra.mrb[16].mxu1 %v6150_v33  ;;  %v24246_v33 = vand.u32 4294901760, %v20664_v49  ;;  %v24252_v49 = vand.u32 4294901760, %v20678_v37 }
 0x92e   : > { %15543 = vmatpush3.bf16.msra.mxu1 %v15542_v0  ;;  %14093 = vmatprep.mubr.msk.f32.mxu1 %vm17371_vm0, %v23939_v5  ;;  %v20980_v0 = vld [vmem:[#allocation15 + $0xa8] sm:$0xff] }
 0x92f   : > { %15544 = vmatprep.subr.bf16.mxu1 %v23936_v62  ;;  %v15551_v39 = vpack.c.bf16 %v24247_v57, %v24246_v33  ;;  %v15560_v12 = vpack.c.bf16 %v24253_v42, %v24252_v49  ;;  %v7013_v33 = vsub.f32 %v20953_v34, %v23501_v16  ;;  %v7020_v57 = vsub.f32 %v20958_v4, %v23500_v60  ;;  %v21066_v16 = vld [vmem:[#allocation15 + $0xc0] sm:$0xff] }
 0x930   : > { %v6835_v25 = vand.u32 4294901760, %v20980_v0 }
 0x931   : > { %v7014_v49 = vand.u32 4294901760, %v7013_v33  ;;  %v7021_v42 = vand.u32 4294901760, %v7020_v57 }
 0x932   : > { %15546 = vmatpush3.bf16.msra.mxu1 %v15545_v29  ;;  %v23498_v29 = vand.u32 4294901760, %v20969_v41 }
 0x933   : > { %15547 = vmatprep.subr.bf16.mxu1 %v23936_v62 }
 0x936   : > { %15549 = vmatpush3.bf16.msra.mxu1 %v15548_v28 }
 0x937   : > { %15550 = vmatprep.subr.bf16.mxu1 %v23936_v62 }
 0x93a   : > { %15552 = vmatpush3.bf16.msra.mxu1 %v15551_v39  ;;  %v6832_v39 = vand.u32 4294901760, %v20976_v38 }
 0x93b   : > { %15553 = vmatprep.subr.bf16.mxu1 %v23936_v62 }
 0x93e   : > { %15555 = vmatpush3.bf16.msra.mxu1 %v15554_v8  ;;  %v6901_v8 = vsub.f32 %v20969_v41, %v23498_v29 }
 0x93f   : > { %15556 = vmatprep.subr.bf16.mxu1 %v23936_v62 }
 0x942   : > { %15558 = vmatpush3.bf16.msra.mxu1 %v15557_v30  ;;  %v21002_v30 = vld [vmem:[#allocation15 + $0xb0] sm:$0xff] }
 0x943   : > { %15559 = vmatprep.subr.bf16.mxu1 %v23936_v62 }
 0x946   : > { %15561 = vmatpush3.bf16.msra.mxu1 %v15560_v12  ;;  %v21007_v12 = vsub.f32 %v20976_v38, %v6832_v39 }
 0x947   : > { %15562 = vmatprep.subr.bf16.mxu1 %v23936_v62 }
 0x94a   : > { %15564 = vmatpush3.bf16.msra.mxu1 %v15563_v35  ;;  %v6902_v35 = vand.u32 4294901760, %v6901_v8  ;;  %v6841_v8 = vand.u32 4294901760, %v21010_v18 }
 0x94b   : > { %15565 = vmatprep.subr.bf16.mxu1 %v23936_v62 }
 0x94d   : > { %14094 = vmatmul.mubr.f32.vlgmr.msra.gmra.mrb[16].mxu1 %v20789_v17 }
 0x94e   : > { %15567 = vmatpush3.bf16.msra.mxu1 %v20628_v55  ;;  %14128 = vmatprep.mubr.msk.f32.mxu1 %vm17371_vm0, %v23939_v5  ;;  %v20896_v55 = vld [vmem:[#allocation15 + $0x80] sm:$0xff] }
 0x94f   : > { %15568 = vmatprep.subr.bf16.mxu1 %v23936_v62 }
 0x952   : > { %15570 = vmatpush3.bf16.msra.mxu1 %v20636_v21  ;;  %v20898_v21 = vld [vmem:[#allocation15 + $0x88] sm:$0xff] }
 0x953   : > { %15571 = vmatprep.subr.bf16.mxu1 %v23936_v62 }
 0x956   : > { %15573 = vmatpush3.bf16.msra.mxu1 %v20640_v44  ;;  %v6820_v44 = vand.u32 4294901760, %v20896_v55 }
 0x957   : > { %15574 = vmatprep.subr.bf16.mxu1 %v23936_v62 }
 0x95a   : > { %15576 = vmatpush3.bf16.msra.mxu1 %v20644_v26  ;;  %v6823_v26 = vand.u32 4294901760, %v20898_v21 }
 0x95b   : > { %15577 = vmatprep.subr.bf16.mxu1 %v23936_v62 }
 0x95c   : > { %v20916_v37 = vsub.f32 %v20898_v21, %v6823_v26  ;;  %v21060_v29 = vpack.c.bf16 %v6823_v26, %v6820_v44 }
 0x95e   : > { %15579 = vmatpush3.bf16.msra.mxu1 %v20648_v59  ;;  %v20902_v59 = vld [vmem:[#allocation15] sm:$0xff]  ;;  %v23507_v52 = vand.u32 4294901760, %v20916_v37  ;;  %15590 = vmatprep.subr.bf16.mxu0 %v21060_v29 }
 0x95f   : > { %15580 = vmatprep.subr.bf16.mxu1 %v23936_v62  ;;  %v6772_v50 = vand.u32 4294901760, %v20902_v59 }
 0x960   : > { %v7006_v15 = vsub.f32 %v20916_v37, %v23507_v52  ;;  %v21111_v52 = vld [vmem:[#allocation15 + $0xd0] sm:$0xff] }
 0x961   : > { %v20921_v46 = vsub.f32 %v20902_v59, %v6772_v50 }
 0x962   : > { %15582 = vmatpush3.bf16.msra.mxu1 %v20652_v31  ;;  %v20904_v31 = vld [vmem:[#allocation15 + $0x8] sm:$0xff]  ;;  %v7007_v13 = vand.u32 4294901760, %v7006_v15  ;;  %v21015_v15 = vsub.f32 %v20980_v0, %v6835_v25 }
 0x963   : > { %15583 = vmatprep.subr.bf16.mxu1 %v23936_v62  ;;  %v6775_v7 = vand.u32 4294901760, %v20904_v31  ;;  %v23503_v40 = vand.u32 4294901760, %v20921_v46 }
 0x964   : > { %v23499_v57 = vand.u32 4294901760, %v21015_v15 }
 0x965   : > { %v6887_v56 = vsub.f32 %v20921_v46, %v23503_v40  ;;  %v21072_v40 = vpack.c.bf16 %v6775_v7, %v6772_v50  ;;  %v21092_v50 = vld [vmem:[#allocation15 + $0xc8] sm:$0xff] }
 0x966   : > { %15585 = vmatpush3.bf16.msra.mxu1 %v20676_v61  ;;  %v20911_v61 = vsub.f32 %v20896_v55, %v6820_v44  ;;  %v6847_v45 = vand.u32 4294901760, %v21092_v50 }
 0x967   : > { %15586 = vmatprep.subr.bf16.mxu1 %v23936_v62  ;;  %v6888_v53 = vand.u32 4294901760, %v6887_v56  ;;  %v6787_v56 = vand.u32 4294901760, %v20993_v22  ;;  %15592 = vmatpush3.bf16.msra.mxu0 %v21072_v40 }
 0x968   : > { %v21133_v9 = vsub.f32 %v21092_v50, %v6847_v45 }
 0x96a   : > { %15588 = vmatpush3.bf16.msra.mxu1 %v20686_v63  ;;  %v20926_v63 = vsub.f32 %v20904_v31, %v6775_v7 }
 0x96c   : > { %v23502_v24 = vand.u32 4294901760, %v20926_v63 }
 0x96d   : > { %14129 = vmatmul.mubr.f32.vlgmr.msra.gmra.mrb[16].mxu1 %v20789_v17  ;;  %v23509_v17 = vand.u32 4294901760, %v20911_v61 }
 0x96e   : > { %v6894_v1 = vsub.f32 %v20926_v63, %v23502_v24 }
 0x96f   : > { %v6999_v27 = vsub.f32 %v20911_v61, %v23509_v17 }
 0x970   : > { %v6895_v48 = vand.u32 4294901760, %v6894_v1  ;;  %v21018_v1 = vld [vmem:[#allocation15 + $0x30] sm:$0xff] }
 0x971   : > { %v7000_v43 = vand.u32 4294901760, %v6999_v27  ;;  %v6909_v27 = vand.u32 4294901760, %v6908_v36 }
 0x972   : > { %v15623_v6 = vpack.c.bf16 %v6895_v48, %v6888_v53  ;;  %v21024_v53 = vsub.f32 %v20984_v19, %v6784_v23  ;;  %v6838_v48 = vand.u32 4294901760, %v21002_v30 }
 0x973   : > { %v15621_v28 = vpack.c.bf16 %v7007_v13, %v7000_v43  ;;  %v15625_v43 = vpack.c.bf16 %v7021_v42, %v7014_v49  ;;  %v23496_v13 = vand.u32 4294901760, %v21007_v12  ;;  %v15627_v33 = vpack.c.bf16 %v6909_v27, %v6902_v35 }
 0x974   : > { %v23506_v49 = vand.u32 4294901760, %v21024_v53  ;;  %v21043_v42 = vsub.f32 %v21002_v30, %v6838_v48  ;;  %v6790_v35 = vand.u32 4294901760, %v21018_v1  ;;  %v7034_v27 = vsub.f32 %v21015_v15, %v23499_v57 }
 0x975   : > { %15622 = vmatprep.subr.bf16.mxu1 %v15621_v28  ;;  %v21027_v28 = vld [vmem:[#allocation15 + $0x38] sm:$0xff]  ;;  %v7027_v36 = vsub.f32 %v21007_v12, %v23496_v13  ;;  %v21053_v13 = vsub.f32 %v21010_v18, %v6841_v8 }
 0x976   : > { %15624 = vmatpush3.bf16.msra.mxu1 %v15623_v6  ;;  %v21033_v6 = vsub.f32 %v20993_v22, %v6787_v56  ;;  %v6793_v2 = vand.u32 4294901760, %v21027_v28  ;;  %v6915_v57 = vsub.f32 %v21024_v53, %v23506_v49  ;;  %v23504_v60 = vand.u32 4294901760, %v21043_v42  ;;  %v21169_v22 = vld [vmem:[#allocation15 + $0x50] sm:$0xff] }
 0x977   : > { %15626 = vmatprep.subr.bf16.mxu1 %v15625_v43  ;;  %v7035_v24 = vand.u32 4294901760, %v7034_v27  ;;  %v23508_v21 = vand.u32 4294901760, %v21053_v13  ;;  %v21085_v59 = vsub.f32 %v21018_v1, %v6790_v35  ;;  %v6844_v27 = vand.u32 4294901760, %v21066_v16 }
 0x978   : > { %v23505_v43 = vand.u32 4294901760, %v21033_v6  ;;  %v6916_v44 = vand.u32 4294901760, %v6915_v57  ;;  %v7041_v26 = vsub.f32 %v21043_v42, %v23504_v60  ;;  %v21090_v31 = vsub.f32 %v21027_v28, %v6793_v2  ;;  %v21099_v60 = vld [vmem:[#allocation15 + $0x40] sm:$0xff] }
 0x979   : > { %v6796_v54 = vand.u32 4294901760, %v21099_v60 }
 0x97a   : > { %15628 = vmatpush3.bf16.msra.mxu1 %v15627_v33  ;;  %v7028_v33 = vand.u32 4294901760, %v7027_v36  ;;  %v6922_v55 = vsub.f32 %v21033_v6, %v23505_v43  ;;  %v7048_v36 = vsub.f32 %v21053_v13, %v23508_v21  ;;  %v21105_v43 = vpack.c.bf16 %v6829_v51, %v6826_v14 }
 0x97b   : > { %v7042_v49 = vand.u32 4294901760, %v7041_v26  ;;  %v21136_v26 = vld [vmem:[#allocation15 + $0xd8] sm:$0xff]  ;;  %v21154_v50 = vsub.f32 %v21099_v60, %v6796_v54 }
 0x97c   : > { %v15629_v7 = vpack.c.bf16 %v7035_v24, %v7028_v33  ;;  %v6923_v57 = vand.u32 4294901760, %v6922_v55  ;;  %v23517_v24 = vand.u32 4294901760, %v21085_v59  ;;  %v23515_v33 = vand.u32 4294901760, %v21090_v31  ;;  %v21109_v55 = vld [vmem:[#allocation15 + $0x48] sm:$0xff]  ;;  %15594 = vmatprep.subr.bf16.mxu0 %v21105_v43 }
 0x97d   : > { %v7049_v17 = vand.u32 4294901760, %v7048_v36  ;;  %15596 = vmatpush3.bf16.msra.mxu0 %v21117_v11  ;;  %v6799_v20 = vand.u32 4294901760, %v21109_v55  ;;  %24256 = vst [vmem:[#allocation113_spill] sm:$0xff] %v21154_v50 }
 0x97e   : > { %15630 = vmatprep.subr.bf16.mxu1 %v15629_v7  ;;  %v15631_v21 = vpack.c.bf16 %v6923_v57, %v6916_v44  ;;  %v6929_v14 = vsub.f32 %v21085_v59, %v23517_v24  ;;  %v6936_v51 = vsub.f32 %v21090_v31, %v23515_v33  ;;  %v21128_v44 = vsub.f32 %v21066_v16, %v6844_v27  ;;  %v6746_v24 = vld [vmem:[#allocation15 + $0xf0] sm:$0xff] }
 0x97f   : > { %v15633_v47 = vpack.c.bf16 %v7049_v17, %v7042_v49  ;;  %v6850_v7 = vand.u32 4294901760, %v21111_v52  ;;  %v21143_v16 = vpack.c.bf16 %v6835_v25, %v6832_v39  ;;  %v23512_v49 = vand.u32 4294901760, %v21133_v9 }
 0x980   : > { %15632 = vmatpush3.bf16.msra.mxu1 %v15631_v21  ;;  %v6930_v57 = vand.u32 4294901760, %v6929_v14  ;;  %v6937_v36 = vand.u32 4294901760, %v6936_v51  ;;  %v23513_v17 = vand.u32 4294901760, %v21128_v44  ;;  %v21151_v21 = vpack.c.bf16 %v6787_v56, %v6784_v23  ;;  %v21183_v14 = vld [vmem:[#allocation15 + $0x58] sm:$0xff] }
 0x981   : > { %15634 = vmatprep.subr.bf16.mxu1 %v15633_v47  ;;  %v21157_v38 = vsub.f32 %v21109_v55, %v6799_v20  ;;  %15598 = vmatprep.subr.bf16.mxu0 %v21143_v16  ;;  %v6853_v25 = vand.u32 4294901760, %v21136_v26  ;;  %v21167_v19 = vsub.f32 %v21111_v52, %v6850_v7  ;;  %v7062_v60 = vsub.f32 %v21133_v9, %v23512_v49  ;;  %v21218_v49 = vld [vmem:[#allocation15 + $0x60] sm:$0xff] }
 0x982   : > { %v15635_v0 = vpack.c.bf16 %v6937_v36, %v6930_v57  ;;  %v7055_v39 = vsub.f32 %v21128_v44, %v23513_v17  ;;  %15600 = vmatpush3.bf16.msra.mxu0 %v21151_v21  ;;  %v23511_v23 = vand.u32 4294901760, %v21154_v50  ;;  %v21181_v55 = vpack.c.bf16 %v6841_v8, %v6838_v48 }
 0x983   : > { %24257 = vst [vmem:[#allocation108_spill] sm:$0xff] %v21157_v38  ;;  %24258 = vst [vmem:[#allocation109_spill] sm:$0xff] %v21167_v19  ;;  %v23510_v56 = vand.u32 4294901760, %v21157_v38  ;;  %v23514_v47 = vand.u32 4294901760, %v21167_v19  ;;  %v21187_v57 = vsub.f32 %v21136_v26, %v6853_v25  ;;  %v21193_v36 = vpack.c.bf16 %v6793_v2, %v6790_v35  ;;  %v21203_v26 = vld [vmem:[#allocation15 + $0xe0] sm:$0xff] }
 0x984   : > { %15636 = vmatpush3.bf16.msra.mxu1 %v15635_v0  ;;  %v7056_v51 = vand.u32 4294901760, %v7055_v39  ;;  %v7063_v30 = vand.u32 4294901760, %v7062_v60  ;;  %v6943_v18 = vsub.f32 %v21154_v50, %v23511_v23  ;;  %15602 = vmatprep.subr.bf16.mxu0 %v21181_v55  ;;  %v6802_v8 = vand.u32 4294901760, %v21169_v22  ;;  %v21212_v0 = vld [vmem:[#allocation15 + $0xe8] sm:$0xff] }
 0x985   : > { %24259 = vst [vmem:[#allocation110_spill] sm:$0xff] %v21187_v57  ;;  %v6950_v48 = vsub.f32 %v21157_v38, %v23510_v56  ;;  %v7069_v2 = vsub.f32 %v21167_v19, %v23514_v47  ;;  %v23516_v1 = vand.u32 4294901760, %v21187_v57  ;;  %v6805_v28 = vand.u32 4294901760, %v21183_v14 }
 0x986   : > { %v21210_v35 = vpack.c.bf16 %v6847_v45, %v6844_v27  ;;  %v15637_v39 = vpack.c.bf16 %v7063_v30, %v7056_v51  ;;  %v6944_v60 = vand.u32 4294901760, %v6943_v18  ;;  %15604 = vmatpush3.bf16.msra.mxu0 %v21193_v36  ;;  %v21216_v23 = vsub.f32 %v21169_v22, %v6802_v8  ;;  %v6729_v51 = vld [vmem:[#allocation15 + $0x68] sm:$0xff] }
 0x987   : > { %v6951_v56 = vand.u32 4294901760, %v6950_v48  ;;  %v7070_v17 = vand.u32 4294901760, %v7069_v2  ;;  %v7076_v47 = vsub.f32 %v21187_v57, %v23516_v1  ;;  %v21224_v27 = vsub.f32 %v21183_v14, %v6805_v28 }
 0x988   : > { %24260 = vst [vmem:[#allocation112_spill] sm:$0xff] %v21216_v23  ;;  %15606 = vmatprep.subr.bf16.mxu0 %v21210_v35  ;;  %v6856_v45 = vand.u32 4294901760, %v21203_v26  ;;  %15638 = vmatprep.subr.bf16.mxu1 %v15637_v39  ;;  %v23518_v22 = vand.u32 4294901760, %v21216_v23  ;;  %v6859_v18 = vand.u32 4294901760, %v21212_v0  ;;  %v21230_v48 = vpack.c.bf16 %v6799_v20, %v6796_v54 }
 0x989   : > { %24261 = vst [vmem:[#allocation114_spill] sm:$0xff] %v21224_v27  ;;  %v15639_v30 = vpack.c.bf16 %v6951_v56, %v6944_v60  ;;  %v7077_v2 = vand.u32 4294901760, %v7076_v47  ;;  %v23520_v33 = vand.u32 4294901760, %v21224_v27  ;;  %v6808_v14 = vand.u32 4294901760, %v21218_v49  ;;  %v6747_v47 = vld [vmem:[#allocation15 + $0xf8] sm:$0xff] }
 0x98a   : > { %24262 = vst [vmem:[#allocation115_spill] sm:$0xff] %v21230_v48  ;;  %v21234_v1 = vsub.f32 %v21203_v26, %v6856_v45  ;;  %v6957_v56 = vsub.f32 %v21216_v23, %v23518_v22  ;;  %v21241_v39 = vsub.f32 %v21212_v0, %v6859_v18  ;;  %15608 = vmatpush3.bf16.msra.mxu0 %v21230_v48  ;;  %v6811_v54 = vand.u32 4294901760, %v6729_v51 }
 0x98b   : > { %15640 = vmatpush3.bf16.msra.mxu1 %v15639_v30  ;;  %v21246_v20 = vpack.c.bf16 %v6853_v25, %v6850_v7  ;;  %v15641_v26 = vpack.c.bf16 %v7077_v2, %v7070_v17  ;;  %v6964_v60 = vsub.f32 %v21224_v27, %v23520_v33  ;;  %v21253_v22 = vsub.f32 %v21218_v49, %v6808_v14  ;;  %v6730_v33 = vld [vmem:[#allocation15 + $0x70] sm:$0xff] }
 0x98c   : > { %24263 = vst [vmem:[#allocation116_spill] sm:$0xff] %v21234_v1  ;;  %24264 = vst [vmem:[#allocation74_spill] sm:$0xff] %v21241_v39  ;;  %v23524_v30 = vand.u32 4294901760, %v21234_v1  ;;  %v6958_v0 = vand.u32 4294901760, %v6957_v56  ;;  %v23528_v10 = vand.u32 4294901760, %v21241_v39  ;;  %v21256_v3 = vsub.f32 %v6729_v51, %v6811_v54 }
 0x98d   : > { %24265 = vst [vmem:[#allocation79_spill] sm:$0xff] %v21246_v20  ;;  %24266 = vst [vmem:[#allocation102_spill] sm:$0xff] %v21253_v22  ;;  %15610 = vmatprep.subr.bf16.mxu0 %v21246_v20  ;;  %v6862_v52 = vand.u32 4294901760, %v6746_v24  ;;  %15642 = vmatprep.subr.bf16.mxu1 %v15641_v26  ;;  %v6965_v7 = vand.u32 4294901760, %v6964_v60  ;;  %v23531_v25 = vand.u32 4294901760, %v21253_v22  ;;  %v6865_v2 = vand.u32 4294901760, %v6747_v47 }
 0x98e   : > { %24267 = vst [vmem:[#allocation103_spill] sm:$0xff] %v21256_v3  ;;  %v7083_v17 = vsub.f32 %v21234_v1, %v23524_v30  ;;  %v7090_v49 = vsub.f32 %v21241_v39, %v23528_v10  ;;  %v23532_v51 = vand.u32 4294901760, %v21256_v3  ;;  %v21269_v58 = vpack.c.bf16 %v6805_v28, %v6802_v8  ;;  %v6731_v26 = vld [vmem:[#allocation15 + $0x78] sm:$0xff] }
 0x98f   : > { %v21267_v56 = vsub.f32 %v6746_v24, %v6862_v52  ;;  %v15643_v60 = vpack.c.bf16 %v6965_v7, %v6958_v0  ;;  %v6971_v30 = vsub.f32 %v21253_v22, %v23531_v25  ;;  %v21274_v5 = vsub.f32 %v6747_v47, %v6865_v2 }
 0x990   : > { %24268 = vst [vmem:[#allocation104_spill] sm:$0xff] %v21269_v58  ;;  %v7084_v62 = vand.u32 4294901760, %v7083_v17  ;;  %v7091_v20 = vand.u32 4294901760, %v7090_v49  ;;  %v6978_v10 = vsub.f32 %v21256_v3, %v23532_v51  ;;  %15612 = vmatpush3.bf16.msra.mxu0 %v21269_v58  ;;  %v6814_v24 = vand.u32 4294901760, %v6730_v33 }
 0x991   : > { %v23536_v48 = vand.u32 4294901760, %v21267_v56  ;;  %15644 = vmatpush3.bf16.msra.mxu1 %v15643_v60  ;;  %v6972_v8 = vand.u32 4294901760, %v6971_v30  ;;  %v23535_v28 = vand.u32 4294901760, %v21274_v5  ;;  %v6817_v0 = vand.u32 4294901760, %v6731_v26 }
 0x992   : > { %v21282_v7 = vpack.c.bf16 %v6859_v18, %v6856_v45  ;;  %v15645_v17 = vpack.c.bf16 %v7091_v20, %v7084_v62  ;;  %v6979_v47 = vand.u32 4294901760, %v6978_v10  ;;  %v21287_v25 = vsub.f32 %v6730_v33, %v6814_v24 }
 0x993   : > { %v7097_v49 = vsub.f32 %v21267_v56, %v23536_v48  ;;  %v7104_v51 = vsub.f32 %v21274_v5, %v23535_v28  ;;  %v21292_v58 = vsub.f32 %v6731_v26, %v6817_v0  ;;  %v21295_v30 = vpack.c.bf16 %v6811_v54, %v6808_v14  ;;  %v11305_v48 = vld [vmem:[%s24270_s11] ss:$0 sm:$0xff] }
 0x994   : > { %15614 = vmatprep.subr.bf16.mxu0 %v21282_v7  ;;  %v21297_v45 = vpack.c.bf16 %v6865_v2, %v6862_v52  ;;  %15646 = vmatprep.subr.bf16.mxu1 %v15645_v17  ;;  %v15647_v62 = vpack.c.bf16 %v6979_v47, %v6972_v8  ;;  %v6984_v18 = vand.u32 4294901760, %v21287_v25  ;;  %v21302_v60 = vpack.c.bf16 %v6817_v0, %v6814_v24 }
 0x995   : > { %v7098_v10 = vand.u32 4294901760, %v7097_v49  ;;  %v7105_v20 = vand.u32 4294901760, %v7104_v51  ;;  %v6991_v33 = vand.u32 4294901760, %v21292_v58  ;;  %15616 = vmatpush3.bf16.msra.mxu0 %v21295_v30  ;;  %v15653_v2 = vpack.c.bf16 %v20916_v37, %v20911_v61 }
 0x996   : > { %15648 = vmatpush3.bf16.msra.mxu1 %v15647_v62  ;;  %v6985_v26 = vsub.f32 %v21287_v25, %v6984_v18  ;;  %15618 = vmatprep.subr.bf16.mxu0 %v21297_v45  ;;  %v15655_v24 = vpack.c.bf16 %v20926_v63, %v20921_v46  ;;  %v15657_v0 = vpack.c.bf16 %v20958_v4, %v20953_v34 }
 0x997   : > { %v15649_v14 = vpack.c.bf16 %v7105_v20, %v7098_v10  ;;  %v6992_v54 = vsub.f32 %v21292_v58, %v6991_v33  ;;  %v15659_v17 = vpack.c.bf16 %v20974_v32, %v20969_v41  ;;  %v15661_v47 = vpack.c.bf16 %v21015_v15, %v21007_v12 }
 0x998   : > { %v6986_v52 = vand.u32 4294901760, %v6985_v26  ;;  %v15663_v49 = vpack.c.bf16 %v21033_v6, %v21024_v53  ;;  %v15665_v62 = vpack.c.bf16 %v21053_v13, %v21043_v42  ;;  %v15667_v10 = vpack.c.bf16 %v21090_v31, %v21085_v59 }
 0x999   : > { %15650 = vmatprep.subr.bf16.mxu1 %v15649_v14  ;;  %v6993_v51 = vand.u32 4294901760, %v6992_v54  ;;  %15620 = vmatpush3.bf16.msra.mxu0 %v21302_v60  ;;  %v15669_v20 = vpack.c.bf16 %v21133_v9, %v21128_v44  ;;  %v15671_v26 = vpack.c.bf16 %v21157_v38, %v21154_v50  ;;  %v15673_v14 = vpack.c.bf16 %v21187_v57, %v21167_v19  ;;  %v24271_v38 = vld [vmem:[#allocation54_spill] sm:$0xff] }
 0x99a   : > { %15654 = vmatprep.subr.bf16.mxu0 %v15653_v2  ;;  %v15675_v54 = vpack.c.bf16 %v21224_v27, %v21216_v23  ;;  %v15679_v2 = vpack.c.bf16 %v21256_v3, %v21253_v22  ;;  %v21341_v28 = vpack.c.bf16 %v6991_v33, %v6984_v18  ;;  %v16846_v22 = vld [vmem:[#allocation3] sm:$0xff] }
 0x99b   : > { %v15651_v8 = vpack.c.bf16 %v6993_v51, %v6986_v52  ;;  %v15677_v52 = vpack.c.bf16 %v21241_v39, %v21234_v1 }
 0x99c   : > { %24269 = vst [vmem:[#allocation105_spill] sm:$0xff] %v21341_v28 }
 0x99d   : > { %15652 = vmatpush3.bf16.msra.mxu1 %v15651_v8 }
 0x99e   : > { %15686 = vmatprep.subr.bf16.mxu1 %v21060_v29 }
 0xa40   : > { %v6704_v57 = vpop.f32.mrb[16].mxu1 }
 0xa41   : > { %v16506_v27 = vadd.f32 %v11305_v48, %v6704_v57  ;;  %v14130_v23 = vpop.f32.mrb[17].mxu1  ;;  %v24274_v48 = vld [vmem:[#allocation104_spill] sm:$0xff] }
 0xa43   : > { %v11306_v19 = vmul.f32 -1.442695, %v16506_v27 }
 0xa45   : > { %16835 = vpow2.f32 %v11306_v19 }
 0xa4f   : > { %v16836_v39 = vpop.eup %16835 }
 0xa50   : > { %v6711_v1 = vadd.f32 1.0, %v16836_v39  ;;  %v24275_v39 = vpack.c.bf16 %v21274_v5, %v21267_v56 }
 0xa52   : > { %16837 = vrcp.f32 %v6711_v1 }
 0xa5c   : > { %v16838_v3 = vpop.eup %16837 }
 0xa5d   : > { %v6715_v51 = vmul.f32 %v16846_v22, %v16838_v3  ;;  %v6714_v50 = vmul.f32 %v16838_v3, %v24271_v38  ;;  %v24273_v22 = vld [vmem:[#allocation79_spill] sm:$0xff] }
 0xa5f   : > { %v6867_v8 = vand.u32 4294901760, %v6715_v51  ;;  %v21347_v18 = vand.u32 4294901760, %v6714_v50 }
 0xa61   : > { %7108 = vmatprep.mubr.f32.mxu1 %v6867_v8  ;;  %v6874_v33 = vsub.f32 %v6714_v50, %v21347_v18  ;;  %v6868_v28 = vsub.f32 %v6715_v51, %v6867_v8  ;;  %v24272_v50 = vld [vmem:[#allocation115_spill] sm:$0xff]  ;;  %v24307_v51 = vld [vmem:[#allocation116_spill] sm:$0xff] }
 0xa62   : > { %7110 = vmatmul.mubr.f32.vlgmr.msra.gmra.mrb[18].mxu1 %v21347_v18 }
 0xa63   : > { %15688 = vmatpush3.bf16.msra.mxu1 %v21072_v40  ;;  %v6869_v19 = vand.u32 4294901760, %v6868_v28  ;;  %v6875_v23 = vand.u32 4294901760, %v6874_v33 }
 0xa64   : > { %15690 = vmatprep.subr.bf16.mxu1 %v21105_v43 }
 0xa65   : > { %7352 = vmatprep.mubr.f32.mxu1 %v6869_v19  ;;  %v6870_v57 = vsub.f32 %v6868_v28, %v6869_v19  ;;  %v6876_v1 = vsub.f32 %v6874_v33, %v6875_v23 }
 0xa67   : > { %15692 = vmatpush3.bf16.msra.mxu1 %v21117_v11  ;;  %v6871_v3 = vand.u32 4294901760, %v6870_v57  ;;  %v6877_v27 = vand.u32 4294901760, %v6876_v1  ;;  %v24311_v57 = vld [vmem:[#allocation102_spill] sm:$0xff] }
 0xa68   : > { %15694 = vmatprep.subr.bf16.mxu1 %v21143_v16  ;;  %v24312_v1 = vand.u32 4294901760, %v24311_v57 }
 0xa69   : > { %6872 = vmatprep.mubr.f32.mxu0 %v6871_v3 }
 0xa6a   : > { %6878 = vmatmul.mubr.f32.vlgmr.msra.gmra.mrb[18].mxu0 %v6877_v27 }
 0xa6b   : > { %15656 = vmatpush3.bf16.msra.mxu0 %v15655_v24  ;;  %15696 = vmatpush3.bf16.msra.mxu1 %v21151_v21  ;;  %v24277_v24 = vand.u32 4294901760, %v20916_v37  ;;  %v24282_v37 = vand.u32 4294901760, %v20958_v4  ;;  %v24288_v4 = vand.u32 4294901760, %v21033_v6  ;;  %v24294_v6 = vand.u32 4294901760, %v21133_v9 }
 0xa6c   : > { %7245 = vmatprep.mubr.f32.mxu0 %v6868_v28  ;;  %15658 = vmatprep.subr.bf16.mxu0 %v15657_v0  ;;  %v24276_v28 = vand.u32 4294901760, %v20911_v61  ;;  %v24281_v61 = vand.u32 4294901760, %v20953_v34  ;;  %v24287_v34 = vand.u32 4294901760, %v21024_v53  ;;  %v24293_v53 = vand.u32 4294901760, %v21128_v44  ;;  %v24303_v44 = vld [vmem:[#allocation112_spill] sm:$0xff] }
 0xa6d   : > { %15698 = vmatprep.subr.bf16.mxu1 %v21181_v55  ;;  %v24304_v9 = vand.u32 4294901760, %v24303_v44 }
 0xa6e   : > { %v15717_v0 = vpack.c.bf16 %v24277_v24, %v24276_v28  ;;  %v6750_v24 = vld [vmem:[#allocation15 + $0x110] sm:$0xff] }
 0xa6f   : > { %15660 = vmatpush3.bf16.msra.mxu0 %v15659_v17  ;;  %15700 = vmatpush3.bf16.msra.mxu1 %v21193_v36  ;;  %v24278_v17 = vpack.c.bf16 %v21292_v58, %v21287_v25  ;;  %v24283_v58 = vand.u32 4294901760, %v20969_v41  ;;  %v15727_v25 = vpack.c.bf16 %v24288_v4, %v24287_v34  ;;  %v24289_v41 = vand.u32 4294901760, %v21043_v42  ;;  %v6757_v34 = vld [vmem:[#allocation15 + $0x148] sm:$0xff] }
 0xa70   : > { %15662 = vmatprep.subr.bf16.mxu0 %v15661_v47  ;;  %15702 = vmatprep.subr.bf16.mxu1 %v21210_v35 }
 0xa73   : > { %15664 = vmatpush3.bf16.msra.mxu0 %v15663_v49  ;;  %15704 = vmatpush3.bf16.msra.mxu1 %v24272_v50  ;;  %v15721_v49 = vpack.c.bf16 %v24282_v37, %v24281_v61  ;;  %v6753_v61 = vld [vmem:[#allocation15 + $0x128] sm:$0xff] }
 0xa74   : > { %15666 = vmatprep.subr.bf16.mxu0 %v15665_v62  ;;  %15706 = vmatprep.subr.bf16.mxu1 %v24273_v22 }
 0xa77   : > { %15668 = vmatpush3.bf16.msra.mxu0 %v15667_v10  ;;  %15708 = vmatpush3.bf16.msra.mxu1 %v24274_v48 }
 0xa78   : > { %15670 = vmatprep.subr.bf16.mxu0 %v15669_v20  ;;  %15710 = vmatprep.subr.bf16.mxu1 %v21282_v7  ;;  %v24301_v20 = vld [vmem:[#allocation110_spill] sm:$0xff] }
 0xa7b   : > { %15672 = vmatpush3.bf16.msra.mxu0 %v15671_v26  ;;  %15712 = vmatpush3.bf16.msra.mxu1 %v21295_v30  ;;  %v24302_v26 = vand.u32 4294901760, %v24301_v20 }
 0xa7c   : > { %15674 = vmatprep.subr.bf16.mxu0 %v15673_v14  ;;  %15714 = vmatprep.subr.bf16.mxu1 %v21297_v45 }
 0xa7f   : > { %15676 = vmatpush3.bf16.msra.mxu0 %v15675_v54  ;;  %15716 = vmatpush3.bf16.msra.mxu1 %v21302_v60  ;;  %v24305_v54 = vld [vmem:[#allocation114_spill] sm:$0xff] }
 0xa80   : > { %15678 = vmatprep.subr.bf16.mxu0 %v15677_v52  ;;  %15750 = vmatprep.subr.bf16.mxu1 %v21060_v29  ;;  %v24280_v29 = vand.u32 4294901760, %v20926_v63  ;;  %v24286_v63 = vand.u32 4294901760, %v21015_v15  ;;  %v24292_v15 = vand.u32 4294901760, %v21090_v31  ;;  %v24306_v52 = vand.u32 4294901760, %v24305_v54 }
 0xa82   : > { %7356 = vmatmul.mubr.f32.vlgmr.msra.gmra.mrb[20].mxu1 %v6875_v23 }
 0xa83   : > { %15680 = vmatpush3.bf16.msra.mxu0 %v15679_v2  ;;  %15752 = vmatpush3.bf16.msra.mxu1 %v21072_v40  ;;  %v24279_v40 = vand.u32 4294901760, %v20921_v46  ;;  %v24285_v46 = vand.u32 4294901760, %v21007_v12  ;;  %v24291_v12 = vand.u32 4294901760, %v21085_v59  ;;  %v24299_v59 = vld [vmem:[#allocation109_spill] sm:$0xff]  ;;  %v15739_v2 = vpack.c.bf16 %v24306_v52, %v24304_v9 }
 0xa84   : > { %7626 = vmatprep.mubr.f32.mxu1 %v6867_v8  ;;  %15682 = vmatprep.subr.bf16.mxu0 %v24275_v39  ;;  %v24300_v31 = vand.u32 4294901760, %v24299_v59  ;;  %v6749_v39 = vld [vmem:[#allocation15 + $0x108] sm:$0xff] }
 0xa85   : > { %15754 = vmatprep.subr.bf16.mxu1 %v21105_v43  ;;  %v15719_v47 = vpack.c.bf16 %v24280_v29, %v24279_v40  ;;  %v24284_v43 = vand.u32 4294901760, %v20974_v32  ;;  %v24290_v32 = vand.u32 4294901760, %v21053_v13  ;;  %v24295_v13 = vld [vmem:[#allocation113_spill] sm:$0xff]  ;;  %v7637_v28 = vand.u32 4294901760, %v6749_v39 }
 0xa86   : > { %v24296_v42 = vand.u32 4294901760, %v24295_v13  ;;  %v15737_v14 = vpack.c.bf16 %v24302_v26, %v24300_v31  ;;  %v24318_v40 = vld [vmem:[#allocation105_spill] sm:$0xff]  ;;  %v21477_v13 = vld [vmem:[#allocation15 + $0x168] sm:$0xff] }
 0xa87   : > { %15684 = vmatpush3.bf16.msra.mxu0 %v24278_v17  ;;  %15756 = vmatpush3.bf16.msra.mxu1 %v21117_v11  ;;  %v15723_v11 = vpack.c.bf16 %v24284_v43, %v24283_v58  ;;  %v24317_v17 = vmov 0.0   ;;  %v7649_v58 = vand.u32 4294901760, %v6753_v61  ;;  %v6754_v43 = vld [vmem:[#allocation15 + $0x130] sm:$0xff]  ;;  %v7673_v20 = vand.u32 4294901760, %v21477_v13 }
 0xa88   : > { %15718 = vmatprep.subr.bf16.mxu0 %v15717_v0  ;;  %15758 = vmatprep.subr.bf16.mxu1 %v21143_v16  ;;  %v15725_v16 = vpack.c.bf16 %v24286_v63, %v24285_v46  ;;  %v6751_v0 = vld [vmem:[#allocation15 + $0x118] sm:$0xff]  ;;  %v7652_v63 = vand.u32 4294901760, %v6754_v43  ;;  %v6762_v26 = vld [vmem:[#allocation15 + $0x170] sm:$0xff] }
 0xa89   : > { %v7643_v29 = vand.u32 4294901760, %v6751_v0 }
 0xa8a   : > { %7248 = vmatmul.mubr.f32.vlgmr.msra.gmra.mrb[20].mxu0 %v6874_v33  ;;  %v24309_v33 = vld [vmem:[#allocation74_spill] sm:$0xff] }
 0xa8b   : > { %15720 = vmatpush3.bf16.msra.mxu0 %v15719_v47  ;;  %7522 = vmatprep.mubr.f32.mxu0 %v6867_v8  ;;  %v24308_v8 = vand.u32 4294901760, %v24307_v51  ;;  %v24310_v19 = vand.u32 4294901760, %v24309_v33  ;;  %v6752_v47 = vld [vmem:[#allocation15 + $0x120] sm:$0xff]  ;;  %v21502_v51 = vsub.f32 %v6753_v61, %v7649_v58  ;;  %v7676_v33 = vand.u32 4294901760, %v6762_v26 }
 0xa8c   : > { %15760 = vmatpush3.bf16.msra.mxu1 %v21151_v21  ;;  %15722 = vmatprep.subr.bf16.mxu0 %v15721_v49  ;;  %v15729_v21 = vpack.c.bf16 %v24290_v32, %v24289_v41  ;;  %v7646_v49 = vand.u32 4294901760, %v6752_v47  ;;  %v7661_v41 = vand.u32 4294901760, %v6757_v34  ;;  %v6758_v32 = vld [vmem:[#allocation15 + $0x150] sm:$0xff] }
 0xa8d   : > { %15762 = vmatprep.subr.bf16.mxu1 %v21181_v55  ;;  %v15731_v55 = vpack.c.bf16 %v24292_v15, %v24291_v12  ;;  %v15741_v23 = vpack.c.bf16 %v24310_v19, %v24308_v8  ;;  %v21471_v15 = vsub.f32 %v6749_v39, %v7637_v28 }
 0xa8e   : > { %v21462_v46 = vpack.c.bf16 %v7649_v58, %v7646_v49  ;;  %v21492_v44 = vsub.f32 %v6752_v47, %v7646_v49  ;;  %v21527_v39 = vsub.f32 %v6757_v34, %v7661_v41  ;;  %v24320_v49 = vld [vmem:[#allocation47_spill] sm:$0xff] }
 0xa8f   : > { %15724 = vmatpush3.bf16.msra.mxu0 %v15723_v11  ;;  %v6755_v11 = vld [vmem:[#allocation15 + $0x138] sm:$0xff] }
 0xa90   : > { %15764 = vmatpush3.bf16.msra.mxu1 %v21193_v36  ;;  %15726 = vmatprep.subr.bf16.mxu0 %v15725_v16  ;;  %v15733_v36 = vpack.c.bf16 %v24294_v6, %v24293_v53  ;;  %v7655_v16 = vand.u32 4294901760, %v6755_v11  ;;  %v7664_v53 = vand.u32 4294901760, %v6758_v32 }
 0xa91   : > { %15766 = vmatprep.subr.bf16.mxu1 %v21210_v35  ;;  %v24297_v35 = vld [vmem:[#allocation108_spill] sm:$0xff] }
 0xa92   : > { %v24298_v62 = vand.u32 4294901760, %v24297_v35  ;;  %v21466_v4 = vpack.c.bf16 %v7655_v16, %v7652_v63  ;;  %v21481_v35 = vsub.f32 %v6751_v0, %v7643_v29  ;;  %v21539_v47 = vsub.f32 %v6758_v32, %v7664_v53 }
 0xa93   : > { %15728 = vmatpush3.bf16.msra.mxu0 %v15727_v25 }
 0xa94   : > { %15768 = vmatpush3.bf16.msra.mxu1 %v24272_v50  ;;  %15730 = vmatprep.subr.bf16.mxu0 %v15729_v21  ;;  %v15735_v10 = vpack.c.bf16 %v24298_v62, %v24296_v42  ;;  %v24315_v50 = vand.u32 4294901760, %v21267_v56  ;;  %v7640_v56 = vand.u32 4294901760, %v6750_v24  ;;  %v6759_v21 = vld [vmem:[#allocation15 + $0x158] sm:$0xff] }
 0xa95   : > { %15770 = vmatprep.subr.bf16.mxu1 %v24273_v22  ;;  %v7667_v6 = vand.u32 4294901760, %v6759_v21 }
 0xa96   : > { %v21456_v37 = vpack.c.bf16 %v7643_v29, %v7640_v56  ;;  %v21479_v42 = vsub.f32 %v6750_v24, %v7640_v56 }
 0xa97   : > { %15732 = vmatpush3.bf16.msra.mxu0 %v15731_v55  ;;  %v21486_v59 = vpack.c.bf16 %v7667_v6, %v7664_v53  ;;  %v21541_v61 = vsub.f32 %v6759_v21, %v7667_v6  ;;  %v23552_v21 = vand.u32 4294901760, %v21539_v47  ;;  %v21566_v6 = vsub.f32 %v21477_v13, %v7673_v20 }
 0xa98   : > { %15772 = vmatpush3.bf16.msra.mxu1 %v24274_v48  ;;  %15734 = vmatprep.subr.bf16.mxu0 %v15733_v36  ;;  %v6748_v48 = vld [vmem:[#allocation15 + $0x100] sm:$0xff]  ;;  %v7741_v52 = vand.u32 4294901760, %v21479_v42 }
 0xa99   : > { %15774 = vmatprep.subr.bf16.mxu1 %v21282_v7  ;;  %v24313_v7 = vld [vmem:[#allocation103_spill] sm:$0xff]  ;;  %v23551_v53 = vand.u32 4294901760, %v21541_v61 }
 0xa9a   : > { %v24314_v3 = vand.u32 4294901760, %v24313_v7  ;;  %v6760_v36 = vld [vmem:[#allocation15 + $0x160] sm:$0xff]  ;;  %v7742_v7 = vsub.f32 %v21479_v42, %v7741_v52 }
 0xa9b   : > { %15736 = vmatpush3.bf16.msra.mxu0 %v15735_v10  ;;  %v7734_v10 = vand.u32 4294901760, %v21471_v15  ;;  %v7670_v31 = vand.u32 4294901760, %v6760_v36 }
 0xa9c   : > { %15776 = vmatpush3.bf16.msra.mxu1 %v21295_v30  ;;  %15738 = vmatprep.subr.bf16.mxu0 %v15737_v14  ;;  %v15743_v27 = vpack.c.bf16 %v24314_v3, %v24312_v1  ;;  %v24316_v30 = vand.u32 4294901760, %v21274_v5  ;;  %v24319_v5 = vmov 0.0|0.0   ;;  %v21490_v14 = vld [vmem:[#allocation15 + $0x178] sm:$0xff] }
 0xa9d   : > { %15778 = vmatprep.subr.bf16.mxu1 %v21297_v45  ;;  %v7634_v45 = vand.u32 4294901760, %v6748_v48  ;;  %v7735_v54 = vsub.f32 %v21471_v15, %v7734_v10  ;;  %v21505_v8 = vpack.c.bf16 %v7673_v20, %v7670_v31  ;;  %v7679_v19 = vand.u32 4294901760, %v21490_v14 }
 0xa9e   : > { %v15745_v22 = vpack.c.bf16 %v24316_v30, %v24315_v50  ;;  %v7755_v30 = vand.u32 4294901760, %v21492_v44 }
 0xa9f   : > { %15740 = vmatpush3.bf16.msra.mxu0 %v15739_v2  ;;  %v21469_v12 = vsub.f32 %v6748_v48, %v7634_v45  ;;  %v7748_v2 = vand.u32 4294901760, %v21481_v35  ;;  %v7736_v1 = vand.u32 4294901760, %v7735_v54  ;;  %v21520_v50 = vpack.c.bf16 %v7679_v19, %v7676_v33 }
 0xaa0   : > { %15780 = vmatpush3.bf16.msra.mxu1 %v21302_v60  ;;  %15742 = vmatprep.subr.bf16.mxu0 %v15741_v23  ;;  %v21451_v60 = vpack.c.bf16 %v7637_v28, %v7634_v45  ;;  %v21509_v23 = vsub.f32 %v6754_v43, %v7652_v63  ;;  %v7743_v28 = vand.u32 4294901760, %v7742_v7  ;;  %v7756_v0 = vsub.f32 %v21492_v44, %v7755_v30 }
 0xaa1   : > { %v7727_v62 = vand.u32 4294901760, %v21469_v12  ;;  %v7749_v3 = vsub.f32 %v21481_v35, %v7748_v2  ;;  %v7798_v7 = vsub.f32 %v21539_v47, %v23552_v21  ;;  %v21578_v13 = vsub.f32 %v21490_v14, %v7679_v19 }
 0xaa2   : > { %v7769_v56 = vand.u32 4294901760, %v21509_v23  ;;  %v7757_v63 = vand.u32 4294901760, %v7756_v0 }
 0xaa3   : > { %7628 = vmatmul.mubr.f32.vlgmr.msra.gmra.mrb[22].mxu1 %v21347_v18  ;;  %15744 = vmatpush3.bf16.msra.mxu0 %v15743_v27  ;;  %v7728_v9 = vsub.f32 %v21469_v12, %v7727_v62  ;;  %v21517_v27 = vsub.f32 %v6755_v11, %v7655_v16  ;;  %v7750_v24 = vand.u32 4294901760, %v7749_v3  ;;  %v23553_v11 = vand.u32 4294901760, %v21527_v39 }
 0xaa4   : > { %15746 = vmatprep.subr.bf16.mxu0 %v15745_v22  ;;  %8415 = vmatprep.mubr.f32.mxu1 %v24317_v17  ;;  %v7762_v22 = vand.u32 4294901760, %v21502_v51  ;;  %v7805_v3 = vsub.f32 %v21541_v61, %v23551_v53 }
 0xaa5   : > { %v7729_v57 = vand.u32 4294901760, %v7728_v9  ;;  %v7776_v29 = vand.u32 4294901760, %v21517_v27  ;;  %v15809_v58 = vpack.c.bf16 %v7750_v24, %v7743_v28  ;;  %v7791_v32 = vsub.f32 %v21527_v39, %v23553_v11 }
 0xaa6   : > { %v7799_v28 = vand.u32 4294901760, %v7798_v7  ;;  %v7806_v24 = vand.u32 4294901760, %v7805_v3  ;;  %v15839_v7 = vpack.c.bf16 %v21517_v27, %v21509_v23 }
 0xaa7   : > { %15748 = vmatpush3.bf16.msra.mxu0 %v24318_v40  ;;  %v15806_v45 = vpack.c.bf16 %v7736_v1, %v7729_v57  ;;  %v7763_v40 = vsub.f32 %v21502_v51, %v7762_v22  ;;  %v7777_v34 = vsub.f32 %v21517_v27, %v7776_v29  ;;  %v7792_v1 = vand.u32 4294901760, %v7791_v32  ;;  %v11307_v27 = vld [vmem:[%s24332_s14] ss:$0 sm:$0xff] }
 0xaa8   : > { %15781 = vmatprep.subr.bf16.mxu0 %v24319_v5 }
 0xaa9   : > { %v7764_v16 = vand.u32 4294901760, %v7763_v40  ;;  %v23547_v40 = vand.u32 4294901760, %v21578_v13 }
 0xaaa   : > { %7524 = vmatmul.mubr.f32.vlgmr.msra.gmra.mrb[22].mxu0 %v21347_v18  ;;  %v6756_v18 = vld [vmem:[#allocation15 + $0x140] sm:$0xff] }
 0xaab   : > { %15783 = vmatpush3.bf16.msra.mxu0 %v21451_v60  ;;  %14163 = vmatprep.mubr.msk.f32.mxu0 %vm17371_vm0, %v24317_v17  ;;  %v7658_v25 = vand.u32 4294901760, %v6756_v18  ;;  %v15812_v9 = vpack.c.bf16 %v7764_v16, %v7757_v63 }
 0xaac   : > { %15784 = vmatprep.subr.bf16.mxu0 %v24319_v5 }
 0xaad   : > { %v21474_v55 = vpack.c.bf16 %v7661_v41, %v7658_v25  ;;  %v21525_v48 = vsub.f32 %v6756_v18, %v7658_v25  ;;  %v7770_v18 = vsub.f32 %v21509_v23, %v7769_v56  ;;  %v21555_v25 = vsub.f32 %v6760_v36, %v7670_v31 }
 0xaae   : > { %v7778_v36 = vand.u32 4294901760, %v7777_v34  ;;  %v21569_v31 = vsub.f32 %v6762_v26, %v7676_v33  ;;  %v23549_v26 = vand.u32 4294901760, %v21566_v6 }
 0xaaf   : > { %15786 = vmatpush3.bf16.msra.mxu0 %v21456_v37  ;;  %v7783_v43 = vand.u32 4294901760, %v21525_v48  ;;  %v7771_v54 = vand.u32 4294901760, %v7770_v18  ;;  %v7833_v18 = vsub.f32 %v21578_v13, %v23547_v40  ;;  %v15842_v3 = vpack.c.bf16 %v21527_v39, %v21525_v48 }
 0xab0   : > { %15787 = vmatprep.subr.bf16.mxu0 %v24319_v5  ;;  %v7819_v14 = vsub.f32 %v21566_v6, %v23549_v26  ;;  %v23548_v19 = vand.u32 4294901760, %v21569_v31 }
 0xab1   : > { %v7784_v41 = vsub.f32 %v21525_v48, %v7783_v43  ;;  %v15815_v20 = vpack.c.bf16 %v7778_v36, %v7771_v54  ;;  %v7834_v32 = vand.u32 4294901760, %v7833_v18  ;;  %v15830_v54 = vpack.c.bf16 %v21471_v15, %v21469_v12  ;;  %v24321_v36 = vld [vmem:[#allocation44_spill] sm:$0xff]  ;;  %v8282_v18 = vld [vmem:[#allocation17 + $0x38] sm:$0xff] }
 0xab2   : > { %v7820_v63 = vand.u32 4294901760, %v7819_v14  ;;  %v7826_v16 = vsub.f32 %v21569_v31, %v23548_v19  ;;  %v15884_v12 = vpack.c.bf16 %v7762_v22, %v7755_v30  ;;  %v15887_v15 = vpack.c.bf16 %v7776_v29, %v7769_v56 }
 0xab3   : > { %15789 = vmatpush3.bf16.msra.mxu0 %v21462_v46  ;;  %v7785_v57 = vand.u32 4294901760, %v7784_v41  ;;  %v24333_v48 = vand.u32 4294901760, %v21555_v25 }
 0xab4   : > { %15790 = vmatprep.subr.bf16.mxu0 %v24319_v5  ;;  %v7827_v41 = vand.u32 4294901760, %v7826_v16  ;;  %v8280_v16 = vld [vmem:[#allocation17 + $0x28] sm:$0xff] }
 0xab5   : > { %v15818_v33 = vpack.c.bf16 %v7792_v1, %v7785_v57  ;;  %v15833_v57 = vpack.c.bf16 %v21481_v35, %v21479_v42  ;;  %v15836_v1 = vpack.c.bf16 %v21502_v51, %v21492_v44 }
 0xab7   : > { %15792 = vmatpush3.bf16.msra.mxu0 %v21466_v4 }
 0xab8   : > { %15793 = vmatprep.subr.bf16.mxu0 %v24319_v5 }
 0xabb   : > { %15795 = vmatpush3.bf16.msra.mxu0 %v21474_v55 }
 0xabc   : > { %15796 = vmatprep.subr.bf16.mxu0 %v24319_v5 }
 0xabf   : > { %15798 = vmatpush3.bf16.msra.mxu0 %v21486_v59 }
 0xac0   : > { %15799 = vmatprep.subr.bf16.mxu0 %v24319_v5 }
 0xac3   : > { %15801 = vmatpush3.bf16.msra.mxu0 %v21505_v8 }
 0xac4   : > { %15802 = vmatprep.subr.bf16.mxu0 %v24319_v5 }
 0xac7   : > { %15804 = vmatpush3.bf16.msra.mxu0 %v21520_v50 }
 0xac8   : > { %15805 = vmatprep.subr.bf16.mxu0 %v24319_v5 }
 0xaca   : > { %14164 = vmatmul.mubr.f32.vlgmr.msra.gmra.mrb[24].mxu0 %v24320_v49  ;;  %v15821_v49 = vpack.c.bf16 %v7806_v24, %v7799_v28  ;;  %v8276_v28 = vld [vmem:[#allocation17 + $0x8] sm:$0xff]  ;;  %v8278_v24 = vld [vmem:[#allocation17 + $0x18] sm:$0xff] }
 0xacb   : > { %15807 = vmatpush3.bf16.msra.mxu0 %v15806_v45  ;;  %14198 = vmatprep.mubr.msk.f32.mxu0 %vm17371_vm0, %v24317_v17  ;;  %v23550_v45 = vand.u32 4294901760, %v21555_v25  ;;  %v8319_v14 = vand.u32 4294901760, %v8276_v28 }
 0xacc   : > { %15808 = vmatprep.subr.bf16.mxu0 %v24319_v5 }
 0xacd   : > { %v7812_v0 = vsub.f32 %v21555_v25, %v23550_v45 }
 0xacf   : > { %15810 = vmatpush3.bf16.msra.mxu0 %v15809_v58  ;;  %v7813_v58 = vand.u32 4294901760, %v7812_v0  ;;  %v8275_v0 = vld [vmem:[#allocation17] sm:$0xff] }
 0xad0   : > { %15811 = vmatprep.subr.bf16.mxu0 %v24319_v5 }
 0xad1   : > { %v15824_v34 = vpack.c.bf16 %v7820_v63, %v7813_v58  ;;  %v8277_v58 = vld [vmem:[#allocation17 + $0x10] sm:$0xff]  ;;  %v8321_v63 = vand.u32 4294901760, %v8275_v0 }
 0xad3   : > { %15813 = vmatpush3.bf16.msra.mxu0 %v15812_v9  ;;  %v15827_v9 = vpack.c.bf16 %v7834_v32, %v7827_v41  ;;  %v8325_v41 = vand.u32 4294901760, %v8277_v58  ;;  %v8327_v32 = vand.u32 4294901760, %v8280_v16  ;;  %v21634_v40 = vsub.f32 %v8275_v0, %v8321_v63 }
 0xad4   : > { %15814 = vmatprep.subr.bf16.mxu0 %v24319_v5 }
 0xad5   : > { %v21636_v19 = vpack.c.bf16 %v8325_v41, %v8321_v63  ;;  %v21638_v26 = vsub.f32 %v8277_v58, %v8325_v41  ;;  %v21642_v53 = vsub.f32 %v8280_v16, %v8327_v32  ;;  %v24328_v41 = vld [vmem:[#allocation46_spill] sm:$0xff] }
 0xad7   : > { %15816 = vmatpush3.bf16.msra.mxu0 %v15815_v20  ;;  %v15845_v20 = vpack.c.bf16 %v21541_v61, %v21539_v47  ;;  %24323 = vst [vmem:[#allocation107_spill] sm:$0xff] %v21636_v19 }
 0xad8   : > { %15817 = vmatprep.subr.bf16.mxu0 %v24319_v5 }
 0xadb   : > { %15819 = vmatpush3.bf16.msra.mxu0 %v15818_v33  ;;  %v15848_v33 = vpack.c.bf16 %v21566_v6, %v21555_v25 }
 0xadc   : > { %15820 = vmatprep.subr.bf16.mxu0 %v24319_v5 }
 0xadf   : > { %15822 = vmatpush3.bf16.msra.mxu0 %v15821_v49  ;;  %v8323_v49 = vand.u32 4294901760, %v8278_v24 }
 0xae0   : > { %15823 = vmatprep.subr.bf16.mxu0 %v24319_v5 }
 0xae3   : > { %15825 = vmatpush3.bf16.msra.mxu0 %v15824_v34  ;;  %v15851_v34 = vpack.c.bf16 %v21578_v13, %v21569_v31 }
 0xae4   : > { %15826 = vmatprep.subr.bf16.mxu0 %v24319_v5 }
 0xae7   : > { %15828 = vmatpush3.bf16.msra.mxu0 %v15827_v9  ;;  %v8331_v9 = vand.u32 4294901760, %v8282_v18 }
 0xae8   : > { %15829 = vmatprep.subr.bf16.mxu0 %v24319_v5 }
 0xae9   : > { %v21640_v45 = vpack.c.bf16 %v8331_v9, %v8327_v32  ;;  %v21645_v21 = vsub.f32 %v8282_v18, %v8331_v9  ;;  %v15881_v32 = vpack.c.bf16 %v7748_v2, %v7741_v52  ;;  %v24330_v52 = vand.u32 4294901760, %v21539_v47 }
 0xaea   : > { %14199 = vmatmul.mubr.f32.vlgmr.msra.gmra.mrb[24].mxu0 %v24321_v36  ;;  %v24331_v2 = vand.u32 4294901760, %v21541_v61  ;;  %v24335_v47 = vand.u32 4294901760, %v21569_v31  ;;  %v24336_v61 = vand.u32 4294901760, %v21578_v13 }
 0xaeb   : > { %15831 = vmatpush3.bf16.msra.mxu0 %v15830_v54  ;;  %14233 = vmatprep.mubr.msk.f32.mxu0 %vm17371_vm0, %v24317_v17  ;;  %v8279_v54 = vld [vmem:[#allocation17 + $0x20] sm:$0xff]  ;;  %24324 = vst [vmem:[#allocation66_spill] sm:$0xff] %v21640_v45 }
 0xaec   : > { %15832 = vmatprep.subr.bf16.mxu0 %v24319_v5  ;;  %v8329_v11 = vand.u32 4294901760, %v8279_v54  ;;  %v15893_v51 = vpack.c.bf16 %v24331_v2, %v24330_v52  ;;  %v8294_v52 = vld [vmem:[#allocation17 + $0x98] sm:$0xff] }
 0xaef   : > { %15834 = vmatpush3.bf16.msra.mxu0 %v15833_v57  ;;  %v8281_v57 = vld [vmem:[#allocation17 + $0x30] sm:$0xff] }
 0xaf0   : > { %15835 = vmatprep.subr.bf16.mxu0 %v24319_v5 }
 0xaf3   : > { %15837 = vmatpush3.bf16.msra.mxu0 %v15836_v1  ;;  %v8284_v1 = vld [vmem:[#allocation17 + $0x48] sm:$0xff] }
 0xaf4   : > { %15838 = vmatprep.subr.bf16.mxu0 %v24319_v5 }
 0xaf7   : > { %15840 = vmatpush3.bf16.msra.mxu0 %v15839_v7  ;;  %v21628_v7 = vpack.c.bf16 %v8323_v49, %v8319_v14 }
 0xaf8   : > { %15841 = vmatprep.subr.bf16.mxu0 %v24319_v5 }
 0xaf9   : > { %24322 = vst [vmem:[#allocation106_spill] sm:$0xff] %v21628_v7  ;;  %15926 = vmatprep.subr.bf16.mxu1 %v21628_v7 }
 0xafa   : > { %15928 = vmatpush1.bf16.msra.mxu1 %v21636_v19 }
 0xafb   : > { %15843 = vmatpush3.bf16.msra.mxu0 %v15842_v3  ;;  %v21630_v3 = vsub.f32 %v8276_v28, %v8319_v14  ;;  %v8333_v28 = vand.u32 4294901760, %v8281_v57  ;;  %v8335_v14 = vand.u32 4294901760, %v8284_v1  ;;  %15930 = vmatprep.subr.bf16.mxu1 %v21640_v45 }
 0xafc   : > { %15844 = vmatprep.subr.bf16.mxu0 %v24319_v5 }
 0xafd   : > { %v21650_v0 = vpack.c.bf16 %v8333_v28, %v8329_v11  ;;  %v21654_v58 = vsub.f32 %v8281_v57, %v8333_v28  ;;  %v21658_v16 = vsub.f32 %v8284_v1, %v8335_v14 }
 0xaff   : > { %15846 = vmatpush3.bf16.msra.mxu0 %v15845_v20  ;;  %v21632_v20 = vsub.f32 %v8278_v24, %v8323_v49  ;;  %24325 = vst [vmem:[#allocation67_spill] sm:$0xff] %v21650_v0  ;;  %v21652_v49 = vsub.f32 %v8279_v54, %v8329_v11  ;;  %15932 = vmatpush1.bf16.msra.mxu1 %v21650_v0 }
 0xb00   : > { %15847 = vmatprep.subr.bf16.mxu0 %v24319_v5  ;;  %v15878_v11 = vpack.c.bf16 %v7734_v10, %v7727_v62  ;;  %v24329_v10 = vand.u32 4294901760, %v21527_v39  ;;  %v24334_v39 = vand.u32 4294901760, %v21566_v6 }
 0xb02   : > { %v15890_v44 = vpack.c.bf16 %v24329_v10, %v7783_v43  ;;  %v15896_v56 = vpack.c.bf16 %v24334_v39, %v24333_v48  ;;  %v15899_v43 = vpack.c.bf16 %v24336_v61, %v24335_v47 }
 0xb03   : > { %15849 = vmatpush3.bf16.msra.mxu0 %v15848_v33  ;;  %v8286_v33 = vld [vmem:[#allocation17 + $0x58] sm:$0xff] }
 0xb04   : > { %15850 = vmatprep.subr.bf16.mxu0 %v24319_v5  ;;  %v8339_v24 = vand.u32 4294901760, %v8286_v33 }
 0xb06   : > { %v21656_v63 = vpack.c.bf16 %v8339_v24, %v8335_v14  ;;  %v21660_v18 = vsub.f32 %v8286_v33, %v8339_v24  ;;  %v8283_v24 = vld [vmem:[#allocation17 + $0x40] sm:$0xff] }
 0xb07   : > { %15852 = vmatpush3.bf16.msra.mxu0 %v15851_v34  ;;  %v24327_v34 = vld [vmem:[#allocation45_spill] sm:$0xff] }
 0xb08   : > { %15853 = vmatprep.subr.bf16.mxu0 %v24319_v5  ;;  %24326 = vst [vmem:[#allocation69_spill] sm:$0xff] %v21656_v63  ;;  %15934 = vmatprep.subr.bf16.mxu1 %v21656_v63 }
 0xb0a   : > { %14234 = vmatmul.mubr.f32.vlgmr.msra.gmra.mrb[24].mxu0 %v24327_v34  ;;  %v8285_v34 = vld [vmem:[#allocation17 + $0x50] sm:$0xff] }
 0xb0b   : > { %15855 = vmatpush3.bf16.msra.mxu0 %v21451_v60  ;;  %14268 = vmatprep.mubr.msk.f32.mxu0 %vm17371_vm0, %v24317_v17 }
 0xb0c   : > { %15856 = vmatprep.subr.bf16.mxu0 %v24319_v5 }
 0xb0f   : > { %15858 = vmatpush3.bf16.msra.mxu0 %v21456_v37 }
 0xb10   : > { %15859 = vmatprep.subr.bf16.mxu0 %v24319_v5 }
 0xb13   : > { %15861 = vmatpush3.bf16.msra.mxu0 %v21462_v46 }
 0xb14   : > { %15862 = vmatprep.subr.bf16.mxu0 %v24319_v5 }
 0xb17   : > { %15864 = vmatpush3.bf16.msra.mxu0 %v21466_v4 }
 0xb18   : > { %15865 = vmatprep.subr.bf16.mxu0 %v24319_v5 }
 0xb1b   : > { %15867 = vmatpush3.bf16.msra.mxu0 %v21474_v55 }
 0xb1c   : > { %15868 = vmatprep.subr.bf16.mxu0 %v24319_v5 }
 0xb1f   : > { %15870 = vmatpush3.bf16.msra.mxu0 %v21486_v59 }
 0xb20   : > { %15871 = vmatprep.subr.bf16.mxu0 %v24319_v5 }
 0xb23   : > { %15873 = vmatpush3.bf16.msra.mxu0 %v21505_v8 }
 0xb24   : > { %15874 = vmatprep.subr.bf16.mxu0 %v24319_v5 }
 0xb27   : > { %15876 = vmatpush3.bf16.msra.mxu0 %v21520_v50 }
 0xb28   : > { %15877 = vmatprep.subr.bf16.mxu0 %v24319_v5 }
 0xb2a   : > { %14269 = vmatmul.mubr.f32.vlgmr.msra.gmra.mrb[24].mxu0 %v24328_v41 }
 0xb2b   : > { %15879 = vmatpush3.bf16.msra.mxu0 %v15878_v11  ;;  %14303 = vmatprep.mubr.msk.f32.mxu0 %vm17371_vm0, %v24317_v17  ;;  %v8337_v11 = vand.u32 4294901760, %v8283_v24 }
 0xb2c   : > { %15880 = vmatprep.subr.bf16.mxu0 %v24319_v5 }
 0xb2f   : > { %15882 = vmatpush3.bf16.msra.mxu0 %v15881_v32  ;;  %v8290_v32 = vld [vmem:[#allocation17 + $0x78] sm:$0xff] }
 0xb30   : > { %15883 = vmatprep.subr.bf16.mxu0 %v24319_v5 }
 0xb33   : > { %15885 = vmatpush3.bf16.msra.mxu0 %v15884_v12  ;;  %v8347_v12 = vand.u32 4294901760, %v8290_v32 }
 0xb34   : > { %15886 = vmatprep.subr.bf16.mxu0 %v24319_v5 }
 0xb35   : > { %v12416_v42 = vpop.f32.mrb[18].mxu1 }
 0xb36   : > { %v12417_v35 = vpop.f32.mrb[19].mxu1 }
 0xb37   : > { %v12418_v62 = vadd.f32 %v12417_v35, %v12416_v42  ;;  %15888 = vmatpush3.bf16.msra.mxu0 %v15887_v15  ;;  %v8289_v15 = vld [vmem:[#allocation17 + $0x70] sm:$0xff] }
 0xb38   : > { %15889 = vmatprep.subr.bf16.mxu0 %v24319_v5  ;;  %v8349_v35 = vand.u32 4294901760, %v8289_v15 }
 0xb3b   : > { %15891 = vmatpush3.bf16.msra.mxu0 %v15890_v44  ;;  %v8292_v44 = vld [vmem:[#allocation17 + $0x88] sm:$0xff] }
 0xb3c   : > { %15892 = vmatprep.subr.bf16.mxu0 %v24319_v5  ;;  %v8351_v2 = vand.u32 4294901760, %v8292_v44 }
 0xb3d   : > { %v12381_v23 = vpop.f32.mrb[18].mxu0 }
 0xb3e   : > { %v12382_v30 = vpop.f32.mrb[19].mxu0 }
 0xb3f   : > { %v12383_v22 = vadd.f32 %v12382_v30, %v12381_v23  ;;  %15894 = vmatpush3.bf16.msra.mxu0 %v15893_v51  ;;  %v8355_v51 = vand.u32 4294901760, %v8294_v52  ;;  %v8291_v23 = vld [vmem:[#allocation17 + $0x80] sm:$0xff] }
 0xb40   : > { %15895 = vmatprep.subr.bf16.mxu0 %v24319_v5  ;;  %v8353_v30 = vand.u32 4294901760, %v8291_v23 }
 0xb41   : > { %v6880_v29 = vadd.f32 %v12383_v22, %v11307_v27  ;;  %v8293_v27 = vld [vmem:[#allocation17 + $0x90] sm:$0xff]  ;;  %v21759_v48 = vpack.c.bf16 %v8355_v51, %v8351_v2 }
 0xb42   : > { %v8357_v22 = vand.u32 4294901760, %v8293_v27 }
 0xb43   : > { %15897 = vmatpush3.bf16.msra.mxu0 %v15896_v56  ;;  %v7112_v9 = vadd.f32 %v12418_v62, %v6880_v29  ;;  %24340 = vst [vmem:[#allocation75_spill] sm:$0xff] %v21759_v48  ;;  %v8296_v56 = vld [vmem:[#allocation17 + $0xa8] sm:$0xff]  ;;  %v8298_v29 = vld [vmem:[#allocation17 + $0xb8] sm:$0xff] }
 0xb44   : > { %15898 = vmatprep.subr.bf16.mxu0 %v24319_v5  ;;  %v21761_v39 = vpack.c.bf16 %v8357_v22, %v8353_v30  ;;  %v8359_v47 = vand.u32 4294901760, %v8296_v56  ;;  %v8363_v61 = vand.u32 4294901760, %v8298_v29 }
 0xb46   : > { %24341 = vst [vmem:[#allocation76_spill] sm:$0xff] %v21761_v39 }
 0xb47   : > { %15900 = vmatpush3.bf16.msra.mxu0 %v15899_v43  ;;  %v8295_v43 = vld [vmem:[#allocation17 + $0xa0] sm:$0xff] }
 0xb48   : > { %15901 = vmatprep.subr.bf16.mxu0 %v24319_v5 }
 0xb4a   : > { %14304 = vmatmul.mubr.f32.vlgmr.msra.gmra.mrb[24].mxu0 %v24321_v36 }
 0xb4b   : > { %15903 = vmatpush3.bf16.msra.mxu0 %v21451_v60  ;;  %14338 = vmatprep.mubr.msk.f32.mxu0 %vm17371_vm0, %v24317_v17 }
 0xb4c   : > { %15904 = vmatprep.subr.bf16.mxu0 %v24319_v5 }
 0xb4f   : > { %15906 = vmatpush3.bf16.msra.mxu0 %v21456_v37 }
 0xb50   : > { %15907 = vmatprep.subr.bf16.mxu0 %v24319_v5 }
 0xb53   : > { %15909 = vmatpush3.bf16.msra.mxu0 %v21462_v46 }
 0xb54   : > { %15910 = vmatprep.subr.bf16.mxu0 %v24319_v5 }
 0xb55   : > { %v12486_v25 = vpop.f32.mrb[20].mxu1 }
 0xb56   : > { %v12487_v6 = vpop.f32.mrb[21].mxu1 }
 0xb57   : > { %v12488_v31 = vadd.f32 %v12487_v6, %v12486_v25  ;;  %15912 = vmatpush3.bf16.msra.mxu0 %v21466_v4  ;;  %v8361_v25 = vand.u32 4294901760, %v8295_v43 }
 0xb58   : > { %15913 = vmatprep.subr.bf16.mxu0 %v24319_v5 }
 0xb5b   : > { %15915 = vmatpush3.bf16.msra.mxu0 %v21474_v55 }
 0xb5c   : > { %15916 = vmatprep.subr.bf16.mxu0 %v24319_v5 }
 0xb5d   : > { %v12451_v60 = vpop.f32.mrb[20].mxu0 }
 0xb5e   : > { %v12452_v13 = vpop.f32.mrb[21].mxu0 }
 0xb5f   : > { %v12453_v37 = vadd.f32 %v12452_v13, %v12451_v60  ;;  %15918 = vmatpush3.bf16.msra.mxu0 %v21486_v59  ;;  %v8300_v13 = vld [vmem:[#allocation17 + $0xc8] sm:$0xff] }
 0xb60   : > { %15919 = vmatprep.subr.bf16.mxu0 %v24319_v5 }
 0xb61   : > { %v7250_v46 = vadd.f32 %v12453_v37, %v7112_v9  ;;  %v8297_v9 = vld [vmem:[#allocation17 + $0xb0] sm:$0xff]  ;;  %v8302_v37 = vld [vmem:[#allocation17 + $0xd8] sm:$0xff] }
 0xb62   : > { %v8365_v6 = vand.u32 4294901760, %v8297_v9 }
 0xb63   : > { %15921 = vmatpush3.bf16.msra.mxu0 %v21505_v8  ;;  %v7358_v54 = vadd.f32 %v12488_v31, %v7250_v46  ;;  %v8341_v8 = vand.u32 4294901760, %v8285_v34  ;;  %v21765_v31 = vpack.c.bf16 %v8363_v61, %v8359_v47  ;;  %v8367_v46 = vand.u32 4294901760, %v8300_v13 }
 0xb64   : > { %15922 = vmatprep.subr.bf16.mxu0 %v24319_v5  ;;  %v8288_v5 = vld [vmem:[#allocation17 + $0x68] sm:$0xff]  ;;  %v21767_v60 = vpack.c.bf16 %v8365_v6, %v8361_v25 }
 0xb65   : > { %v21750_v41 = vpack.c.bf16 %v8341_v8, %v8337_v11  ;;  %24342 = vst [vmem:[#allocation77_spill] sm:$0xff] %v21765_v31  ;;  %v21777_v38 = vsub.f32 %v8285_v34, %v8341_v8  ;;  %v21793_v34 = vsub.f32 %v8291_v23, %v8353_v30  ;;  %v21795_v8 = vsub.f32 %v8293_v27, %v8357_v22 }
 0xb66   : > { %24343 = vst [vmem:[#allocation78_spill] sm:$0xff] %v21767_v60  ;;  %v23579_v30 = vand.u32 4294901760, %v21630_v3  ;;  %v23569_v22 = vand.u32 4294901760, %v21632_v20 }
 0xb67   : > { %15924 = vmatpush3.bf16.msra.mxu0 %v21520_v50  ;;  %24337 = vst [vmem:[#allocation70_spill] sm:$0xff] %v21750_v41  ;;  %v8343_v50 = vand.u32 4294901760, %v8288_v5  ;;  %15936 = vmatpush1.bf16.msra.mxu1 %v21750_v41  ;;  %24347 = vst [vmem:[#allocation83_spill] sm:$0xff] %v21793_v34 }
 0xb68   : > { %24348 = vst [vmem:[#allocation84_spill] sm:$0xff] %v21795_v8 }
 0xb69   : > { %v21753_v62 = vpack.c.bf16 %v8347_v12, %v8343_v50 }
 0xb6a   : > { %14339 = vmatmul.mubr.f32.vlgmr.msra.gmra.mrb[24].mxu0 %v24321_v36  ;;  %v8287_v36 = vld [vmem:[#allocation17 + $0x60] sm:$0xff] }
 0xb6b   : > { %v8345_v42 = vand.u32 4294901760, %v8287_v36  ;;  %24338 = vst [vmem:[#allocation71_spill] sm:$0xff] %v21753_v62  ;;  %15938 = vmatprep.subr.bf16.mxu1 %v21753_v62  ;;  %v21790_v62 = vsub.f32 %v8294_v52, %v8355_v51 }
 0xb6d   : > { %v21755_v10 = vpack.c.bf16 %v8349_v35, %v8345_v42  ;;  %24346 = vst [vmem:[#allocation82_spill] sm:$0xff] %v21790_v62 }
 0xb6f   : > { %24339 = vst [vmem:[#allocation73_spill] sm:$0xff] %v21755_v10  ;;  %15940 = vmatpush1.bf16.msra.mxu1 %v21755_v10  ;;  %v21786_v10 = vsub.f32 %v8289_v15, %v8349_v35  ;;  %v21803_v15 = vsub.f32 %v8297_v9, %v8365_v6  ;;  %v8430_v6 = vsub.f32 %v21630_v3, %v23579_v30 }
 0xb70   : > { %15942 = vmatprep.subr.bf16.mxu1 %v21759_v48  ;;  %v21781_v48 = vsub.f32 %v8290_v32, %v8347_v12  ;;  %v21799_v32 = vsub.f32 %v8298_v29, %v8363_v61  ;;  %v8305_v12 = vld [vmem:[#allocation17 + $0xf0] sm:$0xff]  ;;  %v23568_v61 = vand.u32 4294901760, %v21634_v40 }
 0xb71   : > { %24352 = vst [vmem:[#allocation87_spill] sm:$0xff] %v21803_v15  ;;  %v8381_v27 = vand.u32 4294901760, %v8305_v12 }
 0xb72   : > { %24350 = vst [vmem:[#allocation52_spill] sm:$0xff] %v21799_v32 }
 0xb73   : > { %15944 = vmatpush1.bf16.msra.mxu1 %v21761_v39  ;;  %v21779_v39 = vsub.f32 %v8288_v5, %v8343_v50  ;;  %v21797_v5 = vsub.f32 %v8296_v56, %v8359_v47  ;;  %v8303_v50 = vld [vmem:[#allocation17 + $0xe0] sm:$0xff] }
 0xb74   : > { %15946 = vmatprep.subr.bf16.mxu1 %v21765_v31  ;;  %v21784_v31 = vsub.f32 %v8287_v36, %v8345_v42  ;;  %v21801_v36 = vsub.f32 %v8295_v43, %v8361_v25  ;;  %v21805_v42 = vsub.f32 %v8300_v13, %v8367_v46  ;;  %v8377_v23 = vand.u32 4294901760, %v8303_v50 }
 0xb75   : > { %24349 = vst [vmem:[#allocation85_spill] sm:$0xff] %v21797_v5  ;;  %v21826_v25 = vsub.f32 %v8305_v12, %v8381_v27  ;;  %v8442_v13 = vsub.f32 %v21632_v20, %v23569_v22 }
 0xb76   : > { %v12556_v4 = vpop.f32.mrb[22].mxu1  ;;  %24351 = vst [vmem:[#allocation86_spill] sm:$0xff] %v21801_v36  ;;  %24353 = vst [vmem:[#allocation88_spill] sm:$0xff] %v21805_v42  ;;  %v21822_v43 = vpack.c.bf16 %v8381_v27, %v8377_v23  ;;  %v21824_v9 = vsub.f32 %v8303_v50, %v8377_v23  ;;  %v23576_v27 = vand.u32 4294901760, %v21658_v16 }
 0xb77   : > { %v12557_v55 = vpop.f32.mrb[23].mxu1  ;;  %15948 = vmatpush1.bf16.msra.mxu1 %v21767_v60  ;;  %v21788_v60 = vsub.f32 %v8292_v44, %v8351_v2 }
 0xb78   : > { %v12558_v57 = vadd.f32 %v12557_v55, %v12556_v4  ;;  %v8299_v4 = vld [vmem:[#allocation17 + $0xc0] sm:$0xff]  ;;  %v8301_v55 = vld [vmem:[#allocation17 + $0xd0] sm:$0xff]  ;;  %24356 = vst [vmem:[#allocation91_spill] sm:$0xff] %v21822_v43 }
 0xb7d   : > { %v12521_v1 = vpop.f32.mrb[22].mxu0 }
 0xb7e   : > { %v12522_v33 = vpop.f32.mrb[23].mxu0 }
 0xb7f   : > { %v12523_v28 = vadd.f32 %v12522_v33, %v12521_v1  ;;  %v8373_v1 = vand.u32 4294901760, %v8301_v55 }
 0xb81   : > { %v7526_v14 = vadd.f32 %v12523_v28, %v7358_v54  ;;  %v8371_v54 = vand.u32 4294901760, %v8302_v37  ;;  %v21811_v52 = vsub.f32 %v8301_v55, %v8373_v1  ;;  %v23570_v55 = vand.u32 4294901760, %v21645_v21 }
 0xb83   : > { %v21748_v59 = vadd.f32 %v12558_v57, %v7526_v14  ;;  %v8369_v57 = vand.u32 4294901760, %v8299_v4  ;;  %v21771_v33 = vpack.c.bf16 %v8371_v54, %v8367_v46  ;;  %v21775_v14 = vsub.f32 %v8283_v24, %v8337_v11  ;;  %v8304_v24 = vld [vmem:[#allocation17 + $0xe8] sm:$0xff]  ;;  %v8306_v11 = vld [vmem:[#allocation17 + $0xf8] sm:$0xff] }
 0xb84   : > { %v21807_v35 = vsub.f32 %v8302_v37, %v8371_v54  ;;  %v8375_v2 = vand.u32 4294901760, %v8304_v24  ;;  %v8379_v51 = vand.u32 4294901760, %v8306_v11  ;;  %v8436_v37 = vsub.f32 %v21634_v40, %v23568_v61 }
 0xb85   : > { %24344 = vst [vmem:[#allocation80_spill] sm:$0xff] %v21771_v33  ;;  %v21773_v28 = vpack.c.bf16 %v8373_v1, %v8369_v57  ;;  %15950 = vmatprep.subr.bf16.mxu1 %v21771_v33  ;;  %v21809_v44 = vsub.f32 %v8299_v4, %v8369_v57  ;;  %v23566_v46 = vand.u32 4294901760, %v21638_v26  ;;  %v23567_v54 = vand.u32 4294901760, %v21642_v53 }
 0xb86   : > { %24354 = vst [vmem:[#allocation89_spill] sm:$0xff] %v21807_v35  ;;  %v21815_v56 = vpack.c.bf16 %v8379_v51, %v8375_v2  ;;  %v21817_v29 = vsub.f32 %v8304_v24, %v8375_v2  ;;  %v21819_v47 = vsub.f32 %v8306_v11, %v8379_v51  ;;  %v8431_v4 = vand.u32 4294901760, %v8430_v6 }
 0xb87   : > { %24345 = vst [vmem:[#allocation81_spill] sm:$0xff] %v21773_v28  ;;  %15952 = vmatpush1.bf16.msra.mxu1 %v21773_v28  ;;  %v23571_v57 = vand.u32 4294901760, %v21652_v49  ;;  %v23572_v1 = vand.u32 4294901760, %v21654_v58  ;;  %v8443_v24 = vand.u32 4294901760, %v8442_v13  ;;  %v8437_v11 = vand.u32 4294901760, %v8436_v37 }
 0xb88   : > { %24355 = vst [vmem:[#allocation90_spill] sm:$0xff] %v21815_v56  ;;  %15954 = vmatprep.subr.bf16.mxu1 %v21815_v56  ;;  %v8448_v50 = vsub.f32 %v21638_v26, %v23566_v46  ;;  %v8454_v12 = vsub.f32 %v21642_v53, %v23567_v54  ;;  %v8466_v2 = vsub.f32 %v21645_v21, %v23570_v55  ;;  %v23575_v46 = vand.u32 4294901760, %v21660_v18 }
 0xb89   : > { %v8460_v51 = vsub.f32 %v21652_v49, %v23571_v57  ;;  %v8472_v23 = vsub.f32 %v21654_v58, %v23572_v1  ;;  %v15957_v6 = vpack.c.bf16 %v8443_v24, %v8431_v4  ;;  %v8478_v55 = vsub.f32 %v21658_v16, %v23576_v27 }
 0xb8a   : > { %v8449_v13 = vand.u32 4294901760, %v8448_v50  ;;  %v8455_v37 = vand.u32 4294901760, %v8454_v12  ;;  %v8467_v54 = vand.u32 4294901760, %v8466_v2  ;;  %v8490_v1 = vsub.f32 %v21660_v18, %v23575_v46 }
 0xb8b   : > { %15956 = vmatpush1.bf16.msra.mxu1 %v21822_v43  ;;  %v8461_v61 = vand.u32 4294901760, %v8460_v51  ;;  %v8473_v22 = vand.u32 4294901760, %v8472_v23  ;;  %v23573_v4 = vand.u32 4294901760, %v21775_v14  ;;  %v23574_v24 = vand.u32 4294901760, %v21777_v38 }
 0xb8c   : > { %15958 = vmatprep.subr.bf16.mxu1 %v15957_v6  ;;  %v21864_v57 = vpack.c.bf16 %v8449_v13, %v8437_v11  ;;  %v21871_v50 = vpack.c.bf16 %v8467_v54, %v8455_v37  ;;  %v8479_v2 = vand.u32 4294901760, %v8478_v55  ;;  %v23577_v51 = vand.u32 4294901760, %v21779_v39 }
 0xb8d   : > { %v21873_v12 = vpack.c.bf16 %v8473_v22, %v8461_v61  ;;  %v8491_v23 = vand.u32 4294901760, %v8490_v1  ;;  %v8484_v11 = vsub.f32 %v21775_v14, %v23573_v4  ;;  %v8496_v6 = vsub.f32 %v21777_v38, %v23574_v24 }
 0xb8e   : > { %v23578_v13 = vand.u32 4294901760, %v21781_v48  ;;  %v8502_v54 = vsub.f32 %v21779_v39, %v23577_v51  ;;  %v23582_v22 = vand.u32 4294901760, %v21784_v31  ;;  %v23585_v61 = vand.u32 4294901760, %v21786_v10 }
 0xb8f   : > { %v23588_v55 = vand.u32 4294901760, %v21788_v60  ;;  %v21889_v1 = vpack.c.bf16 %v8491_v23, %v8479_v2  ;;  %v8485_v37 = vand.u32 4294901760, %v8484_v11  ;;  %v8497_v4 = vand.u32 4294901760, %v8496_v6 }
 0xb90   : > { %v8514_v24 = vsub.f32 %v21781_v48, %v23578_v13  ;;  %v8503_v46 = vand.u32 4294901760, %v8502_v54  ;;  %v8508_v27 = vsub.f32 %v21784_v31, %v23582_v22  ;;  %v8520_v51 = vsub.f32 %v21786_v10, %v23585_v61 }
 0xb91   : > { %v8526_v2 = vsub.f32 %v21788_v60, %v23588_v55  ;;  %v21903_v23 = vpack.c.bf16 %v8497_v4, %v8485_v37  ;;  %v23586_v6 = vand.u32 4294901760, %v21790_v62  ;;  %v23587_v13 = vand.u32 4294901760, %v21793_v34 }
 0xb92   : > { %v8515_v11 = vand.u32 4294901760, %v8514_v24  ;;  %v8509_v54 = vand.u32 4294901760, %v8508_v27  ;;  %v8521_v30 = vand.u32 4294901760, %v8520_v51  ;;  %v23589_v22 = vand.u32 4294901760, %v21795_v8 }
 0xb93   : > { %v8527_v43 = vand.u32 4294901760, %v8526_v2  ;;  %v8538_v61 = vsub.f32 %v21790_v62, %v23586_v6  ;;  %v8532_v4 = vsub.f32 %v21793_v34, %v23587_v13  ;;  %v23592_v24 = vand.u32 4294901760, %v21797_v5 }
 0xb94   : > { %v21908_v56 = vpack.c.bf16 %v8515_v11, %v8503_v46  ;;  %v21917_v37 = vpack.c.bf16 %v8521_v30, %v8509_v54  ;;  %v8544_v27 = vsub.f32 %v21795_v8, %v23589_v22  ;;  %v23597_v51 = vand.u32 4294901760, %v21799_v32 }
 0xb95   : > { %v23598_v46 = vand.u32 4294901760, %v21801_v36  ;;  %v8539_v2 = vand.u32 4294901760, %v8538_v61  ;;  %v8533_v11 = vand.u32 4294901760, %v8532_v4  ;;  %v8550_v6 = vsub.f32 %v21797_v5, %v23592_v24 }
 0xb96   : > { %v23599_v13 = vand.u32 4294901760, %v21803_v15  ;;  %v8545_v55 = vand.u32 4294901760, %v8544_v27  ;;  %v8562_v30 = vsub.f32 %v21799_v32, %v23597_v51  ;;  %v23603_v22 = vand.u32 4294901760, %v21805_v42 }
 0xb97   : > { %v8556_v54 = vsub.f32 %v21801_v36, %v23598_v46  ;;  %v21935_v28 = vpack.c.bf16 %v8539_v2, %v8527_v43  ;;  %v8551_v61 = vand.u32 4294901760, %v8550_v6  ;;  %v23602_v24 = vand.u32 4294901760, %v21807_v35 }
 0xb98   : > { %v8568_v4 = vsub.f32 %v21803_v15, %v23599_v13  ;;  %v21941_v27 = vpack.c.bf16 %v8545_v55, %v8533_v11  ;;  %v8563_v33 = vand.u32 4294901760, %v8562_v30  ;;  %v8574_v51 = vsub.f32 %v21805_v42, %v23603_v22 }
 0xb99   : > { %v8557_v41 = vand.u32 4294901760, %v8556_v54  ;;  %v8586_v43 = vsub.f32 %v21807_v35, %v23602_v24  ;;  %v23604_v6 = vand.u32 4294901760, %v21809_v44  ;;  %v23607_v2 = vand.u32 4294901760, %v21811_v52 }
 0xb9a   : > { %24357 = vst [vmem:[#allocation92_spill] sm:$0xff] %v21941_v27  ;;  %v8569_v46 = vand.u32 4294901760, %v8568_v4  ;;  %v15977_v13 = vpack.c.bf16 %v8563_v33, %v8551_v61  ;;  %v8575_v63 = vand.u32 4294901760, %v8574_v51  ;;  %v23608_v55 = vand.u32 4294901760, %v21817_v29 }
 0xb9b   : > { %v23613_v11 = vand.u32 4294901760, %v21819_v47  ;;  %v8587_v54 = vand.u32 4294901760, %v8586_v43  ;;  %v8580_v4 = vsub.f32 %v21809_v44, %v23604_v6  ;;  %v8592_v24 = vsub.f32 %v21811_v52, %v23607_v2 }
 0xb9c   : > { %v15979_v30 = vpack.c.bf16 %v8569_v46, %v8557_v41  ;;  %v8598_v22 = vsub.f32 %v21817_v29, %v23608_v55  ;;  %v23617_v51 = vand.u32 4294901760, %v21824_v9  ;;  %v23616_v41 = vand.u32 4294901760, %v21826_v25 }
 0xb9d   : > { %v8610_v33 = vsub.f32 %v21819_v47, %v23613_v11  ;;  %v15981_v46 = vpack.c.bf16 %v8587_v54, %v8575_v63  ;;  %v8581_v61 = vand.u32 4294901760, %v8580_v4  ;;  %v8593_v43 = vand.u32 4294901760, %v8592_v24 }
 0xb9e   : > { %v8599_v6 = vand.u32 4294901760, %v8598_v22  ;;  %v8604_v2 = vsub.f32 %v21824_v9, %v23617_v51  ;;  %v8616_v55 = vsub.f32 %v21826_v25, %v23616_v41  ;;  %v15989_v63 = vpack.c.bf16 %v21632_v20, %v21630_v3 }
 0xb9f   : > { %v8611_v0 = vand.u32 4294901760, %v8610_v33  ;;  %v15983_v45 = vpack.c.bf16 %v8593_v43, %v8581_v61  ;;  %v15991_v22 = vpack.c.bf16 %v21638_v26, %v21634_v40  ;;  %v15993_v24 = vpack.c.bf16 %v21645_v21, %v21642_v53 }
 0xba0   : > { %v8605_v11 = vand.u32 4294901760, %v8604_v2  ;;  %v8617_v7 = vand.u32 4294901760, %v8616_v55  ;;  %v15995_v54 = vpack.c.bf16 %v21654_v58, %v21652_v49  ;;  %v15997_v4 = vpack.c.bf16 %v21660_v18, %v21658_v16 }
 0xba1   : > { %v15985_v19 = vpack.c.bf16 %v8611_v0, %v8599_v6  ;;  %v15999_v0 = vpack.c.bf16 %v21777_v38, %v21775_v14  ;;  %v16003_v6 = vpack.c.bf16 %v21786_v10, %v21784_v31  ;;  %v16005_v2 = vpack.c.bf16 %v21790_v62, %v21788_v60 }
 0xba2   : > { %v15987_v27 = vpack.c.bf16 %v8617_v7, %v8605_v11  ;;  %v16001_v7 = vpack.c.bf16 %v21781_v48, %v21779_v39  ;;  %v16007_v55 = vpack.c.bf16 %v21795_v8, %v21793_v34  ;;  %v16009_v11 = vpack.c.bf16 %v21799_v32, %v21797_v5 }
 0xba3   : > { %v16011_v33 = vpack.c.bf16 %v21803_v15, %v21801_v36  ;;  %v16013_v61 = vpack.c.bf16 %v21807_v35, %v21805_v42  ;;  %v16015_v43 = vpack.c.bf16 %v21811_v52, %v21809_v44  ;;  %v16017_v41 = vpack.c.bf16 %v21819_v47, %v21817_v29 }
 0xba4   : > { %v16019_v51 = vpack.c.bf16 %v21826_v25, %v21824_v9 }
 0xc3d   : > { %v8270_v62 = vpop.f32.mrb[24].mxu0 }
 0xc3e   : > { %v16507_v8 = vadd.f32 %v8270_v62, %v21748_v59  ;;  %v14340_v34 = vpop.f32.mrb[25].mxu0  ;;  %v24358_v59 = vld [vmem:[#allocation92_spill] sm:$0xff]  ;;  %v24361_v62 = vld [vmem:[#allocation66_spill] sm:$0xff] }
 0xc3f   : > { %v24363_v34 = vld [vmem:[#allocation69_spill] sm:$0xff] }
 0xc40   : > { %16839 = vtanh.f32 %v16507_v8  ;;  %v24364_v8 = vld [vmem:[#allocation70_spill] sm:$0xff] }
 0xc4a   : > { %v16840_v32 = vpop.eup %16839 }
 0xc4b   : > { %v22006_v5 = vand.u32 4294901760, %v16840_v32 }
 0xc4d   : > { %v8417_v15 = vsub.f32 %v16840_v32, %v22006_v5  ;;  %v24365_v32 = vld [vmem:[#allocation71_spill] sm:$0xff] }
 0xc4f   : > { %v8418_v35 = vand.u32 4294901760, %v8417_v15 }
 0xc51   : > { %v8419_v42 = vsub.f32 %v8417_v15, %v8418_v35 }
 0xc53   : > { %v8420_v36 = vand.u32 4294901760, %v8419_v42  ;;  %v24367_v42 = vld [vmem:[#allocation75_spill] sm:$0xff] }
 0xc55   : > { %8421 = vmatmul.mubr.f32.vlgmr.msra.gmra.mrb[24].mxu1 %v8420_v36  ;;  %v24366_v36 = vld [vmem:[#allocation73_spill] sm:$0xff] }
 0xc56   : > { %15960 = vmatpush1.bf16.msra.mxu1 %v21864_v57  ;;  %8651 = vmatprep.mubr.f32.mxu1 %v24317_v17  ;;  %v24370_v57 = vld [vmem:[#allocation78_spill] sm:$0xff] }
 0xc57   : > { %15962 = vmatprep.subr.bf16.mxu1 %v21871_v50  ;;  %v24371_v50 = vld [vmem:[#allocation80_spill] sm:$0xff] }
 0xc5a   : > { %15964 = vmatpush1.bf16.msra.mxu1 %v21873_v12  ;;  %v24372_v12 = vld [vmem:[#allocation81_spill] sm:$0xff] }
 0xc5b   : > { %15966 = vmatprep.subr.bf16.mxu1 %v21889_v1  ;;  %v24374_v1 = vand.u32 4294901760, %v21630_v3  ;;  %v24381_v3 = vand.u32 4294901760, %v21652_v49  ;;  %v24387_v49 = vand.u32 4294901760, %v21779_v39 }
 0xc5e   : > { %15968 = vmatpush1.bf16.msra.mxu1 %v21903_v23  ;;  %v24375_v23 = vand.u32 4294901760, %v21632_v20  ;;  %v24382_v20 = vand.u32 4294901760, %v21654_v58  ;;  %v24388_v58 = vand.u32 4294901760, %v21781_v48  ;;  %v24398_v48 = vld [vmem:[#allocation85_spill] sm:$0xff] }
 0xc5f   : > { %15970 = vmatprep.subr.bf16.mxu1 %v21908_v56  ;;  %v24368_v56 = vld [vmem:[#allocation76_spill] sm:$0xff] }
 0xc62   : > { %15972 = vmatpush1.bf16.msra.mxu1 %v21917_v37  ;;  %v16053_v37 = vpack.c.bf16 %v24375_v23, %v24374_v1  ;;  %v24404_v23 = vld [vmem:[#allocation87_spill] sm:$0xff] }
 0xc63   : > { %15974 = vmatprep.subr.bf16.mxu1 %v21935_v28  ;;  %v24362_v28 = vld [vmem:[#allocation67_spill] sm:$0xff] }
 0xc66   : > { %15976 = vmatpush1.bf16.msra.mxu1 %v24358_v59 }
 0xc67   : > { %15978 = vmatprep.subr.bf16.mxu1 %v15977_v13  ;;  %v24373_v13 = vld [vmem:[#allocation90_spill] sm:$0xff] }
 0xc6a   : > { %15980 = vmatpush1.bf16.msra.mxu1 %v15979_v30  ;;  %v24377_v30 = vand.u32 4294901760, %v21634_v40  ;;  %v24383_v40 = vand.u32 4294901760, %v21658_v16  ;;  %v24390_v16 = vand.u32 4294901760, %v21786_v10  ;;  %v24402_v10 = vld [vmem:[#allocation86_spill] sm:$0xff] }
 0xc6b   : > { %15982 = vmatprep.subr.bf16.mxu1 %v15981_v46  ;;  %v24379_v46 = vand.u32 4294901760, %v21642_v53  ;;  %v24385_v53 = vand.u32 4294901760, %v21775_v14  ;;  %v24403_v1 = vand.u32 4294901760, %v24402_v10 }
 0xc6e   : > { %15984 = vmatpush1.bf16.msra.mxu1 %v15983_v45  ;;  %v24359_v45 = vld [vmem:[#allocation106_spill] sm:$0xff] }
 0xc6f   : > { %15986 = vmatprep.subr.bf16.mxu1 %v15985_v19  ;;  %v24360_v19 = vld [vmem:[#allocation107_spill] sm:$0xff] }
 0xc72   : > { %15988 = vmatpush1.bf16.msra.mxu1 %v15987_v27  ;;  %v24376_v27 = vld [vmem:[#allocation91_spill] sm:$0xff] }
 0xc73   : > { %15990 = vmatprep.subr.bf16.mxu1 %v15989_v63  ;;  %v24380_v63 = vand.u32 4294901760, %v21645_v21  ;;  %v24386_v21 = vand.u32 4294901760, %v21777_v38  ;;  %v24394_v38 = vld [vmem:[#allocation83_spill] sm:$0xff] }
 0xc75   : > { %8653 = vmatmul.mubr.f32.vlgmr.msra.gmra.mrb[24].mxu1 %v22006_v5 }
 0xc76   : > { %15992 = vmatpush1.bf16.msra.mxu1 %v15991_v22  ;;  %8787 = vmatprep.mubr.f32.mxu1 %v24317_v17  ;;  %v16057_v22 = vpack.c.bf16 %v24380_v63, %v24379_v46 }
 0xc77   : > { %15994 = vmatprep.subr.bf16.mxu1 %v15993_v24  ;;  %v16059_v24 = vpack.c.bf16 %v24382_v20, %v24381_v3  ;;  %v24411_v3 = vand.u32 4294901760, %v21811_v52  ;;  %v24417_v52 = vld [vmem:[#allocation111_spill] sm:$0xff] }
 0xc7a   : > { %15996 = vmatpush1.bf16.msra.mxu1 %v15995_v54 }
 0xc7b   : > { %15998 = vmatprep.subr.bf16.mxu1 %v15997_v4  ;;  %v16065_v4 = vpack.c.bf16 %v24388_v58, %v24387_v49 }
 0xc7e   : > { %16000 = vmatpush1.bf16.msra.mxu1 %v15999_v0  ;;  %v24389_v0 = vand.u32 4294901760, %v21784_v31 }
 0xc7f   : > { %16002 = vmatprep.subr.bf16.mxu1 %v16001_v7 }
 0xc80   : > { %v16067_v7 = vpack.c.bf16 %v24390_v16, %v24389_v0  ;;  %v16847_v16 = vld [vmem:[#allocation3] sm:$0xff] }
 0xc82   : > { %16004 = vmatpush1.bf16.msra.mxu1 %v16003_v6  ;;  %v24392_v6 = vld [vmem:[#allocation82_spill] sm:$0xff] }
 0xc83   : > { %16006 = vmatprep.subr.bf16.mxu1 %v16005_v2  ;;  %v24393_v14 = vand.u32 4294901760, %v24392_v6 }
 0xc86   : > { %16008 = vmatpush1.bf16.msra.mxu1 %v16007_v55  ;;  %v24395_v55 = vand.u32 4294901760, %v24394_v38 }
 0xc87   : > { %16010 = vmatprep.subr.bf16.mxu1 %v16009_v11  ;;  %v24396_v11 = vld [vmem:[#allocation84_spill] sm:$0xff] }
 0xc88   : > { %v24397_v39 = vand.u32 4294901760, %v24396_v11 }
 0xc8a   : > { %16012 = vmatpush1.bf16.msra.mxu1 %v16011_v33  ;;  %v16071_v33 = vpack.c.bf16 %v24397_v39, %v24395_v55 }
 0xc8b   : > { %16014 = vmatprep.subr.bf16.mxu1 %v16013_v61  ;;  %v24399_v61 = vand.u32 4294901760, %v24398_v48 }
 0xc8e   : > { %16016 = vmatpush1.bf16.msra.mxu1 %v16015_v43  ;;  %v24400_v43 = vld [vmem:[#allocation52_spill] sm:$0xff] }
 0xc8f   : > { %16018 = vmatprep.subr.bf16.mxu1 %v16017_v41  ;;  %v24401_v31 = vand.u32 4294901760, %v24400_v43 }
 0xc91   : > { %v16073_v59 = vpack.c.bf16 %v24401_v31, %v24399_v61 }
 0xc92   : > { %16020 = vmatpush1.bf16.msra.mxu1 %v16019_v51  ;;  %v24378_v51 = vand.u32 4294901760, %v21638_v26  ;;  %v24384_v26 = vand.u32 4294901760, %v21660_v18  ;;  %v24391_v18 = vand.u32 4294901760, %v21788_v60  ;;  %v24405_v60 = vand.u32 4294901760, %v24404_v23 }
 0xc93   : > { %16022 = vmatprep.subr.bf16.mxu1 %v24359_v45 }
 0xc94   : > { %v16055_v41 = vpack.c.bf16 %v24378_v51, %v24377_v30  ;;  %v16061_v54 = vpack.c.bf16 %v24384_v26, %v24383_v40  ;;  %v16069_v2 = vpack.c.bf16 %v24393_v14, %v24391_v18  ;;  %v24406_v30 = vld [vmem:[#allocation88_spill] sm:$0xff]  ;;  %v24413_v40 = vand.u32 4294901760, %v21819_v47 }
 0xc95   : > { %8790 = vmatmul.mubr.f32.vlgmr.msra.gmra.mrb[24].mxu1 %v8417_v15  ;;  %v24369_v15 = vld [vmem:[#allocation77_spill] sm:$0xff]  ;;  %v24407_v51 = vand.u32 4294901760, %v24406_v30 }
 0xc96   : > { %16024 = vmatpush1.bf16.msra.mxu1 %v24360_v19  ;;  %8892 = vmatprep.mubr.f32.mxu1 %v24317_v17 }
 0xc97   : > { %16026 = vmatprep.subr.bf16.mxu1 %v24361_v62 }
 0xc9a   : > { %16028 = vmatpush1.bf16.msra.mxu1 %v24362_v28 }
 0xc9b   : > { %16030 = vmatprep.subr.bf16.mxu1 %v24363_v34 }
 0xc9e   : > { %16032 = vmatpush1.bf16.msra.mxu1 %v24364_v8 }
 0xc9f   : > { %16034 = vmatprep.subr.bf16.mxu1 %v24365_v32 }
 0xca2   : > { %16036 = vmatpush1.bf16.msra.mxu1 %v24366_v36 }
 0xca3   : > { %16038 = vmatprep.subr.bf16.mxu1 %v24367_v42 }
 0xca6   : > { %16040 = vmatpush1.bf16.msra.mxu1 %v24368_v56 }
 0xca7   : > { %16042 = vmatprep.subr.bf16.mxu1 %v24369_v15 }
 0xcaa   : > { %16044 = vmatpush1.bf16.msra.mxu1 %v24370_v57 }
 0xcab   : > { %16046 = vmatprep.subr.bf16.mxu1 %v24371_v50 }
 0xcae   : > { %16048 = vmatpush1.bf16.msra.mxu1 %v24372_v12 }
 0xcaf   : > { %16050 = vmatprep.subr.bf16.mxu1 %v24373_v13 }
 0xcb2   : > { %16052 = vmatpush1.bf16.msra.mxu1 %v24376_v27 }
 0xcb3   : > { %16054 = vmatprep.subr.bf16.mxu1 %v16053_v37  ;;  %v16075_v37 = vpack.c.bf16 %v24405_v60, %v24403_v1 }
 0xcb5   : > { %8896 = vmatmul.mubr.f32.vlgmr.msra.gmra.mrb[24].mxu1 %v8418_v35  ;;  %v16063_v35 = vpack.c.bf16 %v24386_v21, %v24385_v53  ;;  %v24415_v53 = vand.u32 4294901760, %v21826_v25 }
 0xcb6   : > { %16056 = vmatpush1.bf16.msra.mxu1 %v16055_v41  ;;  %9062 = vmatprep.mubr.f32.mxu1 %v24317_v17  ;;  %v24408_v41 = vld [vmem:[#allocation89_spill] sm:$0xff] }
 0xcb7   : > { %16058 = vmatprep.subr.bf16.mxu1 %v16057_v22  ;;  %v24409_v46 = vand.u32 4294901760, %v24408_v41  ;;  %v24410_v22 = vand.u32 4294901760, %v21809_v44  ;;  %v11302_v44 = vld [vmem:[%s24416_s4] ss:$0 sm:$0xff] }
 0xcb9   : > { %v16077_v63 = vpack.c.bf16 %v24409_v46, %v24407_v51  ;;  %v16079_v20 = vpack.c.bf16 %v24411_v3, %v24410_v22 }
 0xcba   : > { %16060 = vmatpush1.bf16.msra.mxu1 %v16059_v24  ;;  %v24412_v24 = vand.u32 4294901760, %v21817_v29  ;;  %v16504_v29 = vadd.f32 %v11302_v44, %v24417_v52 }
 0xcbb   : > { %16062 = vmatprep.subr.bf16.mxu1 %v16061_v54  ;;  %v24414_v54 = vand.u32 4294901760, %v21824_v9 }
 0xcbc   : > { %v16081_v26 = vpack.c.bf16 %v24413_v40, %v24412_v24  ;;  %v11303_v47 = vmul.f32 -1.442695, %v16504_v29 }
 0xcbd   : > { %v16083_v21 = vpack.c.bf16 %v24415_v53, %v24414_v54 }
 0xcbe   : > { %16064 = vmatpush1.bf16.msra.mxu1 %v16063_v35  ;;  %16841 = vpow2.f32 %v11303_v47  ;;  %v24421_v35 = vld [vmem:[#allocation54_spill] sm:$0xff] }
 0xcbf   : > { %16066 = vmatprep.subr.bf16.mxu1 %v16065_v4 }
 0xcc2   : > { %16068 = vmatpush1.bf16.msra.mxu1 %v16067_v7 }
 0xcc3   : > { %16070 = vmatprep.subr.bf16.mxu1 %v16069_v2 }
 0xcc6   : > { %16072 = vmatpush1.bf16.msra.mxu1 %v16071_v33 }
 0xcc7   : > { %16074 = vmatprep.subr.bf16.mxu1 %v16073_v59 }
 0xcc8   : > { %v16842_v9 = vpop.eup %16841 }
 0xcc9   : > { %v4482_v25 = vadd.f32 1.0, %v16842_v9 }
 0xcca   : > { %16076 = vmatpush1.bf16.msra.mxu1 %v16075_v37 }
 0xccb   : > { %16078 = vmatprep.subr.bf16.mxu1 %v16077_v63  ;;  %16843 = vrcp.f32 %v4482_v25 }
 0xcce   : > { %16080 = vmatpush1.bf16.msra.mxu1 %v16079_v20 }
 0xccf   : > { %16082 = vmatprep.subr.bf16.mxu1 %v16081_v26 }
 0xcd2   : > { %16084 = vmatpush1.bf16.msra.mxu1 %v16083_v21 }
 0xcd3   : > { %16086 = vmatprep.subr.bf16.mxu1 %v24359_v45  ;;  %v24418_v45 = vlaneseq }
 0xcd5   : > { %9064 = vmatmul.mubr.f32.vlgmr.msra.gmra.mrb[24].mxu1 %v22006_v5 }
 0xcd6   : > { %16088 = vmatpush1.bf16.msra.mxu1 %v24360_v19  ;;  %9166 = vmatprep.mubr.f32.mxu1 %v24317_v17  ;;  %v22127_v19 = vshrl.u32 %v24418_v45, 7 }
 0xcd7   : > { %16090 = vmatprep.subr.bf16.mxu1 %v24361_v62 }
 0xcd8   : > { %24419 = vst [vmem:[#allocation93_spill] sm:$0xff] %v22127_v19  ;;  %v23628_v62 = vsub.s32 0, %v22127_v19 }
 0xcda   : > { %16092 = vmatpush1.bf16.msra.mxu1 %v24362_v28  ;;  %v9189_v28 = vpop.xlane.xlu0 %9188 }
 0xcdb   : > { %16094 = vmatprep.subr.bf16.mxu1 %v24363_v34  ;;  %v23627_v34 = vsub.s32 1, %v22127_v19  ;;  %vm9190_vm4 = vcmp.gt.f32.partialorder %v9189_v28, 0.0 }
 0xcde   : > { %16096 = vmatpush1.bf16.msra.mxu1 %v24364_v8 }
 0xcdf   : > { %16098 = vmatprep.subr.bf16.mxu1 %v24365_v32  ;;  %v16844_v32 = vpop.eup %16843 }
 0xce0   : > { %v9177_v49 = vmul.f32 %v16844_v32, %v24421_v35  ;;  %v9180_v7 = vmul.f32 %v16847_v16, %v16844_v32 }
 0xce2   : > { %16100 = vmatpush1.bf16.msra.mxu1 %v24366_v36 }
 0xce3   : > { %16102 = vmatprep.subr.bf16.mxu1 %v24367_v42  ;;  %v11308_v42 = vsel %vm9190_vm4, 1.0, %v24317_v17 }
 0xce6   : > { %16104 = vmatpush1.bf16.msra.mxu1 %v24368_v56 }
 0xce7   : > { %16106 = vmatprep.subr.bf16.mxu1 %v24369_v15 }
 0xcea   : > { %16108 = vmatpush1.bf16.msra.mxu1 %v24370_v57  ;;  %v9175_v57 = vsub.f32 1.0, %v16844_v32 }
 0xceb   : > { %16110 = vmatprep.subr.bf16.mxu1 %v24371_v50 }
 0xcee   : > { %16112 = vmatpush1.bf16.msra.mxu1 %v24372_v12 }
 0xcef   : > { %16114 = vmatprep.subr.bf16.mxu1 %v24373_v13  ;;  %v9194_v13 = vsub.f32 1.0, %v11308_v42 }
 0xcf1   : > { %v9195_v18 = vmul.f32 %v9194_v13, %v24421_v35  ;;  %v9198_v14 = vmul.f32 %v16847_v16, %v9194_v13 }
 0xcf2   : > { %16116 = vmatpush1.bf16.msra.mxu1 %v24376_v27 }
 0xcf5   : > { %9168 = vmatmul.mubr.f32.vlgmr.msra.gmra.mrb[24].mxu1 %v22006_v5  ;;  %v8307_v5 = vld [vmem:[%s24420_s29] sm:$0x3] }
 0xcf6   : > { %v8312_v8 = vrot.slane %v8307_v5, %v23628_v62  ;;  %v8316_v36 = vrot.slane %v8307_v5, %v23627_v34 }
 0xdc8   : > { %v9169_v56 = vpop.f32.mrb[24].mxu1 }
 0xdc9   : > { %v16508_v15 = vadd.f32 %v9169_v56, %v8312_v8  ;;  %v9171_v50 = vpop.f32.mrb[25].mxu1 }
 0xdca   : > { %v16509_v12 = vadd.f32 %v9171_v50, %v8316_v36 }
 0xdcb   : > { %v9176_v27 = vmul.f32 %v16508_v15, %v9175_v57 }
 0xdcc   : > { %v9174_v58 = vand.u32 2147483647, %v16509_v12 }
 0xdcd   : > { %v9178_v4 = vadd.f32 %v9177_v49, %v9176_v27 }
 0xdce   : > { %v9179_v0 = vmul.f32 %v9175_v57, %v9174_v58 }
 0xdcf   : > { %v9193_v6 = vmul.f32 %v11308_v42, %v9178_v4 }
 0xdd0   : > { %v9181_v2 = vadd.f32 %v9180_v7, %v9179_v0 }
 0xdd1   : > { %v22141_v17 = vadd.f32 %v9195_v18, %v9193_v6 }
 0xdd2   : > { %v9197_v38 = vmul.f32 %v11308_v42, %v9181_v2  ;;  %9206 = sbr.rel (%p11309_p0) target bundleno = 4358 (0x1106), region = 164 }
 0xdd3   : > { %9201 = vst [vmem:[#allocation2] sm:$0xff] %v22141_v17 }
 0xdd4   : > { %v9199_v55 = vadd.f32 %v9198_v14, %v9197_v38 }
 0xdd6   : > { %v9200_v11 = vand.u32 2147483647, %v9199_v55 }
 0xdd8   : > { %9202 = vst [vmem:[#allocation3] sm:$0xff] %v9200_v11 }
 0xdd9   : > { %v9223_v39 = vld [vmem:[#allocation21 + $0x80] sm:$0xff]  ;;  %v9224_v33 = vld [vmem:[#allocation21 + $0x88] sm:$0xff]  ;;  %v9225_v10 = vld [vmem:[#allocation21 + $0x90] sm:$0xff]  ;;  %v22147_v20 = vand.u32 4294901760, %v9200_v11  ;;  %v22156_v25 = vand.u32 4294901760, %v22141_v17  ;;  %s24508_s9 = sld [smem:[#allocation167_spill]] }
 0xdda   : > { %v9207_v48 = vld [vmem:[#allocation21] sm:$0xff]  ;;  %v9295_v61 = vand.u32 4294901760, %v9223_v39  ;;  %v9298_v43 = vand.u32 4294901760, %v9224_v33  ;;  %v9208_v31 = vld [vmem:[#allocation21 + $0x8] sm:$0xff]  ;;  %v9226_v1 = vld [vmem:[#allocation21 + $0x98] sm:$0xff]  ;;  %v9301_v60 = vand.u32 4294901760, %v9225_v10 }
 0xddb   : > { %v9247_v59 = vand.u32 4294901760, %v9207_v48  ;;  %v9250_v23 = vand.u32 4294901760, %v9208_v31  ;;  %v9304_v37 = vand.u32 4294901760, %v9226_v1  ;;  %v9209_v30 = vld [vmem:[#allocation21 + $0x10] sm:$0xff]  ;;  %v9210_v51 = vld [vmem:[#allocation21 + $0x18] sm:$0xff]  ;;  %v9227_v41 = vld [vmem:[#allocation21 + $0xa0] sm:$0xff]  ;;  %v22164_v32 = vsub.f32 %v9200_v11, %v22147_v20 }
 0xddc   : > { %v22145_v46 = vpack.c.bf16 %v9298_v43, %v9295_v61  ;;  %v9228_v63 = vld [vmem:[#allocation21 + $0xa8] sm:$0xff]  ;;  %v9211_v22 = vld [vmem:[#allocation21 + $0x20] sm:$0xff]  ;;  %24423 = vst [vmem:[#allocation118_spill] sm:$0xff] %v22147_v20  ;;  %v9229_v26 = vld [vmem:[#allocation21 + $0xb0] sm:$0xff]  ;;  %v9253_v54 = vand.u32 4294901760, %v9209_v30  ;;  %v9256_v53 = vand.u32 4294901760, %v9210_v51  ;;  %v22158_v45 = vsub.f32 %v9223_v39, %v9295_v61 }
 0xddd   : > { %v9212_v3 = vld [vmem:[#allocation21 + $0x28] sm:$0xff]  ;;  %v22149_v24 = vpack.c.bf16 %v9250_v23, %v9247_v59  ;;  %v22151_v40 = vpack.c.bf16 %v9304_v37, %v9301_v60  ;;  %v9307_v21 = vand.u32 4294901760, %v9227_v41  ;;  %v9310_v44 = vand.u32 4294901760, %v9228_v63  ;;  %v9230_v47 = vld [vmem:[#allocation21 + $0xb8] sm:$0xff]  ;;  %v9213_v9 = vld [vmem:[#allocation21 + $0x30] sm:$0xff]  ;;  %24427 = vst [vmem:[#allocation122_spill] sm:$0xff] %v22164_v32 }
 0xdde   : > { %24422 = vst [vmem:[#allocation117_spill] sm:$0xff] %v22145_v46  ;;  %16118 = vmatprep.subr.bf16.mxu1 %v22145_v46  ;;  %v9259_v52 = vand.u32 4294901760, %v9211_v22  ;;  %v9262_v29 = vand.u32 4294901760, %v9212_v3  ;;  %v22161_v28 = vpack.c.bf16 %v9256_v53, %v9253_v54  ;;  %v9313_v5 = vand.u32 4294901760, %v9229_v26  ;;  %v9214_v8 = vld [vmem:[#allocation21 + $0x38] sm:$0xff]  ;;  %v9231_v57 = vld [vmem:[#allocation21 + $0xc0] sm:$0xff] }
 0xddf   : > { %24424 = vst [vmem:[#allocation119_spill] sm:$0xff] %v22149_v24  ;;  %24425 = vst [vmem:[#allocation120_spill] sm:$0xff] %v22151_v40  ;;  %16120 = vmatpush3.bf16.msra.mxu1 %v22149_v24  ;;  %v22166_v36 = vsub.f32 %v9224_v33, %v9298_v43  ;;  %v22168_v42 = vsub.f32 %v9207_v48, %v9247_v59  ;;  %v22170_v56 = vsub.f32 %v9208_v31, %v9250_v23  ;;  %v9232_v50 = vld [vmem:[#allocation21 + $0xc8] sm:$0xff]  ;;  %v9215_v49 = vld [vmem:[#allocation21 + $0x40] sm:$0xff]  ;;  %s24603_s30 = sld [smem:[#allocation168_spill]] }
 0xde0   : > { %16122 = vmatprep.subr.bf16.mxu1 %v22151_v40  ;;  %24426 = vst [vmem:[#allocation121_spill] sm:$0xff] %v22161_v28  ;;  %v22172_v15 = vpack.c.bf16 %v9310_v44, %v9307_v21  ;;  %v22174_v12 = vsub.f32 %v9225_v10, %v9301_v60  ;;  %v22176_v13 = vsub.f32 %v9226_v1, %v9304_v37  ;;  %v9316_v27 = vand.u32 4294901760, %v9230_v47  ;;  %v9216_v58 = vld [vmem:[#allocation21 + $0x48] sm:$0xff]  ;;  %v9233_v18 = vld [vmem:[#allocation21 + $0xd0] sm:$0xff]  ;;  %v9234_v55 = vld [vmem:[#allocation21 + $0xd8] sm:$0xff] }
 0xde1   : > { %v9265_v35 = vand.u32 4294901760, %v9213_v9  ;;  %v22179_v4 = vsub.f32 %v9209_v30, %v9253_v54  ;;  %v22181_v0 = vsub.f32 %v9210_v51, %v9256_v53  ;;  %v22183_v16 = vpack.c.bf16 %v9262_v29, %v9259_v52  ;;  %v9217_v11 = vld [vmem:[#allocation21 + $0x50] sm:$0xff]  ;;  %v9218_v39 = vld [vmem:[#allocation21 + $0x58] sm:$0xff]  ;;  %v9235_v31 = vld [vmem:[#allocation21 + $0xe0] sm:$0xff] }
 0xde2   : > { %24428 = vst [vmem:[#allocation123_spill] sm:$0xff] %v22172_v15  ;;  %v9268_v7 = vand.u32 4294901760, %v9214_v8  ;;  %v22186_v6 = vsub.f32 %v9227_v41, %v9307_v21  ;;  %v22188_v14 = vpack.c.bf16 %v9316_v27, %v9313_v5  ;;  %v9319_v2 = vand.u32 4294901760, %v9231_v57  ;;  %v9236_v59 = vld [vmem:[#allocation21 + $0xe8] sm:$0xff] }
 0xde3   : > { %16124 = vmatpush3.bf16.msra.mxu1 %v22161_v28  ;;  %24429 = vst [vmem:[#allocation124_spill] sm:$0xff] %v22183_v16  ;;  %v9322_v38 = vand.u32 4294901760, %v9232_v50  ;;  %v22190_v33 = vsub.f32 %v9228_v63, %v9310_v44  ;;  %v22192_v48 = vsub.f32 %v9211_v22, %v9259_v52  ;;  %v9271_v61 = vand.u32 4294901760, %v9215_v49  ;;  %v9219_v63 = vld [vmem:[#allocation21 + $0x60] sm:$0xff]  ;;  %v9220_v22 = vld [vmem:[#allocation21 + $0x68] sm:$0xff] }
 0xde4   : > { %16126 = vmatprep.subr.bf16.mxu1 %v22172_v15  ;;  %24430 = vst [vmem:[#allocation125_spill] sm:$0xff] %v22188_v14  ;;  %v9274_v43 = vand.u32 4294901760, %v9216_v58  ;;  %v22194_v10 = vsub.f32 %v9212_v3, %v9262_v29  ;;  %v22196_v1 = vsub.f32 %v9229_v26, %v9313_v5  ;;  %v22198_v23 = vsub.f32 %v9230_v47, %v9316_v27 }
 0xde5   : > { %v22200_v60 = vpack.c.bf16 %v9268_v7, %v9265_v35  ;;  %v9325_v37 = vand.u32 4294901760, %v9233_v18  ;;  %v9328_v30 = vand.u32 4294901760, %v9234_v55  ;;  %v9277_v51 = vand.u32 4294901760, %v9217_v11 }
 0xde6   : > { %v9280_v41 = vand.u32 4294901760, %v9218_v39  ;;  %v22204_v54 = vsub.f32 %v9213_v9, %v9265_v35  ;;  %v22206_v3 = vpack.c.bf16 %v9322_v38, %v9319_v2  ;;  %v9331_v26 = vand.u32 4294901760, %v9235_v31 }
 0xde7   : > { %24431 = vst [vmem:[#allocation126_spill] sm:$0xff] %v22200_v60  ;;  %16128 = vmatpush3.bf16.msra.mxu1 %v22183_v16  ;;  %v9334_v53 = vand.u32 4294901760, %v9236_v59  ;;  %v22208_v21 = vsub.f32 %v9214_v8, %v9268_v7  ;;  %v22210_v44 = vsub.f32 %v9231_v57, %v9319_v2  ;;  %v22212_v52 = vsub.f32 %v9232_v50, %v9322_v38  ;;  %v22229_v50 = vld [vmem:[#allocation21 + $0xf0] sm:$0xff]  ;;  %v22231_v7 = vld [vmem:[#allocation21 + $0xf8] sm:$0xff] }
 0xde8   : > { %16130 = vmatprep.subr.bf16.mxu1 %v22188_v14  ;;  %24432 = vst [vmem:[#allocation127_spill] sm:$0xff] %v22206_v3  ;;  %v22214_v29 = vpack.c.bf16 %v9274_v43, %v9271_v61  ;;  %v22216_v47 = vsub.f32 %v9215_v49, %v9271_v61  ;;  %v22218_v5 = vsub.f32 %v9216_v58, %v9274_v43  ;;  %v9283_v27 = vand.u32 4294901760, %v9219_v63 }
 0xde9   : > { %v9286_v34 = vand.u32 4294901760, %v9220_v22  ;;  %v22221_v9 = vpack.c.bf16 %v9328_v30, %v9325_v37  ;;  %v22223_v35 = vsub.f32 %v9233_v18, %v9325_v37  ;;  %v22225_v8 = vsub.f32 %v9234_v55, %v9328_v30  ;;  %v22242_v18 = vld [vmem:[#allocation21 + $0x70] sm:$0xff]  ;;  %v22244_v55 = vld [vmem:[#allocation21 + $0x78] sm:$0xff] }
 0xdea   : > { %24433 = vst [vmem:[#allocation128_spill] sm:$0xff] %v22214_v29  ;;  %v22227_v57 = vpack.c.bf16 %v9280_v41, %v9277_v51  ;;  %v22234_v49 = vsub.f32 %v9217_v11, %v9277_v51  ;;  %v22236_v58 = vsub.f32 %v9218_v39, %v9280_v41  ;;  %v22238_v2 = vpack.c.bf16 %v9334_v53, %v9331_v26 }
 0xdeb   : > { %16132 = vmatpush3.bf16.msra.mxu1 %v22200_v60  ;;  %24434 = vst [vmem:[#allocation129_spill] sm:$0xff] %v22221_v9  ;;  %v22240_v38 = vsub.f32 %v9235_v31, %v9331_v26  ;;  %v23631_v61 = vand.u32 4294901760, %v22164_v32  ;;  %v22249_v43 = vsub.f32 %v22141_v17, %v22156_v25  ;;  %v23636_v37 = vand.u32 4294901760, %v22158_v45 }
 0xdec   : > { %24435 = vst [vmem:[#allocation130_spill] sm:$0xff] %v22227_v57  ;;  %16134 = vmatprep.subr.bf16.mxu1 %v22206_v3  ;;  %24436 = vst [vmem:[#allocation131_spill] sm:$0xff] %v22238_v2  ;;  %v23637_v11 = vand.u32 4294901760, %v22166_v36  ;;  %v22253_v39 = vsub.f32 %v9236_v59, %v9334_v53  ;;  %v22255_v30 = vpack.c.bf16 %v9286_v34, %v9283_v27  ;;  %v9337_v31 = vand.u32 4294901760, %v22229_v50 }
 0xded   : > { %24437 = vst [vmem:[#allocation132_spill] sm:$0xff] %v22240_v38  ;;  %24438 = vst [vmem:[#allocation133_spill] sm:$0xff] %v22249_v43  ;;  %v9345_v17 = vsub.f32 %v22164_v32, %v23631_v61  ;;  %v9474_v59 = vsub.f32 %v22158_v45, %v23636_v37  ;;  %v23643_v41 = vand.u32 4294901760, %v22168_v42  ;;  %v23641_v26 = vand.u32 4294901760, %v22170_v56 }
 0xdee   : > { %24439 = vst [vmem:[#allocation134_spill] sm:$0xff] %v22253_v39  ;;  %24440 = vst [vmem:[#allocation135_spill] sm:$0xff] %v22255_v30  ;;  %v9481_v53 = vsub.f32 %v22166_v36, %v23637_v11  ;;  %v22275_v51 = vsub.f32 %v9219_v63, %v9283_v27  ;;  %v23640_v61 = vand.u32 4294901760, %v22174_v12  ;;  %v23642_v62 = vand.u32 4294901760, %v22176_v13 }
 0xdef   : > { %16136 = vmatpush3.bf16.msra.mxu1 %v22214_v29  ;;  %v9346_v19 = vand.u32 4294901760, %v9345_v17  ;;  %v9362_v37 = vsub.f32 %v22168_v42, %v23643_v41  ;;  %v9369_v11 = vsub.f32 %v22170_v56, %v23641_v26  ;;  %v22286_v3 = vsub.f32 %v9220_v22, %v9286_v34 }
 0xdf0   : > { %16138 = vmatprep.subr.bf16.mxu1 %v22221_v9  ;;  %24441 = vst [vmem:[#allocation136_spill] sm:$0xff] %v22275_v51  ;;  %v9475_v9 = vand.u32 4294901760, %v9474_v59  ;;  %v9482_v29 = vand.u32 4294901760, %v9481_v53  ;;  %v9488_v63 = vsub.f32 %v22174_v12, %v23640_v61  ;;  %v9495_v27 = vsub.f32 %v22176_v13, %v23642_v62 }
 0xdf1   : > { %24442 = vst [vmem:[#allocation137_spill] sm:$0xff] %v22286_v3  ;;  %9347 = vmatprep.mubr.f32.mxu1 %v9346_v19  ;;  %v24443_v59 = vand.u32 4294901760, %v22231_v7  ;;  %v24445_v34 = vand.u32 4294901760, %v22242_v18  ;;  %v24446_v19 = vand.u32 4294901760, %v22244_v55  ;;  %v24448_v61 = vand.u32 4294901760, %v22249_v43 }
 0xdf2   : > { %v23652_v62 = vand.u32 4294901760, %v22181_v0  ;;  %v16149_v41 = vpack.c.bf16 %v9482_v29, %v9475_v9  ;;  %v9363_v17 = vand.u32 4294901760, %v9362_v37  ;;  %v9370_v60 = vand.u32 4294901760, %v9369_v11 }
 0xdf3   : > { %16140 = vmatpush3.bf16.msra.mxu1 %v22227_v57  ;;  %v22298_v53 = vpack.c.bf16 %v24443_v59, %v9337_v31  ;;  %v22304_v22 = vpack.c.bf16 %v24446_v19, %v24445_v34  ;;  %v9351_v26 = vsub.f32 %v22249_v43, %v24448_v61  ;;  %v23655_v59 = vand.u32 4294901760, %v22186_v6 }
 0xdf4   : > { %16142 = vmatprep.subr.bf16.mxu1 %v22238_v2  ;;  %v24449_v2 = vand.u32 4294901760, %v22179_v4  ;;  %v9383_v34 = vsub.f32 %v22181_v0, %v23652_v62  ;;  %v23660_v19 = vand.u32 4294901760, %v22190_v33  ;;  %v9489_v61 = vand.u32 4294901760, %v9488_v63 }
 0xdf5   : > { %24444 = vst [vmem:[#allocation138_spill] sm:$0xff] %v22298_v53  ;;  %24447 = vst [vmem:[#allocation139_spill] sm:$0xff] %v22304_v22  ;;  %v9496_v29 = vand.u32 4294901760, %v9495_v27  ;;  %v23661_v37 = vand.u32 4294901760, %v22194_v10  ;;  %v9502_v11 = vsub.f32 %v22186_v6, %v23655_v59  ;;  %v23664_v14 = vand.u32 4294901760, %v22196_v1 }
 0xdf6   : > { %v9376_v57 = vsub.f32 %v22179_v4, %v24449_v2  ;;  %v9384_v2 = vand.u32 4294901760, %v9383_v34  ;;  %v9509_v62 = vsub.f32 %v22190_v33, %v23660_v19  ;;  %v23667_v27 = vand.u32 4294901760, %v22198_v23 }
 0xdf7   : > { %16144 = vmatpush3.bf16.msra.mxu1 %v22255_v30  ;;  %v24450_v30 = vand.u32 4294901760, %v22192_v48  ;;  %v23670_v34 = vand.u32 4294901760, %v22204_v54  ;;  %v22338_v59 = vsub.f32 %v22229_v50, %v9337_v31  ;;  %v16151_v16 = vpack.c.bf16 %v9370_v60, %v9363_v17 }
 0xdf8   : > { %v9377_v9 = vand.u32 4294901760, %v9376_v57  ;;  %16146 = vmatprep.subr.bf16.mxu1 %v22298_v53  ;;  %v9397_v57 = vsub.f32 %v22194_v10, %v23661_v37  ;;  %v9352_v53 = vand.u32 4294901760, %v9351_v26  ;;  %v9516_v19 = vsub.f32 %v22196_v1, %v23664_v14 }
 0xdf9   : > { %v9390_v63 = vsub.f32 %v22192_v48, %v24450_v30  ;;  %v16153_v30 = vpack.c.bf16 %v9496_v29, %v9489_v61  ;;  %v9523_v37 = vsub.f32 %v22198_v23, %v23667_v27  ;;  %v9404_v15 = vsub.f32 %v22204_v54, %v23670_v34 }
 0xdfa   : > { %v23673_v50 = vand.u32 4294901760, %v22208_v21  ;;  %v9503_v31 = vand.u32 4294901760, %v9502_v11  ;;  %v9510_v60 = vand.u32 4294901760, %v9509_v62  ;;  %v23672_v26 = vand.u32 4294901760, %v22210_v44 }
 0xdfb   : > { %16148 = vmatpush3.bf16.msra.mxu1 %v22304_v22  ;;  %v23671_v17 = vand.u32 4294901760, %v22212_v52  ;;  %v16155_v14 = vpack.c.bf16 %v9384_v2, %v9377_v9  ;;  %v9391_v22 = vand.u32 4294901760, %v9390_v63  ;;  %v9398_v61 = vand.u32 4294901760, %v9397_v57 }
 0xdfc   : > { %16150 = vmatprep.subr.bf16.mxu1 %v16149_v41  ;;  %v9411_v29 = vsub.f32 %v22208_v21, %v23673_v50  ;;  %v9517_v27 = vand.u32 4294901760, %v9516_v19  ;;  %v9524_v28 = vand.u32 4294901760, %v9523_v37  ;;  %v23674_v34 = vand.u32 4294901760, %v22216_v47 }
 0xdfd   : > { %v23675_v41 = vand.u32 4294901760, %v22218_v5  ;;  %v9405_v62 = vand.u32 4294901760, %v9404_v15  ;;  %v9530_v9 = vsub.f32 %v22210_v44, %v23672_v26  ;;  %v9537_v2 = vsub.f32 %v22212_v52, %v23671_v17 }
 0xdfe   : > { %9353 = vmatmul.mubr.f32.vlgmr.msra.gmra.mrb[0].mxu1 %v9352_v53  ;;  %v9412_v11 = vand.u32 4294901760, %v9411_v29  ;;  %v24451_v53 = vand.u32 4294901760, %v22231_v7  ;;  %v16157_v37 = vpack.c.bf16 %v9510_v60, %v9503_v31  ;;  %v23678_v15 = vand.u32 4294901760, %v22223_v35 }
 0xdff   : > { %16152 = vmatpush3.bf16.msra.mxu1 %v16151_v16  ;;  %9583 = vmatprep.mubr.f32.mxu1 %v22147_v20  ;;  %v23677_v16 = vand.u32 4294901760, %v22225_v8  ;;  %v24452_v63 = vand.u32 4294901760, %v22242_v18  ;;  %v9418_v29 = vsub.f32 %v22216_v47, %v23674_v34  ;;  %v24453_v31 = vand.u32 4294901760, %v22244_v55 }
 0xe00   : > { %v22368_v19 = vsub.f32 %v22231_v7, %v24451_v53  ;;  %16154 = vmatprep.subr.bf16.mxu1 %v16153_v30  ;;  %v9425_v7 = vsub.f32 %v22218_v5, %v23675_v41  ;;  %v23676_v30 = vand.u32 4294901760, %v22234_v49  ;;  %v16159_v53 = vpack.c.bf16 %v9398_v61, %v9391_v22 }
 0xe01   : > { %v22375_v57 = vsub.f32 %v22242_v18, %v24452_v63  ;;  %v22387_v60 = vsub.f32 %v22244_v55, %v24453_v31  ;;  %v16161_v17 = vpack.c.bf16 %v9524_v28, %v9517_v27  ;;  %v23681_v18 = vand.u32 4294901760, %v22236_v58 }
 0xe02   : > { %v16163_v63 = vpack.c.bf16 %v9412_v11, %v9405_v62  ;;  %v9531_v26 = vand.u32 4294901760, %v9530_v9  ;;  %v9538_v50 = vand.u32 4294901760, %v9537_v2  ;;  %v9557_v34 = vand.u32 4294901760, %v22240_v38 }
 0xe03   : > { %16156 = vmatpush3.bf16.msra.mxu1 %v16155_v14  ;;  %v9544_v41 = vsub.f32 %v22223_v35, %v23678_v15  ;;  %v9551_v55 = vsub.f32 %v22225_v8, %v23677_v16  ;;  %v9564_v22 = vand.u32 4294901760, %v22253_v39  ;;  %v9445_v28 = vand.u32 4294901760, %v22275_v51 }
 0xe04   : > { %16158 = vmatprep.subr.bf16.mxu1 %v16157_v37  ;;  %v9419_v27 = vand.u32 4294901760, %v9418_v29  ;;  %v9426_v14 = vand.u32 4294901760, %v9425_v7  ;;  %v9432_v61 = vsub.f32 %v22234_v49, %v23676_v30  ;;  %v9452_v62 = vand.u32 4294901760, %v22286_v3 }
 0xe05   : > { %v9439_v11 = vsub.f32 %v22236_v58, %v23681_v18  ;;  %v9558_v9 = vsub.f32 %v22240_v38, %v9557_v34  ;;  %v9565_v2 = vsub.f32 %v22253_v39, %v9564_v22  ;;  %v9446_v37 = vsub.f32 %v22275_v51, %v9445_v28 }
 0xe06   : > { %v9453_v29 = vsub.f32 %v22286_v3, %v9452_v62  ;;  %v9571_v7 = vand.u32 4294901760, %v22338_v59  ;;  %v9578_v31 = vand.u32 4294901760, %v22368_v19  ;;  %v9459_v30 = vand.u32 4294901760, %v22375_v57 }
 0xe07   : > { %16160 = vmatpush3.bf16.msra.mxu1 %v16159_v53  ;;  %v16165_v16 = vpack.c.bf16 %v9538_v50, %v9531_v26  ;;  %v9545_v15 = vand.u32 4294901760, %v9544_v41  ;;  %v9552_v20 = vand.u32 4294901760, %v9551_v55  ;;  %v16167_v18 = vpack.c.bf16 %v9426_v14, %v9419_v27 }
 0xe08   : > { %16162 = vmatprep.subr.bf16.mxu1 %v16161_v17  ;;  %v9433_v40 = vand.u32 4294901760, %v9432_v61  ;;  %v9466_v24 = vand.u32 4294901760, %v22387_v60  ;;  %v9440_v43 = vand.u32 4294901760, %v9439_v11  ;;  %v9559_v46 = vand.u32 4294901760, %v9558_v9 }
 0xe09   : > { %v9566_v51 = vand.u32 4294901760, %v9565_v2  ;;  %v9447_v53 = vand.u32 4294901760, %v9446_v37  ;;  %v9454_v3 = vand.u32 4294901760, %v9453_v29  ;;  %v9572_v39 = vsub.f32 %v22338_v59, %v9571_v7 }
 0xe0a   : > { %v9579_v38 = vsub.f32 %v22368_v19, %v9578_v31  ;;  %v9460_v32 = vsub.f32 %v22375_v57, %v9459_v30  ;;  %v16169_v50 = vpack.c.bf16 %v9552_v20, %v9545_v15  ;;  %v9467_v26 = vsub.f32 %v22387_v60, %v9466_v24 }
 0xe0b   : > { %16164 = vmatpush3.bf16.msra.mxu1 %v16163_v63  ;;  %v16171_v17 = vpack.c.bf16 %v9440_v43, %v9433_v40  ;;  %v16173_v41 = vpack.c.bf16 %v9566_v51, %v9559_v46  ;;  %v16175_v55 = vpack.c.bf16 %v9454_v3, %v9447_v53  ;;  %v9573_v27 = vand.u32 4294901760, %v9572_v39 }
 0xe0c   : > { %16166 = vmatprep.subr.bf16.mxu1 %v16165_v16  ;;  %v9580_v14 = vand.u32 4294901760, %v9579_v38  ;;  %v9461_v61 = vand.u32 4294901760, %v9460_v32  ;;  %v9468_v63 = vand.u32 4294901760, %v9467_v26  ;;  %v24454_v11 = vand.u32 4294901760, %v22158_v45 }
 0xe0d   : > { %v24455_v9 = vand.u32 4294901760, %v22166_v36  ;;  %v24456_v16 = vand.u32 4294901760, %v22168_v42  ;;  %v24457_v20 = vand.u32 4294901760, %v22170_v56  ;;  %v24458_v46 = vand.u32 4294901760, %v22174_v12 }
 0xe0e   : > { %v24459_v40 = vand.u32 4294901760, %v22176_v13  ;;  %v24460_v32 = vand.u32 4294901760, %v22179_v4  ;;  %v24461_v38 = vand.u32 4294901760, %v22181_v0  ;;  %v24462_v39 = vand.u32 4294901760, %v22186_v6 }
 0xe0f   : > { %16168 = vmatpush3.bf16.msra.mxu1 %v16167_v18  ;;  %v22422_v2 = vpack.c.bf16 %v24455_v9, %v24454_v11  ;;  %v22428_v15 = vpack.c.bf16 %v24457_v20, %v24456_v16  ;;  %v24463_v51 = vand.u32 4294901760, %v22190_v33  ;;  %v24464_v37 = vand.u32 4294901760, %v22192_v48 }
 0xe10   : > { %16170 = vmatprep.subr.bf16.mxu1 %v16169_v50  ;;  %v22434_v3 = vpack.c.bf16 %v24459_v40, %v24458_v46  ;;  %v22440_v43 = vpack.c.bf16 %v24461_v38, %v24460_v32  ;;  %v24465_v29 = vand.u32 4294901760, %v22194_v10  ;;  %v24466_v50 = vand.u32 4294901760, %v22196_v1 }
 0xe11   : > { %v22446_v18 = vpack.c.bf16 %v24463_v51, %v24462_v39  ;;  %v24467_v26 = vand.u32 4294901760, %v22198_v23  ;;  %v24468_v9 = vand.u32 4294901760, %v22204_v54  ;;  %v24469_v16 = vand.u32 4294901760, %v22208_v21 }
 0xe12   : > { %v22452_v53 = vpack.c.bf16 %v24465_v29, %v24464_v37  ;;  %v24470_v46 = vand.u32 4294901760, %v22210_v44  ;;  %v24471_v40 = vand.u32 4294901760, %v22212_v52  ;;  %v24473_v38 = vand.u32 4294901760, %v22216_v47 }
 0xe13   : > { %v22458_v11 = vpack.c.bf16 %v24467_v26, %v24466_v50  ;;  %v22464_v20 = vpack.c.bf16 %v24469_v16, %v24468_v9  ;;  %v24474_v39 = vand.u32 4294901760, %v22218_v5  ;;  %v24475_v37 = vand.u32 4294901760, %v22223_v35  ;;  %16172 = vmatpush3.bf16.msra.mxu1 %v16171_v17 }
 0xe14   : > { %v22470_v32 = vpack.c.bf16 %v24471_v40, %v24470_v46  ;;  %v24476_v29 = vand.u32 4294901760, %v22225_v8  ;;  %v24477_v26 = vand.u32 4294901760, %v22234_v49  ;;  %v24478_v9 = vand.u32 4294901760, %v22236_v58  ;;  %16174 = vmatprep.subr.bf16.mxu1 %v16173_v41  ;;  %v24501_v41 = vld [vmem:[#allocation139_spill] sm:$0xff] }
 0xe15   : > { %v22476_v51 = vpack.c.bf16 %v24474_v39, %v24473_v38  ;;  %v22490_v46 = vpack.c.bf16 %v9564_v22, %v9557_v34  ;;  %v22492_v40 = vpack.c.bf16 %v9452_v62, %v9445_v28  ;;  %v16177_v38 = vpack.c.bf16 %v9580_v14, %v9573_v27  ;;  %v24496_v22 = vld [vmem:[#allocation129_spill] sm:$0xff]  ;;  %v24497_v28 = vld [vmem:[#allocation130_spill] sm:$0xff]  ;;  %v24498_v62 = vld [vmem:[#allocation131_spill] sm:$0xff] }
 0xe16   : > { %24472 = vst [vmem:[#allocation140_spill] sm:$0xff] %v22470_v32  ;;  %v22482_v50 = vpack.c.bf16 %v24476_v29, %v24475_v37  ;;  %v22488_v16 = vpack.c.bf16 %v24478_v9, %v24477_v26  ;;  %v22494_v32 = vpack.c.bf16 %v9578_v31, %v9571_v7  ;;  %v22496_v39 = vpack.c.bf16 %v9466_v24, %v9459_v30  ;;  %v24479_v30 = vld [vmem:[#allocation122_spill] sm:$0xff]  ;;  %v24499_v7 = vld [vmem:[#allocation135_spill] sm:$0xff] }
 0xe17   : > { %16176 = vmatpush3.bf16.msra.mxu1 %v16175_v55  ;;  %v16179_v37 = vpack.c.bf16 %v9468_v63, %v9461_v61  ;;  %v16181_v17 = vpack.c.bf16 %v22166_v36, %v22158_v45  ;;  %v16183_v29 = vpack.c.bf16 %v22170_v56, %v22168_v42  ;;  %v16185_v34 = vpack.c.bf16 %v22176_v13, %v22174_v12  ;;  %v24500_v31 = vld [vmem:[#allocation138_spill] sm:$0xff] }
 0xe18   : > { %16178 = vmatprep.subr.bf16.mxu1 %v16177_v38  ;;  %v16187_v24 = vpack.c.bf16 %v22181_v0, %v22179_v4  ;;  %v16189_v45 = vpack.c.bf16 %v22190_v33, %v22186_v6  ;;  %v16191_v36 = vpack.c.bf16 %v22194_v10, %v22192_v48  ;;  %v16193_v42 = vpack.c.bf16 %v22198_v23, %v22196_v1  ;;  %v24480_v6 = vld [vmem:[#allocation132_spill] sm:$0xff]  ;;  %v24481_v33 = vld [vmem:[#allocation134_spill] sm:$0xff]  ;;  %v24483_v1 = vld [vmem:[#allocation137_spill] sm:$0xff] }
 0xe19   : > { %v16195_v56 = vpack.c.bf16 %v22208_v21, %v22204_v54  ;;  %v16197_v12 = vpack.c.bf16 %v22212_v52, %v22210_v44  ;;  %v16199_v13 = vpack.c.bf16 %v22218_v5, %v22216_v47  ;;  %v16201_v4 = vpack.c.bf16 %v22225_v8, %v22223_v35  ;;  %v24482_v10 = vld [vmem:[#allocation136_spill] sm:$0xff]  ;;  %v24484_v44 = vld [vmem:[#allocation117_spill] sm:$0xff]  ;;  %v24486_v47 = vld [vmem:[#allocation119_spill] sm:$0xff] }
 0xe1a   : > { %v16203_v0 = vpack.c.bf16 %v22236_v58, %v22234_v49  ;;  %v16205_v48 = vpack.c.bf16 %v24481_v33, %v24480_v6  ;;  %v16207_v23 = vpack.c.bf16 %v24483_v1, %v24482_v10  ;;  %v16209_v54 = vpack.c.bf16 %v22368_v19, %v22338_v59  ;;  %v24485_v52 = vld [vmem:[#allocation133_spill] sm:$0xff]  ;;  %v24488_v35 = vld [vmem:[#allocation120_spill] sm:$0xff]  ;;  %v24490_v49 = vld [vmem:[#allocation123_spill] sm:$0xff] }
 0xe1b   : > { %16180 = vmatpush3.bf16.msra.mxu1 %v16179_v37  ;;  %v16211_v21 = vpack.c.bf16 %v22387_v60, %v22375_v57  ;;  %v24487_v5 = vand.u32 4294901760, %v24479_v30  ;;  %v24489_v8 = vld [vmem:[#allocation121_spill] sm:$0xff]  ;;  %v24491_v58 = vld [vmem:[#allocation124_spill] sm:$0xff]  ;;  %v24493_v19 = vld [vmem:[#allocation126_spill] sm:$0xff]  ;;  %v24502_v55 = vand.u32 4294901760, %v24485_v52 }
 0xe1c   : > { %16182 = vmatprep.subr.bf16.mxu1 %v16181_v17  ;;  %v24492_v59 = vld [vmem:[#allocation125_spill] sm:$0xff]  ;;  %v24494_v57 = vld [vmem:[#allocation127_spill] sm:$0xff]  ;;  %v24495_v60 = vld [vmem:[#allocation128_spill] sm:$0xff] }
 0xe1d   : > { %v24503_v27 = vld [vmem:[#allocation118_spill] sm:$0xff]  ;;  %v24504_v14 = vld [vmem:[#allocation140_spill] sm:$0xff]  ;;  %v11310_v6 = vld [vmem:[%s24508_s9] ss:$0 sm:$0xff] }
 0xe1e   : > { %9585 = vmatmul.mubr.f32.vlgmr.msra.gmra.mrb[2].mxu1 %v22156_v25 }
 0xe1f   : > { %16184 = vmatpush3.bf16.msra.mxu1 %v16183_v29  ;;  %9720 = vmatprep.mubr.f32.mxu1 %v24479_v30 }
 0xe20   : > { %16186 = vmatprep.subr.bf16.mxu1 %v16185_v34 }
 0xe23   : > { %16188 = vmatpush3.bf16.msra.mxu1 %v16187_v24 }
 0xe24   : > { %16190 = vmatprep.subr.bf16.mxu1 %v16189_v45 }
 0xe27   : > { %16192 = vmatpush3.bf16.msra.mxu1 %v16191_v36 }
 0xe28   : > { %16194 = vmatprep.subr.bf16.mxu1 %v16193_v42  ;;  %v22623_v42 = vld [vmem:[#allocation23 + $0x48] sm:$0xff] }
 0xe2b   : > { %16196 = vmatpush3.bf16.msra.mxu1 %v16195_v56  ;;  %v22625_v56 = vld [vmem:[#allocation23 + $0x58] sm:$0xff] }
 0xe2c   : > { %16198 = vmatprep.subr.bf16.mxu1 %v16197_v12  ;;  %v23697_v12 = vand.u32 4294901760, %v22623_v42 }
 0xe2f   : > { %16200 = vmatpush3.bf16.msra.mxu1 %v16199_v13  ;;  %v23696_v13 = vand.u32 4294901760, %v22625_v56 }
 0xe30   : > { %16202 = vmatprep.subr.bf16.mxu1 %v16201_v4  ;;  %v22629_v4 = vld [vmem:[#allocation23 + $0x40] sm:$0xff] }
 0xe31   : > { %v10171_v33 = vand.u32 4294901760, %v22629_v4  ;;  %v22642_v1 = vpack.c.bf16 %v23696_v13, %v23697_v12 }
 0xe33   : > { %16204 = vmatpush3.bf16.msra.mxu1 %v16203_v0  ;;  %v22631_v0 = vld [vmem:[#allocation23 + $0x50] sm:$0xff]  ;;  %24509 = vst [vmem:[#allocation136_spill] sm:$0xff] %v22642_v1 }
 0xe34   : > { %16206 = vmatprep.subr.bf16.mxu1 %v16205_v48  ;;  %v10175_v48 = vand.u32 4294901760, %v22631_v0 }
 0xe37   : > { %16208 = vmatpush3.bf16.msra.mxu1 %v16207_v23 }
 0xe38   : > { %16210 = vmatprep.subr.bf16.mxu1 %v16209_v54  ;;  %v22644_v54 = vpack.c.bf16 %v10175_v48, %v10171_v33 }
 0xe3a   : > { %24510 = vst [vmem:[#allocation137_spill] sm:$0xff] %v22644_v54 }
 0xe3b   : > { %16212 = vmatpush3.bf16.msra.mxu1 %v16211_v21  ;;  %v10122_v21 = vld [vmem:[#allocation23 + $0x68] sm:$0xff] }
 0xe3c   : > { %16214 = vmatprep.subr.bf16.mxu1 %v24484_v44 }
 0xe3e   : > { %9723 = vmatmul.mubr.f32.vlgmr.msra.gmra.mrb[4].mxu1 %v24485_v52 }
 0xe3f   : > { %16216 = vmatpush3.bf16.msra.mxu1 %v24486_v47  ;;  %9827 = vmatprep.mubr.f32.mxu1 %v24487_v5  ;;  %v10177_v5 = vand.u32 4294901760, %v10122_v21 }
 0xe40   : > { %16218 = vmatprep.subr.bf16.mxu1 %v24488_v35 }
 0xe43   : > { %16220 = vmatpush3.bf16.msra.mxu1 %v24489_v8 }
 0xe44   : > { %16222 = vmatprep.subr.bf16.mxu1 %v24490_v49 }
 0xe47   : > { %16224 = vmatpush3.bf16.msra.mxu1 %v24491_v58 }
 0xe48   : > { %16226 = vmatprep.subr.bf16.mxu1 %v24492_v59 }
 0xe4b   : > { %16228 = vmatpush3.bf16.msra.mxu1 %v24493_v19 }
 0xe4c   : > { %16230 = vmatprep.subr.bf16.mxu1 %v24494_v57 }
 0xe4f   : > { %16232 = vmatpush3.bf16.msra.mxu1 %v24495_v60 }
 0xe50   : > { %16234 = vmatprep.subr.bf16.mxu1 %v24496_v22 }
 0xe53   : > { %16236 = vmatpush3.bf16.msra.mxu1 %v24497_v28 }
 0xe54   : > { %16238 = vmatprep.subr.bf16.mxu1 %v24498_v62 }
 0xe57   : > { %16240 = vmatpush3.bf16.msra.mxu1 %v24499_v7 }
 0xe58   : > { %16242 = vmatprep.subr.bf16.mxu1 %v24500_v31 }
 0xe5b   : > { %16244 = vmatpush3.bf16.msra.mxu1 %v24501_v41 }
 0xe5c   : > { %16246 = vmatprep.subr.bf16.mxu1 %v22422_v2 }
 0xe5e   : > { %9831 = vmatmul.mubr.f32.vlgmr.msra.gmra.mrb[6].mxu1 %v24502_v55 }
 0xe5f   : > { %16248 = vmatpush3.bf16.msra.mxu1 %v22428_v15  ;;  %9997 = vmatprep.mubr.f32.mxu1 %v24503_v27  ;;  %v22589_v15 = vld [vmem:[#allocation23 + $0x8] sm:$0xff] }
 0xe60   : > { %16250 = vmatprep.subr.bf16.mxu1 %v22434_v3  ;;  %v22591_v3 = vld [vmem:[#allocation23 + $0x18] sm:$0xff] }
 0xe63   : > { %16252 = vmatpush3.bf16.msra.mxu1 %v22440_v43  ;;  %v10109_v43 = vld [vmem:[#allocation23] sm:$0xff] }
 0xe64   : > { %16254 = vmatprep.subr.bf16.mxu1 %v22446_v18  ;;  %v10153_v18 = vand.u32 4294901760, %v22589_v15 }
 0xe67   : > { %16256 = vmatpush3.bf16.msra.mxu1 %v22452_v53  ;;  %v10157_v53 = vand.u32 4294901760, %v22591_v3 }
 0xe68   : > { %16258 = vmatprep.subr.bf16.mxu1 %v22458_v11  ;;  %v10111_v11 = vld [vmem:[#allocation23 + $0x10] sm:$0xff] }
 0xe6b   : > { %16260 = vmatpush3.bf16.msra.mxu1 %v22464_v20  ;;  %v10155_v20 = vand.u32 4294901760, %v10109_v43 }
 0xe6c   : > { %16262 = vmatprep.subr.bf16.mxu1 %v24504_v14 }
 0xe6f   : > { %16264 = vmatpush3.bf16.msra.mxu1 %v22476_v51  ;;  %v10116_v51 = vld [vmem:[#allocation23 + $0x38] sm:$0xff] }
 0xe70   : > { %16266 = vmatprep.subr.bf16.mxu1 %v22482_v50  ;;  %v10159_v50 = vand.u32 4294901760, %v10111_v11  ;;  %v10165_v9 = vand.u32 4294901760, %v10116_v51 }
 0xe72   : > { %v22603_v38 = vpack.c.bf16 %v10159_v50, %v10155_v20  ;;  %v22612_v29 = vsub.f32 %v10116_v51, %v10165_v9 }
 0xe73   : > { %16268 = vmatpush3.bf16.msra.mxu1 %v22488_v16  ;;  %v10115_v16 = vld [vmem:[#allocation23 + $0x30] sm:$0xff] }
 0xe74   : > { %16270 = vmatprep.subr.bf16.mxu1 %v22490_v46  ;;  %v22599_v46 = vpack.c.bf16 %v10157_v53, %v10153_v18  ;;  %24505 = vst [vmem:[#allocation122_spill] sm:$0xff] %v22603_v38  ;;  %v10167_v24 = vand.u32 4294901760, %v10115_v16 }
 0xe76   : > { %16310 = vmatprep.subr.bf16.mxu0 %v22599_v46  ;;  %v22620_v36 = vsub.f32 %v10115_v16, %v10167_v24  ;;  %v10136_v16 = vld [vmem:[#allocation23 + $0xd8] sm:$0xff] }
 0xe77   : > { %16272 = vmatpush3.bf16.msra.mxu1 %v22492_v40  ;;  %v22601_v40 = vsub.f32 %v10109_v43, %v10155_v20  ;;  %16312 = vmatpush1.bf16.msra.mxu0 %v22603_v38  ;;  %v10129_v20 = vld [vmem:[#allocation23 + $0xa0] sm:$0xff] }
 0xe78   : > { %16274 = vmatprep.subr.bf16.mxu1 %v22494_v32  ;;  %v10114_v32 = vld [vmem:[#allocation23 + $0x28] sm:$0xff]  ;;  %v10195_v51 = vand.u32 4294901760, %v10129_v20 }
 0xe79   : > { %v10161_v26 = vand.u32 4294901760, %v10114_v32 }
 0xe7b   : > { %16276 = vmatpush3.bf16.msra.mxu1 %v22496_v39  ;;  %v22605_v39 = vsub.f32 %v10111_v11, %v10159_v50  ;;  %v22607_v37 = vpack.c.bf16 %v10165_v9, %v10161_v26  ;;  %v22609_v17 = vsub.f32 %v10114_v32, %v10161_v26  ;;  %v10131_v32 = vld [vmem:[#allocation23 + $0xb0] sm:$0xff] }
 0xe7c   : > { %16278 = vmatprep.subr.bf16.mxu1 %v24484_v44  ;;  %v10124_v44 = vld [vmem:[#allocation23 + $0x78] sm:$0xff]  ;;  %v10199_v50 = vand.u32 4294901760, %v10131_v32 }
 0xe7d   : > { %24506 = vst [vmem:[#allocation132_spill] sm:$0xff] %v22607_v37  ;;  %16314 = vmatprep.subr.bf16.mxu0 %v22607_v37 }
 0xe7e   : > { %9999 = vmatmul.mubr.f32.vlgmr.msra.gmra.mrb[8].mxu1 %v22156_v25  ;;  %v22664_v9 = vpack.c.bf16 %v10199_v50, %v10195_v51 }
 0xe7f   : > { %16280 = vmatpush3.bf16.msra.mxu1 %v24486_v47  ;;  %10101 = vmatprep.mubr.f32.mxu1 %v24503_v27 }
 0xe80   : > { %16282 = vmatprep.subr.bf16.mxu1 %v24488_v35  ;;  %v10181_v35 = vand.u32 4294901760, %v10124_v44  ;;  %24516 = vst [vmem:[#allocation123_spill] sm:$0xff] %v22664_v9 }
 0xe83   : > { %16284 = vmatpush3.bf16.msra.mxu1 %v24489_v8  ;;  %v10121_v8 = vld [vmem:[#allocation23 + $0x60] sm:$0xff] }
 0xe84   : > { %16286 = vmatprep.subr.bf16.mxu1 %v24490_v49  ;;  %v10123_v49 = vld [vmem:[#allocation23 + $0x70] sm:$0xff] }
 0xe87   : > { %16288 = vmatpush3.bf16.msra.mxu1 %v24491_v58  ;;  %v10179_v58 = vand.u32 4294901760, %v10121_v8 }
 0xe88   : > { %16290 = vmatprep.subr.bf16.mxu1 %v24492_v59  ;;  %v10183_v59 = vand.u32 4294901760, %v10123_v49 }
 0xe8b   : > { %16292 = vmatpush3.bf16.msra.mxu1 %v24493_v19 }
 0xe8c   : > { %16294 = vmatprep.subr.bf16.mxu1 %v24494_v57  ;;  %v22650_v57 = vpack.c.bf16 %v10181_v35, %v10177_v5 }
 0xe8e   : > { %24511 = vst [vmem:[#allocation117_spill] sm:$0xff] %v22650_v57 }
 0xe8f   : > { %16296 = vmatpush3.bf16.msra.mxu1 %v24495_v60  ;;  %v22652_v60 = vpack.c.bf16 %v10183_v59, %v10179_v58 }
 0xe90   : > { %16298 = vmatprep.subr.bf16.mxu1 %v24496_v22  ;;  %v10126_v22 = vld [vmem:[#allocation23 + $0x88] sm:$0xff] }
 0xe91   : > { %24512 = vst [vmem:[#allocation133_spill] sm:$0xff] %v22652_v60 }
 0xe93   : > { %16300 = vmatpush3.bf16.msra.mxu1 %v24497_v28  ;;  %v10128_v28 = vld [vmem:[#allocation23 + $0x98] sm:$0xff] }
 0xe94   : > { %16302 = vmatprep.subr.bf16.mxu1 %v24498_v62  ;;  %v10185_v62 = vand.u32 4294901760, %v10126_v22 }
 0xe97   : > { %16304 = vmatpush3.bf16.msra.mxu1 %v24499_v7  ;;  %v10189_v7 = vand.u32 4294901760, %v10128_v28 }
 0xe98   : > { %16306 = vmatprep.subr.bf16.mxu1 %v24500_v31  ;;  %v10125_v31 = vld [vmem:[#allocation23 + $0x80] sm:$0xff] }
 0xe99   : > { %v10187_v55 = vand.u32 4294901760, %v10125_v31  ;;  %v22656_v14 = vpack.c.bf16 %v10189_v7, %v10185_v62 }
 0xe9b   : > { %16308 = vmatpush3.bf16.msra.mxu1 %v24501_v41  ;;  %v10127_v41 = vld [vmem:[#allocation23 + $0x90] sm:$0xff]  ;;  %24513 = vst [vmem:[#allocation119_spill] sm:$0xff] %v22656_v14 }
 0xe9c   : > { %v10191_v27 = vand.u32 4294901760, %v10127_v41 }
 0xe9e   : > { %10103 = vmatmul.mubr.f32.vlgmr.msra.gmra.mrb[10].mxu1 %v22156_v25  ;;  %v10113_v25 = vld [vmem:[#allocation23 + $0x20] sm:$0xff] }
 0xe9f   : > { %v10163_v34 = vand.u32 4294901760, %v10113_v25 }
 0xea1   : > { %v22616_v30 = vpack.c.bf16 %v10167_v24, %v10163_v34  ;;  %v22618_v45 = vsub.f32 %v10113_v25, %v10163_v34  ;;  %v10134_v25 = vld [vmem:[#allocation23 + $0xc8] sm:$0xff]  ;;  %v10205_v24 = vand.u32 4294901760, %v10136_v16 }
 0xea2   : > { %v10201_v34 = vand.u32 4294901760, %v10134_v25 }
 0xea3   : > { %24507 = vst [vmem:[#allocation134_spill] sm:$0xff] %v22616_v30  ;;  %16316 = vmatpush1.bf16.msra.mxu0 %v22616_v30 }
 0xea4   : > { %16318 = vmatprep.subr.bf16.mxu0 %v22642_v1 }
 0xea7   : > { %16320 = vmatpush1.bf16.msra.mxu0 %v22644_v54 }
 0xea8   : > { %16322 = vmatprep.subr.bf16.mxu0 %v22650_v57  ;;  %v22702_v57 = vsub.f32 %v10123_v49, %v10183_v59  ;;  %v22721_v49 = vsub.f32 %v10134_v25, %v10201_v34  ;;  %v23712_v25 = vand.u32 4294901760, %v22609_v17 }
 0xeaa   : > { %24521 = vst [vmem:[#allocation126_spill] sm:$0xff] %v22702_v57  ;;  %24530 = vst [vmem:[#allocation118_spill] sm:$0xff] %v22721_v49 }
 0xeab   : > { %16324 = vmatpush1.bf16.msra.mxu0 %v22652_v60  ;;  %v22700_v60 = vsub.f32 %v10121_v8, %v10179_v58  ;;  %v10139_v8 = vld [vmem:[#allocation23 + $0xf0] sm:$0xff]  ;;  %v22723_v58 = vsub.f32 %v10136_v16, %v10205_v24  ;;  %v23715_v16 = vand.u32 4294901760, %v22612_v29 }
 0xeac   : > { %16326 = vmatprep.subr.bf16.mxu0 %v22656_v14  ;;  %v24519_v14 = vand.u32 4294901760, %v22625_v56 }
 0xead   : > { %24520 = vst [vmem:[#allocation125_spill] sm:$0xff] %v22700_v60  ;;  %24531 = vst [vmem:[#allocation140_spill] sm:$0xff] %v22723_v58 }
 0xed1   : > { %v12693_v61 = vpop.f32.mrb[0].mxu1 }
 0xed2   : > { %v12694_v63 = vpop.f32.mrb[1].mxu1 }
 0xed3   : > { %v12695_v2 = vadd.f32 %v12694_v63, %v12693_v61  ;;  %v22658_v61 = vpack.c.bf16 %v10191_v27, %v10187_v55  ;;  %v10130_v63 = vld [vmem:[#allocation23 + $0xa8] sm:$0xff] }
 0xed4   : > { %v10193_v43 = vand.u32 4294901760, %v10130_v63 }
 0xed5   : > { %v9355_v52 = vadd.f32 %v12695_v2, %v11310_v6  ;;  %24514 = vst [vmem:[#allocation120_spill] sm:$0xff] %v22658_v61  ;;  %v10132_v2 = vld [vmem:[#allocation23 + $0xb8] sm:$0xff]  ;;  %16328 = vmatpush1.bf16.msra.mxu0 %v22658_v61  ;;  %v10133_v6 = vld [vmem:[#allocation23 + $0xc0] sm:$0xff] }
 0xed6   : > { %v10197_v11 = vand.u32 4294901760, %v10132_v2  ;;  %v10203_v13 = vand.u32 4294901760, %v10133_v6 }
 0xed8   : > { %v22662_v26 = vpack.c.bf16 %v10197_v11, %v10193_v43 }
 0xeda   : > { %24515 = vst [vmem:[#allocation121_spill] sm:$0xff] %v22662_v26  ;;  %16330 = vmatprep.subr.bf16.mxu0 %v22662_v26  ;;  %v24518_v26 = vand.u32 4294901760, %v22623_v42 }
 0xedb   : > { %16332 = vmatpush1.bf16.msra.mxu0 %v22664_v9  ;;  %v22698_v9 = vsub.f32 %v10124_v44, %v10181_v35  ;;  %v22715_v44 = vsub.f32 %v10132_v2, %v10197_v11  ;;  %v22719_v35 = vsub.f32 %v10131_v32, %v10199_v50  ;;  %v23711_v50 = vand.u32 4294901760, %v22601_v40 }
 0xedc   : > { %v22683_v61 = vsub.f32 %v22623_v42, %v24518_v26  ;;  %v22705_v42 = vsub.f32 %v10126_v22, %v10185_v62  ;;  %v22727_v22 = vsub.f32 %v10133_v6, %v10203_v13  ;;  %v23710_v26 = vand.u32 4294901760, %v22605_v39 }
 0xedd   : > { %24527 = vst [vmem:[#allocation135_spill] sm:$0xff] %v22715_v44  ;;  %24529 = vst [vmem:[#allocation139_spill] sm:$0xff] %v22719_v35  ;;  %v23714_v6 = vand.u32 4294901760, %v22618_v45 }
 0xede   : > { %24522 = vst [vmem:[#allocation127_spill] sm:$0xff] %v22705_v42  ;;  %24533 = vst [vmem:[#allocation142_spill] sm:$0xff] %v22727_v22 }
 0xef1   : > { %v12728_v10 = vpop.f32.mrb[2].mxu1 }
 0xef2   : > { %v12729_v23 = vpop.f32.mrb[3].mxu1 }
 0xef3   : > { %v12730_v47 = vadd.f32 %v12729_v23, %v12728_v10  ;;  %v10135_v10 = vld [vmem:[#allocation23 + $0xd0] sm:$0xff]  ;;  %v22670_v23 = vsub.f32 %v22589_v15, %v10153_v18  ;;  %v22688_v15 = vsub.f32 %v22625_v56, %v24519_v14  ;;  %v22691_v18 = vsub.f32 %v22629_v4, %v10171_v33  ;;  %v10140_v33 = vld [vmem:[#allocation23 + $0xf8] sm:$0xff] }
 0xef4   : > { %v10207_v12 = vand.u32 4294901760, %v10135_v10  ;;  %v22707_v56 = vsub.f32 %v10128_v28, %v10189_v7  ;;  %v22709_v14 = vsub.f32 %v10125_v31, %v10187_v55  ;;  %v22711_v4 = vsub.f32 %v10127_v41, %v10191_v27 }
 0xef5   : > { %v22648_v19 = vadd.f32 %v12730_v47, %v9355_v52  ;;  %v22676_v52 = vsub.f32 %v22591_v3, %v10157_v53  ;;  %v22678_v47 = vpack.c.bf16 %v10205_v24, %v10201_v34  ;;  %v22694_v3 = vsub.f32 %v22631_v0, %v10175_v48  ;;  %v10138_v0 = vld [vmem:[#allocation23 + $0xe8] sm:$0xff]  ;;  %v10137_v48 = vld [vmem:[#allocation23 + $0xe0] sm:$0xff] }
 0xef6   : > { %v22696_v53 = vsub.f32 %v10122_v21, %v10177_v5  ;;  %24523 = vst [vmem:[#allocation128_spill] sm:$0xff] %v22707_v56  ;;  %24524 = vst [vmem:[#allocation129_spill] sm:$0xff] %v22709_v14  ;;  %v22713_v21 = vsub.f32 %v10130_v63, %v10193_v43  ;;  %v22717_v5 = vsub.f32 %v10129_v20, %v10195_v51  ;;  %v10209_v62 = vand.u32 4294901760, %v10138_v0 }
 0xef7   : > { %24517 = vst [vmem:[#allocation124_spill] sm:$0xff] %v22678_v47  ;;  %16334 = vmatprep.subr.bf16.mxu0 %v22678_v47  ;;  %24525 = vst [vmem:[#allocation130_spill] sm:$0xff] %v22711_v4  ;;  %v22725_v59 = vpack.c.bf16 %v10207_v12, %v10203_v13  ;;  %v22729_v28 = vsub.f32 %v10135_v10, %v10207_v12  ;;  %v10213_v7 = vand.u32 4294901760, %v10140_v33  ;;  %v10211_v31 = vand.u32 4294901760, %v10137_v48 }
 0xef8   : > { %24526 = vst [vmem:[#allocation131_spill] sm:$0xff] %v22713_v21  ;;  %24528 = vst [vmem:[#allocation138_spill] sm:$0xff] %v22717_v5  ;;  %v10215_v41 = vand.u32 4294901760, %v10139_v8  ;;  %v23716_v55 = vand.u32 4294901760, %v22670_v23  ;;  %v23713_v27 = vand.u32 4294901760, %v22676_v52  ;;  %v22736_v2 = vsub.f32 %v10138_v0, %v10209_v62 }
 0xef9   : > { %24532 = vst [vmem:[#allocation141_spill] sm:$0xff] %v22725_v59  ;;  %24534 = vst [vmem:[#allocation143_spill] sm:$0xff] %v22729_v28  ;;  %16336 = vmatpush1.bf16.msra.mxu0 %v22725_v59  ;;  %v22734_v63 = vpack.c.bf16 %v10213_v7, %v10209_v62  ;;  %v22738_v43 = vsub.f32 %v10140_v33, %v10213_v7  ;;  %v22740_v13 = vsub.f32 %v10137_v48, %v10211_v31  ;;  %v23723_v12 = vmov 0.0  }
 0xefa   : > { %10249 = vmatprep.mubr.f32.mxu0 %v23723_v12  ;;  %v22743_v11 = vpack.c.bf16 %v10215_v41, %v10211_v31  ;;  %v22745_v20 = vsub.f32 %v10139_v8, %v10215_v41  ;;  %v10264_v32 = vsub.f32 %v22670_v23, %v23716_v55  ;;  %v10276_v51 = vsub.f32 %v22676_v52, %v23713_v27 }
 0xefb   : > { %24535 = vst [vmem:[#allocation144_spill] sm:$0xff] %v22734_v63  ;;  %24536 = vst [vmem:[#allocation145_spill] sm:$0xff] %v22738_v43  ;;  %16338 = vmatprep.subr.bf16.mxu0 %v22734_v63  ;;  %v23717_v10 = vand.u32 4294901760, %v22620_v36  ;;  %v10270_v0 = vsub.f32 %v22601_v40, %v23711_v50  ;;  %v10282_v33 = vsub.f32 %v22605_v39, %v23710_v26  ;;  %v23722_v41 = vand.u32 4294901760, %v22683_v61 }
 0xefc   : > { %24537 = vst [vmem:[#allocation146_spill] sm:$0xff] %v22743_v11  ;;  %24538 = vst [vmem:[#allocation147_spill] sm:$0xff] %v22745_v20  ;;  %v10265_v34 = vand.u32 4294901760, %v10264_v32  ;;  %v10277_v24 = vand.u32 4294901760, %v10276_v51  ;;  %v10288_v48 = vsub.f32 %v22609_v17, %v23712_v25  ;;  %v10300_v8 = vsub.f32 %v22612_v29, %v23715_v16 }
 0xefd   : > { %16340 = vmatpush1.bf16.msra.mxu0 %v22743_v11  ;;  %v10294_v7 = vsub.f32 %v22618_v45, %v23714_v6  ;;  %v10306_v31 = vsub.f32 %v22620_v36, %v23717_v10  ;;  %v10271_v32 = vand.u32 4294901760, %v10270_v0  ;;  %v10283_v51 = vand.u32 4294901760, %v10282_v33 }
 0xefe   : > { %v16341_v62 = vpack.c.bf16 %v10277_v24, %v10265_v34  ;;  %v10289_v26 = vand.u32 4294901760, %v10288_v48  ;;  %v10301_v50 = vand.u32 4294901760, %v10300_v8  ;;  %v10312_v34 = vsub.f32 %v22683_v61, %v23722_v41 }
 0xeff   : > { %v10295_v25 = vand.u32 4294901760, %v10294_v7  ;;  %v10307_v27 = vand.u32 4294901760, %v10306_v31  ;;  %v23720_v24 = vand.u32 4294901760, %v22688_v15  ;;  %v22784_v16 = vpack.c.bf16 %v10283_v51, %v10271_v32 }
 0xf00   : > { %16342 = vmatprep.subr.bf16.mxu0 %v16341_v62  ;;  %v22786_v55 = vpack.c.bf16 %v10301_v50, %v10289_v26  ;;  %v23718_v10 = vand.u32 4294901760, %v22691_v18  ;;  %v23719_v0 = vand.u32 4294901760, %v22694_v3  ;;  %v10313_v8 = vand.u32 4294901760, %v10312_v34 }
 0xf01   : > { %v22790_v48 = vpack.c.bf16 %v10307_v27, %v10295_v25  ;;  %v10324_v62 = vsub.f32 %v22688_v15, %v23720_v24  ;;  %v23721_v7 = vand.u32 4294901760, %v22696_v53  ;;  %v23725_v32 = vand.u32 4294901760, %v22698_v9 }
 0xf02   : > { %v10318_v50 = vsub.f32 %v22691_v18, %v23718_v10  ;;  %v10330_v26 = vsub.f32 %v22694_v3, %v23719_v0  ;;  %v23726_v51 = vand.u32 4294901760, %v22700_v60  ;;  %v23729_v34 = vand.u32 4294901760, %v22702_v57 }
 0xf03   : > { %v10325_v27 = vand.u32 4294901760, %v10324_v62  ;;  %v10336_v25 = vsub.f32 %v22696_v53, %v23721_v7  ;;  %v10348_v0 = vsub.f32 %v22698_v9, %v23725_v32  ;;  %v23741_v11 = vand.u32 4294901760, %v22719_v35 }
 0xf04   : > { %v10331_v10 = vand.u32 4294901760, %v10330_v26  ;;  %v10342_v7 = vsub.f32 %v22700_v60, %v23726_v51  ;;  %v10354_v41 = vsub.f32 %v22702_v57, %v23729_v34  ;;  %v23740_v34 = vand.u32 4294901760, %v22717_v5 }
 0xf05   : > { %v22814_v24 = vpack.c.bf16 %v10325_v27, %v10313_v8  ;;  %v10337_v62 = vand.u32 4294901760, %v10336_v25  ;;  %v23730_v8 = vand.u32 4294901760, %v22709_v14  ;;  %v23735_v27 = vand.u32 4294901760, %v22711_v4 }
 0xf06   : > { %v10343_v26 = vand.u32 4294901760, %v10342_v7  ;;  %v10355_v32 = vand.u32 4294901760, %v10354_v41  ;;  %v23759_v47 = vand.u32 4294901760, %v22738_v43  ;;  %v23760_v1 = vand.u32 4294901760, %v22745_v20 }
 0xf07   : > { %v10366_v41 = vsub.f32 %v22709_v14, %v23730_v8  ;;  %v10378_v7 = vsub.f32 %v22711_v4, %v23735_v27 }
 0xf11   : > { %v12763_v6 = vpop.f32.mrb[4].mxu1 }
 0xf12   : > { %v12764_v33 = vpop.f32.mrb[5].mxu1 }
 0xf13   : > { %v12765_v31 = vadd.f32 %v12764_v33, %v12763_v6  ;;  %v10319_v33 = vand.u32 4294901760, %v10318_v50  ;;  %v23728_v50 = vand.u32 4294901760, %v22707_v56 }
 0xf15   : > { %v22809_v6 = vadd.f32 %v12765_v31, %v22648_v19  ;;  %v22822_v12 = vpack.c.bf16 %v10331_v10, %v10319_v33  ;;  %v10349_v19 = vand.u32 4294901760, %v10348_v0  ;;  %v23727_v31 = vand.u32 4294901760, %v22705_v42 }
 0xf16   : > { %v10372_v10 = vsub.f32 %v22707_v56, %v23728_v50  ;;  %v23736_v0 = vand.u32 4294901760, %v22713_v21  ;;  %v22837_v33 = vpack.c.bf16 %v10355_v32, %v10343_v26  ;;  %v10367_v32 = vand.u32 4294901760, %v10366_v41 }
 0xf17   : > { %v22828_v25 = vpack.c.bf16 %v10349_v19, %v10337_v62  ;;  %v10360_v51 = vsub.f32 %v22705_v42, %v23727_v31  ;;  %v23739_v62 = vand.u32 4294901760, %v22715_v44  ;;  %v10379_v26 = vand.u32 4294901760, %v10378_v7 }
 0xf18   : > { %v10373_v31 = vand.u32 4294901760, %v10372_v10  ;;  %v10384_v50 = vsub.f32 %v22713_v21, %v23736_v0  ;;  %v23742_v10 = vand.u32 4294901760, %v22721_v49  ;;  %v10402_v41 = vsub.f32 %v22719_v35, %v23741_v11 }
 0xf19   : > { %v10361_v19 = vand.u32 4294901760, %v10360_v51  ;;  %v10396_v8 = vsub.f32 %v22715_v44, %v23739_v62  ;;  %v10390_v51 = vsub.f32 %v22717_v5, %v23740_v34  ;;  %v22860_v0 = vpack.c.bf16 %v10379_v26, %v10367_v32 }
 0xf1a   : > { %v10385_v27 = vand.u32 4294901760, %v10384_v50  ;;  %v23745_v7 = vand.u32 4294901760, %v22723_v58  ;;  %v23748_v50 = vand.u32 4294901760, %v22727_v22  ;;  %v10403_v32 = vand.u32 4294901760, %v10402_v41 }
 0xf1b   : > { %v22854_v63 = vpack.c.bf16 %v10373_v31, %v10361_v19  ;;  %v10397_v59 = vand.u32 4294901760, %v10396_v8  ;;  %v10391_v62 = vand.u32 4294901760, %v10390_v51  ;;  %v10408_v31 = vsub.f32 %v22721_v49, %v23742_v10 }
 0xf1c   : > { %v23751_v19 = vand.u32 4294901760, %v22729_v28  ;;  %v10420_v8 = vsub.f32 %v22723_v58, %v23745_v7  ;;  %v23754_v26 = vand.u32 4294901760, %v22736_v2  ;;  %v10414_v51 = vsub.f32 %v22727_v22, %v23748_v50 }
 0xf1d   : > { %v22871_v34 = vpack.c.bf16 %v10397_v59, %v10385_v27  ;;  %v10409_v11 = vand.u32 4294901760, %v10408_v31  ;;  %v22884_v59 = vpack.c.bf16 %v10403_v32, %v10391_v62  ;;  %v23761_v7 = vand.u32 4294901760, %v22740_v13 }
 0xf1e   : > { %v10426_v10 = vsub.f32 %v22729_v28, %v23751_v19  ;;  %v10421_v27 = vand.u32 4294901760, %v10420_v8  ;;  %v10432_v41 = vsub.f32 %v22736_v2, %v23754_v26  ;;  %v10415_v31 = vand.u32 4294901760, %v10414_v51 }
 0xf1f   : > { %v10444_v50 = vsub.f32 %v22738_v43, %v23759_v47  ;;  %v10438_v62 = vsub.f32 %v22740_v13, %v23761_v7  ;;  %v10450_v26 = vsub.f32 %v22745_v20, %v23760_v1  ;;  %v16373_v47 = vpack.c.bf16 %v22676_v52, %v22670_v23 }
 0xf20   : > { %v10427_v54 = vand.u32 4294901760, %v10426_v10  ;;  %v16365_v19 = vpack.c.bf16 %v10421_v27, %v10409_v11  ;;  %v10433_v30 = vand.u32 4294901760, %v10432_v41  ;;  %v16375_v11 = vpack.c.bf16 %v22605_v39, %v22601_v40 }
 0xf21   : > { %v10445_v8 = vand.u32 4294901760, %v10444_v50  ;;  %v10439_v51 = vand.u32 4294901760, %v10438_v62  ;;  %v10451_v37 = vand.u32 4294901760, %v10450_v26  ;;  %v16377_v27 = vpack.c.bf16 %v22612_v29, %v22609_v17 }
 0xf22   : > { %v16367_v32 = vpack.c.bf16 %v10427_v54, %v10415_v31  ;;  %v16379_v54 = vpack.c.bf16 %v22620_v36, %v22618_v45  ;;  %v16381_v41 = vpack.c.bf16 %v22688_v15, %v22683_v61  ;;  %v16385_v62 = vpack.c.bf16 %v22698_v9, %v22696_v53 }
 0xf23   : > { %v16369_v10 = vpack.c.bf16 %v10445_v8, %v10433_v30  ;;  %v16371_v38 = vpack.c.bf16 %v10451_v37, %v10439_v51  ;;  %v16383_v37 = vpack.c.bf16 %v22694_v3, %v22691_v18  ;;  %v16387_v8 = vpack.c.bf16 %v22702_v57, %v22700_v60 }
 0xf24   : > { %v16389_v51 = vpack.c.bf16 %v22707_v56, %v22705_v42  ;;  %v16391_v1 = vpack.c.bf16 %v22711_v4, %v22709_v14  ;;  %v16393_v7 = vpack.c.bf16 %v22715_v44, %v22713_v21  ;;  %v16403_v56 = vpack.c.bf16 %v22745_v20, %v22740_v13 }
 0xf25   : > { %v24539_v20 = vmov 0.0  }
 0xf31   : > { %v12798_v50 = vpop.f32.mrb[6].mxu1 }
 0xf32   : > { %v12799_v31 = vpop.f32.mrb[7].mxu1 }
 0xf33   : > { %v12800_v30 = vadd.f32 %v12799_v31, %v12798_v50  ;;  %v16395_v50 = vpack.c.bf16 %v22719_v35, %v22717_v5  ;;  %v16399_v31 = vpack.c.bf16 %v22729_v28, %v22727_v22 }
 0xf35   : > { %v9833_v26 = vadd.f32 %v12800_v30, %v22809_v6  ;;  %v16397_v6 = vpack.c.bf16 %v22723_v58, %v22721_v49  ;;  %v16401_v30 = vpack.c.bf16 %v22738_v43, %v22736_v2 }
 0xf51   : > { %v12833_v42 = vpop.f32.mrb[8].mxu1 }
 0xf52   : > { %v12834_v4 = vpop.f32.mrb[9].mxu1 }
 0xf53   : > { %v12835_v14 = vadd.f32 %v12834_v4, %v12833_v42  ;;  %v24545_v42 = vld [vmem:[#allocation117_spill] sm:$0xff]  ;;  %v24548_v4 = vld [vmem:[#allocation120_spill] sm:$0xff] }
 0xf55   : > { %v10001_v57 = vadd.f32 %v12835_v14, %v9833_v26  ;;  %v24546_v14 = vld [vmem:[#allocation133_spill] sm:$0xff] }
 0xf71   : > { %v12868_v44 = vpop.f32.mrb[10].mxu1 }
 0xf72   : > { %v12869_v21 = vpop.f32.mrb[11].mxu1 }
 0xf73   : > { %v12870_v60 = vadd.f32 %v12869_v21, %v12868_v44  ;;  %v24549_v21 = vld [vmem:[#allocation121_spill] sm:$0xff]  ;;  %v24550_v44 = vld [vmem:[#allocation123_spill] sm:$0xff] }
 0xf75   : > { %v10105_v35 = vadd.f32 %v12870_v60, %v10001_v57  ;;  %v24541_v57 = vld [vmem:[#allocation132_spill] sm:$0xff]  ;;  %v24542_v60 = vld [vmem:[#allocation134_spill] sm:$0xff] }
 0xf77   : > { %16848 = vtanh.f32 %v10105_v35  ;;  %v24552_v35 = vld [vmem:[#allocation141_spill] sm:$0xff] }
 0xf81   : > { %v16849_v5 = vpop.eup %16848 }
 0xf82   : > { %v22933_v58 = vand.u32 4294901760, %v16849_v5 }
 0xf84   : > { %v10251_v28 = vsub.f32 %v16849_v5, %v22933_v58  ;;  %v24551_v5 = vld [vmem:[#allocation124_spill] sm:$0xff] }
 0xf86   : > { %v10252_v22 = vand.u32 4294901760, %v10251_v28 }
 0xf88   : > { %v10253_v49 = vsub.f32 %v10251_v28, %v10252_v22 }
 0xf8a   : > { %v10254_v43 = vand.u32 4294901760, %v10253_v49  ;;  %v24553_v49 = vld [vmem:[#allocation144_spill] sm:$0xff] }
 0xf8c   : > { %10255 = vmatmul.mubr.f32.vlgmr.msra.gmra.mrb[0].mxu0 %v10254_v43  ;;  %v24556_v43 = vld [vmem:[#allocation146_spill] sm:$0xff] }
 0xf8d   : > { %16344 = vmatpush1.bf16.msra.mxu0 %v22784_v16  ;;  %10485 = vmatprep.mubr.f32.mxu0 %v24539_v20  ;;  %v24558_v16 = vand.u32 4294901760, %v22605_v39  ;;  %v24564_v39 = vand.u32 4294901760, %v22688_v15  ;;  %v24573_v15 = vld [vmem:[#allocation127_spill] sm:$0xff] }
 0xf8e   : > { %16346 = vmatprep.subr.bf16.mxu0 %v22786_v55  ;;  %v24555_v55 = vand.u32 4294901760, %v22676_v52  ;;  %v24562_v52 = vand.u32 4294901760, %v22620_v36  ;;  %v24568_v36 = vand.u32 4294901760, %v22698_v9  ;;  %v24581_v9 = vld [vmem:[#allocation131_spill] sm:$0xff] }
 0xf91   : > { %16348 = vmatpush1.bf16.msra.mxu0 %v22790_v48  ;;  %v24559_v48 = vand.u32 4294901760, %v22609_v17  ;;  %v24565_v17 = vand.u32 4294901760, %v22691_v18 }
 0xf92   : > { %16350 = vmatprep.subr.bf16.mxu0 %v22814_v24 }
 0xf95   : > { %16352 = vmatpush1.bf16.msra.mxu0 %v22822_v12  ;;  %v24557_v12 = vand.u32 4294901760, %v22601_v40  ;;  %v24563_v40 = vand.u32 4294901760, %v22683_v61 }
 0xf96   : > { %16354 = vmatprep.subr.bf16.mxu0 %v22828_v25 }
 0xf97   : > { %v16439_v24 = vpack.c.bf16 %v24558_v16, %v24557_v12  ;;  %v24591_v16 = vld [vmem:[#allocation140_spill] sm:$0xff] }
 0xf99   : > { %16356 = vmatpush1.bf16.msra.mxu0 %v22837_v33  ;;  %v16445_v33 = vpack.c.bf16 %v24564_v39, %v24563_v40  ;;  %v24597_v40 = vand.u32 4294901760, %v22736_v2  ;;  %v24598_v39 = vld [vmem:[#allocation145_spill] sm:$0xff] }
 0xf9a   : > { %16358 = vmatprep.subr.bf16.mxu0 %v22854_v63  ;;  %v24604_v2 = vld [vmem:[#allocation93_spill] sm:$0xff] }
 0xf9d   : > { %16360 = vmatpush1.bf16.msra.mxu0 %v22860_v0 }
 0xf9e   : > { %16362 = vmatprep.subr.bf16.mxu0 %v22871_v34  ;;  %v24560_v34 = vand.u32 4294901760, %v22612_v29  ;;  %v24566_v29 = vand.u32 4294901760, %v22694_v3  ;;  %v24577_v3 = vld [vmem:[#allocation129_spill] sm:$0xff] }
 0xfa0   : > { %v16441_v25 = vpack.c.bf16 %v24560_v34, %v24559_v48  ;;  %v24593_v34 = vld [vmem:[#allocation142_spill] sm:$0xff] }
 0xfa1   : > { %16364 = vmatpush1.bf16.msra.mxu0 %v22884_v59 }
 0xfa2   : > { %16366 = vmatprep.subr.bf16.mxu0 %v16365_v19  ;;  %v24569_v19 = vld [vmem:[#allocation125_spill] sm:$0xff] }
 0xfa3   : > { %v24570_v59 = vand.u32 4294901760, %v24569_v19 }
 0xfa5   : > { %16368 = vmatpush1.bf16.msra.mxu0 %v16367_v32  ;;  %v24571_v32 = vld [vmem:[#allocation126_spill] sm:$0xff] }
 0xfa6   : > { %16370 = vmatprep.subr.bf16.mxu0 %v16369_v10  ;;  %v24572_v61 = vand.u32 4294901760, %v24571_v32 }
 0xfa8   : > { %v16451_v10 = vpack.c.bf16 %v24572_v61, %v24570_v59 }
 0xfa9   : > { %16372 = vmatpush1.bf16.msra.mxu0 %v16371_v38  ;;  %v24540_v38 = vld [vmem:[#allocation122_spill] sm:$0xff] }
 0xfaa   : > { %16374 = vmatprep.subr.bf16.mxu0 %v16373_v47  ;;  %v24543_v47 = vld [vmem:[#allocation136_spill] sm:$0xff] }
 0xfac   : > { %10487 = vmatmul.mubr.f32.vlgmr.msra.gmra.mrb[0].mxu0 %v22933_v58 }
 0xfad   : > { %16376 = vmatpush1.bf16.msra.mxu0 %v16375_v11  ;;  %10621 = vmatprep.mubr.f32.mxu0 %v24539_v20  ;;  %v24574_v11 = vand.u32 4294901760, %v24573_v15 }
 0xfae   : > { %16378 = vmatprep.subr.bf16.mxu0 %v16377_v27  ;;  %v24575_v27 = vld [vmem:[#allocation128_spill] sm:$0xff] }
 0xfaf   : > { %v24576_v18 = vand.u32 4294901760, %v24575_v27 }
 0xfb1   : > { %16380 = vmatpush1.bf16.msra.mxu0 %v16379_v54  ;;  %v16453_v54 = vpack.c.bf16 %v24576_v18, %v24574_v11 }
 0xfb2   : > { %16382 = vmatprep.subr.bf16.mxu0 %v16381_v41  ;;  %v24578_v41 = vand.u32 4294901760, %v24577_v3 }
 0xfb5   : > { %16384 = vmatpush1.bf16.msra.mxu0 %v16383_v37  ;;  %v24579_v37 = vld [vmem:[#allocation130_spill] sm:$0xff] }
 0xfb6   : > { %16386 = vmatprep.subr.bf16.mxu0 %v16385_v62  ;;  %v24582_v62 = vand.u32 4294901760, %v24581_v9 }
 0xfb9   : > { %16388 = vmatpush1.bf16.msra.mxu0 %v16387_v8  ;;  %v24583_v8 = vld [vmem:[#allocation135_spill] sm:$0xff] }
 0xfba   : > { %16390 = vmatprep.subr.bf16.mxu0 %v16389_v51  ;;  %v24584_v51 = vand.u32 4294901760, %v24583_v8 }
 0xfbd   : > { %16392 = vmatpush1.bf16.msra.mxu0 %v16391_v1  ;;  %v24544_v1 = vld [vmem:[#allocation137_spill] sm:$0xff] }
 0xfbe   : > { %16394 = vmatprep.subr.bf16.mxu0 %v16393_v7 }
 0xfc1   : > { %16396 = vmatpush1.bf16.msra.mxu0 %v16395_v50  ;;  %v16457_v50 = vpack.c.bf16 %v24584_v51, %v24582_v62 }
 0xfc2   : > { %16398 = vmatprep.subr.bf16.mxu0 %v16397_v6  ;;  %v24585_v6 = vld [vmem:[#allocation138_spill] sm:$0xff] }
 0xfc5   : > { %16400 = vmatpush1.bf16.msra.mxu0 %v16399_v31  ;;  %v24586_v31 = vand.u32 4294901760, %v24585_v6 }
 0xfc6   : > { %16402 = vmatprep.subr.bf16.mxu0 %v16401_v30  ;;  %v24587_v30 = vld [vmem:[#allocation139_spill] sm:$0xff] }
 0xfc9   : > { %16404 = vmatpush1.bf16.msra.mxu0 %v16403_v56  ;;  %v24547_v56 = vld [vmem:[#allocation119_spill] sm:$0xff] }
 0xfca   : > { %16406 = vmatprep.subr.bf16.mxu0 %v22599_v46 }
 0xfcc   : > { %10624 = vmatmul.mubr.f32.vlgmr.msra.gmra.mrb[0].mxu0 %v10251_v28  ;;  %v24554_v28 = vand.u32 4294901760, %v22670_v23  ;;  %v24561_v23 = vand.u32 4294901760, %v22618_v45  ;;  %v24567_v45 = vand.u32 4294901760, %v22696_v53  ;;  %v24580_v53 = vand.u32 4294901760, %v24579_v37 }
 0xfcd   : > { %16408 = vmatpush1.bf16.msra.mxu0 %v24540_v38  ;;  %10726 = vmatprep.mubr.f32.mxu0 %v24539_v20 }
 0xfce   : > { %16410 = vmatprep.subr.bf16.mxu0 %v24541_v57  ;;  %v16437_v63 = vpack.c.bf16 %v24555_v55, %v24554_v28  ;;  %v16443_v0 = vpack.c.bf16 %v24562_v52, %v24561_v23  ;;  %v16449_v7 = vpack.c.bf16 %v24568_v36, %v24567_v45  ;;  %v16455_v26 = vpack.c.bf16 %v24580_v53, %v24578_v41  ;;  %v24595_v23 = vld [vmem:[#allocation143_spill] sm:$0xff] }
 0xfcf   : > { %v24588_v28 = vand.u32 4294901760, %v24587_v30  ;;  %v24596_v52 = vand.u32 4294901760, %v24595_v23 }
 0xfd1   : > { %16412 = vmatpush1.bf16.msra.mxu0 %v24542_v60  ;;  %v16459_v55 = vpack.c.bf16 %v24588_v28, %v24586_v31 }
 0xfd2   : > { %16414 = vmatprep.subr.bf16.mxu0 %v24543_v47 }
 0xfd5   : > { %16416 = vmatpush1.bf16.msra.mxu0 %v24544_v1 }
 0xfd6   : > { %16418 = vmatprep.subr.bf16.mxu0 %v24545_v42 }
 0xfd9   : > { %16420 = vmatpush1.bf16.msra.mxu0 %v24546_v14 }
 0xfda   : > { %16422 = vmatprep.subr.bf16.mxu0 %v24547_v56 }
 0xfdd   : > { %16424 = vmatpush1.bf16.msra.mxu0 %v24548_v4 }
 0xfde   : > { %16426 = vmatprep.subr.bf16.mxu0 %v24549_v21 }
 0xfe1   : > { %16428 = vmatpush1.bf16.msra.mxu0 %v24550_v44 }
 0xfe2   : > { %16430 = vmatprep.subr.bf16.mxu0 %v24551_v5 }
 0xfe5   : > { %16432 = vmatpush1.bf16.msra.mxu0 %v24552_v35 }
 0xfe6   : > { %16434 = vmatprep.subr.bf16.mxu0 %v24553_v49 }
 0xfe9   : > { %16436 = vmatpush1.bf16.msra.mxu0 %v24556_v43 }
 0xfea   : > { %16438 = vmatprep.subr.bf16.mxu0 %v16437_v63  ;;  %v24589_v63 = vld [vmem:[#allocation118_spill] sm:$0xff] }
 0xfeb   : > { %v24590_v12 = vand.u32 4294901760, %v24589_v63 }
 0xfec   : > { %10730 = vmatmul.mubr.f32.vlgmr.msra.gmra.mrb[0].mxu0 %v10252_v22  ;;  %v16447_v22 = vpack.c.bf16 %v24566_v29, %v24565_v17  ;;  %v24600_v29 = vand.u32 4294901760, %v22740_v13  ;;  %v24605_v13 = vsub.s32 0, %v24604_v2 }
 0xfed   : > { %16440 = vmatpush1.bf16.msra.mxu0 %v16439_v24  ;;  %10896 = vmatprep.mubr.f32.mxu0 %v24539_v20  ;;  %v24592_v24 = vand.u32 4294901760, %v24591_v16 }
 0xfee   : > { %16442 = vmatprep.subr.bf16.mxu0 %v16441_v25  ;;  %v24594_v25 = vand.u32 4294901760, %v24593_v34 }
 0xfef   : > { %v16461_v48 = vpack.c.bf16 %v24592_v24, %v24590_v12 }
 0xff1   : > { %16444 = vmatpush1.bf16.msra.mxu0 %v16443_v0  ;;  %v16463_v0 = vpack.c.bf16 %v24596_v52, %v24594_v25 }
 0xff2   : > { %16446 = vmatprep.subr.bf16.mxu0 %v16445_v33  ;;  %v24599_v33 = vand.u32 4294901760, %v24598_v39 }
 0xff4   : > { %v16465_v17 = vpack.c.bf16 %v24599_v33, %v24597_v40 }
 0xff5   : > { %16448 = vmatpush1.bf16.msra.mxu0 %v16447_v22  ;;  %v24601_v22 = vld [vmem:[#allocation147_spill] sm:$0xff] }
 0xff6   : > { %16450 = vmatprep.subr.bf16.mxu0 %v16449_v7  ;;  %v24602_v45 = vand.u32 4294901760, %v24601_v22 }
 0xff8   : > { %v16467_v36 = vpack.c.bf16 %v24602_v45, %v24600_v29 }
 0xff9   : > { %16452 = vmatpush1.bf16.msra.mxu0 %v16451_v10 }
 0xffa   : > { %16454 = vmatprep.subr.bf16.mxu0 %v16453_v54 }
 0xffd   : > { %16456 = vmatpush1.bf16.msra.mxu0 %v16455_v26 }
 0xffe   : > { %16458 = vmatprep.subr.bf16.mxu0 %v16457_v50 }
0x1001   : > { %16460 = vmatpush1.bf16.msra.mxu0 %v16459_v55 }
0x1002   : > { %16462 = vmatprep.subr.bf16.mxu0 %v16461_v48 }
0x1005   : > { %16464 = vmatpush1.bf16.msra.mxu0 %v16463_v0 }
0x1006   : > { %16466 = vmatprep.subr.bf16.mxu0 %v16465_v17 }
0x1009   : > { %16468 = vmatpush1.bf16.msra.mxu0 %v16467_v36 }
0x100a   : > { %16470 = vmatprep.subr.bf16.mxu0 %v22599_v46  ;;  %v10141_v46 = vld [vmem:[%s24603_s30] sm:$0x3] }
0x100c   : > { %10898 = vmatmul.mubr.f32.vlgmr.msra.gmra.mrb[0].mxu0 %v22933_v58 }
0x100d   : > { %16472 = vmatpush1.bf16.msra.mxu0 %v24540_v38  ;;  %11000 = vmatprep.mubr.f32.mxu0 %v24539_v20  ;;  %v10146_v20 = vrot.slane %v10141_v46, %v24605_v13  ;;  %v24606_v38 = vsub.s32 1, %v24604_v2 }
0x100e   : > { %16474 = vmatprep.subr.bf16.mxu0 %v24541_v57 }
0x100f   : > { %v10150_v57 = vrot.slane %v10141_v46, %v24606_v38 }
0x1011   : > { %16476 = vmatpush1.bf16.msra.mxu0 %v24542_v60 }
0x1012   : > { %16478 = vmatprep.subr.bf16.mxu0 %v24543_v47 }
0x1015   : > { %16480 = vmatpush1.bf16.msra.mxu0 %v24544_v1 }
0x1016   : > { %16482 = vmatprep.subr.bf16.mxu0 %v24545_v42 }
0x1019   : > { %16484 = vmatpush1.bf16.msra.mxu0 %v24546_v14 }
0x101a   : > { %16486 = vmatprep.subr.bf16.mxu0 %v24547_v56 }
0x101d   : > { %16488 = vmatpush1.bf16.msra.mxu0 %v24548_v4 }
0x101e   : > { %16490 = vmatprep.subr.bf16.mxu0 %v24549_v21 }
0x1021   : > { %16492 = vmatpush1.bf16.msra.mxu0 %v24550_v44 }
0x1022   : > { %16494 = vmatprep.subr.bf16.mxu0 %v24551_v5 }
0x1025   : > { %16496 = vmatpush1.bf16.msra.mxu0 %v24552_v35 }
0x1026   : > { %16498 = vmatprep.subr.bf16.mxu0 %v24553_v49 }
0x1029   : > { %16500 = vmatpush1.bf16.msra.mxu0 %v24556_v43 }
0x102c   : > { %11002 = vmatmul.mubr.f32.vlgmr.msra.gmra.mrb[0].mxu0 %v22933_v58 }
0x10ff   : > { %v11003_v60 = vpop.f32.mrb[0].mxu0 }
0x1100   : > { %v16590_v47 = vadd.f32 %v11003_v60, %v10146_v20  ;;  %v11005_v1 = vpop.f32.mrb[1].mxu0 }
0x1101   : > { %v16591_v42 = vadd.f32 %v11005_v1, %v10150_v57 }
0x1102   : > { %11008 = vst [vmem:[%s17960_s21] sm:$0xff] %v16590_v47 }
0x1103   : > { %v11009_v14 = vand.u32 2147483647, %v16591_v42 }
0x1105   : > { %11010 = vst [vmem:[%s17962_s28] sm:$0xff] %v11009_v14 }
0x1106 PF: > { %s24607_s22 = sld [smem:[#allocation40_spill]]  ;;  %s24608_s29 = sld [smem:[#allocation169_spill]] }
0x1107   : > { %s11030_s11 = sshll.u32 %s17960_s21, 4  ;;  %s11012_s9 = scalar_lea.sflag [#allocation6], %s17957_s13  ;;  %s11031_s11 = int_to_ptr.vmem [resolvable:$true] %s11030_s11 }
0x1108   : > { %s17173_s12 = scalar_lea.vmem %s11031_s11, 128  ;;  %p24609_p6 = scmp.ne.s32.totalorder %s23836_s15, 0 }
0x1109   : > { %p17174_p5 = scmp.ne.s32.totalorder %s11031_s11, %s17173_s12  ;;  %s17374_s14 = smov [#allocation24]  }
0x110a   : > { %s17177_s30 = sshll.u32 %s17374_s14, 4  ;;  %s17178_s30 = int_to_ptr.vmem [resolvable:$false] %s17177_s30 }
0x110b   : > { %p17175_p2 = pnand %p17174_p5, %p24609_p6  ;;  %s17179_s0 = scalar_lea.vmem %s17178_s30, 256 }
0x110c   : > { %s23779_s4 = sshll.u32 %s24607_s22, 7  ;;  %p17180_p4 = scmp.lt.s32.totalorder %s11031_s11, %s17178_s30 }
0x110d   : > { %s23066_s24 = scalar_lea.hbm %s24608_s29, %s23779_s4  ;;  %p17176_p7 = pneg %p17175_p2 }
0x110e   : > { %p17181_p9 = scmp.lt.s32.totalorder %s17179_s0, %s17173_s12 }
0x1110   : > { %p17182_p12 = por %p17181_p9, %p17180_p4 }
0x1112   : > { %p17183_p8 = pnand %p17182_p12, %p17176_p7 }
0x1114   : > { %17186 = shalt.err (!%p17183_p8)
}
0x1115   : > { %s17187_s21 = scalar_lea.hbm %s23066_s24, 128  ;;  %s17191_s14 = scalar_lea.hbm %s24608_s29, 256 }
0x1116   : > { %p17188_p1 = scmp.ne.s32.totalorder %s23066_s24, %s17187_s21  ;;  %p17192_p10 = scmp.lt.u32.totalorder %s23066_s24, %s24608_s29 }
0x1117   : > { %p17193_p11 = scmp.lt.u32.totalorder %s17191_s14, %s17187_s21  ;;  %p17195_p5 = scmp.lt.u32.totalorder %s17187_s21, %s23066_s24 }
0x1118   : > { %p17189_p13 = pnand %p17188_p1, %p24609_p6 }
0x1119   : > { %p17194_p0 = por %p17193_p11, %p17192_p10 }
0x111a   : > { %p17190_p3 = pneg %p17189_p13 }
0x111b   : > { %p17196_p2 = por %p17195_p5, %p17194_p0 }
0x111d   : > { %p17197_p7 = pnand %p17196_p2, %p17190_p3 }
0x111f   : > { %17200 = shalt.err (!%p17197_p7)
}
0x1120   : > { %16648 = dma.vmem_to_hbm [thread:$0]  (%p24609_p6), %s11031_s11, 128, %s23066_s24, %s11012_s9  }
0x1121   : > { %s24610_s0 = sshll.u32 %s24607_s22, 7  ;;  %s24611_s17 = sld [smem:[#allocation170_spill]] }
0x1122   : > { %s11043_s14 = sshll.u32 %s17962_s28, 4  ;;  %s11017_s21 = scalar_lea.sflag [#allocation26], %s17957_s13  ;;  %s11044_s14 = int_to_ptr.vmem [resolvable:$true] %s11043_s14 }
0x1123   : > { %s17201_s30 = scalar_lea.vmem %s11044_s14, 128  ;;  %s17375_s16 = smov [#allocation25]  }
0x1124   : > { %p17202_p4 = scmp.ne.s32.totalorder %s11044_s14, %s17201_s30  ;;  %s17205_s18 = sshll.u32 %s17375_s16, 4  ;;  %s17206_s18 = int_to_ptr.vmem [resolvable:$false] %s17205_s18 }
0x1125   : > { %s17207_s19 = scalar_lea.vmem %s17206_s18, 256  ;;  %p17208_p8 = scmp.lt.s32.totalorder %s11044_s14, %s17206_s18 }
0x1126   : > { %p17203_p9 = pnand %p17202_p4, %p24609_p6  ;;  %p17209_p1 = scmp.lt.s32.totalorder %s17207_s19, %s17201_s30 }
0x1127   : > { %s23092_s4 = scalar_lea.hbm %s24611_s17, %s24610_s0 }
0x1128   : > { %p17204_p12 = pneg %p17203_p9  ;;  %p17210_p13 = por %p17209_p1, %p17208_p8 }
0x112a   : > { %p17211_p3 = pnand %p17210_p13, %p17204_p12 }
0x112c   : > { %17214 = shalt.err (!%p17211_p3)
}
0x112d   : > { %s17215_s13 = scalar_lea.hbm %s23092_s4, 128  ;;  %s17219_s16 = scalar_lea.hbm %s24611_s17, 256 }
0x112e   : > { %p17216_p10 = scmp.ne.s32.totalorder %s23092_s4, %s17215_s13  ;;  %p17220_p5 = scmp.lt.u32.totalorder %s23092_s4, %s24611_s17 }
0x112f   : > { %p17221_p2 = scmp.lt.u32.totalorder %s17219_s16, %s17215_s13  ;;  %p17223_p4 = scmp.lt.u32.totalorder %s17215_s13, %s23092_s4 }
0x1130   : > { %p17217_p11 = pnand %p17216_p10, %p24609_p6 }
0x1131   : > { %p17222_p7 = por %p17221_p2, %p17220_p5 }
0x1132   : > { %p17218_p0 = pneg %p17217_p11 }
0x1133   : > { %p17224_p9 = por %p17223_p4, %p17222_p7 }
0x1135   : > { %p17225_p12 = pnand %p17224_p9, %p17218_p0 }
0x1137   : > { %17228 = shalt.err (!%p17225_p12)
}
0x1138   : > { %16649 = dma.vmem_to_hbm [thread:$0]  (%p24609_p6), %s11044_s14, 128, %s23092_s4, %s11017_s21  }
0x1139 PF: > { %s24612_s19 = sld [smem:[#allocation36_spill]]  ;;  %p16720_p8 = scmp.ge.s32.totalorder %s17351_s7, 2 }
0x113a   : > { %p24613_p1 = scmp.ne.s32.totalorder %s23837_s26, 0 }
0x113c   : > { %p16691_p13 = pnand %p16720_p8, %p24613_p1 }
0x113f   : > { %s11055_s11 = sand.u32 1, %s24612_s19  }
0x1140   : > { %s11056_s9 = scalar_lea.sflag [#allocation6], %s11055_s11 }
0x1141   : > { %17302 = dma.done.wait (!%p16691_p13), %s11056_s9, 128  }
0x1142   : > { %17304 = vsyncadd (!%p16691_p13), %s11056_s9, 4294967168  ;;  %s11065_s0 = scalar_lea.sflag [#allocation26], %s11055_s11 }
0x1143   : > { %17306 = dma.done.wait (!%p16691_p13), %s11065_s0, 128  }
0x1144   : > { %17308 = vsyncadd (!%p16691_p13), %s11065_s0, 4294967168  ;;  %s49_s7 = sadd.s32 1, %s17351_s7   ;;  %s24614_s4 = sld [smem:[#allocation37_spill]] }
0x1145   : > { %p46_p3 = scmp.ge.s32.totalorder %s49_s7, 18   ;;  %s24615_s30 = sld [smem:[#allocation38_spill]] }
0x1146   : > { %s24616_s15 = smov %s17869_s25  ;;  %s24617_s24 = smov %s24632_s8 }
0x1147   : > { %s24618_s25 = smov %s17327_s5  ;;  %s24619_s5 = smov %s17331_s1 }
0x1148   : > { %s24620_s1 = smov %s24616_s15  ;;  %s24621_s26 = smov %s17343_s6 }
0x1149   : > { %s24622_s2 = smov %s17347_s27  ;;  %s24623_s6 = smov %s24626_s3 }
0x114a   : > { %s24624_s27 = smov %s24630_s10  ;;  %48 = sbr.rel (!%p46_p3) target bundleno = 41 (0x29), region = 223 }
0x1151   :  { %11070 = vsyncpa [#allocation5], 1 }
0x1152   :  { %11072 = vsyncpa [#allocation5 + $0x1], 1 }
0x1153   :  { %11073 = vsyncpa [#allocation10], 1 }
0x1154   :  { %11074 = vsyncpa [#allocation13], 1 }
0x1155   :  { %11075 = vsyncpa [#allocation16], 1 }
0x1156   :  { %11076 = vsyncpa [#allocation19], 1 }
0x1157   :  { %11077 = vsyncpa [#allocation22], 1 }
0x1158   :  { %11078 = vsyncpa [#allocation6], 1 }
0x1159   :  { %11080 = vsyncpa [#allocation6 + $0x1], 1 }
0x115a   :  { %11081 = vsyncpa [#allocation26], 1 }
0x115b   :  { %11083 = vsyncpa [#allocation26 + $0x1], 1 }
0x115c   :  { %11084 = vsyncpa [#allocation7], 1 }
0x115d   :  { %11086 = vsyncpa [#allocation7 + $0x1], 1 }

</bundles_post_ra>
